<compile_context>
chip_gen: v7x
topology: tpu7x:2x2x1
jax: 0.10.0
libtpu: 0.0.40
codegen_flags: <defaults>
</compile_context>

<pallas_src>
import jax
import jax.numpy as jnp
from jax.experimental import pallas as pl
from jax.experimental.pallas import tpu as pltpu


# -----------------------------------------------------------------------------
# Pallas kernel: (folded f_image + fc[0]) -> ReLU -> fc[3] -> ReLU -> fc[5]
#
#   h1  = relu(img @ W_fold + cls @ W1b_t + b_fold)     (2048/768 -> 512)
#   h2  = relu(h1 @ W2_t + b2)                          (512 -> 256)
#   out = h2 @ W3p_t + b3p                              (256 -> 128, lane-padded)
#
# Dropout(p=0.2) is identity in eval mode (inference semantics).
# -----------------------------------------------------------------------------
def _joint_head_kernel(img_ref, cls_ref,
                       wfold_ref, w1b_ref, bfold_ref,
                       w2_ref, b2_ref,
                       w3_ref, b3_ref,
                       out_ref):
    img = img_ref[...]          # [TB, 2048] bf16
    cls = cls_ref[...]          # [TB, 768]  bf16

    # fc[0] with f_image folded in (exact: no nonlinearity between them).
    h1 = (jnp.dot(img, wfold_ref[...], preferred_element_type=jnp.float32)
          + jnp.dot(cls, w1b_ref[...], preferred_element_type=jnp.float32)
          + bfold_ref[...])
    # Bias-add + ReLU in f32 (v5e has no bf16 VALU); cast to bf16 right away so
    # VMEM staging of the intermediate is half-width and feeds the next matmul.
    h1 = jnp.maximum(h1, 0.0).astype(jnp.bfloat16)

    # Linear(512, 256) + ReLU
    h2 = jnp.dot(h1, w2_ref[...], preferred_element_type=jnp.float32) + b2_ref[...]
    h2 = jnp.maximum(h2, 0.0).astype(jnp.bfloat16)

    # Linear(256, num_classes), padded to a lane-dense 128-wide output
    out = jnp.dot(h2, w3_ref[...], preferred_element_type=jnp.float32) + b3_ref[...]
    out_ref[...] = out.astype(out_ref.dtype)


def _round_up(x, m):
    return -(-x // m) * m


def _vmem_budget():
    """Pick VMEM limit / activation buffer depth from the chip's VMEM size."""
    try:
        cap = int(pltpu.get_tpu_info().vmem_capacity_bytes)
    except Exception:
        cap = 64 * 1024 * 1024  # conservative default (v7x-sized)
    if cap >= 128 * 1024 * 1024:          # v5e / v6e
        return 64 * 1024 * 1024, 3
    return 32 * 1024 * 1024, 2            # v7x (64 MiB physical per TC)


def joint_head(img_feat, cls_feat, kparams, *, tb=512):
    """Run the JointModelv2 head (f_image + fc) as a single Pallas kernel."""
    B = img_feat.shape[0]
    num_classes = kparams["num_classes"]
    nc_pad = kparams["w3p_t"].shape[-1]            # 128 (lane-dense)

    # Batch tiling: big tiles (amortize ~0.35 us/step overhead) but keep the
    # grid at >= 2 steps when the batch allows it (megacore split on v7x).
    B8 = _round_up(B, 8)
    if B8 < 16:
        TB = B8
    else:
        TB = min(tb, _round_up(-(-B8 // 2), 8))
    B_pad = _round_up(B, TB)

    def to_bf16(x):
        return x if x.dtype == jnp.bfloat16 else x.astype(jnp.bfloat16)

    def pad_batch(x):
        return x if B_pad == B else jnp.pad(x, ((0, B_pad - B), (0, 0)))

    # Backbone stubs already emit bf16; only pad here (no extra cast roundtrip).
    img = pad_batch(to_bf16(img_feat))             # [B_pad, 2048] bf16
    cls = pad_batch(to_bf16(cls_feat))             # [B_pad, 768]  bf16

    weight_args = (kparams["wfold_t"], kparams["w1b_t"], kparams["bfold"],
                   kparams["w2_t"], kparams["b2"],
                   kparams["w3p_t"], kparams["b3p"])

    flops = 2 * B_pad * (2048 * 512 + 768 * 512 + 512 * 256 + 256 * nc_pad)
    w_bytes = sum(int(a.size) * a.dtype.itemsize for a in weight_args)
    act_bytes = B_pad * (2048 + 768) * 2 + B_pad * nc_pad * 4
    cost = pl.CostEstimate(flops=flops, transcendentals=0,
                           bytes_accessed=w_bytes + act_bytes)

    vmem_limit, act_depth = _vmem_budget()

    def build_and_run(use_pipeline_mode):
        # Weights: full-array blocks, constant index_map -> VMEM-resident for
        # all batch-grid steps. Single-buffered (they are never re-fetched).
        def const_spec(a):
            if use_pipeline_mode:
                return pl.BlockSpec(a.shape, lambda i: (0,) * a.ndim,
                                    pipeline_mode=pl.Buffered(buffer_count=1))
            return pl.BlockSpec(a.shape, lambda i: (0,) * a.ndim)

        def act_spec(shape):
            if use_pipeline_mode and act_depth > 2:
                return pl.BlockSpec(shape, lambda i: (i, 0),
                                    pipeline_mode=pl.Buffered(buffer_count=act_depth))
            return pl.BlockSpec(shape, lambda i: (i, 0))

        return pl.pallas_call(
            _joint_head_kernel,
            out_shape=jax.ShapeDtypeStruct((B_pad, nc_pad), jnp.float32),
            grid=(B_pad // TB,),
            in_specs=[act_spec((TB, 2048)),                  # img tile
                      act_spec((TB, 768)),                   # cls tile
                      *[const_spec(a) for a in weight_args]],
            out_specs=pl.BlockSpec((TB, nc_pad), lambda i: (i, 0)),
            compiler_params=pltpu.CompilerParams(
                dimension_semantics=("parallel",),
                vmem_limit_bytes=vmem_limit),
            cost_estimate=cost,
        )(img, cls, *weight_args)

    try:
        out = build_and_run(True)
    except Exception:
        # Fallback for jax versions without BlockSpec(pipeline_mode=...).
        out = build_and_run(False)

    return out[:B, :num_classes]


# -----------------------------------------------------------------------------
# Deterministic parameter construction (matches nn.Linear shapes of the module)
# -----------------------------------------------------------------------------
def make_params(key, num_classes=18, nc_pad=128):
    ks = jax.random.split(key, 8)

    def lin(kw, kb, fan_in, fan_out):
        scale = 1.0 / jnp.sqrt(fan_in)
        # PyTorch Linear stores [out, in]; we keep the transposed [in, out]
        w_t = jax.random.uniform(kw, (fan_in, fan_out), jnp.float32, -scale, scale)
        b = jax.random.uniform(kb, (1, fan_out), jnp.float32, -scale, scale)
        return w_t, b

    wimg_t, bimg = lin(ks[0], ks[1], 2048, 768)        # f_image
    w1_t, b1 = lin(ks[2], ks[3], 768 * 2, 512)         # fc[0]
    w2_t, b2 = lin(ks[4], ks[5], 512, 256)             # fc[3]
    w3_t, b3 = lin(ks[6], ks[7], 256, num_classes)     # fc[5]

    raw = dict(wimg_t=wimg_t, bimg=bimg, w1_t=w1_t, b1=b1,
               w2_t=w2_t, b2=b2, w3_t=w3_t, b3=b3)

    # --- kernel params -------------------------------------------------------
    # Fold f_image into the image half of fc[0] (exact, done once in f32).
    w1a_t, w1b_t = w1_t[:768, :], w1_t[768:, :]
    wfold_t = wimg_t @ w1a_t                            # [2048, 512]
    bfold = bimg @ w1a_t + b1                           # [1, 512]

    # Pad the classifier to a lane-dense 128-wide output (unmasked vst).
    nc_pad = max(nc_pad, num_classes)
    w3p_t = jnp.zeros((256, nc_pad), jnp.float32).at[:, :num_classes].set(w3_t)
    b3p = jnp.zeros((1, nc_pad), jnp.float32).at[:, :num_classes].set(b3)

    kparams = dict(
        wfold_t=wfold_t.astype(jnp.bfloat16),
        w1b_t=w1b_t.astype(jnp.bfloat16),
        bfold=bfold,                                    # f32 bias
        w2_t=w2_t.astype(jnp.bfloat16),
        b2=b2,                                          # f32 bias
        w3p_t=w3p_t.astype(jnp.bfloat16),
        b3p=b3p,                                        # f32 bias
        num_classes=num_classes,
    )
    return raw, kparams


# -----------------------------------------------------------------------------
# Backbone stubs (external submodules of JointModelv2, not defined by it).
# TODO(synk): image_model (e.g. ResNet50 w/ fc=Identity) and text_model (BERT)
# are external pretrained backbones with no in-module definition; stubbed with
# deterministic plain-JAX feature extractors producing the correct shapes.
# They emit bf16 so the head kernel needs no extra cast round-trip.
# -----------------------------------------------------------------------------
def stub_image_model(image, key):
    # image: NCHW [B, C, H, W]  ->  img_feature: [B, 2048]
    B = image.shape[0]
    flat = image.reshape(B, -1)
    proj = jax.random.normal(key, (flat.shape[1], 2048), jnp.float32) * 0.02
    return (flat @ proj).astype(jnp.bfloat16)


def stub_text_model(input_ids, attention_mask, key):
    # input_ids: [B, S] int32 -> last_hidden_state: [B, S, 768]
    vocab = 1000
    emb = jax.random.normal(key, (vocab, 768), jnp.float32) * 0.02
    hidden = emb[input_ids]                                  # [B, S, 768]
    hidden = hidden * attention_mask[..., None].astype(jnp.float32)
    return hidden.astype(jnp.bfloat16)


def joint_model_v2_forward(input_ids, attention_mask, image, kparams, stub_keys):
    img_feature = stub_image_model(image, stub_keys[0])              # [B, 2048]
    text_feature = stub_text_model(input_ids, attention_mask,
                                   stub_keys[1])                     # [B, S, 768]
    cls = text_feature[:, 0, :]                                      # [B, 768]
    return joint_head(img_feature, cls, kparams)                     # [B, num_classes]


# -----------------------------------------------------------------------------
# Reference (plain JAX, f32, unfolded) for correctness check
# -----------------------------------------------------------------------------
def reference_head(img_feat, cls_feat, p):
    x1 = img_feat @ p["wimg_t"] + p["bimg"]
    x = jnp.concatenate([x1, cls_feat], axis=1)
    h1 = jnp.maximum(x @ p["w1_t"] + p["b1"], 0.0)
    h2 = jnp.maximum(h1 @ p["w2_t"] + p["b2"], 0.0)
    return h2 @ p["w3_t"] + p["b3"]


if __name__ == "__main__":
    key = jax.random.PRNGKey(0)
    k_params, k_img, k_txt, k_image_in, k_ids = jax.random.split(key, 5)

    B, C, H, W, S = 2, 3, 16, 16, 8
    num_classes = 18

    raw_params, kparams = make_params(k_params, num_classes=num_classes)

    image = jax.random.normal(k_image_in, (B, C, H, W), jnp.float32)
    input_ids = jax.random.randint(k_ids, (B, S), 0, 1000, dtype=jnp.int32)
    attention_mask = jnp.ones((B, S), dtype=jnp.int32)

    out = joint_model_v2_forward(input_ids, attention_mask, image,
                                 kparams, (k_img, k_txt))
    out = jax.block_until_ready(out)

    # correctness vs. plain-JAX f32 reference on the SAME (bf16) features
    img_feature = stub_image_model(image, k_img).astype(jnp.float32)
    cls = stub_text_model(input_ids, attention_mask, k_txt)[:, 0, :].astype(jnp.float32)
    ref = reference_head(img_feature, cls, raw_params)
    assert out.shape == (B, num_classes)
    assert jnp.allclose(out, ref, atol=5e-2, rtol=5e-2), "mismatch vs reference"

    print("KERNEL_OK")
</pallas_src>

<mosaic_0001>
module attributes {stable_mosaic.version = 11 : i64} {
  func.func @_joint_head_kernel(%arg0: i32, %arg1: memref<8x2048xbf16, #tpu.memory_space<vmem>>, %arg2: memref<8x768xbf16, #tpu.memory_space<vmem>>, %arg3: memref<2048x512xbf16, #tpu.memory_space<vmem>>, %arg4: memref<768x512xbf16, #tpu.memory_space<vmem>>, %arg5: memref<1x512xf32, #tpu.memory_space<vmem>>, %arg6: memref<512x256xbf16, #tpu.memory_space<vmem>>, %arg7: memref<1x256xf32, #tpu.memory_space<vmem>>, %arg8: memref<256x128xbf16, #tpu.memory_space<vmem>>, %arg9: memref<1x128xf32, #tpu.memory_space<vmem>>, %arg10: memref<8x128xf32, #tpu.memory_space<vmem>>) attributes {dimension_semantics = [#tpu.dimension_semantics<parallel>], iteration_bounds = array<i64: 1>, scalar_prefetch = 0 : i64, scratch_operands = 0 : i64, tpu.core_type = #tpu.core_type<tc>, window_params = [{transform_indices = @transform_0, window_bounds = array<i64: 8, 2048>}, {transform_indices = @transform_1, window_bounds = array<i64: 8, 768>}, {pipeline_mode = #tpu.pipeline_mode<synchronous>, transform_indices = @transform_2, window_bounds = array<i64: 2048, 512>}, {pipeline_mode = #tpu.pipeline_mode<synchronous>, transform_indices = @transform_3, window_bounds = array<i64: 768, 512>}, {pipeline_mode = #tpu.pipeline_mode<synchronous>, transform_indices = @transform_4, window_bounds = array<i64: 1, 512>}, {pipeline_mode = #tpu.pipeline_mode<synchronous>, transform_indices = @transform_5, window_bounds = array<i64: 512, 256>}, {pipeline_mode = #tpu.pipeline_mode<synchronous>, transform_indices = @transform_6, window_bounds = array<i64: 1, 256>}, {pipeline_mode = #tpu.pipeline_mode<synchronous>, transform_indices = @transform_7, window_bounds = array<i64: 256, 128>}, {pipeline_mode = #tpu.pipeline_mode<synchronous>, transform_indices = @transform_8, window_bounds = array<i64: 1, 128>}, {transform_indices = @transform_9, window_bounds = array<i64: 8, 128>}]} {
    %c0 = arith.constant 0 : index
    %c0_0 = arith.constant 0 : index
    %0 = vector.load %arg1[%c0, %c0_0] : memref<8x2048xbf16, #tpu.memory_space<vmem>>, vector<8x2048xbf16>
    %c0_1 = arith.constant 0 : index
    %c0_2 = arith.constant 0 : index
    %1 = vector.load %arg2[%c0_1, %c0_2] : memref<8x768xbf16, #tpu.memory_space<vmem>>, vector<8x768xbf16>
    %c0_3 = arith.constant 0 : index
    %c0_4 = arith.constant 0 : index
    %2 = vector.load %arg3[%c0_3, %c0_4] : memref<2048x512xbf16, #tpu.memory_space<vmem>>, vector<2048x512xbf16>
    %cst = arith.constant dense<0.000000e+00> : vector<8x512xf32>
    %3 = tpu.matmul %0, %2, %cst {dimension_numbers = #tpu.dot_dimension_numbers<[1], [0], [0], [1], [0, 0, 1, 1], [], []>} : vector<8x2048xbf16>, vector<2048x512xbf16>, vector<8x512xf32> -> vector<8x512xf32>
    %c0_5 = arith.constant 0 : index
    %c0_6 = arith.constant 0 : index
    %4 = vector.load %arg4[%c0_5, %c0_6] : memref<768x512xbf16, #tpu.memory_space<vmem>>, vector<768x512xbf16>
    %cst_7 = arith.constant dense<0.000000e+00> : vector<8x512xf32>
    %5 = tpu.matmul %1, %4, %cst_7 {dimension_numbers = #tpu.dot_dimension_numbers<[1], [0], [0], [1], [0, 0, 1, 1], [], []>} : vector<8x768xbf16>, vector<768x512xbf16>, vector<8x512xf32> -> vector<8x512xf32>
    %6 = arith.addf %3, %5 : vector<8x512xf32>
    %c0_8 = arith.constant 0 : index
    %c0_9 = arith.constant 0 : index
    %7 = vector.load %arg5[%c0_8, %c0_9] : memref<1x512xf32, #tpu.memory_space<vmem>>, vector<1x512xf32>
    %8 = vector.broadcast %7 : vector<1x512xf32> to vector<8x512xf32>
    %9 = arith.addf %6, %8 : vector<8x512xf32>
    %cst_10 = arith.constant 0.000000e+00 : f32
    %10 = vector.broadcast %cst_10 : f32 to vector<8x512xf32>
    %11 = arith.maximumf %9, %10 : vector<8x512xf32>
    %12 = arith.truncf %11 : vector<8x512xf32> to vector<8x512xbf16>
    %c0_11 = arith.constant 0 : index
    %c0_12 = arith.constant 0 : index
    %13 = vector.load %arg6[%c0_11, %c0_12] : memref<512x256xbf16, #tpu.memory_space<vmem>>, vector<512x256xbf16>
    %cst_13 = arith.constant dense<0.000000e+00> : vector<8x256xf32>
    %14 = tpu.matmul %12, %13, %cst_13 {dimension_numbers = #tpu.dot_dimension_numbers<[1], [0], [0], [1], [0, 0, 1, 1], [], []>} : vector<8x512xbf16>, vector<512x256xbf16>, vector<8x256xf32> -> vector<8x256xf32>
    %c0_14 = arith.constant 0 : index
    %c0_15 = arith.constant 0 : index
    %15 = vector.load %arg7[%c0_14, %c0_15] : memref<1x256xf32, #tpu.memory_space<vmem>>, vector<1x256xf32>
    %16 = vector.broadcast %15 : vector<1x256xf32> to vector<8x256xf32>
    %17 = arith.addf %14, %16 : vector<8x256xf32>
    %cst_16 = arith.constant 0.000000e+00 : f32
    %18 = vector.broadcast %cst_16 : f32 to vector<8x256xf32>
    %19 = arith.maximumf %17, %18 : vector<8x256xf32>
    %20 = arith.truncf %19 : vector<8x256xf32> to vector<8x256xbf16>
    %c0_17 = arith.constant 0 : index
    %c0_18 = arith.constant 0 : index
    %21 = vector.load %arg8[%c0_17, %c0_18] : memref<256x128xbf16, #tpu.memory_space<vmem>>, vector<256x128xbf16>
    %cst_19 = arith.constant dense<0.000000e+00> : vector<8x128xf32>
    %22 = tpu.matmul %20, %21, %cst_19 {dimension_numbers = #tpu.dot_dimension_numbers<[1], [0], [0], [1], [0, 0, 1, 1], [], []>} : vector<8x256xbf16>, vector<256x128xbf16>, vector<8x128xf32> -> vector<8x128xf32>
    %c0_20 = arith.constant 0 : index
    %c0_21 = arith.constant 0 : index
    %23 = vector.load %arg9[%c0_20, %c0_21] : memref<1x128xf32, #tpu.memory_space<vmem>>, vector<1x128xf32>
    %24 = vector.broadcast %23 : vector<1x128xf32> to vector<8x128xf32>
    %25 = arith.addf %22, %24 : vector<8x128xf32>
    %c0_22 = arith.constant 0 : index
    %c0_23 = arith.constant 0 : index
    %26 = vector.load %arg10[%c0_22, %c0_23] : memref<8x128xf32, #tpu.memory_space<vmem>>, vector<8x128xf32>
    tpu.vector_store %arg10[%c0_22, %c0_23], %25 {strides = array<i32>} : memref<8x128xf32, #tpu.memory_space<vmem>>, vector<8x128xf32>,
    return
  }
  func.func @transform_0(%arg0: i32) -> (i32, i32) {
    %c0_i32 = arith.constant 0 : i32
    %c0_i32_0 = arith.constant 0 : i32
    return %arg0, %c0_i32 : i32, i32
  }
  func.func @transform_1(%arg0: i32) -> (i32, i32) {
    %c0_i32 = arith.constant 0 : i32
    %c0_i32_0 = arith.constant 0 : i32
    return %arg0, %c0_i32 : i32, i32
  }
  func.func @transform_2(%arg0: i32) -> (i32, i32) {
    %c0_i32 = arith.constant 0 : i32
    %c0_i32_0 = arith.constant 0 : i32
    %c0_i32_1 = arith.constant 0 : i32
    return %c0_i32, %c0_i32_0 : i32, i32
  }
  func.func @transform_3(%arg0: i32) -> (i32, i32) {
    %c0_i32 = arith.constant 0 : i32
    %c0_i32_0 = arith.constant 0 : i32
    %c0_i32_1 = arith.constant 0 : i32
    return %c0_i32, %c0_i32_0 : i32, i32
  }
  func.func @transform_4(%arg0: i32) -> (i32, i32) {
    %c0_i32 = arith.constant 0 : i32
    %c0_i32_0 = arith.constant 0 : i32
    %c0_i32_1 = arith.constant 0 : i32
    return %c0_i32, %c0_i32_0 : i32, i32
  }
  func.func @transform_5(%arg0: i32) -> (i32, i32) {
    %c0_i32 = arith.constant 0 : i32
    %c0_i32_0 = arith.constant 0 : i32
    %c0_i32_1 = arith.constant 0 : i32
    return %c0_i32, %c0_i32_0 : i32, i32
  }
  func.func @transform_6(%arg0: i32) -> (i32, i32) {
    %c0_i32 = arith.constant 0 : i32
    %c0_i32_0 = arith.constant 0 : i32
    %c0_i32_1 = arith.constant 0 : i32
    return %c0_i32, %c0_i32_0 : i32, i32
  }
  func.func @transform_7(%arg0: i32) -> (i32, i32) {
    %c0_i32 = arith.constant 0 : i32
    %c0_i32_0 = arith.constant 0 : i32
    %c0_i32_1 = arith.constant 0 : i32
    return %c0_i32, %c0_i32_0 : i32, i32
  }
  func.func @transform_8(%arg0: i32) -> (i32, i32) {
    %c0_i32 = arith.constant 0 : i32
    %c0_i32_0 = arith.constant 0 : i32
    %c0_i32_1 = arith.constant 0 : i32
    return %c0_i32, %c0_i32_0 : i32, i32
  }
  func.func @transform_9(%arg0: i32) -> (i32, i32) {
    %c0_i32 = arith.constant 0 : i32
    %c0_i32_0 = arith.constant 0 : i32
    return %arg0, %c0_i32 : i32, i32
  }
}

module attributes {stable_mosaic.version = 11 : i64} {
  func.func @_joint_head_kernel(%arg0: i32, %arg1: memref<8x2048xbf16, #tpu.memory_space<vmem>>, %arg2: memref<8x768xbf16, #tpu.memory_space<vmem>>, %arg3: memref<2048x512xbf16, #tpu.memory_space<vmem>>, %arg4: memref<768x512xbf16, #tpu.memory_space<vmem>>, %arg5: memref<1x512xf32, #tpu.memory_space<vmem>>, %arg6: memref<512x256xbf16, #tpu.memory_space<vmem>>, %arg7: memref<1x256xf32, #tpu.memory_space<vmem>>, %arg8: memref<256x128xbf16, #tpu.memory_space<vmem>>, %arg9: memref<1x128xf32, #tpu.memory_space<vmem>>, %arg10: memref<8x128xf32, #tpu.memory_space<vmem>>) attributes {dimension_semantics = [#tpu.dimension_semantics<parallel>], iteration_bounds = array<i64: 1>, scalar_prefetch = 0 : i64, scratch_operands = 0 : i64, tpu.core_type = #tpu.core_type<tc>, window_params = [{transform_indices = @transform_0, window_bounds = array<i64: 8, 2048>}, {transform_indices = @transform_1, window_bounds = array<i64: 8, 768>}, {pipeline_mode = #tpu.pipeline_mode<synchronous>, transform_indices = @transform_2, window_bounds = array<i64: 2048, 512>}, {pipeline_mode = #tpu.pipeline_mode<synchronous>, transform_indices = @transform_3, window_bounds = array<i64: 768, 512>}, {pipeline_mode = #tpu.pipeline_mode<synchronous>, transform_indices = @transform_4, window_bounds = array<i64: 1, 512>}, {pipeline_mode = #tpu.pipeline_mode<synchronous>, transform_indices = @transform_5, window_bounds = array<i64: 512, 256>}, {pipeline_mode = #tpu.pipeline_mode<synchronous>, transform_indices = @transform_6, window_bounds = array<i64: 1, 256>}, {pipeline_mode = #tpu.pipeline_mode<synchronous>, transform_indices = @transform_7, window_bounds = array<i64: 256, 128>}, {pipeline_mode = #tpu.pipeline_mode<synchronous>, transform_indices = @transform_8, window_bounds = array<i64: 1, 128>}, {transform_indices = @transform_9, window_bounds = array<i64: 8, 128>}]} {
    %c0 = arith.constant 0 : index
    %c0_0 = arith.constant 0 : index
    %0 = vector.load %arg1[%c0, %c0_0] : memref<8x2048xbf16, #tpu.memory_space<vmem>>, vector<8x2048xbf16>
    %c0_1 = arith.constant 0 : index
    %c0_2 = arith.constant 0 : index
    %1 = vector.load %arg2[%c0_1, %c0_2] : memref<8x768xbf16, #tpu.memory_space<vmem>>, vector<8x768xbf16>
    %c0_3 = arith.constant 0 : index
    %c0_4 = arith.constant 0 : index
    %2 = vector.load %arg3[%c0_3, %c0_4] : memref<2048x512xbf16, #tpu.memory_space<vmem>>, vector<2048x512xbf16>
    %cst = arith.constant dense<0.000000e+00> : vector<8x512xf32>
    %3 = tpu.matmul %0, %2, %cst {dimension_numbers = #tpu.dot_dimension_numbers<[1], [0], [0], [1], [0, 0, 1, 1], [], []>} : vector<8x2048xbf16>, vector<2048x512xbf16>, vector<8x512xf32> -> vector<8x512xf32>
    %c0_5 = arith.constant 0 : index
    %c0_6 = arith.constant 0 : index
    %4 = vector.load %arg4[%c0_5, %c0_6] : memref<768x512xbf16, #tpu.memory_space<vmem>>, vector<768x512xbf16>
    %cst_7 = arith.constant dense<0.000000e+00> : vector<8x512xf32>
    %5 = tpu.matmul %1, %4, %cst_7 {dimension_numbers = #tpu.dot_dimension_numbers<[1], [0], [0], [1], [0, 0, 1, 1], [], []>} : vector<8x768xbf16>, vector<768x512xbf16>, vector<8x512xf32> -> vector<8x512xf32>
    %6 = arith.addf %3, %5 : vector<8x512xf32>
    %c0_8 = arith.constant 0 : index
    %c0_9 = arith.constant 0 : index
    %7 = vector.load %arg5[%c0_8, %c0_9] : memref<1x512xf32, #tpu.memory_space<vmem>>, vector<1x512xf32>
    %8 = vector.broadcast %7 : vector<1x512xf32> to vector<8x512xf32>
    %9 = arith.addf %6, %8 : vector<8x512xf32>
    %cst_10 = arith.constant 0.000000e+00 : f32
    %10 = vector.broadcast %cst_10 : f32 to vector<8x512xf32>
    %11 = arith.maximumf %9, %10 : vector<8x512xf32>
    %12 = arith.truncf %11 : vector<8x512xf32> to vector<8x512xbf16>
    %c0_11 = arith.constant 0 : index
    %c0_12 = arith.constant 0 : index
    %13 = vector.load %arg6[%c0_11, %c0_12] : memref<512x256xbf16, #tpu.memory_space<vmem>>, vector<512x256xbf16>
    %cst_13 = arith.constant dense<0.000000e+00> : vector<8x256xf32>
    %14 = tpu.matmul %12, %13, %cst_13 {dimension_numbers = #tpu.dot_dimension_numbers<[1], [0], [0], [1], [0, 0, 1, 1], [], []>} : vector<8x512xbf16>, vector<512x256xbf16>, vector<8x256xf32> -> vector<8x256xf32>
    %c0_14 = arith.constant 0 : index
    %c0_15 = arith.constant 0 : index
    %15 = vector.load %arg7[%c0_14, %c0_15] : memref<1x256xf32, #tpu.memory_space<vmem>>, vector<1x256xf32>
    %16 = vector.broadcast %15 : vector<1x256xf32> to vector<8x256xf32>
    %17 = arith.addf %14, %16 : vector<8x256xf32>
    %cst_16 = arith.constant 0.000000e+00 : f32
    %18 = vector.broadcast %cst_16 : f32 to vector<8x256xf32>
    %19 = arith.maximumf %17, %18 : vector<8x256xf32>
    %20 = arith.truncf %19 : vector<8x256xf32> to vector<8x256xbf16>
    %c0_17 = arith.constant 0 : index
    %c0_18 = arith.constant 0 : index
    %21 = vector.load %arg8[%c0_17, %c0_18] : memref<256x128xbf16, #tpu.memory_space<vmem>>, vector<256x128xbf16>
    %cst_19 = arith.constant dense<0.000000e+00> : vector<8x128xf32>
    %22 = tpu.matmul %20, %21, %cst_19 {dimension_numbers = #tpu.dot_dimension_numbers<[1], [0], [0], [1], [0, 0, 1, 1], [], []>} : vector<8x256xbf16>, vector<256x128xbf16>, vector<8x128xf32> -> vector<8x128xf32>
    %c0_20 = arith.constant 0 : index
    %c0_21 = arith.constant 0 : index
    %23 = vector.load %arg9[%c0_20, %c0_21] : memref<1x128xf32, #tpu.memory_space<vmem>>, vector<1x128xf32>
    %24 = vector.broadcast %23 : vector<1x128xf32> to vector<8x128xf32>
    %25 = arith.addf %22, %24 : vector<8x128xf32>
    %c0_22 = arith.constant 0 : index
    %c0_23 = arith.constant 0 : index
    %26 = vector.load %arg10[%c0_22, %c0_23] : memref<8x128xf32, #tpu.memory_space<vmem>>, vector<8x128xf32>
    tpu.vector_store %arg10[%c0_22, %c0_23], %25 {strides = array<i32>} : memref<8x128xf32, #tpu.memory_space<vmem>>, vector<8x128xf32>,
    return
  }
  func.func @transform_0(%arg0: i32) -> (i32, i32) {
    %c0_i32 = arith.constant 0 : i32
    %c0_i32_0 = arith.constant 0 : i32
    return %arg0, %c0_i32 : i32, i32
  }
  func.func @transform_1(%arg0: i32) -> (i32, i32) {
    %c0_i32 = arith.constant 0 : i32
    %c0_i32_0 = arith.constant 0 : i32
    return %arg0, %c0_i32 : i32, i32
  }
  func.func @transform_2(%arg0: i32) -> (i32, i32) {
    %c0_i32 = arith.constant 0 : i32
    %c0_i32_0 = arith.constant 0 : i32
    %c0_i32_1 = arith.constant 0 : i32
    return %c0_i32, %c0_i32_0 : i32, i32
  }
  func.func @transform_3(%arg0: i32) -> (i32, i32) {
    %c0_i32 = arith.constant 0 : i32
    %c0_i32_0 = arith.constant 0 : i32
    %c0_i32_1 = arith.constant 0 : i32
    return %c0_i32, %c0_i32_0 : i32, i32
  }
  func.func @transform_4(%arg0: i32) -> (i32, i32) {
    %c0_i32 = arith.constant 0 : i32
    %c0_i32_0 = arith.constant 0 : i32
    %c0_i32_1 = arith.constant 0 : i32
    return %c0_i32, %c0_i32_0 : i32, i32
  }
  func.func @transform_5(%arg0: i32) -> (i32, i32) {
    %c0_i32 = arith.constant 0 : i32
    %c0_i32_0 = arith.constant 0 : i32
    %c0_i32_1 = arith.constant 0 : i32
    return %c0_i32, %c0_i32_0 : i32, i32
  }
  func.func @transform_6(%arg0: i32) -> (i32, i32) {
    %c0_i32 = arith.constant 0 : i32
    %c0_i32_0 = arith.constant 0 : i32
    %c0_i32_1 = arith.constant 0 : i32
    return %c0_i32, %c0_i32_0 : i32, i32
  }
  func.func @transform_7(%arg0: i32) -> (i32, i32) {
    %c0_i32 = arith.constant 0 : i32
    %c0_i32_0 = arith.constant 0 : i32
    %c0_i32_1 = arith.constant 0 : i32
    return %c0_i32, %c0_i32_0 : i32, i32
  }
  func.func @transform_8(%arg0: i32) -> (i32, i32) {
    %c0_i32 = arith.constant 0 : i32
    %c0_i32_0 = arith.constant 0 : i32
    %c0_i32_1 = arith.constant 0 : i32
    return %c0_i32, %c0_i32_0 : i32, i32
  }
  func.func @transform_9(%arg0: i32) -> (i32, i32) {
    %c0_i32 = arith.constant 0 : i32
    %c0_i32_0 = arith.constant 0 : i32
    return %arg0, %c0_i32 : i32, i32
  }
}

</mosaic_0001>

<bundles_post_ra>
// kernel: tpu_custom_call.1
= control target key start
LH: loop header
LB: loop body
LE: loop exit
PB: predicated region body
PF: predicated region fallthrough
CT: control target
= control target key end

     0   :  { %14 = vsyncpa [#allocation3], 0  ;;  %s8796_s0 = inlined_call_operand.hbm [shape: bf16[8,2048], index: 0, kind: input, shape index: {}]   ;;  %s8797_s1 = inlined_call_operand.hbm [shape: bf16[8,768], index: 1, kind: input, shape index: {}]   ;;  %s8798_s2 = inlined_call_operand.hbm [shape: bf16[2048,512], index: 2, kind: input, shape index: {}]   ;;  %s8799_s3 = inlined_call_operand.hbm [shape: bf16[768,512], index: 3, kind: input, shape index: {}]   ;;  %s8800_s4 = inlined_call_operand.hbm [shape: f32[1,512], index: 4, kind: input, shape index: {}]   ;;  %s8801_s5 = inlined_call_operand.hbm [shape: bf16[512,256], index: 5, kind: input, shape index: {}]   ;;  %s8802_s6 = inlined_call_operand.hbm [shape: f32[1,256], index: 6, kind: input, shape index: {}]   ;;  %s8803_s7 = inlined_call_operand.hbm [shape: bf16[256,128], index: 7, kind: input, shape index: {}]   ;;  %s8804_s8 = inlined_call_operand.hbm [shape: f32[1,128], index: 8, kind: input, shape index: {}]   ;;  %s8805_s9 = inlined_call_operand.hbm [shape: f32[8,128], index: 9, kind: output, shape index: {}]  }
   0x1   :  { %15 = vsyncpa [#allocation6], 0 }
   0x2   :  { %16 = vsyncpa [#allocation9], 0 }
   0x3   :  { %17 = vsyncpa [#allocation12], 0 }
   0x4   :  { %18 = vsyncpa [#allocation15], 0 }
   0x5   :  { %19 = vsyncpa [#allocation4], 0  ;;  %s8344_s30 = smov [#allocation5]   ;;  %s8112_s13 = scalar_lea.hbm %s8797_s1, 384 }
   0x6   :  { %s36_s10 = sshll.u32 %s8344_s30, 4  ;;  %p8113_p0 = scmp.ne.s32.totalorder %s8797_s1, %s8112_s13  ;;  %s37_s10 = int_to_ptr.vmem [resolvable:$true] %s36_s10 }
   0x7   :  { %p8116_p1 = scmp.lt.u32.totalorder %s8112_s13, %s8797_s1 }
   0x9   :  { %p8118_p2 = pnand %p8116_p1, %p8113_p0 }
   0xb   :  { %8121 = shalt.err (!%p8118_p2)
}
   0xc   :  { %s8122_s18 = scalar_lea.vmem %s37_s10, 384  ;;  %p8127_p4 = scmp.lt.s32.totalorder %s37_s10, %s37_s10 }
   0xd   :  { %p8123_p3 = scmp.ne.s32.totalorder %s37_s10, %s8122_s18  ;;  %p8128_p5 = scmp.lt.s32.totalorder %s8122_s18, %s8122_s18 }
   0xf   :  { %p8129_p6 = por %p8128_p5, %p8127_p4 }
  0x11   :  { %p8130_p7 = pnand %p8129_p6, %p8123_p3 }
  0x13   :  { %8133 = shalt.err (!%p8130_p7)
}
  0x14   :  { %39 = dma.hbm_to_vmem [thread:$0]  %s8797_s1, 384, %s37_s10, [#allocation6]  }
  0x15   :  { %s8345_s21 = smov [#allocation8]   ;;  %s8346_s23 = smov [#allocation11]  }
  0x16   :  { %s57_s22 = sshll.u32 %s8345_s21, 4  ;;  %s79_s24 = sshll.u32 %s8346_s23, 4  ;;  %s58_s22 = int_to_ptr.vmem [resolvable:$true] %s57_s22  ;;  %s80_s24 = int_to_ptr.vmem [resolvable:$true] %s79_s24 }
  0x17   :  { %s8134_s27 = scalar_lea.hbm %s8799_s3, 24576 }
  0x18   :  { %p8135_p8 = scmp.ne.s32.totalorder %s8799_s3, %s8134_s27  ;;  %p8138_p9 = scmp.lt.u32.totalorder %s8134_s27, %s8799_s3 }
  0x1a   :  { %p8140_p10 = pnand %p8138_p9, %p8135_p8 }
  0x1c   :  { %8143 = shalt.err (!%p8140_p10)
}
  0x1d   :  { %s8144_s1 = scalar_lea.vmem %s58_s22, 24576  ;;  %p8149_p12 = scmp.lt.s32.totalorder %s58_s22, %s58_s22 }
  0x1e   :  { %p8145_p11 = scmp.ne.s32.totalorder %s58_s22, %s8144_s1  ;;  %p8150_p13 = scmp.lt.s32.totalorder %s8144_s1, %s8144_s1 }
  0x20   :  { %p8151_p0 = por %p8150_p13, %p8149_p12 }
  0x22   :  { %p8152_p1 = pnand %p8151_p0, %p8145_p11 }
  0x24   :  { %8155 = shalt.err (!%p8152_p1)
}
  0x25   :  { %s8347_s10 = smov 256   ;;  %s8348_s12 = smov 16  }
  0x26   :  { %63 = dma.hbm_to_vmem [thread:$0]  %s8799_s3, 24576, %s58_s22, [#allocation9], %s8347_s10, %s8347_s10, %s8348_s12  }
  0x27   :  { %s8156_s17 = scalar_lea.hbm %s8801_s5, 8192 }
  0x28   :  { %p8157_p2 = scmp.ne.s32.totalorder %s8801_s5, %s8156_s17  ;;  %p8160_p3 = scmp.lt.u32.totalorder %s8156_s17, %s8801_s5 }
  0x2a   :  { %p8162_p4 = pnand %p8160_p3, %p8157_p2 }
  0x2c   :  { %8165 = shalt.err (!%p8162_p4)
}
  0x2d   :  { %s8166_s23 = scalar_lea.vmem %s80_s24, 8192  ;;  %p8171_p6 = scmp.lt.s32.totalorder %s80_s24, %s80_s24 }
  0x2e   :  { %p8167_p5 = scmp.ne.s32.totalorder %s80_s24, %s8166_s23  ;;  %p8172_p7 = scmp.lt.s32.totalorder %s8166_s23, %s8166_s23 }
  0x30   :  { %p8173_p8 = por %p8172_p7, %p8171_p6 }
  0x32   :  { %p8174_p9 = pnand %p8173_p8, %p8167_p5 }
  0x34   :  { %8177 = shalt.err (!%p8174_p9)
}
  0x35   :  { %s8349_s3 = smov 128   ;;  %s8350_s22 = smov 8  }
  0x36   :  { %85 = dma.hbm_to_vmem [thread:$0]  %s8801_s5, 8192, %s80_s24, [#allocation12], %s8349_s3, %s8349_s3, %s8350_s22  }
  0x37   :  { %s8351_s27 = smov [#allocation14]   ;;  %s8178_s11 = scalar_lea.hbm %s8803_s7, 2048 }
  0x38   :  { %s101_s28 = sshll.u32 %s8351_s27, 4  ;;  %p8179_p10 = scmp.ne.s32.totalorder %s8803_s7, %s8178_s11  ;;  %s102_s28 = int_to_ptr.vmem [resolvable:$true] %s101_s28 }
  0x39   :  { %p8182_p11 = scmp.lt.u32.totalorder %s8178_s11, %s8803_s7 }
  0x3b   :  { %p8184_p12 = pnand %p8182_p11, %p8179_p10 }
  0x3d   :  { %8187 = shalt.err (!%p8184_p12)
}
  0x3e   :  { %s8188_s16 = scalar_lea.vmem %s102_s28, 2048  ;;  %p8193_p0 = scmp.lt.s32.totalorder %s102_s28, %s102_s28 }
  0x3f   :  { %p8189_p13 = scmp.ne.s32.totalorder %s102_s28, %s8188_s16  ;;  %p8194_p1 = scmp.lt.s32.totalorder %s8188_s16, %s8188_s16 }
  0x41   :  { %p8195_p2 = por %p8194_p1, %p8193_p0 }
  0x43   :  { %p8196_p3 = pnand %p8195_p2, %p8189_p13 }
  0x45   :  { %8199 = shalt.err (!%p8196_p3)
}
  0x46   :  { %s8352_s5 = smov 64   ;;  %s8353_s24 = smov 4  }
  0x47   :  { %107 = dma.hbm_to_vmem [thread:$0]  %s8803_s7, 2048, %s102_s28, [#allocation15], %s8352_s5, %s8352_s5, %s8353_s24  }
  0x48   :  { %s8354_s19 = smov [#allocation2]   ;;  %s8355_s21 = smov [#allocation7]  }
  0x49   :  { %s26_s20 = sshll.u32 %s8354_s19, 4  ;;  %s45_s23 = sshll.u32 %s8355_s21, 4  ;;  %s27_s20 = int_to_ptr.vmem [resolvable:$true] %s26_s20  ;;  %s8461_s23 = int_to_ptr.vmem [resolvable:$true] %s45_s23 }
  0x4a   :  { %s8200_s25 = scalar_lea.hbm %s8796_s0, 1024 }
  0x4b   :  { %p8201_p4 = scmp.ne.s32.totalorder %s8796_s0, %s8200_s25  ;;  %p8204_p5 = scmp.lt.u32.totalorder %s8200_s25, %s8796_s0 }
  0x4d   :  { %p8206_p6 = pnand %p8204_p5, %p8201_p4 }
  0x4f   :  { %8209 = shalt.err (!%p8206_p6)
}
  0x50   :  { %s8210_s7 = scalar_lea.vmem %s27_s20, 1024  ;;  %p8215_p8 = scmp.lt.s32.totalorder %s27_s20, %s27_s20 }
  0x51   :  { %p8211_p7 = scmp.ne.s32.totalorder %s27_s20, %s8210_s7  ;;  %p8216_p9 = scmp.lt.s32.totalorder %s8210_s7, %s8210_s7 }
  0x53   :  { %p8217_p10 = por %p8216_p9, %p8215_p8 }
  0x55   :  { %p8218_p11 = pnand %p8217_p10, %p8211_p7 }
  0x57   :  { %8221 = shalt.err (!%p8218_p11)
}
  0x58   :  { %29 = dma.hbm_to_vmem [thread:$0]  %s8796_s0, 1024, %s27_s20, [#allocation3]  }
  0x59   :  { %s8222_s14 = scalar_lea.hbm %s8798_s2, 65536 }
  0x5a   :  { %p8223_p12 = scmp.ne.s32.totalorder %s8798_s2, %s8222_s14  ;;  %p8226_p13 = scmp.lt.u32.totalorder %s8222_s14, %s8798_s2 }
  0x5c   :  { %p8228_p0 = pnand %p8226_p13, %p8223_p12 }
  0x5e   :  { %8231 = shalt.err (!%p8228_p0)
}
  0x5f   :  { %s8232_s17 = scalar_lea.vmem %s8461_s23, 65536  ;;  %p8237_p2 = scmp.lt.s32.totalorder %s8461_s23, %s8461_s23 }
  0x60   :  { %p8233_p1 = scmp.ne.s32.totalorder %s8461_s23, %s8232_s17  ;;  %p8238_p3 = scmp.lt.s32.totalorder %s8232_s17, %s8232_s17 }
  0x62   :  { %p8239_p4 = por %p8238_p3, %p8237_p2 }
  0x64   :  { %p8240_p5 = pnand %p8239_p4, %p8233_p1 }
  0x66   :  { %8243 = shalt.err (!%p8240_p5)
}
  0x67   :  { %51 = dma.hbm_to_vmem [thread:$0]  %s8798_s2, 65536, %s8461_s23, [#allocation6], %s8347_s10, %s8347_s10, %s8348_s12  }
  0x68   :  { %s8356_s19 = smov [#allocation10]   ;;  %s8357_s21 = smov [#allocation13]  }
  0x69   :  { %s70_s20 = sshll.u32 %s8356_s19, 4  ;;  %s92_s3 = sshll.u32 %s8357_s21, 4  ;;  %s71_s20 = int_to_ptr.vmem [resolvable:$true] %s70_s20  ;;  %s93_s3 = int_to_ptr.vmem [resolvable:$true] %s92_s3 }
  0x6a   :  { %s8244_s26 = scalar_lea.hbm %s8800_s4, 64 }
  0x6b   :  { %p8245_p6 = scmp.ne.s32.totalorder %s8800_s4, %s8244_s26  ;;  %p8248_p7 = scmp.lt.u32.totalorder %s8244_s26, %s8800_s4 }
  0x6d   :  { %p8250_p8 = pnand %p8248_p7, %p8245_p6 }
  0x6f   :  { %8253 = shalt.err (!%p8250_p8)
}
  0x70   :  { %s8254_s2 = scalar_lea.vmem %s71_s20, 64  ;;  %p8259_p10 = scmp.lt.s32.totalorder %s71_s20, %s71_s20 }
  0x71   :  { %p8255_p9 = scmp.ne.s32.totalorder %s71_s20, %s8254_s2  ;;  %p8260_p11 = scmp.lt.s32.totalorder %s8254_s2, %s8254_s2 }
  0x73   :  { %p8261_p12 = por %p8260_p11, %p8259_p10 }
  0x75   :  { %p8262_p13 = pnand %p8261_p12, %p8255_p9 }
  0x77   :  { %8265 = shalt.err (!%p8262_p13)
}
  0x78   :  { %73 = dma.hbm_to_vmem [thread:$0]  %s8800_s4, 64, %s71_s20, [#allocation9]  }
  0x79   :  { %s8266_s11 = scalar_lea.hbm %s8802_s6, 32 }
  0x7a   :  { %p8267_p0 = scmp.ne.s32.totalorder %s8802_s6, %s8266_s11  ;;  %p8270_p1 = scmp.lt.u32.totalorder %s8266_s11, %s8802_s6 }
  0x7c   :  { %p8272_p2 = pnand %p8270_p1, %p8267_p0 }
  0x7e   :  { %8275 = shalt.err (!%p8272_p2)
}
  0x7f   :  { %s8276_s16 = scalar_lea.vmem %s93_s3, 32  ;;  %p8281_p4 = scmp.lt.s32.totalorder %s93_s3, %s93_s3 }
  0x80   :  { %p8277_p3 = scmp.ne.s32.totalorder %s93_s3, %s8276_s16  ;;  %p8282_p5 = scmp.lt.s32.totalorder %s8276_s16, %s8276_s16 }
  0x82   :  { %p8283_p6 = por %p8282_p5, %p8281_p4 }
  0x84   :  { %p8284_p7 = pnand %p8283_p6, %p8277_p3 }
  0x86   :  { %8287 = shalt.err (!%p8284_p7)
}
  0x87   :  { %95 = dma.hbm_to_vmem [thread:$0]  %s8802_s6, 32, %s93_s3, [#allocation12]  }
  0x88   :  { %s8358_s24 = smov [#allocation16]   ;;  %s8288_s19 = scalar_lea.hbm %s8804_s8, 16 }
  0x89   :  { %s114_s17 = sshll.u32 %s8358_s24, 4  ;;  %p8289_p8 = scmp.ne.s32.totalorder %s8804_s8, %s8288_s19  ;;  %s115_s17 = int_to_ptr.vmem [resolvable:$true] %s114_s17 }
  0x8a   :  { %p8292_p9 = scmp.lt.u32.totalorder %s8288_s19, %s8804_s8 }
  0x8c   :  { %p8294_p10 = pnand %p8292_p9, %p8289_p8 }
  0x8e   :  { %8297 = shalt.err (!%p8294_p10)
}
  0x8f   :  { %s8298_s26 = scalar_lea.vmem %s115_s17, 16  ;;  %s8302_s6 = scalar_lea.vmem %s115_s17, 32 }
  0x90   :  { %p8299_p11 = scmp.ne.s32.totalorder %s115_s17, %s8298_s26  ;;  %p8303_p12 = scmp.lt.s32.totalorder %s115_s17, %s115_s17 }
  0x91   :  { %p8304_p13 = scmp.lt.s32.totalorder %s8302_s6, %s8298_s26 }
  0x93   :  { %p8305_p0 = por %p8304_p13, %p8303_p12 }
  0x95   :  { %p8306_p1 = pnand %p8305_p0, %p8299_p11 }
  0x97   :  { %8309 = shalt.err (!%p8306_p1)
}
  0x98   :  { %117 = dma.hbm_to_vmem [thread:$0]  %s8804_s8, 16, %s115_s17, [#allocation15]  }
  0x99   :  { %8332 = dma.done.wait [#allocation3], 1024  }
  0x9a   :  { %8333 = vsyncadd [#allocation3], 4294966272 }
  0x9b   :  { %8334 = dma.done.wait [#allocation6], 65920  }
  0x9c   :  { %8335 = vsyncadd [#allocation6], 4294901376 }
  0x9d   :  { %8336 = dma.done.wait [#allocation9], 24640  }
  0x9e   :  { %8337 = vsyncadd [#allocation9], 4294942656 }
  0x9f   :  { %8338 = dma.done.wait [#allocation12], 8224  }
  0xa0   :  { %8339 = vsyncadd [#allocation12], 4294959072 }
  0xa1   :  { %8340 = dma.done.wait [#allocation15], 2064  }
  0xa2   :  { %8341 = vsyncadd [#allocation15], 4294965232  ;;  %v6922_v0 = vld [vmem:[#allocation8 + $0x4] ss:$16 sps:$4 sm:$0xff]   ;;  %v6926_v2 = vld [vmem:[#allocation8] ss:$16 sps:$4 sm:$0xff]  }
  0xa3   :  { %v6924_v1 = vld [vmem:[#allocation8 + $0x404] ss:$16 sps:$4 sm:$0xff]   ;;  %1842 = vmatprep.subr.bf16.mxu1 %v6922_v0  ;;  %v6927_v3 = vld [vmem:[#allocation8 + $0x400] ss:$16 sps:$4 sm:$0xff]   ;;  %v154_v46 = vld [vmem:[#allocation5] sm:$0xff]  ;;  %s8359_s8 = smov [#allocation17]  }
  0xa4   :  { %1924 = vmatprep.subr.bf16.mxu0 %v6924_v1  ;;  %v6928_v4 = vld [vmem:[#allocation8 + $0x24] ss:$16 sps:$4 sm:$0xff]   ;;  %1843 = vmatpush1.bf16.msra.mxu1 %v6926_v2  ;;  %v6932_v6 = vld [vmem:[#allocation8 + $0x20] ss:$16 sps:$4 sm:$0xff]   ;;  %v8531_v48 = vcombine.high %v154_v46, %v154_v46  ;;  %v156_v50 = vld [vmem:[#allocation5 + $0x10] sm:$0xff]  ;;  %s6058_s29 = sshll.u32 %s8359_s8, 4  ;;  %s6059_s29 = int_to_ptr.vmem [resolvable:$true] %s6058_s29 }
  0xa5   :  { %1925 = vmatpush1.bf16.msra.mxu0 %v6927_v3  ;;  %v6930_v5 = vld [vmem:[#allocation8 + $0x424] ss:$16 sps:$4 sm:$0xff]   ;;  %1844 = vmatprep.subr.bf16.mxu1 %v6928_v4  ;;  %v6933_v7 = vld [vmem:[#allocation8 + $0x420] ss:$16 sps:$4 sm:$0xff]   ;;  %v8533_v53 = vcombine.high %v156_v50, %v156_v50  ;;  %s8310_s30 = scalar_lea.vmem %s6059_s29, 128  ;;  %p8315_p3 = scmp.lt.s32.totalorder %s6059_s29, %s6059_s29 }
  0xa6   :  { %1926 = vmatprep.subr.bf16.mxu0 %v6930_v5  ;;  %v6934_v8 = vld [vmem:[#allocation8 + $0x44] ss:$16 sps:$4 sm:$0xff]   ;;  %v6938_v10 = vld [vmem:[#allocation8 + $0x40] ss:$16 sps:$4 sm:$0xff]   ;;  %1874 = vmatprep.mubr.bf16.mxu1 %v8531_v48  ;;  %v7027_v5 = vld [vmem:[#allocation8 + $0x20c] ss:$16 sps:$4 sm:$0xff]   ;;  %p8311_p2 = scmp.ne.s32.totalorder %s6059_s29, %s8310_s30  ;;  %p8316_p4 = scmp.lt.s32.totalorder %s8310_s30, %s8310_s30 }
  0xa7   :  { %v6936_v9 = vld [vmem:[#allocation8 + $0x444] ss:$16 sps:$4 sm:$0xff]   ;;  %v6939_v11 = vld [vmem:[#allocation8 + $0x440] ss:$16 sps:$4 sm:$0xff]   ;;  %1956 = vmatprep.mubr.bf16.mxu0 %v8533_v53 }
  0xa8   :  { %1845 = vmatpush1.bf16.msra.mxu1 %v6932_v6  ;;  %v6940_v12 = vld [vmem:[#allocation8 + $0x64] ss:$16 sps:$4 sm:$0xff]   ;;  %v6944_v14 = vld [vmem:[#allocation8 + $0x60] ss:$16 sps:$4 sm:$0xff]   ;;  %v8537_v6 = vcombine.low %v154_v46, %v154_v46  ;;  %p8317_p5 = por %p8316_p4, %p8315_p3 }
  0xa9   :  { %1927 = vmatpush1.bf16.msra.mxu0 %v6933_v7  ;;  %1846 = vmatprep.subr.bf16.mxu1 %v6934_v8  ;;  %v6942_v13 = vld [vmem:[#allocation8 + $0x464] ss:$16 sps:$4 sm:$0xff]   ;;  %v6945_v15 = vld [vmem:[#allocation8 + $0x460] ss:$16 sps:$4 sm:$0xff]   ;;  %v8539_v7 = vcombine.low %v156_v50, %v156_v50  ;;  %v7087_v50 = vld [vmem:[#allocation8 + $0x34c] ss:$16 sps:$4 sm:$0xff]  }
  0xaa   :  { %1928 = vmatprep.subr.bf16.mxu0 %v6936_v9  ;;  %v6946_v16 = vld [vmem:[#allocation8 + $0x84] ss:$16 sps:$4 sm:$0xff]   ;;  %v6950_v18 = vld [vmem:[#allocation8 + $0x80] ss:$16 sps:$4 sm:$0xff]   ;;  %v7025_v9 = vld [vmem:[#allocation8 + $0x208] ss:$16 sps:$4 sm:$0xff]   ;;  %p8318_p6 = pnand %p8317_p5, %p8311_p2 }
  0xab   :  { %v6948_v17 = vld [vmem:[#allocation8 + $0x484] ss:$16 sps:$4 sm:$0xff]   ;;  %v6951_v19 = vld [vmem:[#allocation8 + $0x480] ss:$16 sps:$4 sm:$0xff]  }
  0xac   :  { %1847 = vmatpush1.bf16.msra.mxu1 %v6938_v10  ;;  %v6952_v20 = vld [vmem:[#allocation8 + $0xa4] ss:$16 sps:$4 sm:$0xff]   ;;  %v6956_v22 = vld [vmem:[#allocation8 + $0xa0] ss:$16 sps:$4 sm:$0xff]  }
  0xad   :  { %1929 = vmatpush1.bf16.msra.mxu0 %v6939_v11  ;;  %1848 = vmatprep.subr.bf16.mxu1 %v6940_v12  ;;  %v6954_v21 = vld [vmem:[#allocation8 + $0x4a4] ss:$16 sps:$4 sm:$0xff]   ;;  %v6957_v23 = vld [vmem:[#allocation8 + $0x4a0] ss:$16 sps:$4 sm:$0xff]   ;;  %v7033_v11 = vld [vmem:[#allocation8 + $0x22c] ss:$16 sps:$4 sm:$0xff]  }
  0xae   :  { %1930 = vmatprep.subr.bf16.mxu0 %v6942_v13  ;;  %v6958_v24 = vld [vmem:[#allocation8 + $0xc4] ss:$16 sps:$4 sm:$0xff]   ;;  %v6962_v26 = vld [vmem:[#allocation8 + $0xc0] ss:$16 sps:$4 sm:$0xff]   ;;  %v7031_v13 = vld [vmem:[#allocation8 + $0x228] ss:$16 sps:$4 sm:$0xff]  }
  0xaf   :  { %v6960_v25 = vld [vmem:[#allocation8 + $0x4c4] ss:$16 sps:$4 sm:$0xff]   ;;  %v6963_v27 = vld [vmem:[#allocation8 + $0x4c0] ss:$16 sps:$4 sm:$0xff]  }
  0xb0   :  { %1849 = vmatpush1.bf16.msra.mxu1 %v6944_v14  ;;  %v6964_v28 = vld [vmem:[#allocation8 + $0xe4] ss:$16 sps:$4 sm:$0xff]   ;;  %v6968_v30 = vld [vmem:[#allocation8 + $0xe0] ss:$16 sps:$4 sm:$0xff]  }
  0xb1   :  { %1931 = vmatpush1.bf16.msra.mxu0 %v6945_v15  ;;  %1850 = vmatprep.subr.bf16.mxu1 %v6946_v16  ;;  %v6966_v29 = vld [vmem:[#allocation8 + $0x4e4] ss:$16 sps:$4 sm:$0xff]   ;;  %v6969_v31 = vld [vmem:[#allocation8 + $0x4e0] ss:$16 sps:$4 sm:$0xff]   ;;  %v7039_v15 = vld [vmem:[#allocation8 + $0x24c] ss:$16 sps:$4 sm:$0xff]  }
  0xb2   :  { %1932 = vmatprep.subr.bf16.mxu0 %v6948_v17  ;;  %v6970_v32 = vld [vmem:[#allocation8 + $0x104] ss:$16 sps:$4 sm:$0xff]   ;;  %v6974_v34 = vld [vmem:[#allocation8 + $0x100] ss:$16 sps:$4 sm:$0xff]   ;;  %v7037_v17 = vld [vmem:[#allocation8 + $0x248] ss:$16 sps:$4 sm:$0xff]  }
  0xb3   :  { %v6972_v33 = vld [vmem:[#allocation8 + $0x504] ss:$16 sps:$4 sm:$0xff]   ;;  %v6975_v35 = vld [vmem:[#allocation8 + $0x500] ss:$16 sps:$4 sm:$0xff]  }
  0xb4   :  { %1851 = vmatpush1.bf16.msra.mxu1 %v6950_v18  ;;  %v6976_v36 = vld [vmem:[#allocation8 + $0x124] ss:$16 sps:$4 sm:$0xff]   ;;  %v6980_v38 = vld [vmem:[#allocation8 + $0x120] ss:$16 sps:$4 sm:$0xff]  }
  0xb5   :  { %1933 = vmatpush1.bf16.msra.mxu0 %v6951_v19  ;;  %1852 = vmatprep.subr.bf16.mxu1 %v6952_v20  ;;  %v6978_v37 = vld [vmem:[#allocation8 + $0x524] ss:$16 sps:$4 sm:$0xff]   ;;  %v6981_v39 = vld [vmem:[#allocation8 + $0x520] ss:$16 sps:$4 sm:$0xff]   ;;  %v7045_v19 = vld [vmem:[#allocation8 + $0x26c] ss:$16 sps:$4 sm:$0xff]  }
  0xb6   :  { %1934 = vmatprep.subr.bf16.mxu0 %v6954_v21  ;;  %v6982_v40 = vld [vmem:[#allocation8 + $0x144] ss:$16 sps:$4 sm:$0xff]   ;;  %v6986_v42 = vld [vmem:[#allocation8 + $0x140] ss:$16 sps:$4 sm:$0xff]   ;;  %v7043_v21 = vld [vmem:[#allocation8 + $0x268] ss:$16 sps:$4 sm:$0xff]  }
  0xb7   :  { %v6984_v41 = vld [vmem:[#allocation8 + $0x544] ss:$16 sps:$4 sm:$0xff]   ;;  %v6987_v43 = vld [vmem:[#allocation8 + $0x540] ss:$16 sps:$4 sm:$0xff]  }
  0xb8   :  { %1853 = vmatpush1.bf16.msra.mxu1 %v6956_v22  ;;  %v6988_v44 = vld [vmem:[#allocation8 + $0x164] ss:$16 sps:$4 sm:$0xff]   ;;  %v6992_v47 = vld [vmem:[#allocation8 + $0x160] ss:$16 sps:$4 sm:$0xff]  }
  0xb9   :  { %1935 = vmatpush1.bf16.msra.mxu0 %v6957_v23  ;;  %1854 = vmatprep.subr.bf16.mxu1 %v6958_v24  ;;  %v6990_v45 = vld [vmem:[#allocation8 + $0x564] ss:$16 sps:$4 sm:$0xff]   ;;  %v6993_v49 = vld [vmem:[#allocation8 + $0x560] ss:$16 sps:$4 sm:$0xff]   ;;  %v7051_v23 = vld [vmem:[#allocation8 + $0x28c] ss:$16 sps:$4 sm:$0xff]  }
  0xba   :  { %1936 = vmatprep.subr.bf16.mxu0 %v6960_v25  ;;  %v6994_v51 = vld [vmem:[#allocation8 + $0x184] ss:$16 sps:$4 sm:$0xff]   ;;  %v6998_v54 = vld [vmem:[#allocation8 + $0x180] ss:$16 sps:$4 sm:$0xff]   ;;  %v7049_v25 = vld [vmem:[#allocation8 + $0x288] ss:$16 sps:$4 sm:$0xff]  }
  0xbb   :  { %v6996_v52 = vld [vmem:[#allocation8 + $0x584] ss:$16 sps:$4 sm:$0xff]   ;;  %v6999_v55 = vld [vmem:[#allocation8 + $0x580] ss:$16 sps:$4 sm:$0xff]  }
  0xbc   :  { %1855 = vmatpush1.bf16.msra.mxu1 %v6962_v26  ;;  %v7000_v56 = vld [vmem:[#allocation8 + $0x1a4] ss:$16 sps:$4 sm:$0xff]   ;;  %v7004_v58 = vld [vmem:[#allocation8 + $0x1a0] ss:$16 sps:$4 sm:$0xff]  }
  0xbd   :  { %1937 = vmatpush1.bf16.msra.mxu0 %v6963_v27  ;;  %1856 = vmatprep.subr.bf16.mxu1 %v6964_v28  ;;  %v7002_v57 = vld [vmem:[#allocation8 + $0x5a4] ss:$16 sps:$4 sm:$0xff]   ;;  %v7005_v59 = vld [vmem:[#allocation8 + $0x5a0] ss:$16 sps:$4 sm:$0xff]   ;;  %v7057_v27 = vld [vmem:[#allocation8 + $0x2ac] ss:$16 sps:$4 sm:$0xff]  }
  0xbe   :  { %1938 = vmatprep.subr.bf16.mxu0 %v6966_v29  ;;  %v7006_v60 = vld [vmem:[#allocation8 + $0x1c4] ss:$16 sps:$4 sm:$0xff]   ;;  %v7010_v62 = vld [vmem:[#allocation8 + $0x1c0] ss:$16 sps:$4 sm:$0xff]   ;;  %v7055_v29 = vld [vmem:[#allocation8 + $0x2a8] ss:$16 sps:$4 sm:$0xff]  }
  0xbf   :  { %v7008_v61 = vld [vmem:[#allocation8 + $0x5c4] ss:$16 sps:$4 sm:$0xff]   ;;  %v7011_v63 = vld [vmem:[#allocation8 + $0x5c0] ss:$16 sps:$4 sm:$0xff]  }
  0xc0   :  { %1857 = vmatpush1.bf16.msra.mxu1 %v6968_v30  ;;  %v7012_v0 = vld [vmem:[#allocation8 + $0x1e4] ss:$16 sps:$4 sm:$0xff]   ;;  %v7016_v2 = vld [vmem:[#allocation8 + $0x1e0] ss:$16 sps:$4 sm:$0xff]  }
  0xc1   :  { %1939 = vmatpush1.bf16.msra.mxu0 %v6969_v31  ;;  %1858 = vmatprep.subr.bf16.mxu1 %v6970_v32  ;;  %v7014_v1 = vld [vmem:[#allocation8 + $0x5e4] ss:$16 sps:$4 sm:$0xff]   ;;  %v7017_v3 = vld [vmem:[#allocation8 + $0x5e0] ss:$16 sps:$4 sm:$0xff]   ;;  %v7063_v31 = vld [vmem:[#allocation8 + $0x2cc] ss:$16 sps:$4 sm:$0xff]  }
  0xc2   :  { %1940 = vmatprep.subr.bf16.mxu0 %v6972_v33  ;;  %v7022_v4 = vld [vmem:[#allocation8 + $0x204] ss:$16 sps:$4 sm:$0xff]   ;;  %v7020_v8 = vld [vmem:[#allocation8 + $0x200] ss:$16 sps:$4 sm:$0xff]  }
  0xc3   :  { %v7030_v10 = vld [vmem:[#allocation8 + $0x224] ss:$16 sps:$4 sm:$0xff]   ;;  %v7028_v12 = vld [vmem:[#allocation8 + $0x220] ss:$16 sps:$4 sm:$0xff]  }
  0xc4   :  { %1859 = vmatpush1.bf16.msra.mxu1 %v6974_v34  ;;  %v7036_v14 = vld [vmem:[#allocation8 + $0x244] ss:$16 sps:$4 sm:$0xff]   ;;  %v7034_v16 = vld [vmem:[#allocation8 + $0x240] ss:$16 sps:$4 sm:$0xff]  }
  0xc5   :  { %1941 = vmatpush1.bf16.msra.mxu0 %v6975_v35  ;;  %1860 = vmatprep.subr.bf16.mxu1 %v6976_v36  ;;  %v7042_v18 = vld [vmem:[#allocation8 + $0x264] ss:$16 sps:$4 sm:$0xff]   ;;  %v7040_v20 = vld [vmem:[#allocation8 + $0x260] ss:$16 sps:$4 sm:$0xff]   ;;  %v7061_v35 = vld [vmem:[#allocation8 + $0x2c8] ss:$16 sps:$4 sm:$0xff]  }
  0xc6   :  { %1942 = vmatprep.subr.bf16.mxu0 %v6978_v37  ;;  %v7048_v22 = vld [vmem:[#allocation8 + $0x284] ss:$16 sps:$4 sm:$0xff]   ;;  %v7046_v24 = vld [vmem:[#allocation8 + $0x280] ss:$16 sps:$4 sm:$0xff]   ;;  %v7069_v37 = vld [vmem:[#allocation8 + $0x2ec] ss:$16 sps:$4 sm:$0xff]  }
  0xc7   :  { %v7054_v26 = vld [vmem:[#allocation8 + $0x2a4] ss:$16 sps:$4 sm:$0xff]   ;;  %v7052_v28 = vld [vmem:[#allocation8 + $0x2a0] ss:$16 sps:$4 sm:$0xff]  }
  0xc8   :  { %1861 = vmatpush1.bf16.msra.mxu1 %v6980_v38  ;;  %v7060_v30 = vld [vmem:[#allocation8 + $0x2c4] ss:$16 sps:$4 sm:$0xff]   ;;  %v7058_v33 = vld [vmem:[#allocation8 + $0x2c0] ss:$16 sps:$4 sm:$0xff]  }
  0xc9   :  { %1943 = vmatpush1.bf16.msra.mxu0 %v6981_v39  ;;  %1862 = vmatprep.subr.bf16.mxu1 %v6982_v40  ;;  %v8543_v32 = vld [vmem:[#allocation5 + $0x8] sm:$0xff]  ;;  %v7067_v39 = vld [vmem:[#allocation8 + $0x2e8] ss:$16 sps:$4 sm:$0xff]  }
  0xca   :  { %1944 = vmatprep.subr.bf16.mxu0 %v6984_v41  ;;  %v6074_v34 = vcombine.high %v8543_v32, %v8543_v32  ;;  %v7066_v36 = vld [vmem:[#allocation8 + $0x2e4] ss:$16 sps:$4 sm:$0xff]   ;;  %v7064_v38 = vld [vmem:[#allocation8 + $0x2e0] ss:$16 sps:$4 sm:$0xff]   ;;  %v7075_v41 = vld [vmem:[#allocation8 + $0x30c] ss:$16 sps:$4 sm:$0xff]  }
  0xcb   :  { %v7072_v40 = vld [vmem:[#allocation8 + $0x304] ss:$16 sps:$4 sm:$0xff]   ;;  %v7076_v46 = vld [vmem:[#allocation8 + $0x320] ss:$16 sps:$4 sm:$0xff]  }
  0xcc   :  { %1863 = vmatpush1.bf16.msra.mxu1 %v6986_v42  ;;  %v7070_v42 = vld [vmem:[#allocation8 + $0x300] ss:$16 sps:$4 sm:$0xff]  }
  0xcd   :  { %1945 = vmatpush1.bf16.msra.mxu0 %v6987_v43  ;;  %1864 = vmatprep.subr.bf16.mxu1 %v6988_v44  ;;  %v7073_v43 = vld [vmem:[#allocation8 + $0x308] ss:$16 sps:$4 sm:$0xff]   ;;  %v7078_v44 = vld [vmem:[#allocation8 + $0x324] ss:$16 sps:$4 sm:$0xff]  }
  0xce   :  { %1946 = vmatprep.subr.bf16.mxu0 %v6990_v45  ;;  %v7081_v45 = vld [vmem:[#allocation8 + $0x32c] ss:$16 sps:$4 sm:$0xff]  }
  0xd0   :  { %1865 = vmatpush1.bf16.msra.mxu1 %v6992_v47  ;;  %v7079_v47 = vld [vmem:[#allocation8 + $0x328] ss:$16 sps:$4 sm:$0xff]  }
  0xd1   :  { %1947 = vmatpush1.bf16.msra.mxu0 %v6993_v49  ;;  %1866 = vmatprep.subr.bf16.mxu1 %v6994_v51  ;;  %v7084_v49 = vld [vmem:[#allocation8 + $0x344] ss:$16 sps:$4 sm:$0xff]   ;;  %v7082_v51 = vld [vmem:[#allocation8 + $0x340] ss:$16 sps:$4 sm:$0xff]  }
  0xd2   :  { %1948 = vmatprep.subr.bf16.mxu0 %v6996_v52  ;;  %v7085_v52 = vld [vmem:[#allocation8 + $0x348] ss:$16 sps:$4 sm:$0xff]  }
  0xd4   :  { %1867 = vmatpush1.bf16.msra.mxu1 %v6998_v54  ;;  %v7090_v54 = vld [vmem:[#allocation8 + $0x364] ss:$16 sps:$4 sm:$0xff]  }
  0xd5   :  { %1949 = vmatpush1.bf16.msra.mxu0 %v6999_v55  ;;  %1868 = vmatprep.subr.bf16.mxu1 %v7000_v56  ;;  %v7093_v55 = vld [vmem:[#allocation8 + $0x36c] ss:$16 sps:$4 sm:$0xff]   ;;  %v7088_v56 = vld [vmem:[#allocation8 + $0x360] ss:$16 sps:$4 sm:$0xff]  }
  0xd6   :  { %1950 = vmatprep.subr.bf16.mxu0 %v7002_v57  ;;  %v7091_v57 = vld [vmem:[#allocation8 + $0x368] ss:$16 sps:$4 sm:$0xff]  }
  0xd8   :  { %1869 = vmatpush1.bf16.msra.mxu1 %v7004_v58  ;;  %v7096_v58 = vld [vmem:[#allocation8 + $0x384] ss:$16 sps:$4 sm:$0xff]  }
  0xd9   :  { %1951 = vmatpush1.bf16.msra.mxu0 %v7005_v59  ;;  %1870 = vmatprep.subr.bf16.mxu1 %v7006_v60  ;;  %v7099_v59 = vld [vmem:[#allocation8 + $0x38c] ss:$16 sps:$4 sm:$0xff]   ;;  %v7094_v60 = vld [vmem:[#allocation8 + $0x380] ss:$16 sps:$4 sm:$0xff]  }
  0xda   :  { %1952 = vmatprep.subr.bf16.mxu0 %v7008_v61  ;;  %v7097_v61 = vld [vmem:[#allocation8 + $0x388] ss:$16 sps:$4 sm:$0xff]  }
  0xdc   :  { %1871 = vmatpush1.bf16.msra.mxu1 %v7010_v62  ;;  %v7102_v62 = vld [vmem:[#allocation8 + $0x3a4] ss:$16 sps:$4 sm:$0xff]  }
  0xdd   :  { %1953 = vmatpush1.bf16.msra.mxu0 %v7011_v63  ;;  %1872 = vmatprep.subr.bf16.mxu1 %v7012_v0  ;;  %v7105_v63 = vld [vmem:[#allocation8 + $0x3ac] ss:$16 sps:$4 sm:$0xff]   ;;  %v7100_v0 = vld [vmem:[#allocation8 + $0x3a0] ss:$16 sps:$4 sm:$0xff]  }
  0xde   :  { %1954 = vmatprep.subr.bf16.mxu0 %v7014_v1  ;;  %v7103_v1 = vld [vmem:[#allocation8 + $0x3a8] ss:$16 sps:$4 sm:$0xff]  }
  0xe0   :  { %1873 = vmatpush1.bf16.msra.mxu1 %v7016_v2  ;;  %v7108_v2 = vld [vmem:[#allocation8 + $0x3c4] ss:$16 sps:$4 sm:$0xff]  }
  0xe1   :  { %1955 = vmatpush1.bf16.msra.mxu0 %v7017_v3  ;;  %1883 = vmatprep.subr.bf16.mxu1 %v7022_v4  ;;  %v7111_v3 = vld [vmem:[#allocation8 + $0x3cc] ss:$16 sps:$4 sm:$0xff]   ;;  %v7106_v4 = vld [vmem:[#allocation8 + $0x3c0] ss:$16 sps:$4 sm:$0xff]  }
  0xe2   :  { %2006 = vmatprep.subr.bf16.mxu0 %v7027_v5  ;;  %v7109_v5 = vld [vmem:[#allocation8 + $0x3c8] ss:$16 sps:$4 sm:$0xff]  }
  0xe3   :  { %1875 = vmatmul.mubr.bf16.vlgmr.msra.gmra.mrb[0].mxu1 %v8537_v6 }
  0xe4   :  { %1957 = vmatmul.mubr.bf16.vlgmr.msra.gmra.mrb[0].mxu0 %v8539_v7  ;;  %1884 = vmatpush1.bf16.msra.mxu1 %v7020_v8  ;;  %v7114_v8 = vld [vmem:[#allocation8 + $0x3e4] ss:$16 sps:$4 sm:$0xff]  }
  0xe5   :  { %2007 = vmatpush1.bf16.msra.mxu0 %v7025_v9  ;;  %1885 = vmatprep.subr.bf16.mxu1 %v7030_v10  ;;  %v7117_v9 = vld [vmem:[#allocation8 + $0x3ec] ss:$16 sps:$4 sm:$0xff]   ;;  %v7112_v10 = vld [vmem:[#allocation8 + $0x3e0] ss:$16 sps:$4 sm:$0xff]  }
  0xe6   :  { %2008 = vmatprep.subr.bf16.mxu0 %v7033_v11  ;;  %1915 = vmatprep.mubr.bf16.mxu1 %v6074_v34  ;;  %v7115_v11 = vld [vmem:[#allocation8 + $0x3e8] ss:$16 sps:$4 sm:$0xff]  }
  0xe7   :  { %2038 = vmatprep.mubr.bf16.mxu0 %v6074_v34  ;;  %v7152_v34 = vld [vmem:[#allocation8 + $0xac] ss:$16 sps:$4 sm:$0xff]  }
  0xe8   :  { %1886 = vmatpush1.bf16.msra.mxu1 %v7028_v12  ;;  %v7122_v12 = vld [vmem:[#allocation8 + $0xc] ss:$16 sps:$4 sm:$0xff]  }
  0xe9   :  { %2009 = vmatpush1.bf16.msra.mxu0 %v7031_v13  ;;  %1887 = vmatprep.subr.bf16.mxu1 %v7036_v14  ;;  %v7125_v13 = vld [vmem:[#allocation7 + $0x4] ss:$16 sps:$4 sm:$0xff]   ;;  %v6073_v14 = vcombine.low %v8543_v32, %v8543_v32 }
  0xea   :  { %2010 = vmatprep.subr.bf16.mxu0 %v7039_v15  ;;  %v7120_v15 = vld [vmem:[#allocation8 + $0x8] ss:$16 sps:$4 sm:$0xff]   ;;  %v7149_v32 = vld [vmem:[#allocation7 + $0x84] ss:$16 sps:$4 sm:$0xff]  }
  0xec   :  { %1888 = vmatpush1.bf16.msra.mxu1 %v7034_v16  ;;  %v7123_v16 = vld [vmem:[#allocation7] ss:$16 sps:$4 sm:$0xff]  }
  0xed   :  { %2011 = vmatpush1.bf16.msra.mxu0 %v7037_v17  ;;  %1889 = vmatprep.subr.bf16.mxu1 %v7042_v18  ;;  %v7128_v17 = vld [vmem:[#allocation8 + $0x2c] ss:$16 sps:$4 sm:$0xff]   ;;  %v7131_v18 = vld [vmem:[#allocation7 + $0x24] ss:$16 sps:$4 sm:$0xff]  }
  0xee   :  { %2012 = vmatprep.subr.bf16.mxu0 %v7045_v19  ;;  %v8549_v19 = vld [vmem:[#allocation2] sm:$0xff] }
  0xf0   :  { %1890 = vmatpush1.bf16.msra.mxu1 %v7040_v20  ;;  %v8553_v20 = vcombine.high %v8549_v19, %v8549_v19 }
  0xf1   :  { %2013 = vmatpush1.bf16.msra.mxu0 %v7043_v21  ;;  %1891 = vmatprep.subr.bf16.mxu1 %v7048_v22  ;;  %v7126_v21 = vld [vmem:[#allocation8 + $0x28] ss:$16 sps:$4 sm:$0xff]   ;;  %v7129_v22 = vld [vmem:[#allocation7 + $0x20] ss:$16 sps:$4 sm:$0xff]  }
  0xf2   :  { %2014 = vmatprep.subr.bf16.mxu0 %v7051_v23  ;;  %v7134_v23 = vld [vmem:[#allocation8 + $0x4c] ss:$16 sps:$4 sm:$0xff]  }
  0xf4   :  { %1892 = vmatpush1.bf16.msra.mxu1 %v7046_v24  ;;  %v7137_v24 = vld [vmem:[#allocation7 + $0x44] ss:$16 sps:$4 sm:$0xff]  }
  0xf5   :  { %2015 = vmatpush1.bf16.msra.mxu0 %v7049_v25  ;;  %1893 = vmatprep.subr.bf16.mxu1 %v7054_v26  ;;  %v7132_v25 = vld [vmem:[#allocation8 + $0x48] ss:$16 sps:$4 sm:$0xff]   ;;  %v7135_v26 = vld [vmem:[#allocation7 + $0x40] ss:$16 sps:$4 sm:$0xff]  }
  0xf6   :  { %2016 = vmatprep.subr.bf16.mxu0 %v7057_v27  ;;  %v7140_v27 = vld [vmem:[#allocation8 + $0x6c] ss:$16 sps:$4 sm:$0xff]  }
  0xf8   :  { %1894 = vmatpush1.bf16.msra.mxu1 %v7052_v28  ;;  %v7143_v28 = vld [vmem:[#allocation7 + $0x64] ss:$16 sps:$4 sm:$0xff]  }
  0xf9   :  { %2017 = vmatpush1.bf16.msra.mxu0 %v7055_v29  ;;  %1895 = vmatprep.subr.bf16.mxu1 %v7060_v30  ;;  %v7138_v29 = vld [vmem:[#allocation8 + $0x68] ss:$16 sps:$4 sm:$0xff]   ;;  %v7141_v30 = vld [vmem:[#allocation7 + $0x60] ss:$16 sps:$4 sm:$0xff]  }
  0xfa   :  { %2018 = vmatprep.subr.bf16.mxu0 %v7063_v31  ;;  %v7146_v31 = vld [vmem:[#allocation8 + $0x8c] ss:$16 sps:$4 sm:$0xff]  }
  0xfc   :  { %1896 = vmatpush1.bf16.msra.mxu1 %v7058_v33  ;;  %v7144_v33 = vld [vmem:[#allocation8 + $0x88] ss:$16 sps:$4 sm:$0xff]  }
  0xfd   :  { %2019 = vmatpush1.bf16.msra.mxu0 %v7061_v35  ;;  %1897 = vmatprep.subr.bf16.mxu1 %v7066_v36  ;;  %v7155_v35 = vld [vmem:[#allocation7 + $0xa4] ss:$16 sps:$4 sm:$0xff]   ;;  %v7150_v36 = vld [vmem:[#allocation8 + $0xa8] ss:$16 sps:$4 sm:$0xff]  }
  0xfe   :  { %2020 = vmatprep.subr.bf16.mxu0 %v7069_v37  ;;  %v7153_v37 = vld [vmem:[#allocation7 + $0xa0] ss:$16 sps:$4 sm:$0xff]  }
 0x100   :  { %1898 = vmatpush1.bf16.msra.mxu1 %v7064_v38  ;;  %v7158_v38 = vld [vmem:[#allocation8 + $0xcc] ss:$16 sps:$4 sm:$0xff]  }
 0x101   :  { %2021 = vmatpush1.bf16.msra.mxu0 %v7067_v39  ;;  %1899 = vmatprep.subr.bf16.mxu1 %v7072_v40  ;;  %v7161_v39 = vld [vmem:[#allocation7 + $0xc4] ss:$16 sps:$4 sm:$0xff]   ;;  %v7156_v40 = vld [vmem:[#allocation8 + $0xc8] ss:$16 sps:$4 sm:$0xff]  }
 0x102   :  { %2022 = vmatprep.subr.bf16.mxu0 %v7075_v41  ;;  %v7159_v41 = vld [vmem:[#allocation7 + $0xc0] ss:$16 sps:$4 sm:$0xff]  }
 0x104   :  { %1900 = vmatpush1.bf16.msra.mxu1 %v7070_v42  ;;  %v7164_v42 = vld [vmem:[#allocation8 + $0xec] ss:$16 sps:$4 sm:$0xff]  }
 0x105   :  { %2023 = vmatpush1.bf16.msra.mxu0 %v7073_v43  ;;  %1901 = vmatprep.subr.bf16.mxu1 %v7078_v44  ;;  %v7167_v43 = vld [vmem:[#allocation7 + $0xe4] ss:$16 sps:$4 sm:$0xff]   ;;  %v7162_v44 = vld [vmem:[#allocation8 + $0xe8] ss:$16 sps:$4 sm:$0xff]  }
 0x106   :  { %2024 = vmatprep.subr.bf16.mxu0 %v7081_v45  ;;  %v7165_v45 = vld [vmem:[#allocation7 + $0xe0] ss:$16 sps:$4 sm:$0xff]  }
 0x108   :  { %1902 = vmatpush1.bf16.msra.mxu1 %v7076_v46  ;;  %v7170_v46 = vld [vmem:[#allocation8 + $0x10c] ss:$16 sps:$4 sm:$0xff]  }
 0x109   :  { %2025 = vmatpush1.bf16.msra.mxu0 %v7079_v47  ;;  %1903 = vmatprep.subr.bf16.mxu1 %v7084_v49  ;;  %v7173_v47 = vld [vmem:[#allocation7 + $0x104] ss:$16 sps:$4 sm:$0xff]   ;;  %v7168_v49 = vld [vmem:[#allocation8 + $0x108] ss:$16 sps:$4 sm:$0xff]  }
 0x10a   :  { %2026 = vmatprep.subr.bf16.mxu0 %v7087_v50  ;;  %v7171_v50 = vld [vmem:[#allocation7 + $0x100] ss:$16 sps:$4 sm:$0xff]  }
 0x10c   :  { %1904 = vmatpush1.bf16.msra.mxu1 %v7082_v51  ;;  %v7176_v51 = vld [vmem:[#allocation8 + $0x12c] ss:$16 sps:$4 sm:$0xff]  }
 0x10d   :  { %2027 = vmatpush1.bf16.msra.mxu0 %v7085_v52  ;;  %1905 = vmatprep.subr.bf16.mxu1 %v7090_v54  ;;  %v7179_v52 = vld [vmem:[#allocation7 + $0x124] ss:$16 sps:$4 sm:$0xff]   ;;  %v7174_v54 = vld [vmem:[#allocation8 + $0x128] ss:$16 sps:$4 sm:$0xff]  }
 0x10e   :  { %2028 = vmatprep.subr.bf16.mxu0 %v7093_v55  ;;  %v7177_v55 = vld [vmem:[#allocation7 + $0x120] ss:$16 sps:$4 sm:$0xff]  }
 0x110   :  { %1906 = vmatpush1.bf16.msra.mxu1 %v7088_v56  ;;  %v7182_v56 = vld [vmem:[#allocation8 + $0x14c] ss:$16 sps:$4 sm:$0xff]  }
 0x111   :  { %2029 = vmatpush1.bf16.msra.mxu0 %v7091_v57  ;;  %1907 = vmatprep.subr.bf16.mxu1 %v7096_v58  ;;  %v7185_v57 = vld [vmem:[#allocation7 + $0x144] ss:$16 sps:$4 sm:$0xff]   ;;  %v7180_v58 = vld [vmem:[#allocation8 + $0x148] ss:$16 sps:$4 sm:$0xff]  }
 0x112   :  { %2030 = vmatprep.subr.bf16.mxu0 %v7099_v59  ;;  %v7183_v59 = vld [vmem:[#allocation7 + $0x140] ss:$16 sps:$4 sm:$0xff]  }
 0x114   :  { %1908 = vmatpush1.bf16.msra.mxu1 %v7094_v60  ;;  %v7188_v60 = vld [vmem:[#allocation8 + $0x16c] ss:$16 sps:$4 sm:$0xff]  }
 0x115   :  { %2031 = vmatpush1.bf16.msra.mxu0 %v7097_v61  ;;  %1909 = vmatprep.subr.bf16.mxu1 %v7102_v62  ;;  %v7191_v61 = vld [vmem:[#allocation7 + $0x164] ss:$16 sps:$4 sm:$0xff]   ;;  %v7186_v62 = vld [vmem:[#allocation8 + $0x168] ss:$16 sps:$4 sm:$0xff]  }
 0x116   :  { %2032 = vmatprep.subr.bf16.mxu0 %v7105_v63  ;;  %v7189_v63 = vld [vmem:[#allocation7 + $0x160] ss:$16 sps:$4 sm:$0xff]  }
 0x118   :  { %1910 = vmatpush1.bf16.msra.mxu1 %v7100_v0  ;;  %v7194_v0 = vld [vmem:[#allocation8 + $0x18c] ss:$16 sps:$4 sm:$0xff]  }
 0x119   :  { %2033 = vmatpush1.bf16.msra.mxu0 %v7103_v1  ;;  %1911 = vmatprep.subr.bf16.mxu1 %v7108_v2  ;;  %v7197_v1 = vld [vmem:[#allocation7 + $0x184] ss:$16 sps:$4 sm:$0xff]   ;;  %v7192_v2 = vld [vmem:[#allocation8 + $0x188] ss:$16 sps:$4 sm:$0xff]  }
 0x11a   :  { %2034 = vmatprep.subr.bf16.mxu0 %v7111_v3  ;;  %v7195_v3 = vld [vmem:[#allocation7 + $0x180] ss:$16 sps:$4 sm:$0xff]  }
 0x11c   :  { %1912 = vmatpush1.bf16.msra.mxu1 %v7106_v4  ;;  %v7200_v4 = vld [vmem:[#allocation8 + $0x1ac] ss:$16 sps:$4 sm:$0xff]  }
 0x11d   :  { %2035 = vmatpush1.bf16.msra.mxu0 %v7109_v5  ;;  %1913 = vmatprep.subr.bf16.mxu1 %v7114_v8  ;;  %v7203_v5 = vld [vmem:[#allocation7 + $0x1a4] ss:$16 sps:$4 sm:$0xff]   ;;  %v7198_v8 = vld [vmem:[#allocation8 + $0x1a8] ss:$16 sps:$4 sm:$0xff]  }
 0x11e   :  { %2036 = vmatprep.subr.bf16.mxu0 %v7117_v9  ;;  %v7201_v9 = vld [vmem:[#allocation7 + $0x1a0] ss:$16 sps:$4 sm:$0xff]  }
 0x120   :  { %1914 = vmatpush1.bf16.msra.mxu1 %v7112_v10  ;;  %v7206_v10 = vld [vmem:[#allocation8 + $0x1cc] ss:$16 sps:$4 sm:$0xff]  }
 0x121   :  { %2037 = vmatpush1.bf16.msra.mxu0 %v7115_v11  ;;  %1965 = vmatprep.subr.bf16.mxu1 %v7122_v12  ;;  %v7209_v11 = vld [vmem:[#allocation7 + $0x1c4] ss:$16 sps:$4 sm:$0xff]   ;;  %v7204_v12 = vld [vmem:[#allocation8 + $0x1c8] ss:$16 sps:$4 sm:$0xff]  }
 0x122   :  { %4704 = vmatprep.subr.bf16.mxu0 %v7125_v13  ;;  %v7207_v13 = vld [vmem:[#allocation7 + $0x1c0] ss:$16 sps:$4 sm:$0xff]  }
 0x123   :  { %1916 = vmatmul.mubr.bf16.vlgmr.msra.gmra.mrb[4].mxu1 %v6073_v14 }
 0x124   :  { %2039 = vmatmul.mubr.bf16.vlgmr.msra.gmra.mrb[4].mxu0 %v6073_v14  ;;  %1966 = vmatpush1.bf16.msra.mxu1 %v7120_v15  ;;  %v7212_v14 = vld [vmem:[#allocation8 + $0x1ec] ss:$16 sps:$4 sm:$0xff]   ;;  %v7215_v15 = vld [vmem:[#allocation7 + $0x1e4] ss:$16 sps:$4 sm:$0xff]  }
 0x125   :  { %4705 = vmatpush1.bf16.msra.mxu0 %v7123_v16  ;;  %1967 = vmatprep.subr.bf16.mxu1 %v7128_v17  ;;  %v7210_v16 = vld [vmem:[#allocation8 + $0x1e8] ss:$16 sps:$4 sm:$0xff]   ;;  %v7213_v17 = vld [vmem:[#allocation7 + $0x1e0] ss:$16 sps:$4 sm:$0xff]  }
 0x126   :  { %4706 = vmatprep.subr.bf16.mxu0 %v7131_v18  ;;  %1997 = vmatprep.mubr.bf16.mxu1 %v8531_v48  ;;  %v7147_v48 = vld [vmem:[#allocation7 + $0x80] ss:$16 sps:$4 sm:$0xff]   ;;  %v7220_v18 = vld [vmem:[#allocation8 + $0x40c] ss:$16 sps:$4 sm:$0xff]  }
 0x127   :  { %4736 = vmatprep.mubr.bf16.mxu0 %v8553_v20 }
 0x128   :  { %1968 = vmatpush1.bf16.msra.mxu1 %v7126_v21  ;;  %v7223_v21 = vld [vmem:[#allocation7 + $0x404] ss:$16 sps:$4 sm:$0xff]  }
 0x129   :  { %4707 = vmatpush1.bf16.msra.mxu0 %v7129_v22  ;;  %1969 = vmatprep.subr.bf16.mxu1 %v7134_v23  ;;  %v7218_v22 = vld [vmem:[#allocation8 + $0x408] ss:$16 sps:$4 sm:$0xff]   ;;  %v8559_v23 = vcombine.low %v8549_v19, %v8549_v19  ;;  %v7227_v19 = vld [vmem:[#allocation7 + $0x420] ss:$16 sps:$4 sm:$0xff]  }
 0x12a   :  { %4708 = vmatprep.subr.bf16.mxu0 %v7137_v24  ;;  %v8561_v24 = vld [vmem:[#allocation2 + $0x10] sm:$0xff] }
 0x12c   :  { %1970 = vmatpush1.bf16.msra.mxu1 %v7132_v25  ;;  %v7221_v25 = vld [vmem:[#allocation7 + $0x400] ss:$16 sps:$4 sm:$0xff]  }
 0x12d   :  { %4709 = vmatpush1.bf16.msra.mxu0 %v7135_v26  ;;  %1971 = vmatprep.subr.bf16.mxu1 %v7140_v27  ;;  %v7226_v26 = vld [vmem:[#allocation8 + $0x42c] ss:$16 sps:$4 sm:$0xff]   ;;  %v7229_v27 = vld [vmem:[#allocation7 + $0x424] ss:$16 sps:$4 sm:$0xff]  }
 0x12e   :  { %4710 = vmatprep.subr.bf16.mxu0 %v7143_v28  ;;  %v8565_v28 = vcombine.high %v8561_v24, %v8561_v24 }
 0x130   :  { %1972 = vmatpush1.bf16.msra.mxu1 %v7138_v29  ;;  %v7224_v29 = vld [vmem:[#allocation8 + $0x428] ss:$16 sps:$4 sm:$0xff]  }
 0x131   :  { %4711 = vmatpush1.bf16.msra.mxu0 %v7141_v30  ;;  %1973 = vmatprep.subr.bf16.mxu1 %v7146_v31  ;;  %v7232_v30 = vld [vmem:[#allocation8 + $0x44c] ss:$16 sps:$4 sm:$0xff]   ;;  %v7235_v31 = vld [vmem:[#allocation7 + $0x444] ss:$16 sps:$4 sm:$0xff]  }
 0x132   :  { %4712 = vmatprep.subr.bf16.mxu0 %v7149_v32  ;;  %v7230_v32 = vld [vmem:[#allocation8 + $0x448] ss:$16 sps:$4 sm:$0xff]  }
 0x134   :  { %1974 = vmatpush1.bf16.msra.mxu1 %v7144_v33  ;;  %v7233_v33 = vld [vmem:[#allocation7 + $0x440] ss:$16 sps:$4 sm:$0xff]  }
 0x135   :  { %4713 = vmatpush1.bf16.msra.mxu0 %v7147_v48  ;;  %1975 = vmatprep.subr.bf16.mxu1 %v7152_v34  ;;  %v7241_v48 = vld [vmem:[#allocation7 + $0x464] ss:$16 sps:$4 sm:$0xff]   ;;  %v7236_v34 = vld [vmem:[#allocation8 + $0x468] ss:$16 sps:$4 sm:$0xff]  }
 0x136   :  { %4714 = vmatprep.subr.bf16.mxu0 %v7155_v35  ;;  %v7239_v35 = vld [vmem:[#allocation7 + $0x460] ss:$16 sps:$4 sm:$0xff]  }
 0x138   :  { %1976 = vmatpush1.bf16.msra.mxu1 %v7150_v36  ;;  %v7244_v36 = vld [vmem:[#allocation8 + $0x48c] ss:$16 sps:$4 sm:$0xff]  }
 0x139   :  { %4715 = vmatpush1.bf16.msra.mxu0 %v7153_v37  ;;  %1977 = vmatprep.subr.bf16.mxu1 %v7158_v38  ;;  %v7247_v37 = vld [vmem:[#allocation7 + $0x484] ss:$16 sps:$4 sm:$0xff]   ;;  %v7242_v38 = vld [vmem:[#allocation8 + $0x488] ss:$16 sps:$4 sm:$0xff]  }
 0x13a   :  { %4716 = vmatprep.subr.bf16.mxu0 %v7161_v39  ;;  %v7250_v39 = vld [vmem:[#allocation8 + $0x4ac] ss:$16 sps:$4 sm:$0xff]  }
 0x13c   :  { %1978 = vmatpush1.bf16.msra.mxu1 %v7156_v40  ;;  %v7253_v40 = vld [vmem:[#allocation7 + $0x4a4] ss:$16 sps:$4 sm:$0xff]  }
 0x13d   :  { %4717 = vmatpush1.bf16.msra.mxu0 %v7159_v41  ;;  %1979 = vmatprep.subr.bf16.mxu1 %v7164_v42  ;;  %v7248_v41 = vld [vmem:[#allocation8 + $0x4a8] ss:$16 sps:$4 sm:$0xff]   ;;  %v7251_v42 = vld [vmem:[#allocation7 + $0x4a0] ss:$16 sps:$4 sm:$0xff]  }
 0x13e   :  { %4718 = vmatprep.subr.bf16.mxu0 %v7167_v43  ;;  %v7256_v43 = vld [vmem:[#allocation8 + $0x4cc] ss:$16 sps:$4 sm:$0xff]  }
 0x140   :  { %1980 = vmatpush1.bf16.msra.mxu1 %v7162_v44  ;;  %v7259_v44 = vld [vmem:[#allocation7 + $0x4c4] ss:$16 sps:$4 sm:$0xff]  }
 0x141   :  { %4719 = vmatpush1.bf16.msra.mxu0 %v7165_v45  ;;  %1981 = vmatprep.subr.bf16.mxu1 %v7170_v46  ;;  %v7254_v45 = vld [vmem:[#allocation8 + $0x4c8] ss:$16 sps:$4 sm:$0xff]   ;;  %v7257_v46 = vld [vmem:[#allocation7 + $0x4c0] ss:$16 sps:$4 sm:$0xff]  }
 0x142   :  { %4720 = vmatprep.subr.bf16.mxu0 %v7173_v47  ;;  %v7262_v47 = vld [vmem:[#allocation8 + $0x4ec] ss:$16 sps:$4 sm:$0xff]  }
 0x144   :  { %1982 = vmatpush1.bf16.msra.mxu1 %v7168_v49  ;;  %v7265_v49 = vld [vmem:[#allocation7 + $0x4e4] ss:$16 sps:$4 sm:$0xff]  }
 0x145   :  { %4721 = vmatpush1.bf16.msra.mxu0 %v7171_v50  ;;  %1983 = vmatprep.subr.bf16.mxu1 %v7176_v51  ;;  %v7260_v50 = vld [vmem:[#allocation8 + $0x4e8] ss:$16 sps:$4 sm:$0xff]   ;;  %v7263_v51 = vld [vmem:[#allocation7 + $0x4e0] ss:$16 sps:$4 sm:$0xff]  }
 0x146   :  { %4722 = vmatprep.subr.bf16.mxu0 %v7179_v52  ;;  %v7268_v52 = vld [vmem:[#allocation8 + $0x50c] ss:$16 sps:$4 sm:$0xff]  }
 0x148   :  { %1984 = vmatpush1.bf16.msra.mxu1 %v7174_v54  ;;  %v7271_v54 = vld [vmem:[#allocation7 + $0x504] ss:$16 sps:$4 sm:$0xff]  }
 0x149   :  { %4723 = vmatpush1.bf16.msra.mxu0 %v7177_v55  ;;  %1985 = vmatprep.subr.bf16.mxu1 %v7182_v56  ;;  %v7266_v55 = vld [vmem:[#allocation8 + $0x508] ss:$16 sps:$4 sm:$0xff]   ;;  %v7269_v56 = vld [vmem:[#allocation7 + $0x500] ss:$16 sps:$4 sm:$0xff]  }
 0x14a   :  { %4724 = vmatprep.subr.bf16.mxu0 %v7185_v57  ;;  %v7274_v57 = vld [vmem:[#allocation8 + $0x52c] ss:$16 sps:$4 sm:$0xff]  }
 0x14c   :  { %1986 = vmatpush1.bf16.msra.mxu1 %v7180_v58  ;;  %v7277_v58 = vld [vmem:[#allocation7 + $0x524] ss:$16 sps:$4 sm:$0xff]  }
 0x14d   :  { %4725 = vmatpush1.bf16.msra.mxu0 %v7183_v59  ;;  %1987 = vmatprep.subr.bf16.mxu1 %v7188_v60  ;;  %v7272_v59 = vld [vmem:[#allocation8 + $0x528] ss:$16 sps:$4 sm:$0xff]   ;;  %v7275_v60 = vld [vmem:[#allocation7 + $0x520] ss:$16 sps:$4 sm:$0xff]  }
 0x14e   :  { %4726 = vmatprep.subr.bf16.mxu0 %v7191_v61  ;;  %v7280_v61 = vld [vmem:[#allocation8 + $0x54c] ss:$16 sps:$4 sm:$0xff]  }
 0x150   :  { %1988 = vmatpush1.bf16.msra.mxu1 %v7186_v62  ;;  %v7283_v62 = vld [vmem:[#allocation7 + $0x544] ss:$16 sps:$4 sm:$0xff]  }
 0x151   :  { %4727 = vmatpush1.bf16.msra.mxu0 %v7189_v63  ;;  %1989 = vmatprep.subr.bf16.mxu1 %v7194_v0  ;;  %v7278_v63 = vld [vmem:[#allocation8 + $0x548] ss:$16 sps:$4 sm:$0xff]   ;;  %v7281_v0 = vld [vmem:[#allocation7 + $0x540] ss:$16 sps:$4 sm:$0xff]  }
 0x152   :  { %4728 = vmatprep.subr.bf16.mxu0 %v7197_v1  ;;  %v7286_v1 = vld [vmem:[#allocation8 + $0x56c] ss:$16 sps:$4 sm:$0xff]  }
 0x154   :  { %1990 = vmatpush1.bf16.msra.mxu1 %v7192_v2  ;;  %v7289_v2 = vld [vmem:[#allocation7 + $0x564] ss:$16 sps:$4 sm:$0xff]  }
 0x155   :  { %4729 = vmatpush1.bf16.msra.mxu0 %v7195_v3  ;;  %1991 = vmatprep.subr.bf16.mxu1 %v7200_v4  ;;  %v7284_v3 = vld [vmem:[#allocation8 + $0x568] ss:$16 sps:$4 sm:$0xff]   ;;  %v7287_v4 = vld [vmem:[#allocation7 + $0x560] ss:$16 sps:$4 sm:$0xff]  }
 0x156   :  { %4730 = vmatprep.subr.bf16.mxu0 %v7203_v5  ;;  %v7292_v5 = vld [vmem:[#allocation8 + $0x58c] ss:$16 sps:$4 sm:$0xff]  }
 0x158   :  { %1992 = vmatpush1.bf16.msra.mxu1 %v7198_v8  ;;  %v7295_v8 = vld [vmem:[#allocation7 + $0x584] ss:$16 sps:$4 sm:$0xff]  }
 0x159   :  { %4731 = vmatpush1.bf16.msra.mxu0 %v7201_v9  ;;  %1993 = vmatprep.subr.bf16.mxu1 %v7206_v10  ;;  %v7290_v9 = vld [vmem:[#allocation8 + $0x588] ss:$16 sps:$4 sm:$0xff]   ;;  %v7293_v10 = vld [vmem:[#allocation7 + $0x580] ss:$16 sps:$4 sm:$0xff]  }
 0x15a   :  { %4732 = vmatprep.subr.bf16.mxu0 %v7209_v11  ;;  %v7298_v11 = vld [vmem:[#allocation8 + $0x5ac] ss:$16 sps:$4 sm:$0xff]  }
 0x15c   :  { %1994 = vmatpush1.bf16.msra.mxu1 %v7204_v12  ;;  %v7301_v12 = vld [vmem:[#allocation7 + $0x5a4] ss:$16 sps:$4 sm:$0xff]  }
 0x15d   :  { %4733 = vmatpush1.bf16.msra.mxu0 %v7207_v13  ;;  %1995 = vmatprep.subr.bf16.mxu1 %v7212_v14  ;;  %v7296_v13 = vld [vmem:[#allocation8 + $0x5a8] ss:$16 sps:$4 sm:$0xff]   ;;  %v7299_v14 = vld [vmem:[#allocation7 + $0x5a0] ss:$16 sps:$4 sm:$0xff]  }
 0x15e   :  { %4734 = vmatprep.subr.bf16.mxu0 %v7215_v15  ;;  %v7304_v15 = vld [vmem:[#allocation8 + $0x5cc] ss:$16 sps:$4 sm:$0xff]  }
 0x160   :  { %1996 = vmatpush1.bf16.msra.mxu1 %v7210_v16  ;;  %v7307_v16 = vld [vmem:[#allocation7 + $0x5c4] ss:$16 sps:$4 sm:$0xff]  }
 0x161   :  { %4735 = vmatpush1.bf16.msra.mxu0 %v7213_v17  ;;  %2047 = vmatprep.subr.bf16.mxu1 %v7220_v18  ;;  %v7302_v17 = vld [vmem:[#allocation8 + $0x5c8] ss:$16 sps:$4 sm:$0xff]   ;;  %v7305_v18 = vld [vmem:[#allocation7 + $0x5c0] ss:$16 sps:$4 sm:$0xff]  }
 0x162   :  { %4786 = vmatprep.subr.bf16.mxu0 %v7223_v21  ;;  %v7310_v21 = vld [vmem:[#allocation8 + $0x5ec] ss:$16 sps:$4 sm:$0xff]  }
 0x163   :  { %1998 = vmatmul.mubr.bf16.vlgmr.msra.gmra.mrb[8].mxu1 %v8537_v6  ;;  %v7238_v6 = vld [vmem:[#allocation8 + $0x46c] ss:$16 sps:$4 sm:$0xff]  }
 0x164   :  { %4737 = vmatmul.mubr.bf16.vlgmr.msra.gmra.mrb[8].mxu0 %v8559_v23  ;;  %2048 = vmatpush1.bf16.msra.mxu1 %v7218_v22  ;;  %v7313_v22 = vld [vmem:[#allocation7 + $0x5e4] ss:$16 sps:$4 sm:$0xff]  }
 0x165   :  { %4787 = vmatpush1.bf16.msra.mxu0 %v7221_v25  ;;  %2049 = vmatprep.subr.bf16.mxu1 %v7226_v26  ;;  %v7308_v25 = vld [vmem:[#allocation8 + $0x5e8] ss:$16 sps:$4 sm:$0xff]   ;;  %v7311_v26 = vld [vmem:[#allocation7 + $0x5e0] ss:$16 sps:$4 sm:$0xff]  }
 0x166   :  { %4788 = vmatprep.subr.bf16.mxu0 %v7229_v27  ;;  %2079 = vmatprep.mubr.bf16.mxu1 %v8533_v53  ;;  %v7245_v53 = vld [vmem:[#allocation7 + $0x480] ss:$16 sps:$4 sm:$0xff]   ;;  %v7316_v27 = vld [vmem:[#allocation7 + $0x204] ss:$16 sps:$4 sm:$0xff]  }
 0x167   :  { %4818 = vmatprep.mubr.bf16.mxu0 %v8565_v28 }
 0x168   :  { %2050 = vmatpush1.bf16.msra.mxu1 %v7224_v29  ;;  %v7321_v29 = vld [vmem:[#allocation7 + $0x804] ss:$16 sps:$4 sm:$0xff]  }
 0x169   :  { %4789 = vmatpush1.bf16.msra.mxu0 %v7227_v19  ;;  %2051 = vmatprep.subr.bf16.mxu1 %v7232_v30  ;;  %v7314_v19 = vld [vmem:[#allocation7 + $0x200] ss:$16 sps:$4 sm:$0xff]   ;;  %v8573_v30 = vcombine.low %v8561_v24, %v8561_v24 }
 0x16a   :  { %4790 = vmatprep.subr.bf16.mxu0 %v7235_v31  ;;  %v8575_v31 = vld [vmem:[#allocation2 + $0x8] sm:$0xff] }
 0x16b   :  { %v7322_v24 = vld [vmem:[#allocation7 + $0x220] ss:$16 sps:$4 sm:$0xff]  }
 0x16c   :  { %2052 = vmatpush1.bf16.msra.mxu1 %v7230_v32  ;;  %v8577_v32 = vld [vmem:[#allocation2 + $0x20] sm:$0xff] }
 0x16d   :  { %4791 = vmatpush1.bf16.msra.mxu0 %v7233_v33  ;;  %2053 = vmatprep.subr.bf16.mxu1 %v7238_v6  ;;  %v7319_v33 = vld [vmem:[#allocation7 + $0x800] ss:$16 sps:$4 sm:$0xff]   ;;  %v7324_v6 = vld [vmem:[#allocation7 + $0x224] ss:$16 sps:$4 sm:$0xff]  }
 0x16e   :  { %4792 = vmatprep.subr.bf16.mxu0 %v7241_v48  ;;  %v7327_v48 = vld [vmem:[#allocation7 + $0x824] ss:$16 sps:$4 sm:$0xff]  }
 0x170   :  { %2054 = vmatpush1.bf16.msra.mxu1 %v7236_v34  ;;  %v8581_v34 = vcombine.high %v8575_v31, %v8575_v31 }
 0x171   :  { %4793 = vmatpush1.bf16.msra.mxu0 %v7239_v35  ;;  %2055 = vmatprep.subr.bf16.mxu1 %v7244_v36  ;;  %v8585_v35 = vcombine.high %v8577_v32, %v8577_v32  ;;  %v7325_v36 = vld [vmem:[#allocation7 + $0x820] ss:$16 sps:$4 sm:$0xff]  }
 0x172   :  { %4794 = vmatprep.subr.bf16.mxu0 %v7247_v37  ;;  %v7330_v37 = vld [vmem:[#allocation7 + $0x244] ss:$16 sps:$4 sm:$0xff]  }
 0x174   :  { %2056 = vmatpush1.bf16.msra.mxu1 %v7242_v38  ;;  %v7333_v38 = vld [vmem:[#allocation7 + $0x844] ss:$16 sps:$4 sm:$0xff]  }
 0x175   :  { %4795 = vmatpush1.bf16.msra.mxu0 %v7245_v53  ;;  %2057 = vmatprep.subr.bf16.mxu1 %v7250_v39  ;;  %v7328_v53 = vld [vmem:[#allocation7 + $0x240] ss:$16 sps:$4 sm:$0xff]  }
 0x176   :  { %4796 = vmatprep.subr.bf16.mxu0 %v7253_v40  ;;  %v7331_v39 = vld [vmem:[#allocation7 + $0x840] ss:$16 sps:$4 sm:$0xff]   ;;  %v7339_v40 = vld [vmem:[#allocation7 + $0x864] ss:$16 sps:$4 sm:$0xff]  }
 0x178   :  { %2058 = vmatpush1.bf16.msra.mxu1 %v7248_v41  ;;  %v7334_v41 = vld [vmem:[#allocation7 + $0x260] ss:$16 sps:$4 sm:$0xff]  }
 0x179   :  { %4797 = vmatpush1.bf16.msra.mxu0 %v7251_v42  ;;  %2059 = vmatprep.subr.bf16.mxu1 %v7256_v43  ;;  %v7337_v42 = vld [vmem:[#allocation7 + $0x860] ss:$16 sps:$4 sm:$0xff]   ;;  %v7342_v43 = vld [vmem:[#allocation7 + $0x284] ss:$16 sps:$4 sm:$0xff]  }
 0x17a   :  { %4798 = vmatprep.subr.bf16.mxu0 %v7259_v44  ;;  %v7345_v44 = vld [vmem:[#allocation7 + $0x884] ss:$16 sps:$4 sm:$0xff]  }
 0x17c   :  { %2060 = vmatpush1.bf16.msra.mxu1 %v7254_v45  ;;  %v7340_v45 = vld [vmem:[#allocation7 + $0x280] ss:$16 sps:$4 sm:$0xff]  }
 0x17d   :  { %4799 = vmatpush1.bf16.msra.mxu0 %v7257_v46  ;;  %2061 = vmatprep.subr.bf16.mxu1 %v7262_v47  ;;  %v7343_v46 = vld [vmem:[#allocation7 + $0x880] ss:$16 sps:$4 sm:$0xff]   ;;  %v7348_v47 = vld [vmem:[#allocation7 + $0x2a4] ss:$16 sps:$4 sm:$0xff]  }
 0x17e   :  { %4800 = vmatprep.subr.bf16.mxu0 %v7265_v49  ;;  %v7351_v49 = vld [vmem:[#allocation7 + $0x8a4] ss:$16 sps:$4 sm:$0xff]  }
 0x180   :  { %2062 = vmatpush1.bf16.msra.mxu1 %v7260_v50  ;;  %v7346_v50 = vld [vmem:[#allocation7 + $0x2a0] ss:$16 sps:$4 sm:$0xff]  }
 0x181   :  { %4801 = vmatpush1.bf16.msra.mxu0 %v7263_v51  ;;  %2063 = vmatprep.subr.bf16.mxu1 %v7268_v52  ;;  %v7349_v51 = vld [vmem:[#allocation7 + $0x8a0] ss:$16 sps:$4 sm:$0xff]   ;;  %v7354_v52 = vld [vmem:[#allocation7 + $0x2c4] ss:$16 sps:$4 sm:$0xff]  }
 0x182   :  { %4802 = vmatprep.subr.bf16.mxu0 %v7271_v54  ;;  %v7357_v54 = vld [vmem:[#allocation7 + $0x8c4] ss:$16 sps:$4 sm:$0xff]  }
 0x184   :  { %2064 = vmatpush1.bf16.msra.mxu1 %v7266_v55 }
 0x185   :  { %4803 = vmatpush1.bf16.msra.mxu0 %v7269_v56  ;;  %2065 = vmatprep.subr.bf16.mxu1 %v7274_v57  ;;  %v7352_v56 = vld [vmem:[#allocation7 + $0x2c0] ss:$16 sps:$4 sm:$0xff]  }
 0x186   :  { %4804 = vmatprep.subr.bf16.mxu0 %v7277_v58  ;;  %v7355_v57 = vld [vmem:[#allocation7 + $0x8c0] ss:$16 sps:$4 sm:$0xff]  }
 0x188   :  { %2066 = vmatpush1.bf16.msra.mxu1 %v7272_v59 }
 0x189   :  { %4805 = vmatpush1.bf16.msra.mxu0 %v7275_v60  ;;  %2067 = vmatprep.subr.bf16.mxu1 %v7280_v61 }
 0x18a   :  { %4806 = vmatprep.subr.bf16.mxu0 %v7283_v62 }
 0x18c   :  { %2068 = vmatpush1.bf16.msra.mxu1 %v7278_v63 }
 0x18d   :  { %4807 = vmatpush1.bf16.msra.mxu0 %v7281_v0  ;;  %2069 = vmatprep.subr.bf16.mxu1 %v7286_v1  ;;  %v7360_v0 = vld [vmem:[#allocation7 + $0x2e4] ss:$16 sps:$4 sm:$0xff]  }
 0x18e   :  { %4808 = vmatprep.subr.bf16.mxu0 %v7289_v2  ;;  %v7363_v1 = vld [vmem:[#allocation7 + $0x8e4] ss:$16 sps:$4 sm:$0xff]  }
 0x190   :  { %2070 = vmatpush1.bf16.msra.mxu1 %v7284_v3  ;;  %v7358_v3 = vld [vmem:[#allocation7 + $0x2e0] ss:$16 sps:$4 sm:$0xff]  }
 0x191   :  { %4809 = vmatpush1.bf16.msra.mxu0 %v7287_v4  ;;  %2071 = vmatprep.subr.bf16.mxu1 %v7292_v5  ;;  %v7361_v4 = vld [vmem:[#allocation7 + $0x8e0] ss:$16 sps:$4 sm:$0xff]   ;;  %v7366_v5 = vld [vmem:[#allocation7 + $0x304] ss:$16 sps:$4 sm:$0xff]  }
 0x192   :  { %4810 = vmatprep.subr.bf16.mxu0 %v7295_v8  ;;  %v7369_v8 = vld [vmem:[#allocation7 + $0x904] ss:$16 sps:$4 sm:$0xff]  }
 0x194   :  { %2072 = vmatpush1.bf16.msra.mxu1 %v7290_v9  ;;  %v7364_v9 = vld [vmem:[#allocation7 + $0x300] ss:$16 sps:$4 sm:$0xff]  }
 0x195   :  { %4811 = vmatpush1.bf16.msra.mxu0 %v7293_v10  ;;  %2073 = vmatprep.subr.bf16.mxu1 %v7298_v11  ;;  %v7367_v10 = vld [vmem:[#allocation7 + $0x900] ss:$16 sps:$4 sm:$0xff]   ;;  %v7372_v11 = vld [vmem:[#allocation7 + $0x324] ss:$16 sps:$4 sm:$0xff]  }
 0x196   :  { %4812 = vmatprep.subr.bf16.mxu0 %v7301_v12  ;;  %v7375_v12 = vld [vmem:[#allocation7 + $0x924] ss:$16 sps:$4 sm:$0xff]  }
 0x198   :  { %2074 = vmatpush1.bf16.msra.mxu1 %v7296_v13  ;;  %v7370_v13 = vld [vmem:[#allocation7 + $0x320] ss:$16 sps:$4 sm:$0xff]  }
 0x199   :  { %4813 = vmatpush1.bf16.msra.mxu0 %v7299_v14  ;;  %2075 = vmatprep.subr.bf16.mxu1 %v7304_v15  ;;  %v7373_v14 = vld [vmem:[#allocation7 + $0x920] ss:$16 sps:$4 sm:$0xff]   ;;  %v7378_v15 = vld [vmem:[#allocation7 + $0x344] ss:$16 sps:$4 sm:$0xff]  }
 0x19a   :  { %4814 = vmatprep.subr.bf16.mxu0 %v7307_v16  ;;  %v7381_v16 = vld [vmem:[#allocation7 + $0x944] ss:$16 sps:$4 sm:$0xff]  }
 0x19c   :  { %2076 = vmatpush1.bf16.msra.mxu1 %v7302_v17  ;;  %v7376_v17 = vld [vmem:[#allocation7 + $0x340] ss:$16 sps:$4 sm:$0xff]  }
 0x19d   :  { %4815 = vmatpush1.bf16.msra.mxu0 %v7305_v18  ;;  %2077 = vmatprep.subr.bf16.mxu1 %v7310_v21  ;;  %v7379_v18 = vld [vmem:[#allocation7 + $0x940] ss:$16 sps:$4 sm:$0xff]   ;;  %v7384_v21 = vld [vmem:[#allocation7 + $0x364] ss:$16 sps:$4 sm:$0xff]  }
 0x19e   :  { %4816 = vmatprep.subr.bf16.mxu0 %v7313_v22  ;;  %v7387_v22 = vld [vmem:[#allocation7 + $0x964] ss:$16 sps:$4 sm:$0xff]  }
 0x1a0   :  { %2078 = vmatpush1.bf16.msra.mxu1 %v7308_v25  ;;  %v7382_v25 = vld [vmem:[#allocation7 + $0x360] ss:$16 sps:$4 sm:$0xff]  }
 0x1a1   :  { %4817 = vmatpush1.bf16.msra.mxu0 %v7311_v26  ;;  %4745 = vmatprep.subr.bf16.mxu1 %v7316_v27  ;;  %v7385_v26 = vld [vmem:[#allocation7 + $0x960] ss:$16 sps:$4 sm:$0xff]   ;;  %v7390_v27 = vld [vmem:[#allocation7 + $0x384] ss:$16 sps:$4 sm:$0xff]  }
 0x1a2   :  { %4868 = vmatprep.subr.bf16.mxu0 %v7321_v29  ;;  %v7393_v29 = vld [vmem:[#allocation7 + $0x984] ss:$16 sps:$4 sm:$0xff]  }
 0x1a3   :  { %2080 = vmatmul.mubr.bf16.vlgmr.msra.gmra.mrb[12].mxu1 %v8539_v7  ;;  %v7336_v7 = vld [vmem:[#allocation7 + $0x264] ss:$16 sps:$4 sm:$0xff]  }
 0x1a4   :  { %4819 = vmatmul.mubr.bf16.vlgmr.msra.gmra.mrb[12].mxu0 %v8573_v30  ;;  %4746 = vmatpush1.bf16.msra.mxu1 %v7314_v19  ;;  %v7388_v19 = vld [vmem:[#allocation7 + $0x380] ss:$16 sps:$4 sm:$0xff]  }
 0x1a5   :  { %4869 = vmatpush1.bf16.msra.mxu0 %v7319_v33  ;;  %4747 = vmatprep.subr.bf16.mxu1 %v7324_v6  ;;  %v7391_v33 = vld [vmem:[#allocation7 + $0x980] ss:$16 sps:$4 sm:$0xff]   ;;  %v7396_v6 = vld [vmem:[#allocation7 + $0x3a4] ss:$16 sps:$4 sm:$0xff]  }
 0x1a6   :  { %4870 = vmatprep.subr.bf16.mxu0 %v7327_v48  ;;  %4777 = vmatprep.mubr.bf16.mxu1 %v8581_v34  ;;  %v7399_v48 = vld [vmem:[#allocation7 + $0x9a4] ss:$16 sps:$4 sm:$0xff]  }
 0x1a7   :  { %4900 = vmatprep.mubr.bf16.mxu0 %v8585_v35 }
 0x1a8   :  { %4748 = vmatpush1.bf16.msra.mxu1 %v7322_v24  ;;  %v7394_v24 = vld [vmem:[#allocation7 + $0x3a0] ss:$16 sps:$4 sm:$0xff]  }
 0x1a9   :  { %4871 = vmatpush1.bf16.msra.mxu0 %v7325_v36  ;;  %4749 = vmatprep.subr.bf16.mxu1 %v7330_v37  ;;  %v7397_v36 = vld [vmem:[#allocation7 + $0x9a0] ss:$16 sps:$4 sm:$0xff]   ;;  %v7402_v37 = vld [vmem:[#allocation7 + $0x3c4] ss:$16 sps:$4 sm:$0xff]  }
 0x1aa   :  { %4872 = vmatprep.subr.bf16.mxu0 %v7333_v38  ;;  %v7405_v38 = vld [vmem:[#allocation7 + $0x9c4] ss:$16 sps:$4 sm:$0xff]  }
 0x1ac   :  { %4750 = vmatpush1.bf16.msra.mxu1 %v7328_v53  ;;  %v7400_v53 = vld [vmem:[#allocation7 + $0x3c0] ss:$16 sps:$4 sm:$0xff]  }
 0x1ad   :  { %4873 = vmatpush1.bf16.msra.mxu0 %v7331_v39  ;;  %4751 = vmatprep.subr.bf16.mxu1 %v7336_v7  ;;  %v7403_v39 = vld [vmem:[#allocation7 + $0x9c0] ss:$16 sps:$4 sm:$0xff]   ;;  %v7408_v7 = vld [vmem:[#allocation7 + $0x3e4] ss:$16 sps:$4 sm:$0xff]  }
 0x1ae   :  { %4874 = vmatprep.subr.bf16.mxu0 %v7339_v40  ;;  %v7411_v40 = vld [vmem:[#allocation7 + $0x9e4] ss:$16 sps:$4 sm:$0xff]  }
 0x1b0   :  { %4752 = vmatpush1.bf16.msra.mxu1 %v7334_v41  ;;  %v7406_v41 = vld [vmem:[#allocation7 + $0x3e0] ss:$16 sps:$4 sm:$0xff]  }
 0x1b1   :  { %4875 = vmatpush1.bf16.msra.mxu0 %v7337_v42  ;;  %4753 = vmatprep.subr.bf16.mxu1 %v7342_v43  ;;  %v7409_v42 = vld [vmem:[#allocation7 + $0x9e0] ss:$16 sps:$4 sm:$0xff]   ;;  %v7416_v43 = vld [vmem:[#allocation7 + $0x604] ss:$16 sps:$4 sm:$0xff]  }
 0x1b2   :  { %4876 = vmatprep.subr.bf16.mxu0 %v7345_v44  ;;  %v7421_v44 = vld [vmem:[#allocation7 + $0xc04] ss:$16 sps:$4 sm:$0xff]  }
 0x1b4   :  { %4754 = vmatpush1.bf16.msra.mxu1 %v7340_v45  ;;  %v8599_v45 = vld [vmem:[#allocation2 + $0x18] sm:$0xff] }
 0x1b5   :  { %4877 = vmatpush1.bf16.msra.mxu0 %v7343_v46  ;;  %4755 = vmatprep.subr.bf16.mxu1 %v7348_v47  ;;  %v7414_v46 = vld [vmem:[#allocation7 + $0x600] ss:$16 sps:$4 sm:$0xff]  }
 0x1b6   :  { %4878 = vmatprep.subr.bf16.mxu0 %v7351_v49  ;;  %v8591_v55 = vpop.f32.mrb[0].mxu1  ;;  %v7419_v47 = vld [vmem:[#allocation7 + $0xc00] ss:$16 sps:$4 sm:$0xff]   ;;  %v8603_v49 = vcombine.low %v8575_v31, %v8575_v31 }
 0x1b7   :  { %v8593_v58 = vpop.f32.mrb[0].mxu0  ;;  %v8595_v59 = vpop.f32.mrb[1].mxu1 }
 0x1b8   :  { %v8597_v60 = vpop.f32.mrb[1].mxu0  ;;  %v1880_v61 = vpop.f32.mrb[2].mxu1  ;;  %4756 = vmatpush1.bf16.msra.mxu1 %v7346_v50  ;;  %v8607_v50 = vcombine.low %v8577_v32, %v8577_v32  ;;  %v7430_v32 = vld [vmem:[#allocation7 + $0x644] ss:$16 sps:$4 sm:$0xff]  }
 0x1b9   :  { %4879 = vmatpush1.bf16.msra.mxu0 %v7349_v51  ;;  %v1962_v62 = vpop.f32.mrb[2].mxu0  ;;  %v1881_v63 = vpop.f32.mrb[3].mxu1  ;;  %4757 = vmatprep.subr.bf16.mxu1 %v7354_v52  ;;  %v7424_v51 = vld [vmem:[#allocation7 + $0x624] ss:$16 sps:$4 sm:$0xff]   ;;  %v8609_v52 = vld [vmem:[#allocation2 + $0x30] sm:$0xff]  ;;  %v8613_v61 = vcombine.high %v8599_v45, %v8599_v45 }
 0x1ba   :  { %4880 = vmatprep.subr.bf16.mxu0 %v7357_v54  ;;  %v1963_v2 = vpop.f32.mrb[3].mxu0  ;;  %v7427_v54 = vld [vmem:[#allocation7 + $0xc24] ss:$16 sps:$4 sm:$0xff]   ;;  %v8617_v31 = vcombine.high %v8609_v52, %v8609_v52  ;;  %v7428_v63 = vld [vmem:[#allocation7 + $0x640] ss:$16 sps:$4 sm:$0xff]  }
 0x1bb   :  { %v7433_v62 = vld [vmem:[#allocation7 + $0xc44] ss:$16 sps:$4 sm:$0xff]  }
 0x1bc   :  { %4758 = vmatpush1.bf16.msra.mxu1 %v7352_v56  ;;  %v7422_v56 = vld [vmem:[#allocation7 + $0x620] ss:$16 sps:$4 sm:$0xff]   ;;  %v7439_v2 = vld [vmem:[#allocation7 + $0xc64] ss:$16 sps:$4 sm:$0xff]  }
 0x1bd   :  { %4881 = vmatpush1.bf16.msra.mxu0 %v7355_v57  ;;  %4759 = vmatprep.subr.bf16.mxu1 %v7360_v0  ;;  %v7425_v57 = vld [vmem:[#allocation7 + $0xc20] ss:$16 sps:$4 sm:$0xff]  }
 0x1be   :  { %4882 = vmatprep.subr.bf16.mxu0 %v7363_v1  ;;  %v7431_v0 = vld [vmem:[#allocation7 + $0xc40] ss:$16 sps:$4 sm:$0xff]   ;;  %v7436_v1 = vld [vmem:[#allocation7 + $0x664] ss:$16 sps:$4 sm:$0xff]  }
 0x1c0   :  { %4760 = vmatpush1.bf16.msra.mxu1 %v7358_v3  ;;  %v7434_v3 = vld [vmem:[#allocation7 + $0x660] ss:$16 sps:$4 sm:$0xff]  }
 0x1c1   :  { %4883 = vmatpush1.bf16.msra.mxu0 %v7361_v4  ;;  %4761 = vmatprep.subr.bf16.mxu1 %v7366_v5  ;;  %v7437_v4 = vld [vmem:[#allocation7 + $0xc60] ss:$16 sps:$4 sm:$0xff]   ;;  %v7442_v5 = vld [vmem:[#allocation7 + $0x684] ss:$16 sps:$4 sm:$0xff]  }
 0x1c2   :  { %4884 = vmatprep.subr.bf16.mxu0 %v7369_v8  ;;  %v7445_v8 = vld [vmem:[#allocation7 + $0xc84] ss:$16 sps:$4 sm:$0xff]  }
 0x1c4   :  { %4762 = vmatpush1.bf16.msra.mxu1 %v7364_v9  ;;  %v7440_v9 = vld [vmem:[#allocation7 + $0x680] ss:$16 sps:$4 sm:$0xff]  }
 0x1c5   :  { %4885 = vmatpush1.bf16.msra.mxu0 %v7367_v10  ;;  %4763 = vmatprep.subr.bf16.mxu1 %v7372_v11  ;;  %v7443_v10 = vld [vmem:[#allocation7 + $0xc80] ss:$16 sps:$4 sm:$0xff]   ;;  %v7448_v11 = vld [vmem:[#allocation7 + $0x6a4] ss:$16 sps:$4 sm:$0xff]  }
 0x1c6   :  { %4886 = vmatprep.subr.bf16.mxu0 %v7375_v12  ;;  %v7451_v12 = vld [vmem:[#allocation7 + $0xca4] ss:$16 sps:$4 sm:$0xff]  }
 0x1c8   :  { %4764 = vmatpush1.bf16.msra.mxu1 %v7370_v13  ;;  %v7446_v13 = vld [vmem:[#allocation7 + $0x6a0] ss:$16 sps:$4 sm:$0xff]  }
 0x1c9   :  { %4887 = vmatpush1.bf16.msra.mxu0 %v7373_v14  ;;  %4765 = vmatprep.subr.bf16.mxu1 %v7378_v15  ;;  %v7449_v14 = vld [vmem:[#allocation7 + $0xca0] ss:$16 sps:$4 sm:$0xff]   ;;  %v7454_v15 = vld [vmem:[#allocation7 + $0x6c4] ss:$16 sps:$4 sm:$0xff]  }
 0x1ca   :  { %4888 = vmatprep.subr.bf16.mxu0 %v7381_v16  ;;  %v7457_v16 = vld [vmem:[#allocation7 + $0xcc4] ss:$16 sps:$4 sm:$0xff]  }
 0x1cc   :  { %4766 = vmatpush1.bf16.msra.mxu1 %v7376_v17 }
 0x1cd   :  { %4889 = vmatpush1.bf16.msra.mxu0 %v7379_v18  ;;  %4767 = vmatprep.subr.bf16.mxu1 %v7384_v21  ;;  %v7452_v18 = vld [vmem:[#allocation7 + $0x6c0] ss:$16 sps:$4 sm:$0xff]  }
 0x1ce   :  { %4890 = vmatprep.subr.bf16.mxu0 %v7387_v22  ;;  %v7455_v21 = vld [vmem:[#allocation7 + $0xcc0] ss:$16 sps:$4 sm:$0xff]  }
 0x1d0   :  { %4768 = vmatpush1.bf16.msra.mxu1 %v7382_v25 }
 0x1d1   :  { %4891 = vmatpush1.bf16.msra.mxu0 %v7385_v26  ;;  %4769 = vmatprep.subr.bf16.mxu1 %v7390_v27 }
 0x1d2   :  { %4892 = vmatprep.subr.bf16.mxu0 %v7393_v29 }
 0x1d4   :  { %4770 = vmatpush1.bf16.msra.mxu1 %v7388_v19 }
 0x1d5   :  { %4893 = vmatpush1.bf16.msra.mxu0 %v7391_v33  ;;  %4771 = vmatprep.subr.bf16.mxu1 %v7396_v6 }
 0x1d6   :  { %4894 = vmatprep.subr.bf16.mxu0 %v7399_v48 }
 0x1d8   :  { %4772 = vmatpush1.bf16.msra.mxu1 %v7394_v24  ;;  %v7460_v24 = vld [vmem:[#allocation7 + $0x6e4] ss:$16 sps:$4 sm:$0xff]  }
 0x1d9   :  { %4895 = vmatpush1.bf16.msra.mxu0 %v7397_v36  ;;  %4773 = vmatprep.subr.bf16.mxu1 %v7402_v37  ;;  %v7463_v36 = vld [vmem:[#allocation7 + $0xce4] ss:$16 sps:$4 sm:$0xff]  }
 0x1da   :  { %4896 = vmatprep.subr.bf16.mxu0 %v7405_v38  ;;  %v7458_v38 = vld [vmem:[#allocation7 + $0x6e0] ss:$16 sps:$4 sm:$0xff]  }
 0x1dc   :  { %4774 = vmatpush1.bf16.msra.mxu1 %v7400_v53  ;;  %v7461_v53 = vld [vmem:[#allocation7 + $0xce0] ss:$16 sps:$4 sm:$0xff]  }
 0x1dd   :  { %4897 = vmatpush1.bf16.msra.mxu0 %v7403_v39  ;;  %4775 = vmatprep.subr.bf16.mxu1 %v7408_v7  ;;  %v7469_v39 = vld [vmem:[#allocation7 + $0xd04] ss:$16 sps:$4 sm:$0xff]   ;;  %v7464_v7 = vld [vmem:[#allocation7 + $0x700] ss:$16 sps:$4 sm:$0xff]  }
 0x1de   :  { %4898 = vmatprep.subr.bf16.mxu0 %v7411_v40  ;;  %v7472_v40 = vld [vmem:[#allocation7 + $0x724] ss:$16 sps:$4 sm:$0xff]  }
 0x1e0   :  { %4776 = vmatpush1.bf16.msra.mxu1 %v7406_v41  ;;  %v7475_v41 = vld [vmem:[#allocation7 + $0xd24] ss:$16 sps:$4 sm:$0xff]  }
 0x1e1   :  { %4899 = vmatpush1.bf16.msra.mxu0 %v7409_v42  ;;  %4827 = vmatprep.subr.bf16.mxu1 %v7416_v43  ;;  %v7470_v42 = vld [vmem:[#allocation7 + $0x720] ss:$16 sps:$4 sm:$0xff]   ;;  %v7478_v43 = vld [vmem:[#allocation7 + $0x744] ss:$16 sps:$4 sm:$0xff]  }
 0x1e2   :  { %4950 = vmatprep.subr.bf16.mxu0 %v7421_v44  ;;  %v7481_v44 = vld [vmem:[#allocation7 + $0xd44] ss:$16 sps:$4 sm:$0xff]  }
 0x1e3   :  { %4778 = vmatmul.mubr.bf16.vlgmr.msra.gmra.mrb[16].mxu1 %v8603_v49 }
 0x1e4   :  { %4901 = vmatmul.mubr.bf16.vlgmr.msra.gmra.mrb[16].mxu0 %v8607_v50  ;;  %4828 = vmatpush1.bf16.msra.mxu1 %v7414_v46  ;;  %v7476_v46 = vld [vmem:[#allocation7 + $0x740] ss:$16 sps:$4 sm:$0xff]  }
 0x1e5   :  { %4951 = vmatpush1.bf16.msra.mxu0 %v7419_v47  ;;  %4829 = vmatprep.subr.bf16.mxu1 %v7424_v51  ;;  %v7479_v47 = vld [vmem:[#allocation7 + $0xd40] ss:$16 sps:$4 sm:$0xff]   ;;  %v7484_v51 = vld [vmem:[#allocation7 + $0x764] ss:$16 sps:$4 sm:$0xff]  }
 0x1e6   :  { %4952 = vmatprep.subr.bf16.mxu0 %v7427_v54  ;;  %4859 = vmatprep.mubr.bf16.mxu1 %v8613_v61  ;;  %v7487_v54 = vld [vmem:[#allocation7 + $0xd64] ss:$16 sps:$4 sm:$0xff]  }
 0x1e7   :  { %4982 = vmatprep.mubr.bf16.mxu0 %v8617_v31 }
 0x1e8   :  { %4830 = vmatpush1.bf16.msra.mxu1 %v7422_v56  ;;  %v7482_v56 = vld [vmem:[#allocation7 + $0x760] ss:$16 sps:$4 sm:$0xff]  }
 0x1e9   :  { %4953 = vmatpush1.bf16.msra.mxu0 %v7425_v57  ;;  %4831 = vmatprep.subr.bf16.mxu1 %v7430_v32  ;;  %v7485_v57 = vld [vmem:[#allocation7 + $0xd60] ss:$16 sps:$4 sm:$0xff]   ;;  %v7490_v32 = vld [vmem:[#allocation7 + $0x784] ss:$16 sps:$4 sm:$0xff]  }
 0x1ea   :  { %4954 = vmatprep.subr.bf16.mxu0 %v7433_v62  ;;  %v7493_v62 = vld [vmem:[#allocation7 + $0xd84] ss:$16 sps:$4 sm:$0xff]  }
 0x1ec   :  { %4832 = vmatpush1.bf16.msra.mxu1 %v7428_v63  ;;  %v7488_v63 = vld [vmem:[#allocation7 + $0x780] ss:$16 sps:$4 sm:$0xff]  }
 0x1ed   :  { %4955 = vmatpush1.bf16.msra.mxu0 %v7431_v0  ;;  %4833 = vmatprep.subr.bf16.mxu1 %v7436_v1  ;;  %v7491_v0 = vld [vmem:[#allocation7 + $0xd80] ss:$16 sps:$4 sm:$0xff]   ;;  %v7496_v1 = vld [vmem:[#allocation7 + $0x7a4] ss:$16 sps:$4 sm:$0xff]  }
 0x1ee   :  { %4956 = vmatprep.subr.bf16.mxu0 %v7439_v2  ;;  %v7499_v2 = vld [vmem:[#allocation7 + $0xda4] ss:$16 sps:$4 sm:$0xff]  }
 0x1f0   :  { %4834 = vmatpush1.bf16.msra.mxu1 %v7434_v3  ;;  %v7494_v3 = vld [vmem:[#allocation7 + $0x7a0] ss:$16 sps:$4 sm:$0xff]  }
 0x1f1   :  { %4957 = vmatpush1.bf16.msra.mxu0 %v7437_v4  ;;  %4835 = vmatprep.subr.bf16.mxu1 %v7442_v5  ;;  %v7497_v4 = vld [vmem:[#allocation7 + $0xda0] ss:$16 sps:$4 sm:$0xff]   ;;  %v7502_v5 = vld [vmem:[#allocation7 + $0x7c4] ss:$16 sps:$4 sm:$0xff]  }
 0x1f2   :  { %4958 = vmatprep.subr.bf16.mxu0 %v7445_v8  ;;  %v7505_v8 = vld [vmem:[#allocation7 + $0xdc4] ss:$16 sps:$4 sm:$0xff]  }
 0x1f4   :  { %4836 = vmatpush1.bf16.msra.mxu1 %v7440_v9  ;;  %v7500_v9 = vld [vmem:[#allocation7 + $0x7c0] ss:$16 sps:$4 sm:$0xff]  }
 0x1f5   :  { %4959 = vmatpush1.bf16.msra.mxu0 %v7443_v10  ;;  %4837 = vmatprep.subr.bf16.mxu1 %v7448_v11  ;;  %v7503_v10 = vld [vmem:[#allocation7 + $0xdc0] ss:$16 sps:$4 sm:$0xff]   ;;  %v7508_v11 = vld [vmem:[#allocation7 + $0x7e4] ss:$16 sps:$4 sm:$0xff]  }
 0x1f6   :  { %4960 = vmatprep.subr.bf16.mxu0 %v7451_v12  ;;  %v1917_v17 = vpop.f32.mrb[4].mxu1  ;;  %v7511_v12 = vld [vmem:[#allocation7 + $0xde4] ss:$16 sps:$4 sm:$0xff]  }
 0x1f7   :  { %v8623_v22 = vpop.f32.mrb[4].mxu0  ;;  %v1918_v25 = vadd.f32 %v1917_v17, %v8591_v55  ;;  %v1919_v26 = vpop.f32.mrb[5].mxu1  ;;  %v7514_v17 = vld [vmem:[#allocation7 + $0xa00] ss:$16 sps:$4 sm:$0xff]  }
 0x1f8   :  { %v8626_v27 = vpop.f32.mrb[5].mxu0  ;;  %v1920_v29 = vadd.f32 %v1919_v26, %v8595_v59  ;;  %v1921_v19 = vpop.f32.mrb[6].mxu1  ;;  %4838 = vmatpush1.bf16.msra.mxu1 %v7446_v13  ;;  %v7466_v59 = vld [vmem:[#allocation7 + $0x704] ss:$16 sps:$4 sm:$0xff]   ;;  %v7506_v13 = vld [vmem:[#allocation7 + $0x7e0] ss:$16 sps:$4 sm:$0xff]  }
 0x1f9   :  { %4961 = vmatpush1.bf16.msra.mxu0 %v7449_v14  ;;  %v2044_v33 = vpop.f32.mrb[6].mxu0  ;;  %v8630_v6 = vadd.f32 %v8593_v58, %v1918_v25  ;;  %v1922_v48 = vpop.f32.mrb[7].mxu1  ;;  %4839 = vmatprep.subr.bf16.mxu1 %v7454_v15  ;;  %v7467_v58 = vld [vmem:[#allocation7 + $0xd00] ss:$16 sps:$4 sm:$0xff]   ;;  %v7516_v15 = vld [vmem:[#allocation7 + $0xa04] ss:$16 sps:$4 sm:$0xff]  }
 0x1fa   :  { %4962 = vmatprep.subr.bf16.mxu0 %v7457_v16  ;;  %v2045_v37 = vpop.f32.mrb[7].mxu0  ;;  %v8633_v55 = vadd.f32 %v8597_v60, %v1920_v29  ;;  %v7473_v60 = vld [vmem:[#allocation7 + $0xd20] ss:$16 sps:$4 sm:$0xff]   ;;  %v7521_v16 = vld [vmem:[#allocation7 + $0xc] ss:$16 sps:$4 sm:$0xff]  }
 0x1fb   :  { %v7509_v14 = vld [vmem:[#allocation7 + $0xde0] ss:$16 sps:$4 sm:$0xff]   ;;  %v7519_v25 = vld [vmem:[#allocation7 + $0x8] ss:$16 sps:$4 sm:$0xff]   ;;  %v7524_v29 = vld [vmem:[#allocation7 + $0xa24] ss:$16 sps:$4 sm:$0xff]  }
 0x1fc   :  { %4840 = vmatpush1.bf16.msra.mxu1 %v7452_v18  ;;  %v8637_v18 = vcombine.low %v8599_v45, %v8599_v45  ;;  %v8643_v26 = vld [vmem:[#allocation2 + $0x28] sm:$0xff]  ;;  %v7527_v19 = vld [vmem:[#allocation7 + $0x2c] ss:$16 sps:$4 sm:$0xff]   ;;  %v7531_v37 = vld [vmem:[#allocation7 + $0x48] ss:$16 sps:$4 sm:$0xff]  }
 0x1fd   :  { %4963 = vmatpush1.bf16.msra.mxu0 %v7455_v21  ;;  %4841 = vmatprep.subr.bf16.mxu1 %v7460_v24  ;;  %v8641_v21 = vcombine.low %v8609_v52, %v8609_v52  ;;  %v8647_v33 = vcombine.high %v8643_v26, %v8643_v26  ;;  %v7522_v45 = vld [vmem:[#allocation7 + $0xa20] ss:$16 sps:$4 sm:$0xff]   ;;  %v7525_v52 = vld [vmem:[#allocation7 + $0x28] ss:$16 sps:$4 sm:$0xff]   ;;  %v7530_v48 = vld [vmem:[#allocation7 + $0xa44] ss:$16 sps:$4 sm:$0xff]  }
 0x1fe   :  { %4964 = vmatprep.subr.bf16.mxu0 %v7463_v36  ;;  %v7533_v24 = vld [vmem:[#allocation7 + $0x4c] ss:$16 sps:$4 sm:$0xff]   ;;  %v7528_v36 = vld [vmem:[#allocation7 + $0xa40] ss:$16 sps:$4 sm:$0xff]  }
 0x200   :  { %4842 = vmatpush1.bf16.msra.mxu1 %v7458_v38  ;;  %v7536_v38 = vld [vmem:[#allocation7 + $0xa64] ss:$16 sps:$4 sm:$0xff]  }
 0x201   :  { %4965 = vmatpush1.bf16.msra.mxu0 %v7461_v53  ;;  %4843 = vmatprep.subr.bf16.mxu1 %v7466_v59  ;;  %v7539_v53 = vld [vmem:[#allocation7 + $0x6c] ss:$16 sps:$4 sm:$0xff]   ;;  %v7534_v59 = vld [vmem:[#allocation7 + $0xa60] ss:$16 sps:$4 sm:$0xff]  }
 0x202   :  { %4966 = vmatprep.subr.bf16.mxu0 %v7469_v39  ;;  %v7537_v39 = vld [vmem:[#allocation7 + $0x68] ss:$16 sps:$4 sm:$0xff]  }
 0x204   :  { %4844 = vmatpush1.bf16.msra.mxu1 %v7464_v7  ;;  %v7542_v7 = vld [vmem:[#allocation7 + $0xa84] ss:$16 sps:$4 sm:$0xff]  }
 0x205   :  { %4967 = vmatpush1.bf16.msra.mxu0 %v7467_v58  ;;  %4845 = vmatprep.subr.bf16.mxu1 %v7472_v40  ;;  %v7545_v58 = vld [vmem:[#allocation7 + $0x8c] ss:$16 sps:$4 sm:$0xff]   ;;  %v7540_v40 = vld [vmem:[#allocation7 + $0xa80] ss:$16 sps:$4 sm:$0xff]  }
 0x206   :  { %4968 = vmatprep.subr.bf16.mxu0 %v7475_v41  ;;  %v7548_v41 = vld [vmem:[#allocation7 + $0xaa4] ss:$16 sps:$4 sm:$0xff]  }
 0x208   :  { %4846 = vmatpush1.bf16.msra.mxu1 %v7470_v42  ;;  %v7551_v42 = vld [vmem:[#allocation7 + $0xac] ss:$16 sps:$4 sm:$0xff]  }
 0x209   :  { %4969 = vmatpush1.bf16.msra.mxu0 %v7473_v60  ;;  %4847 = vmatprep.subr.bf16.mxu1 %v7478_v43  ;;  %v7546_v60 = vld [vmem:[#allocation7 + $0xaa0] ss:$16 sps:$4 sm:$0xff]   ;;  %v7549_v43 = vld [vmem:[#allocation7 + $0xa8] ss:$16 sps:$4 sm:$0xff]  }
 0x20a   :  { %4970 = vmatprep.subr.bf16.mxu0 %v7481_v44  ;;  %v7554_v44 = vld [vmem:[#allocation7 + $0xac4] ss:$16 sps:$4 sm:$0xff]  }
 0x20c   :  { %4848 = vmatpush1.bf16.msra.mxu1 %v7476_v46  ;;  %v7557_v46 = vld [vmem:[#allocation7 + $0xcc] ss:$16 sps:$4 sm:$0xff]  }
 0x20d   :  { %4971 = vmatpush1.bf16.msra.mxu0 %v7479_v47  ;;  %4849 = vmatprep.subr.bf16.mxu1 %v7484_v51 }
 0x20e   :  { %4972 = vmatprep.subr.bf16.mxu0 %v7487_v54  ;;  %v7552_v54 = vld [vmem:[#allocation7 + $0xac0] ss:$16 sps:$4 sm:$0xff]  }
 0x210   :  { %4850 = vmatpush1.bf16.msra.mxu1 %v7482_v56 }
 0x211   :  { %4973 = vmatpush1.bf16.msra.mxu0 %v7485_v57  ;;  %4851 = vmatprep.subr.bf16.mxu1 %v7490_v32 }
 0x212   :  { %4974 = vmatprep.subr.bf16.mxu0 %v7493_v62 }
 0x214   :  { %4852 = vmatpush1.bf16.msra.mxu1 %v7488_v63  ;;  %v7555_v63 = vld [vmem:[#allocation7 + $0xc8] ss:$16 sps:$4 sm:$0xff]  }
 0x215   :  { %4975 = vmatpush1.bf16.msra.mxu0 %v7491_v0  ;;  %4853 = vmatprep.subr.bf16.mxu1 %v7496_v1 }
 0x216   :  { %4976 = vmatprep.subr.bf16.mxu0 %v7499_v2 }
 0x218   :  { %4854 = vmatpush1.bf16.msra.mxu1 %v7494_v3  ;;  %v7560_v3 = vld [vmem:[#allocation7 + $0xae4] ss:$16 sps:$4 sm:$0xff]  }
 0x219   :  { %4977 = vmatpush1.bf16.msra.mxu0 %v7497_v4  ;;  %4855 = vmatprep.subr.bf16.mxu1 %v7502_v5 }
 0x21a   :  { %4978 = vmatprep.subr.bf16.mxu0 %v7505_v8  ;;  %v7558_v8 = vld [vmem:[#allocation7 + $0xae0] ss:$16 sps:$4 sm:$0xff]  }
 0x21c   :  { %4856 = vmatpush1.bf16.msra.mxu1 %v7500_v9  ;;  %v7561_v9 = vld [vmem:[#allocation7 + $0xe8] ss:$16 sps:$4 sm:$0xff]  }
 0x21d   :  { %4979 = vmatpush1.bf16.msra.mxu0 %v7503_v10  ;;  %4857 = vmatprep.subr.bf16.mxu1 %v7508_v11  ;;  %v7566_v10 = vld [vmem:[#allocation7 + $0xb04] ss:$16 sps:$4 sm:$0xff]   ;;  %v7567_v11 = vld [vmem:[#allocation7 + $0x108] ss:$16 sps:$4 sm:$0xff]  }
 0x21e   :  { %4980 = vmatprep.subr.bf16.mxu0 %v7511_v12  ;;  %v7572_v12 = vld [vmem:[#allocation7 + $0xb24] ss:$16 sps:$4 sm:$0xff]  }
 0x220   :  { %4858 = vmatpush1.bf16.msra.mxu1 %v7506_v13  ;;  %v7575_v13 = vld [vmem:[#allocation7 + $0x12c] ss:$16 sps:$4 sm:$0xff]  }
 0x221   :  { %4981 = vmatpush1.bf16.msra.mxu0 %v7509_v14  ;;  %4909 = vmatprep.subr.bf16.mxu1 %v7516_v15  ;;  %v7570_v14 = vld [vmem:[#allocation7 + $0xb20] ss:$16 sps:$4 sm:$0xff]   ;;  %v7573_v15 = vld [vmem:[#allocation7 + $0x128] ss:$16 sps:$4 sm:$0xff]  }
 0x222   :  { %5032 = vmatprep.subr.bf16.mxu0 %v7521_v16  ;;  %v7578_v16 = vld [vmem:[#allocation7 + $0xb44] ss:$16 sps:$4 sm:$0xff]  }
 0x223   :  { %4860 = vmatmul.mubr.bf16.vlgmr.msra.gmra.mrb[20].mxu1 %v8637_v18 }
 0x224   :  { %4983 = vmatmul.mubr.bf16.vlgmr.msra.gmra.mrb[20].mxu0 %v8641_v21  ;;  %4910 = vmatpush1.bf16.msra.mxu1 %v7514_v17  ;;  %v7581_v17 = vld [vmem:[#allocation7 + $0x14c] ss:$16 sps:$4 sm:$0xff]  }
 0x225   :  { %5033 = vmatpush1.bf16.msra.mxu0 %v7519_v25  ;;  %4911 = vmatprep.subr.bf16.mxu1 %v7524_v29  ;;  %v7576_v25 = vld [vmem:[#allocation7 + $0xb40] ss:$16 sps:$4 sm:$0xff]   ;;  %v7579_v29 = vld [vmem:[#allocation7 + $0x148] ss:$16 sps:$4 sm:$0xff]  }
 0x226   :  { %5034 = vmatprep.subr.bf16.mxu0 %v7527_v19  ;;  %4941 = vmatprep.mubr.bf16.mxu1 %v8647_v33  ;;  %v7584_v19 = vld [vmem:[#allocation7 + $0xb64] ss:$16 sps:$4 sm:$0xff]  }
 0x227   :  { %5064 = vmatprep.mubr.bf16.mxu0 %v8553_v20  ;;  %v7543_v20 = vld [vmem:[#allocation7 + $0x88] ss:$16 sps:$4 sm:$0xff]  }
 0x228   :  { %4912 = vmatpush1.bf16.msra.mxu1 %v7522_v45  ;;  %v7587_v45 = vld [vmem:[#allocation7 + $0x16c] ss:$16 sps:$4 sm:$0xff]  }
 0x229   :  { %5035 = vmatpush1.bf16.msra.mxu0 %v7525_v52  ;;  %4913 = vmatprep.subr.bf16.mxu1 %v7530_v48  ;;  %v7582_v52 = vld [vmem:[#allocation7 + $0xb60] ss:$16 sps:$4 sm:$0xff]   ;;  %v7585_v48 = vld [vmem:[#allocation7 + $0x168] ss:$16 sps:$4 sm:$0xff]  }
 0x22a   :  { %5036 = vmatprep.subr.bf16.mxu0 %v7533_v24  ;;  %v7590_v24 = vld [vmem:[#allocation7 + $0xb84] ss:$16 sps:$4 sm:$0xff]  }
 0x22c   :  { %4914 = vmatpush1.bf16.msra.mxu1 %v7528_v36  ;;  %v7593_v36 = vld [vmem:[#allocation7 + $0x18c] ss:$16 sps:$4 sm:$0xff]  }
 0x22d   :  { %5037 = vmatpush1.bf16.msra.mxu0 %v7531_v37  ;;  %4915 = vmatprep.subr.bf16.mxu1 %v7536_v38  ;;  %v7588_v37 = vld [vmem:[#allocation7 + $0xb80] ss:$16 sps:$4 sm:$0xff]   ;;  %v7591_v38 = vld [vmem:[#allocation7 + $0x188] ss:$16 sps:$4 sm:$0xff]  }
 0x22e   :  { %5038 = vmatprep.subr.bf16.mxu0 %v7539_v53  ;;  %v7596_v53 = vld [vmem:[#allocation7 + $0xba4] ss:$16 sps:$4 sm:$0xff]  }
 0x230   :  { %4916 = vmatpush1.bf16.msra.mxu1 %v7534_v59  ;;  %v7599_v59 = vld [vmem:[#allocation7 + $0x1ac] ss:$16 sps:$4 sm:$0xff]  }
 0x231   :  { %5039 = vmatpush1.bf16.msra.mxu0 %v7537_v39  ;;  %4917 = vmatprep.subr.bf16.mxu1 %v7542_v7  ;;  %v7594_v39 = vld [vmem:[#allocation7 + $0xba0] ss:$16 sps:$4 sm:$0xff]   ;;  %v7597_v7 = vld [vmem:[#allocation7 + $0x1a8] ss:$16 sps:$4 sm:$0xff]  }
 0x232   :  { %5040 = vmatprep.subr.bf16.mxu0 %v7545_v58  ;;  %v7602_v58 = vld [vmem:[#allocation7 + $0xbc4] ss:$16 sps:$4 sm:$0xff]  }
 0x234   :  { %4918 = vmatpush1.bf16.msra.mxu1 %v7540_v40  ;;  %v7605_v40 = vld [vmem:[#allocation7 + $0x1cc] ss:$16 sps:$4 sm:$0xff]  }
 0x235   :  { %5041 = vmatpush1.bf16.msra.mxu0 %v7543_v20  ;;  %4919 = vmatprep.subr.bf16.mxu1 %v7548_v41  ;;  %v7600_v20 = vld [vmem:[#allocation7 + $0xbc0] ss:$16 sps:$4 sm:$0xff]   ;;  %v7603_v41 = vld [vmem:[#allocation7 + $0x1c8] ss:$16 sps:$4 sm:$0xff]  }
 0x236   :  { %5042 = vmatprep.subr.bf16.mxu0 %v7551_v42  ;;  %v1999_v47 = vpop.f32.mrb[8].mxu1  ;;  %v7608_v42 = vld [vmem:[#allocation7 + $0xbe4] ss:$16 sps:$4 sm:$0xff]  }
 0x237   :  { %v4738_v51 = vpop.f32.mrb[8].mxu0  ;;  %v8654_v56 = vadd.f32 %v8623_v22, %v1999_v47  ;;  %v2001_v32 = vpop.f32.mrb[9].mxu1  ;;  %v7563_v22 = vld [vmem:[#allocation7 + $0xec] ss:$16 sps:$4 sm:$0xff]  }
 0x238   :  { %v8657_v57 = vadd.f32 %v4738_v51, %v8630_v6  ;;  %v4740_v62 = vpop.f32.mrb[9].mxu0  ;;  %v8660_v0 = vadd.f32 %v8626_v27, %v2001_v32  ;;  %v2003_v2 = vpop.f32.mrb[10].mxu1  ;;  %4920 = vmatpush1.bf16.msra.mxu1 %v7546_v60  ;;  %v7569_v27 = vld [vmem:[#allocation7 + $0x10c] ss:$16 sps:$4 sm:$0xff]   ;;  %v7614_v51 = vld [vmem:[#allocation7 + $0xe00] ss:$16 sps:$4 sm:$0xff]  }
 0x239   :  { %v8663_v1 = vadd.f32 %v4740_v62, %v8633_v55  ;;  %5043 = vmatpush1.bf16.msra.mxu0 %v7549_v43  ;;  %v4742_v4 = vpop.f32.mrb[10].mxu0  ;;  %v2004_v5 = vpop.f32.mrb[11].mxu1  ;;  %4921 = vmatprep.subr.bf16.mxu1 %v7554_v44  ;;  %v7564_v55 = vld [vmem:[#allocation7 + $0xb00] ss:$16 sps:$4 sm:$0xff]   ;;  %v7611_v60 = vld [vmem:[#allocation7 + $0x1ec] ss:$16 sps:$4 sm:$0xff]  }
 0x23a   :  { %5044 = vmatprep.subr.bf16.mxu0 %v7557_v46  ;;  %v4743_v6 = vpop.f32.mrb[11].mxu0  ;;  %v7606_v43 = vld [vmem:[#allocation7 + $0xbe0] ss:$16 sps:$4 sm:$0xff]   ;;  %v7609_v44 = vld [vmem:[#allocation7 + $0x1e8] ss:$16 sps:$4 sm:$0xff]  }
 0x23b   :  { %v7616_v46 = vld [vmem:[#allocation7 + $0xe04] ss:$16 sps:$4 sm:$0xff]   ;;  %v7640_v47 = vld [vmem:[#allocation7 + $0x40c] ss:$16 sps:$4 sm:$0xff]   ;;  %v7617_v4 = vld [vmem:[#allocation7 + $0xe20] ss:$16 sps:$4 sm:$0xff]  }
 0x23c   :  { %4922 = vmatpush1.bf16.msra.mxu1 %v7552_v54  ;;  %v8667_v54 = vcombine.low %v8643_v26, %v8643_v26  ;;  %v7619_v32 = vld [vmem:[#allocation7 + $0xe24] ss:$16 sps:$4 sm:$0xff]   ;;  %v7646_v2 = vld [vmem:[#allocation7 + $0x42c] ss:$16 sps:$4 sm:$0xff]   ;;  %v7644_v5 = vld [vmem:[#allocation7 + $0x428] ss:$16 sps:$4 sm:$0xff]  }
 0x23d   :  { %5045 = vmatpush1.bf16.msra.mxu0 %v7555_v63  ;;  %4923 = vmatprep.subr.bf16.mxu1 %v7560_v3  ;;  %v8669_v62 = vld [vmem:[#allocation2 + $0x38] sm:$0xff]  ;;  %v7638_v63 = vld [vmem:[#allocation7 + $0x408] ss:$16 sps:$4 sm:$0xff]  }
 0x23e   :  { %5046 = vmatprep.subr.bf16.mxu0 %v7563_v22  ;;  %v8673_v3 = vcombine.high %v8669_v62, %v8669_v62  ;;  %v7622_v26 = vld [vmem:[#allocation7 + $0xe44] ss:$16 sps:$4 sm:$0xff]   ;;  %v7652_v22 = vld [vmem:[#allocation7 + $0x44c] ss:$16 sps:$4 sm:$0xff]   ;;  %v7620_v6 = vld [vmem:[#allocation7 + $0xe40] ss:$16 sps:$4 sm:$0xff]  }
 0x240   :  { %4924 = vmatpush1.bf16.msra.mxu1 %v7558_v8  ;;  %v7625_v8 = vld [vmem:[#allocation7 + $0xe64] ss:$16 sps:$4 sm:$0xff]  }
 0x241   :  { %5047 = vmatpush1.bf16.msra.mxu0 %v7561_v9  ;;  %4925 = vmatprep.subr.bf16.mxu1 %v7566_v10  ;;  %v7650_v9 = vld [vmem:[#allocation7 + $0x448] ss:$16 sps:$4 sm:$0xff]   ;;  %v7658_v10 = vld [vmem:[#allocation7 + $0x46c] ss:$16 sps:$4 sm:$0xff]  }
 0x242   :  { %5048 = vmatprep.subr.bf16.mxu0 %v7569_v27  ;;  %v7628_v27 = vld [vmem:[#allocation7 + $0xe84] ss:$16 sps:$4 sm:$0xff]  }
 0x244   :  { %4926 = vmatpush1.bf16.msra.mxu1 %v7564_v55  ;;  %v7656_v55 = vld [vmem:[#allocation7 + $0x468] ss:$16 sps:$4 sm:$0xff]  }
 0x245   :  { %5049 = vmatpush1.bf16.msra.mxu0 %v7567_v11  ;;  %4927 = vmatprep.subr.bf16.mxu1 %v7572_v12  ;;  %v7664_v11 = vld [vmem:[#allocation7 + $0x48c] ss:$16 sps:$4 sm:$0xff]   ;;  %v7626_v12 = vld [vmem:[#allocation7 + $0xe80] ss:$16 sps:$4 sm:$0xff]  }
 0x246   :  { %5050 = vmatprep.subr.bf16.mxu0 %v7575_v13  ;;  %v7631_v13 = vld [vmem:[#allocation7 + $0xea4] ss:$16 sps:$4 sm:$0xff]  }
 0x248   :  { %4928 = vmatpush1.bf16.msra.mxu1 %v7570_v14  ;;  %v7670_v14 = vld [vmem:[#allocation7 + $0x4ac] ss:$16 sps:$4 sm:$0xff]  }
 0x249   :  { %5051 = vmatpush1.bf16.msra.mxu0 %v7573_v15  ;;  %4929 = vmatprep.subr.bf16.mxu1 %v7578_v16  ;;  %v7629_v15 = vld [vmem:[#allocation7 + $0xea0] ss:$16 sps:$4 sm:$0xff]   ;;  %v7668_v16 = vld [vmem:[#allocation7 + $0x4a8] ss:$16 sps:$4 sm:$0xff]  }
 0x24a   :  { %5052 = vmatprep.subr.bf16.mxu0 %v7581_v17  ;;  %v7634_v17 = vld [vmem:[#allocation7 + $0xec4] ss:$16 sps:$4 sm:$0xff]  }
 0x24c   :  { %4930 = vmatpush1.bf16.msra.mxu1 %v7576_v25  ;;  %v7676_v25 = vld [vmem:[#allocation7 + $0x4cc] ss:$16 sps:$4 sm:$0xff]  }
 0x24d   :  { %5053 = vmatpush1.bf16.msra.mxu0 %v7579_v29  ;;  %4931 = vmatprep.subr.bf16.mxu1 %v7584_v19 }
 0x24e   :  { %5054 = vmatprep.subr.bf16.mxu0 %v7587_v45 }
 0x250   :  { %4932 = vmatpush1.bf16.msra.mxu1 %v7582_v52 }
 0x251   :  { %5055 = vmatpush1.bf16.msra.mxu0 %v7585_v48  ;;  %4933 = vmatprep.subr.bf16.mxu1 %v7590_v24 }
 0x252   :  { %5056 = vmatprep.subr.bf16.mxu0 %v7593_v36 }
 0x254   :  { %4934 = vmatpush1.bf16.msra.mxu1 %v7588_v37  ;;  %v7632_v37 = vld [vmem:[#allocation7 + $0xec0] ss:$16 sps:$4 sm:$0xff]  }
 0x255   :  { %5057 = vmatpush1.bf16.msra.mxu0 %v7591_v38  ;;  %4935 = vmatprep.subr.bf16.mxu1 %v7596_v53  ;;  %v7674_v38 = vld [vmem:[#allocation7 + $0x4c8] ss:$16 sps:$4 sm:$0xff]  }
 0x256   :  { %5058 = vmatprep.subr.bf16.mxu0 %v7599_v59 }
 0x258   :  { %4936 = vmatpush1.bf16.msra.mxu1 %v7594_v39  ;;  %v7637_v39 = vld [vmem:[#allocation7 + $0xee4] ss:$16 sps:$4 sm:$0xff]  }
 0x259   :  { %5059 = vmatpush1.bf16.msra.mxu0 %v7597_v7  ;;  %4937 = vmatprep.subr.bf16.mxu1 %v7602_v58  ;;  %v7682_v7 = vld [vmem:[#allocation7 + $0x4ec] ss:$16 sps:$4 sm:$0xff]  }
 0x25a   :  { %5060 = vmatprep.subr.bf16.mxu0 %v7605_v40  ;;  %v7680_v40 = vld [vmem:[#allocation7 + $0x4e8] ss:$16 sps:$4 sm:$0xff]  }
 0x25c   :  { %4938 = vmatpush1.bf16.msra.mxu1 %v7600_v20  ;;  %v7643_v20 = vld [vmem:[#allocation7 + $0xf04] ss:$16 sps:$4 sm:$0xff]  }
 0x25d   :  { %5061 = vmatpush1.bf16.msra.mxu0 %v7603_v41  ;;  %4939 = vmatprep.subr.bf16.mxu1 %v7608_v42  ;;  %v7641_v41 = vld [vmem:[#allocation7 + $0xf00] ss:$16 sps:$4 sm:$0xff]   ;;  %v7686_v42 = vld [vmem:[#allocation7 + $0x508] ss:$16 sps:$4 sm:$0xff]  }
 0x25e   :  { %5062 = vmatprep.subr.bf16.mxu0 %v7611_v60  ;;  %v7649_v60 = vld [vmem:[#allocation7 + $0xf24] ss:$16 sps:$4 sm:$0xff]  }
 0x260   :  { %4940 = vmatpush1.bf16.msra.mxu1 %v7606_v43  ;;  %v7696_v43 = vld [vmem:[#allocation7 + $0x52c] ss:$16 sps:$4 sm:$0xff]  }
 0x261   :  { %5063 = vmatpush1.bf16.msra.mxu0 %v7609_v44  ;;  %4991 = vmatprep.subr.bf16.mxu1 %v7616_v46  ;;  %v7647_v44 = vld [vmem:[#allocation7 + $0xf20] ss:$16 sps:$4 sm:$0xff]   ;;  %v7694_v46 = vld [vmem:[#allocation7 + $0x528] ss:$16 sps:$4 sm:$0xff]  }
 0x262   :  { %5114 = vmatprep.subr.bf16.mxu0 %v7640_v47  ;;  %v7655_v47 = vld [vmem:[#allocation7 + $0xf44] ss:$16 sps:$4 sm:$0xff]  }
 0x263   :  { %4942 = vmatmul.mubr.bf16.vlgmr.msra.gmra.mrb[24].mxu1 %v8667_v54 }
 0x264   :  { %5065 = vmatmul.mubr.bf16.vlgmr.msra.gmra.mrb[24].mxu0 %v8559_v23  ;;  %4992 = vmatpush1.bf16.msra.mxu1 %v7614_v51  ;;  %v7623_v23 = vld [vmem:[#allocation7 + $0xe60] ss:$16 sps:$4 sm:$0xff]   ;;  %v7702_v51 = vld [vmem:[#allocation7 + $0x54c] ss:$16 sps:$4 sm:$0xff]  }
 0x265   :  { %5115 = vmatpush1.bf16.msra.mxu0 %v7638_v63  ;;  %4993 = vmatprep.subr.bf16.mxu1 %v7619_v32  ;;  %v7653_v32 = vld [vmem:[#allocation7 + $0xf40] ss:$16 sps:$4 sm:$0xff]   ;;  %v7700_v63 = vld [vmem:[#allocation7 + $0x548] ss:$16 sps:$4 sm:$0xff]  }
 0x266   :  { %5116 = vmatprep.subr.bf16.mxu0 %v7646_v2  ;;  %5023 = vmatprep.mubr.bf16.mxu1 %v8673_v3  ;;  %v7661_v2 = vld [vmem:[#allocation7 + $0xf64] ss:$16 sps:$4 sm:$0xff]  }
 0x267   :  { %5146 = vmatprep.mubr.bf16.mxu0 %v8565_v28  ;;  %v7662_v28 = vld [vmem:[#allocation7 + $0x488] ss:$16 sps:$4 sm:$0xff]  }
 0x268   :  { %4994 = vmatpush1.bf16.msra.mxu1 %v7617_v4  ;;  %v7708_v4 = vld [vmem:[#allocation7 + $0x56c] ss:$16 sps:$4 sm:$0xff]  }
 0x269   :  { %5117 = vmatpush1.bf16.msra.mxu0 %v7644_v5  ;;  %4995 = vmatprep.subr.bf16.mxu1 %v7622_v26  ;;  %v7659_v26 = vld [vmem:[#allocation7 + $0xf60] ss:$16 sps:$4 sm:$0xff]   ;;  %v7706_v5 = vld [vmem:[#allocation7 + $0x568] ss:$16 sps:$4 sm:$0xff]  }
 0x26a   :  { %5118 = vmatprep.subr.bf16.mxu0 %v7652_v22  ;;  %v7667_v22 = vld [vmem:[#allocation7 + $0xf84] ss:$16 sps:$4 sm:$0xff]  }
 0x26c   :  { %4996 = vmatpush1.bf16.msra.mxu1 %v7620_v6  ;;  %v7714_v6 = vld [vmem:[#allocation7 + $0x58c] ss:$16 sps:$4 sm:$0xff]  }
 0x26d   :  { %5119 = vmatpush1.bf16.msra.mxu0 %v7650_v9  ;;  %4997 = vmatprep.subr.bf16.mxu1 %v7625_v8  ;;  %v7665_v8 = vld [vmem:[#allocation7 + $0xf80] ss:$16 sps:$4 sm:$0xff]   ;;  %v7712_v9 = vld [vmem:[#allocation7 + $0x588] ss:$16 sps:$4 sm:$0xff]  }
 0x26e   :  { %5120 = vmatprep.subr.bf16.mxu0 %v7658_v10  ;;  %v7673_v10 = vld [vmem:[#allocation7 + $0xfa4] ss:$16 sps:$4 sm:$0xff]  }
 0x270   :  { %4998 = vmatpush1.bf16.msra.mxu1 %v7623_v23  ;;  %v7720_v23 = vld [vmem:[#allocation7 + $0x5ac] ss:$16 sps:$4 sm:$0xff]  }
 0x271   :  { %5121 = vmatpush1.bf16.msra.mxu0 %v7656_v55  ;;  %4999 = vmatprep.subr.bf16.mxu1 %v7628_v27  ;;  %v7671_v27 = vld [vmem:[#allocation7 + $0xfa0] ss:$16 sps:$4 sm:$0xff]   ;;  %v7718_v55 = vld [vmem:[#allocation7 + $0x5a8] ss:$16 sps:$4 sm:$0xff]  }
 0x272   :  { %5122 = vmatprep.subr.bf16.mxu0 %v7664_v11  ;;  %v7679_v11 = vld [vmem:[#allocation7 + $0xfc4] ss:$16 sps:$4 sm:$0xff]  }
 0x274   :  { %5000 = vmatpush1.bf16.msra.mxu1 %v7626_v12  ;;  %v7726_v12 = vld [vmem:[#allocation7 + $0x5cc] ss:$16 sps:$4 sm:$0xff]  }
 0x275   :  { %5123 = vmatpush1.bf16.msra.mxu0 %v7662_v28  ;;  %5001 = vmatprep.subr.bf16.mxu1 %v7631_v13  ;;  %v7677_v28 = vld [vmem:[#allocation7 + $0xfc0] ss:$16 sps:$4 sm:$0xff]   ;;  %v7724_v13 = vld [vmem:[#allocation7 + $0x5c8] ss:$16 sps:$4 sm:$0xff]  }
 0x276   :  { %5124 = vmatprep.subr.bf16.mxu0 %v7670_v14  ;;  %v2081_v29 = vpop.f32.mrb[12].mxu1  ;;  %v7685_v14 = vld [vmem:[#allocation7 + $0xfe4] ss:$16 sps:$4 sm:$0xff]  }
 0x277   :  { %v8679_v19 = vpop.f32.mrb[12].mxu0  ;;  %v8682_v45 = vadd.f32 %v2081_v29, %v8654_v56  ;;  %v2083_v52 = vpop.f32.mrb[13].mxu1  ;;  %v7635_v56 = vld [vmem:[#allocation7 + $0xee0] ss:$16 sps:$4 sm:$0xff]   ;;  %v7738_v29 = vld [vmem:[#allocation7 + $0x80c] ss:$16 sps:$4 sm:$0xff]  }
 0x278   :  { %v8684_v48 = vpop.f32.mrb[13].mxu0  ;;  %v8687_v24 = vadd.f32 %v2083_v52, %v8660_v0  ;;  %v2085_v36 = vpop.f32.mrb[14].mxu1  ;;  %5002 = vmatpush1.bf16.msra.mxu1 %v7629_v15  ;;  %v7688_v0 = vld [vmem:[#allocation7 + $0x50c] ss:$16 sps:$4 sm:$0xff]   ;;  %v8691_v52 = vcombine.low %v8669_v62, %v8669_v62 }
 0x279   :  { %5125 = vmatpush1.bf16.msra.mxu0 %v7668_v16  ;;  %v4824_v53 = vpop.f32.mrb[14].mxu0  ;;  %v2086_v59 = vpop.f32.mrb[15].mxu1  ;;  %5003 = vmatprep.subr.bf16.mxu1 %v7634_v17  ;;  %v7732_v15 = vld [vmem:[#allocation7 + $0x5ec] ss:$16 sps:$4 sm:$0xff]   ;;  %v7683_v16 = vld [vmem:[#allocation7 + $0xfe0] ss:$16 sps:$4 sm:$0xff]  }
 0x27a   :  { %5126 = vmatprep.subr.bf16.mxu0 %v7676_v25  ;;  %v4825_v58 = vpop.f32.mrb[15].mxu0  ;;  %v7730_v17 = vld [vmem:[#allocation7 + $0x5e8] ss:$16 sps:$4 sm:$0xff]   ;;  %v7693_v25 = vld [vmem:[#allocation7 + $0x20c] ss:$16 sps:$4 sm:$0xff]  }
 0x27b   :  { %v7691_v36 = vld [vmem:[#allocation7 + $0x208] ss:$16 sps:$4 sm:$0xff]   ;;  %v7744_v53 = vld [vmem:[#allocation7 + $0x82c] ss:$16 sps:$4 sm:$0xff]  }
 0x27c   :  { %5004 = vmatpush1.bf16.msra.mxu1 %v7632_v37  ;;  %v7736_v37 = vld [vmem:[#allocation7 + $0x808] ss:$16 sps:$4 sm:$0xff]   ;;  %v7750_v62 = vld [vmem:[#allocation7 + $0x84c] ss:$16 sps:$4 sm:$0xff]  }
 0x27d   :  { %5127 = vmatpush1.bf16.msra.mxu0 %v7674_v38  ;;  %5005 = vmatprep.subr.bf16.mxu1 %v7637_v39  ;;  %v7699_v38 = vld [vmem:[#allocation7 + $0x22c] ss:$16 sps:$4 sm:$0xff]   ;;  %v7697_v59 = vld [vmem:[#allocation7 + $0x228] ss:$16 sps:$4 sm:$0xff]  }
 0x27e   :  { %5128 = vmatprep.subr.bf16.mxu0 %v7682_v7  ;;  %v7742_v39 = vld [vmem:[#allocation7 + $0x828] ss:$16 sps:$4 sm:$0xff]   ;;  %v7705_v7 = vld [vmem:[#allocation7 + $0x24c] ss:$16 sps:$4 sm:$0xff]  }
 0x27f   :  { %v7703_v58 = vld [vmem:[#allocation7 + $0x248] ss:$16 sps:$4 sm:$0xff]  }
 0x280   :  { %5006 = vmatpush1.bf16.msra.mxu1 %v7635_v56  ;;  %v7748_v56 = vld [vmem:[#allocation7 + $0x848] ss:$16 sps:$4 sm:$0xff]  }
 0x281   :  { %5129 = vmatpush1.bf16.msra.mxu0 %v7680_v40  ;;  %5007 = vmatprep.subr.bf16.mxu1 %v7643_v20  ;;  %v7711_v40 = vld [vmem:[#allocation7 + $0x26c] ss:$16 sps:$4 sm:$0xff]   ;;  %v7709_v20 = vld [vmem:[#allocation7 + $0x268] ss:$16 sps:$4 sm:$0xff]  }
 0x282   :  { %5130 = vmatprep.subr.bf16.mxu0 %v7688_v0  ;;  %v7754_v0 = vld [vmem:[#allocation7 + $0x868] ss:$16 sps:$4 sm:$0xff]  }
 0x284   :  { %5008 = vmatpush1.bf16.msra.mxu1 %v7641_v41  ;;  %v7717_v41 = vld [vmem:[#allocation7 + $0x28c] ss:$16 sps:$4 sm:$0xff]  }
 0x285   :  { %5131 = vmatpush1.bf16.msra.mxu0 %v7686_v42  ;;  %5009 = vmatprep.subr.bf16.mxu1 %v7649_v60  ;;  %v7762_v42 = vld [vmem:[#allocation7 + $0x88c] ss:$16 sps:$4 sm:$0xff]  }
 0x286   :  { %5132 = vmatprep.subr.bf16.mxu0 %v7696_v43  ;;  %v7723_v60 = vld [vmem:[#allocation7 + $0x2ac] ss:$16 sps:$4 sm:$0xff]  }
 0x287   :  { %v7768_v43 = vld [vmem:[#allocation7 + $0x8ac] ss:$16 sps:$4 sm:$0xff]  }
 0x288   :  { %5010 = vmatpush1.bf16.msra.mxu1 %v7647_v44  ;;  %v7721_v44 = vld [vmem:[#allocation7 + $0x2a8] ss:$16 sps:$4 sm:$0xff]  }
 0x289   :  { %5133 = vmatpush1.bf16.msra.mxu0 %v7694_v46  ;;  %5011 = vmatprep.subr.bf16.mxu1 %v7655_v47  ;;  %v7766_v46 = vld [vmem:[#allocation7 + $0x8a8] ss:$16 sps:$4 sm:$0xff]   ;;  %v7729_v47 = vld [vmem:[#allocation7 + $0x2cc] ss:$16 sps:$4 sm:$0xff]  }
 0x28a   :  { %5134 = vmatprep.subr.bf16.mxu0 %v7702_v51  ;;  %v7774_v51 = vld [vmem:[#allocation7 + $0x8cc] ss:$16 sps:$4 sm:$0xff]  }
 0x28c   :  { %5012 = vmatpush1.bf16.msra.mxu1 %v7653_v32 }
 0x28d   :  { %5135 = vmatpush1.bf16.msra.mxu0 %v7700_v63  ;;  %5013 = vmatprep.subr.bf16.mxu1 %v7661_v2 }
 0x28e   :  { %5136 = vmatprep.subr.bf16.mxu0 %v7708_v4 }
 0x290   :  { %5014 = vmatpush1.bf16.msra.mxu1 %v7659_v26 }
 0x291   :  { %5137 = vmatpush1.bf16.msra.mxu0 %v7706_v5  ;;  %5015 = vmatprep.subr.bf16.mxu1 %v7667_v22 }
 0x292   :  { %5138 = vmatprep.subr.bf16.mxu0 %v7714_v6  ;;  %v7727_v6 = vld [vmem:[#allocation7 + $0x2c8] ss:$16 sps:$4 sm:$0xff]  }
 0x294   :  { %5016 = vmatpush1.bf16.msra.mxu1 %v7665_v8  ;;  %v7772_v8 = vld [vmem:[#allocation7 + $0x8c8] ss:$16 sps:$4 sm:$0xff]  }
 0x295   :  { %5139 = vmatpush1.bf16.msra.mxu0 %v7712_v9  ;;  %5017 = vmatprep.subr.bf16.mxu1 %v7673_v10 }
 0x296   :  { %5140 = vmatprep.subr.bf16.mxu0 %v7720_v23 }
 0x298   :  { %5018 = vmatpush1.bf16.msra.mxu1 %v7671_v27  ;;  %v7735_v27 = vld [vmem:[#allocation7 + $0x2ec] ss:$16 sps:$4 sm:$0xff]  }
 0x299   :  { %5141 = vmatpush1.bf16.msra.mxu0 %v7718_v55  ;;  %5019 = vmatprep.subr.bf16.mxu1 %v7679_v11  ;;  %v7780_v55 = vld [vmem:[#allocation7 + $0x8ec] ss:$16 sps:$4 sm:$0xff]  }
 0x29a   :  { %5142 = vmatprep.subr.bf16.mxu0 %v7726_v12  ;;  %v7778_v12 = vld [vmem:[#allocation7 + $0x8e8] ss:$16 sps:$4 sm:$0xff]  }
 0x29c   :  { %5020 = vmatpush1.bf16.msra.mxu1 %v7677_v28  ;;  %v7741_v28 = vld [vmem:[#allocation7 + $0x30c] ss:$16 sps:$4 sm:$0xff]  }
 0x29d   :  { %5143 = vmatpush1.bf16.msra.mxu0 %v7724_v13  ;;  %5021 = vmatprep.subr.bf16.mxu1 %v7685_v14  ;;  %v7786_v13 = vld [vmem:[#allocation7 + $0x90c] ss:$16 sps:$4 sm:$0xff]   ;;  %v7784_v14 = vld [vmem:[#allocation7 + $0x908] ss:$16 sps:$4 sm:$0xff]  }
 0x29e   :  { %5144 = vmatprep.subr.bf16.mxu0 %v7732_v15  ;;  %v7747_v15 = vld [vmem:[#allocation7 + $0x32c] ss:$16 sps:$4 sm:$0xff]  }
 0x2a0   :  { %5022 = vmatpush1.bf16.msra.mxu1 %v7683_v16  ;;  %v7792_v16 = vld [vmem:[#allocation7 + $0x92c] ss:$16 sps:$4 sm:$0xff]  }
 0x2a1   :  { %5145 = vmatpush1.bf16.msra.mxu0 %v7730_v17  ;;  %5073 = vmatprep.subr.bf16.mxu1 %v7693_v25  ;;  %v7745_v17 = vld [vmem:[#allocation7 + $0x328] ss:$16 sps:$4 sm:$0xff]   ;;  %v7753_v25 = vld [vmem:[#allocation7 + $0x34c] ss:$16 sps:$4 sm:$0xff]  }
 0x2a2   :  { %5196 = vmatprep.subr.bf16.mxu0 %v7738_v29  ;;  %v7798_v29 = vld [vmem:[#allocation7 + $0x94c] ss:$16 sps:$4 sm:$0xff]  }
 0x2a3   :  { %5024 = vmatmul.mubr.bf16.vlgmr.msra.gmra.mrb[28].mxu1 %v8691_v52 }
 0x2a4   :  { %5147 = vmatmul.mubr.bf16.vlgmr.msra.gmra.mrb[28].mxu0 %v8573_v30  ;;  %5074 = vmatpush1.bf16.msra.mxu1 %v7691_v36  ;;  %v7756_v30 = vld [vmem:[#allocation7 + $0x86c] ss:$16 sps:$4 sm:$0xff]   ;;  %v7751_v36 = vld [vmem:[#allocation7 + $0x348] ss:$16 sps:$4 sm:$0xff]  }
 0x2a5   :  { %5197 = vmatpush1.bf16.msra.mxu0 %v7736_v37  ;;  %5075 = vmatprep.subr.bf16.mxu1 %v7699_v38  ;;  %v7796_v37 = vld [vmem:[#allocation7 + $0x948] ss:$16 sps:$4 sm:$0xff]   ;;  %v7759_v38 = vld [vmem:[#allocation7 + $0x36c] ss:$16 sps:$4 sm:$0xff]  }
 0x2a6   :  { %5198 = vmatprep.subr.bf16.mxu0 %v7744_v53  ;;  %5105 = vmatprep.mubr.bf16.mxu1 %v8581_v34  ;;  %v7715_v34 = vld [vmem:[#allocation7 + $0x288] ss:$16 sps:$4 sm:$0xff]   ;;  %v7804_v53 = vld [vmem:[#allocation7 + $0x96c] ss:$16 sps:$4 sm:$0xff]  }
 0x2a7   :  { %5228 = vmatprep.mubr.bf16.mxu0 %v8585_v35  ;;  %v7760_v35 = vld [vmem:[#allocation7 + $0x888] ss:$16 sps:$4 sm:$0xff]  }
 0x2a8   :  { %5076 = vmatpush1.bf16.msra.mxu1 %v7697_v59  ;;  %v7757_v59 = vld [vmem:[#allocation7 + $0x368] ss:$16 sps:$4 sm:$0xff]  }
 0x2a9   :  { %5199 = vmatpush1.bf16.msra.mxu0 %v7742_v39  ;;  %5077 = vmatprep.subr.bf16.mxu1 %v7705_v7  ;;  %v7802_v39 = vld [vmem:[#allocation7 + $0x968] ss:$16 sps:$4 sm:$0xff]   ;;  %v7765_v7 = vld [vmem:[#allocation7 + $0x38c] ss:$16 sps:$4 sm:$0xff]  }
 0x2aa   :  { %5200 = vmatprep.subr.bf16.mxu0 %v7750_v62  ;;  %v7810_v62 = vld [vmem:[#allocation7 + $0x98c] ss:$16 sps:$4 sm:$0xff]  }
 0x2ac   :  { %5078 = vmatpush1.bf16.msra.mxu1 %v7703_v58  ;;  %v7763_v58 = vld [vmem:[#allocation7 + $0x388] ss:$16 sps:$4 sm:$0xff]  }
 0x2ad   :  { %5201 = vmatpush1.bf16.msra.mxu0 %v7748_v56  ;;  %5079 = vmatprep.subr.bf16.mxu1 %v7711_v40  ;;  %v7808_v56 = vld [vmem:[#allocation7 + $0x988] ss:$16 sps:$4 sm:$0xff]   ;;  %v7771_v40 = vld [vmem:[#allocation7 + $0x3ac] ss:$16 sps:$4 sm:$0xff]  }
 0x2ae   :  { %5202 = vmatprep.subr.bf16.mxu0 %v7756_v30  ;;  %v7816_v30 = vld [vmem:[#allocation7 + $0x9ac] ss:$16 sps:$4 sm:$0xff]  }
 0x2b0   :  { %5080 = vmatpush1.bf16.msra.mxu1 %v7709_v20  ;;  %v7769_v20 = vld [vmem:[#allocation7 + $0x3a8] ss:$16 sps:$4 sm:$0xff]  }
 0x2b1   :  { %5203 = vmatpush1.bf16.msra.mxu0 %v7754_v0  ;;  %5081 = vmatprep.subr.bf16.mxu1 %v7717_v41  ;;  %v7814_v0 = vld [vmem:[#allocation7 + $0x9a8] ss:$16 sps:$4 sm:$0xff]   ;;  %v7777_v41 = vld [vmem:[#allocation7 + $0x3cc] ss:$16 sps:$4 sm:$0xff]  }
 0x2b2   :  { %5204 = vmatprep.subr.bf16.mxu0 %v7762_v42  ;;  %v7822_v42 = vld [vmem:[#allocation7 + $0x9cc] ss:$16 sps:$4 sm:$0xff]  }
 0x2b4   :  { %5082 = vmatpush1.bf16.msra.mxu1 %v7715_v34  ;;  %v7775_v34 = vld [vmem:[#allocation7 + $0x3c8] ss:$16 sps:$4 sm:$0xff]  }
 0x2b5   :  { %5205 = vmatpush1.bf16.msra.mxu0 %v7760_v35  ;;  %5083 = vmatprep.subr.bf16.mxu1 %v7723_v60  ;;  %v7820_v35 = vld [vmem:[#allocation7 + $0x9c8] ss:$16 sps:$4 sm:$0xff]   ;;  %v7783_v60 = vld [vmem:[#allocation7 + $0x3ec] ss:$16 sps:$4 sm:$0xff]  }
 0x2b6   :  { %5206 = vmatprep.subr.bf16.mxu0 %v7768_v43  ;;  %v4779_v32 = vpop.f32.mrb[16].mxu1  ;;  %v7828_v43 = vld [vmem:[#allocation7 + $0x9ec] ss:$16 sps:$4 sm:$0xff]  }
 0x2b7   :  { %v8697_v63 = vpop.f32.mrb[16].mxu0  ;;  %v4780_v2 = vadd.f32 %v4779_v32, %v8657_v57  ;;  %v4781_v4 = vpop.f32.mrb[17].mxu1  ;;  %v7787_v32 = vld [vmem:[#allocation7 + $0x608] ss:$16 sps:$4 sm:$0xff]  }
 0x2b8   :  { %v8700_v26 = vpop.f32.mrb[17].mxu0  ;;  %v4782_v5 = vadd.f32 %v4781_v4, %v8663_v1  ;;  %v4783_v22 = vpop.f32.mrb[18].mxu1  ;;  %5084 = vmatpush1.bf16.msra.mxu1 %v7721_v44  ;;  %v7733_v1 = vld [vmem:[#allocation7 + $0x2e8] ss:$16 sps:$4 sm:$0xff]   ;;  %v7795_v4 = vld [vmem:[#allocation7 + $0x62c] ss:$16 sps:$4 sm:$0xff]  }
 0x2b9   :  { %5207 = vmatpush1.bf16.msra.mxu0 %v7766_v46  ;;  %v4906_v9 = vpop.f32.mrb[18].mxu0  ;;  %v8704_v10 = vadd.f32 %v8679_v19, %v4780_v2  ;;  %v4784_v23 = vpop.f32.mrb[19].mxu1  ;;  %5085 = vmatprep.subr.bf16.mxu1 %v7729_v47  ;;  %v7739_v19 = vld [vmem:[#allocation7 + $0x308] ss:$16 sps:$4 sm:$0xff]   ;;  %v7789_v47 = vld [vmem:[#allocation7 + $0x60c] ss:$16 sps:$4 sm:$0xff]  }
 0x2ba   :  { %5208 = vmatprep.subr.bf16.mxu0 %v7774_v51  ;;  %v4907_v57 = vpop.f32.mrb[19].mxu0  ;;  %v8707_v11 = vadd.f32 %v8684_v48, %v4782_v5  ;;  %v7790_v48 = vld [vmem:[#allocation7 + $0x928] ss:$16 sps:$4 sm:$0xff]   ;;  %v7834_v51 = vld [vmem:[#allocation7 + $0xc0c] ss:$16 sps:$4 sm:$0xff]  }
 0x2bb   :  { %v7781_v44 = vld [vmem:[#allocation7 + $0x3e8] ss:$16 sps:$4 sm:$0xff]   ;;  %v7840_v5 = vld [vmem:[#allocation7 + $0xc2c] ss:$16 sps:$4 sm:$0xff]  }
 0x2bc   :  { %5086 = vmatpush1.bf16.msra.mxu1 %v7727_v6  ;;  %v7826_v46 = vld [vmem:[#allocation7 + $0x9e8] ss:$16 sps:$4 sm:$0xff]   ;;  %v7846_v9 = vld [vmem:[#allocation7 + $0xc4c] ss:$16 sps:$4 sm:$0xff]  }
 0x2bd   :  { %5209 = vmatpush1.bf16.msra.mxu0 %v7772_v8  ;;  %5087 = vmatprep.subr.bf16.mxu1 %v7735_v27  ;;  %v7832_v2 = vld [vmem:[#allocation7 + $0xc08] ss:$16 sps:$4 sm:$0xff]   ;;  %v7801_v8 = vld [vmem:[#allocation7 + $0x64c] ss:$16 sps:$4 sm:$0xff]  }
 0x2be   :  { %5210 = vmatprep.subr.bf16.mxu0 %v7780_v55  ;;  %v7793_v22 = vld [vmem:[#allocation7 + $0x628] ss:$16 sps:$4 sm:$0xff]  }
 0x2bf   :  { %v7838_v6 = vld [vmem:[#allocation7 + $0xc28] ss:$16 sps:$4 sm:$0xff]  }
 0x2c0   :  { %5088 = vmatpush1.bf16.msra.mxu1 %v7733_v1  ;;  %v7799_v23 = vld [vmem:[#allocation7 + $0x648] ss:$16 sps:$4 sm:$0xff]   ;;  %v7813_v1 = vld [vmem:[#allocation7 + $0x68c] ss:$16 sps:$4 sm:$0xff]  }
 0x2c1   :  { %5211 = vmatpush1.bf16.msra.mxu0 %v7778_v12  ;;  %5089 = vmatprep.subr.bf16.mxu1 %v7741_v28  ;;  %v7844_v27 = vld [vmem:[#allocation7 + $0xc48] ss:$16 sps:$4 sm:$0xff]   ;;  %v7858_v12 = vld [vmem:[#allocation7 + $0xc8c] ss:$16 sps:$4 sm:$0xff]  }
 0x2c2   :  { %5212 = vmatprep.subr.bf16.mxu0 %v7786_v13  ;;  %v7805_v55 = vld [vmem:[#allocation7 + $0x668] ss:$16 sps:$4 sm:$0xff]   ;;  %v7819_v28 = vld [vmem:[#allocation7 + $0x6ac] ss:$16 sps:$4 sm:$0xff]  }
 0x2c3   :  { %v7850_v57 = vld [vmem:[#allocation7 + $0xc68] ss:$16 sps:$4 sm:$0xff]   ;;  %v7864_v13 = vld [vmem:[#allocation7 + $0xcac] ss:$16 sps:$4 sm:$0xff]  }
 0x2c4   :  { %5090 = vmatpush1.bf16.msra.mxu1 %v7739_v19  ;;  %v7817_v19 = vld [vmem:[#allocation7 + $0x6a8] ss:$16 sps:$4 sm:$0xff]  }
 0x2c5   :  { %5213 = vmatpush1.bf16.msra.mxu0 %v7784_v14  ;;  %5091 = vmatprep.subr.bf16.mxu1 %v7747_v15  ;;  %v7862_v14 = vld [vmem:[#allocation7 + $0xca8] ss:$16 sps:$4 sm:$0xff]   ;;  %v7825_v15 = vld [vmem:[#allocation7 + $0x6cc] ss:$16 sps:$4 sm:$0xff]  }
 0x2c6   :  { %5214 = vmatprep.subr.bf16.mxu0 %v7792_v16  ;;  %v7870_v16 = vld [vmem:[#allocation7 + $0xccc] ss:$16 sps:$4 sm:$0xff]  }
 0x2c8   :  { %5092 = vmatpush1.bf16.msra.mxu1 %v7745_v17 }
 0x2c9   :  { %5215 = vmatpush1.bf16.msra.mxu0 %v7790_v48  ;;  %5093 = vmatprep.subr.bf16.mxu1 %v7753_v25 }
 0x2ca   :  { %5216 = vmatprep.subr.bf16.mxu0 %v7798_v29 }
 0x2cc   :  { %5094 = vmatpush1.bf16.msra.mxu1 %v7751_v36 }
 0x2cd   :  { %5217 = vmatpush1.bf16.msra.mxu0 %v7796_v37  ;;  %5095 = vmatprep.subr.bf16.mxu1 %v7759_v38 }
 0x2ce   :  { %5218 = vmatprep.subr.bf16.mxu0 %v7804_v53  ;;  %v7823_v53 = vld [vmem:[#allocation7 + $0x6c8] ss:$16 sps:$4 sm:$0xff]  }
 0x2d0   :  { %5096 = vmatpush1.bf16.msra.mxu1 %v7757_v59  ;;  %v7868_v59 = vld [vmem:[#allocation7 + $0xcc8] ss:$16 sps:$4 sm:$0xff]  }
 0x2d1   :  { %5219 = vmatpush1.bf16.msra.mxu0 %v7802_v39  ;;  %5097 = vmatprep.subr.bf16.mxu1 %v7765_v7 }
 0x2d2   :  { %5220 = vmatprep.subr.bf16.mxu0 %v7810_v62 }
 0x2d4   :  { %5098 = vmatpush1.bf16.msra.mxu1 %v7763_v58  ;;  %v7831_v58 = vld [vmem:[#allocation7 + $0x6ec] ss:$16 sps:$4 sm:$0xff]  }
 0x2d5   :  { %5221 = vmatpush1.bf16.msra.mxu0 %v7808_v56  ;;  %5099 = vmatprep.subr.bf16.mxu1 %v7771_v40  ;;  %v7876_v56 = vld [vmem:[#allocation7 + $0xcec] ss:$16 sps:$4 sm:$0xff]  }
 0x2d6   :  { %5222 = vmatprep.subr.bf16.mxu0 %v7816_v30  ;;  %v7874_v30 = vld [vmem:[#allocation7 + $0xce8] ss:$16 sps:$4 sm:$0xff]  }
 0x2d8   :  { %5100 = vmatpush1.bf16.msra.mxu1 %v7769_v20  ;;  %v7837_v20 = vld [vmem:[#allocation7 + $0x70c] ss:$16 sps:$4 sm:$0xff]  }
 0x2d9   :  { %5223 = vmatpush1.bf16.msra.mxu0 %v7814_v0  ;;  %5101 = vmatprep.subr.bf16.mxu1 %v7777_v41  ;;  %v7882_v0 = vld [vmem:[#allocation7 + $0xd0c] ss:$16 sps:$4 sm:$0xff]   ;;  %v7880_v41 = vld [vmem:[#allocation7 + $0xd08] ss:$16 sps:$4 sm:$0xff]  }
 0x2da   :  { %5224 = vmatprep.subr.bf16.mxu0 %v7822_v42  ;;  %v7843_v42 = vld [vmem:[#allocation7 + $0x72c] ss:$16 sps:$4 sm:$0xff]  }
 0x2dc   :  { %5102 = vmatpush1.bf16.msra.mxu1 %v7775_v34  ;;  %v7888_v34 = vld [vmem:[#allocation7 + $0xd2c] ss:$16 sps:$4 sm:$0xff]  }
 0x2dd   :  { %5225 = vmatpush1.bf16.msra.mxu0 %v7820_v35  ;;  %5103 = vmatprep.subr.bf16.mxu1 %v7783_v60  ;;  %v7841_v35 = vld [vmem:[#allocation7 + $0x728] ss:$16 sps:$4 sm:$0xff]   ;;  %v7849_v60 = vld [vmem:[#allocation7 + $0x74c] ss:$16 sps:$4 sm:$0xff]  }
 0x2de   :  { %5226 = vmatprep.subr.bf16.mxu0 %v7828_v43  ;;  %v7894_v43 = vld [vmem:[#allocation7 + $0xd4c] ss:$16 sps:$4 sm:$0xff]  }
 0x2e0   :  { %5104 = vmatpush1.bf16.msra.mxu1 %v7781_v44  ;;  %v7847_v44 = vld [vmem:[#allocation7 + $0x748] ss:$16 sps:$4 sm:$0xff]  }
 0x2e1   :  { %5227 = vmatpush1.bf16.msra.mxu0 %v7826_v46  ;;  %5155 = vmatprep.subr.bf16.mxu1 %v7789_v47  ;;  %v7892_v46 = vld [vmem:[#allocation7 + $0xd48] ss:$16 sps:$4 sm:$0xff]   ;;  %v7855_v47 = vld [vmem:[#allocation7 + $0x76c] ss:$16 sps:$4 sm:$0xff]  }
 0x2e2   :  { %5278 = vmatprep.subr.bf16.mxu0 %v7834_v51  ;;  %v7900_v51 = vld [vmem:[#allocation7 + $0xd6c] ss:$16 sps:$4 sm:$0xff]  }
 0x2e3   :  { %5106 = vmatmul.mubr.bf16.vlgmr.msra.gmra.mrb[32].mxu1 %v8603_v49  ;;  %v7807_v49 = vld [vmem:[#allocation7 + $0x66c] ss:$16 sps:$4 sm:$0xff]  }
 0x2e4   :  { %5229 = vmatmul.mubr.bf16.vlgmr.msra.gmra.mrb[32].mxu0 %v8607_v50  ;;  %5156 = vmatpush1.bf16.msra.mxu1 %v7787_v32  ;;  %v7852_v50 = vld [vmem:[#allocation7 + $0xc6c] ss:$16 sps:$4 sm:$0xff]   ;;  %v7853_v32 = vld [vmem:[#allocation7 + $0x768] ss:$16 sps:$4 sm:$0xff]  }
 0x2e5   :  { %5279 = vmatpush1.bf16.msra.mxu0 %v7832_v2  ;;  %5157 = vmatprep.subr.bf16.mxu1 %v7795_v4  ;;  %v7898_v2 = vld [vmem:[#allocation7 + $0xd68] ss:$16 sps:$4 sm:$0xff]   ;;  %v7861_v4 = vld [vmem:[#allocation7 + $0x78c] ss:$16 sps:$4 sm:$0xff]  }
 0x2e6   :  { %5280 = vmatprep.subr.bf16.mxu0 %v7840_v5  ;;  %5187 = vmatprep.mubr.bf16.mxu1 %v8613_v61  ;;  %v7811_v61 = vld [vmem:[#allocation7 + $0x688] ss:$16 sps:$4 sm:$0xff]   ;;  %v7906_v5 = vld [vmem:[#allocation7 + $0xd8c] ss:$16 sps:$4 sm:$0xff]  }
 0x2e7   :  { %5310 = vmatprep.mubr.bf16.mxu0 %v8617_v31  ;;  %v7856_v31 = vld [vmem:[#allocation7 + $0xc88] ss:$16 sps:$4 sm:$0xff]  }
 0x2e8   :  { %5158 = vmatpush1.bf16.msra.mxu1 %v7793_v22  ;;  %v7859_v22 = vld [vmem:[#allocation7 + $0x788] ss:$16 sps:$4 sm:$0xff]  }
 0x2e9   :  { %5281 = vmatpush1.bf16.msra.mxu0 %v7838_v6  ;;  %5159 = vmatprep.subr.bf16.mxu1 %v7801_v8  ;;  %v7904_v6 = vld [vmem:[#allocation7 + $0xd88] ss:$16 sps:$4 sm:$0xff]   ;;  %v7867_v8 = vld [vmem:[#allocation7 + $0x7ac] ss:$16 sps:$4 sm:$0xff]  }
 0x2ea   :  { %5282 = vmatprep.subr.bf16.mxu0 %v7846_v9  ;;  %v7912_v9 = vld [vmem:[#allocation7 + $0xdac] ss:$16 sps:$4 sm:$0xff]  }
 0x2ec   :  { %5160 = vmatpush1.bf16.msra.mxu1 %v7799_v23  ;;  %v7865_v23 = vld [vmem:[#allocation7 + $0x7a8] ss:$16 sps:$4 sm:$0xff]  }
 0x2ed   :  { %5283 = vmatpush1.bf16.msra.mxu0 %v7844_v27  ;;  %5161 = vmatprep.subr.bf16.mxu1 %v7807_v49  ;;  %v7910_v27 = vld [vmem:[#allocation7 + $0xda8] ss:$16 sps:$4 sm:$0xff]   ;;  %v7873_v49 = vld [vmem:[#allocation7 + $0x7cc] ss:$16 sps:$4 sm:$0xff]  }
 0x2ee   :  { %5284 = vmatprep.subr.bf16.mxu0 %v7852_v50  ;;  %v7918_v50 = vld [vmem:[#allocation7 + $0xdcc] ss:$16 sps:$4 sm:$0xff]  }
 0x2f0   :  { %5162 = vmatpush1.bf16.msra.mxu1 %v7805_v55  ;;  %v7871_v55 = vld [vmem:[#allocation7 + $0x7c8] ss:$16 sps:$4 sm:$0xff]  }
 0x2f1   :  { %5285 = vmatpush1.bf16.msra.mxu0 %v7850_v57  ;;  %5163 = vmatprep.subr.bf16.mxu1 %v7813_v1  ;;  %v7916_v57 = vld [vmem:[#allocation7 + $0xdc8] ss:$16 sps:$4 sm:$0xff]   ;;  %v7879_v1 = vld [vmem:[#allocation7 + $0x7ec] ss:$16 sps:$4 sm:$0xff]  }
 0x2f2   :  { %5286 = vmatprep.subr.bf16.mxu0 %v7858_v12  ;;  %v7924_v12 = vld [vmem:[#allocation7 + $0xdec] ss:$16 sps:$4 sm:$0xff]  }
 0x2f4   :  { %5164 = vmatpush1.bf16.msra.mxu1 %v7811_v61  ;;  %v7877_v61 = vld [vmem:[#allocation7 + $0x7e8] ss:$16 sps:$4 sm:$0xff]  }
 0x2f5   :  { %5287 = vmatpush1.bf16.msra.mxu0 %v7856_v31  ;;  %5165 = vmatprep.subr.bf16.mxu1 %v7819_v28  ;;  %v7922_v31 = vld [vmem:[#allocation7 + $0xde8] ss:$16 sps:$4 sm:$0xff]   ;;  %v7885_v28 = vld [vmem:[#allocation7 + $0xa0c] ss:$16 sps:$4 sm:$0xff]  }
 0x2f6   :  { %5288 = vmatprep.subr.bf16.mxu0 %v7864_v13  ;;  %v4861_v17 = vpop.f32.mrb[20].mxu1  ;;  %v7930_v13 = vld [vmem:[#allocation11 + $0x4] ss:$8 sps:$4 sm:$0xff]  }
 0x2f7   :  { %v8713_v48 = vpop.f32.mrb[20].mxu0  ;;  %v4862_v25 = vadd.f32 %v4861_v17, %v8704_v10  ;;  %v4863_v29 = vpop.f32.mrb[21].mxu1  ;;  %v7889_v17 = vld [vmem:[#allocation7 + $0xa28] ss:$16 sps:$4 sm:$0xff]  }
 0x2f8   :  { %v8716_v36 = vpop.f32.mrb[21].mxu0  ;;  %v4864_v37 = vadd.f32 %v4863_v29, %v8707_v11  ;;  %v4865_v38 = vpop.f32.mrb[22].mxu1  ;;  %5166 = vmatpush1.bf16.msra.mxu1 %v7817_v19  ;;  %v7829_v11 = vld [vmem:[#allocation7 + $0x6e8] ss:$16 sps:$4 sm:$0xff]   ;;  %v7897_v29 = vld [vmem:[#allocation7 + $0xa4c] ss:$16 sps:$4 sm:$0xff]  }
 0x2f9   :  { %5289 = vmatpush1.bf16.msra.mxu0 %v7862_v14  ;;  %v4988_v39 = vpop.f32.mrb[22].mxu0  ;;  %v8720_v7 = vadd.f32 %v8697_v63, %v4862_v25  ;;  %v4866_v62 = vpop.f32.mrb[23].mxu1  ;;  %5167 = vmatprep.subr.bf16.mxu1 %v7825_v15  ;;  %v7835_v63 = vld [vmem:[#allocation7 + $0x708] ss:$16 sps:$4 sm:$0xff]   ;;  %v7928_v14 = vld [vmem:[#allocation11] ss:$8 sps:$4 sm:$0xff]  }
 0x2fa   :  { %5290 = vmatprep.subr.bf16.mxu0 %v7870_v16  ;;  %v4989_v10 = vpop.f32.mrb[23].mxu0  ;;  %v8723_v40 = vadd.f32 %v8700_v26, %v4864_v37  ;;  %v7886_v26 = vld [vmem:[#allocation7 + $0xd28] ss:$16 sps:$4 sm:$0xff]   ;;  %v7891_v15 = vld [vmem:[#allocation7 + $0xa2c] ss:$16 sps:$4 sm:$0xff]  }
 0x2fb   :  { %v7883_v19 = vld [vmem:[#allocation7 + $0xa08] ss:$16 sps:$4 sm:$0xff]   ;;  %v7934_v25 = vld [vmem:[#allocation11 + $0x10] ss:$8 sps:$4 sm:$0xff]  }
 0x2fc   :  { %5168 = vmatpush1.bf16.msra.mxu1 %v7823_v53  ;;  %v7936_v16 = vld [vmem:[#allocation11 + $0x14] ss:$8 sps:$4 sm:$0xff]   ;;  %v7942_v37 = vld [vmem:[#allocation11 + $0x24] ss:$8 sps:$4 sm:$0xff]   ;;  %v7940_v53 = vld [vmem:[#allocation11 + $0x20] ss:$8 sps:$4 sm:$0xff]  }
 0x2fd   :  { %5291 = vmatpush1.bf16.msra.mxu0 %v7868_v59  ;;  %5169 = vmatprep.subr.bf16.mxu1 %v7831_v58  ;;  %v7895_v38 = vld [vmem:[#allocation7 + $0xa48] ss:$16 sps:$4 sm:$0xff]   ;;  %v7903_v59 = vld [vmem:[#allocation7 + $0xa6c] ss:$16 sps:$4 sm:$0xff]  }
 0x2fe   :  { %5292 = vmatprep.subr.bf16.mxu0 %v7876_v56  ;;  %v7946_v39 = vld [vmem:[#allocation11 + $0x30] ss:$8 sps:$4 sm:$0xff]   ;;  %v7954_v58 = vld [vmem:[#allocation11 + $0x44] ss:$8 sps:$4 sm:$0xff]  }
 0x2ff   :  { %v7909_v62 = vld [vmem:[#allocation7 + $0xa8c] ss:$16 sps:$4 sm:$0xff]   ;;  %v7907_v56 = vld [vmem:[#allocation7 + $0xa88] ss:$16 sps:$4 sm:$0xff]  }
 0x300   :  { %5170 = vmatpush1.bf16.msra.mxu1 %v7829_v11  ;;  %v7915_v10 = vld [vmem:[#allocation7 + $0xaac] ss:$16 sps:$4 sm:$0xff]   ;;  %v7960_v11 = vld [vmem:[#allocation11 + $0x54] ss:$8 sps:$4 sm:$0xff]  }
 0x301   :  { %5293 = vmatpush1.bf16.msra.mxu0 %v7874_v30  ;;  %5171 = vmatprep.subr.bf16.mxu1 %v7837_v20  ;;  %v7913_v30 = vld [vmem:[#allocation7 + $0xaa8] ss:$16 sps:$4 sm:$0xff]   ;;  %v7958_v20 = vld [vmem:[#allocation11 + $0x50] ss:$8 sps:$4 sm:$0xff]  }
 0x302   :  { %5294 = vmatprep.subr.bf16.mxu0 %v7882_v0  ;;  %v7921_v0 = vld [vmem:[#allocation7 + $0xacc] ss:$16 sps:$4 sm:$0xff]  }
 0x304   :  { %5172 = vmatpush1.bf16.msra.mxu1 %v7835_v63  ;;  %v7966_v63 = vld [vmem:[#allocation11 + $0x64] ss:$8 sps:$4 sm:$0xff]  }
 0x305   :  { %5295 = vmatpush1.bf16.msra.mxu0 %v7880_v41  ;;  %5173 = vmatprep.subr.bf16.mxu1 %v7843_v42 }
 0x306   :  { %5296 = vmatprep.subr.bf16.mxu0 %v7888_v34 }
 0x308   :  { %5174 = vmatpush1.bf16.msra.mxu1 %v7841_v35 }
 0x309   :  { %5297 = vmatpush1.bf16.msra.mxu0 %v7886_v26  ;;  %5175 = vmatprep.subr.bf16.mxu1 %v7849_v60 }
 0x30a   :  { %5298 = vmatprep.subr.bf16.mxu0 %v7894_v43 }
 0x30c   :  { %5176 = vmatpush1.bf16.msra.mxu1 %v7847_v44 }
 0x30d   :  { %5299 = vmatpush1.bf16.msra.mxu0 %v7892_v46  ;;  %5177 = vmatprep.subr.bf16.mxu1 %v7855_v47  ;;  %v7919_v47 = vld [vmem:[#allocation7 + $0xac8] ss:$16 sps:$4 sm:$0xff]  }
 0x30e   :  { %5300 = vmatprep.subr.bf16.mxu0 %v7900_v51  ;;  %v7964_v51 = vld [vmem:[#allocation11 + $0x60] ss:$8 sps:$4 sm:$0xff]  }
 0x310   :  { %5178 = vmatpush1.bf16.msra.mxu1 %v7853_v32 }
 0x311   :  { %5301 = vmatpush1.bf16.msra.mxu0 %v7898_v2  ;;  %5179 = vmatprep.subr.bf16.mxu1 %v7861_v4  ;;  %v7927_v4 = vld [vmem:[#allocation7 + $0xaec] ss:$16 sps:$4 sm:$0xff]  }
 0x312   :  { %5302 = vmatprep.subr.bf16.mxu0 %v7906_v5 }
 0x314   :  { %5180 = vmatpush1.bf16.msra.mxu1 %v7859_v22  ;;  %v7970_v22 = vld [vmem:[#allocation11 + $0x70] ss:$8 sps:$4 sm:$0xff]  }
 0x315   :  { %5303 = vmatpush1.bf16.msra.mxu0 %v7904_v6  ;;  %5181 = vmatprep.subr.bf16.mxu1 %v7867_v8  ;;  %v7933_v6 = vld [vmem:[#allocation7 + $0xb0c] ss:$16 sps:$4 sm:$0xff]   ;;  %v7978_v8 = vld [vmem:[#allocation11 + $0x84] ss:$8 sps:$4 sm:$0xff]  }
 0x316   :  { %5304 = vmatprep.subr.bf16.mxu0 %v7912_v9  ;;  %v7931_v9 = vld [vmem:[#allocation7 + $0xb08] ss:$16 sps:$4 sm:$0xff]  }
 0x318   :  { %5182 = vmatpush1.bf16.msra.mxu1 %v7865_v23  ;;  %v7976_v23 = vld [vmem:[#allocation11 + $0x80] ss:$8 sps:$4 sm:$0xff]  }
 0x319   :  { %5305 = vmatpush1.bf16.msra.mxu0 %v7910_v27  ;;  %5183 = vmatprep.subr.bf16.mxu1 %v7873_v49  ;;  %v7939_v27 = vld [vmem:[#allocation7 + $0xb2c] ss:$16 sps:$4 sm:$0xff]   ;;  %v7937_v49 = vld [vmem:[#allocation7 + $0xb28] ss:$16 sps:$4 sm:$0xff]  }
 0x31a   :  { %5306 = vmatprep.subr.bf16.mxu0 %v7918_v50  ;;  %v7945_v50 = vld [vmem:[#allocation7 + $0xb4c] ss:$16 sps:$4 sm:$0xff]  }
 0x31c   :  { %5184 = vmatpush1.bf16.msra.mxu1 %v7871_v55  ;;  %v7990_v55 = vld [vmem:[#allocation11 + $0xa4] ss:$8 sps:$4 sm:$0xff]  }
 0x31d   :  { %5307 = vmatpush1.bf16.msra.mxu0 %v7916_v57  ;;  %5185 = vmatprep.subr.bf16.mxu1 %v7879_v1  ;;  %v7943_v57 = vld [vmem:[#allocation7 + $0xb48] ss:$16 sps:$4 sm:$0xff]   ;;  %v7988_v1 = vld [vmem:[#allocation11 + $0xa0] ss:$8 sps:$4 sm:$0xff]  }
 0x31e   :  { %5308 = vmatprep.subr.bf16.mxu0 %v7924_v12  ;;  %v7951_v12 = vld [vmem:[#allocation7 + $0xb6c] ss:$16 sps:$4 sm:$0xff]  }
 0x320   :  { %5186 = vmatpush1.bf16.msra.mxu1 %v7877_v61  ;;  %v7996_v61 = vld [vmem:[#allocation11 + $0xb4] ss:$8 sps:$4 sm:$0xff]  }
 0x321   :  { %5309 = vmatpush1.bf16.msra.mxu0 %v7922_v31  ;;  %5237 = vmatprep.subr.bf16.mxu1 %v7885_v28  ;;  %v7949_v31 = vld [vmem:[#allocation7 + $0xb68] ss:$16 sps:$4 sm:$0xff]   ;;  %v7994_v28 = vld [vmem:[#allocation11 + $0xb0] ss:$8 sps:$4 sm:$0xff]  }
 0x322   :  { %5790 = vmatprep.subr.bf16.mxu0 %v7930_v13  ;;  %v7957_v13 = vld [vmem:[#allocation7 + $0xb8c] ss:$16 sps:$4 sm:$0xff]  }
 0x323   :  { %5188 = vmatmul.mubr.bf16.vlgmr.msra.gmra.mrb[36].mxu1 %v8637_v18  ;;  %v7948_v18 = vld [vmem:[#allocation11 + $0x34] ss:$8 sps:$4 sm:$0xff]  }
 0x324   :  { %5311 = vmatmul.mubr.bf16.vlgmr.msra.gmra.mrb[36].mxu0 %v8641_v21  ;;  %5238 = vmatpush1.bf16.msra.mxu1 %v7883_v19  ;;  %v7901_v21 = vld [vmem:[#allocation7 + $0xa68] ss:$16 sps:$4 sm:$0xff]  }
 0x325   :  { %5791 = vmatpush1.bf16.msra.mxu0 %v7928_v14  ;;  %5239 = vmatprep.subr.bf16.mxu1 %v7891_v15  ;;  %v8002_v19 = vld [vmem:[#allocation11 + $0xc4] ss:$8 sps:$4 sm:$0xff]   ;;  %v8000_v15 = vld [vmem:[#allocation11 + $0xc0] ss:$8 sps:$4 sm:$0xff]  }
 0x326   :  { %5792 = vmatprep.subr.bf16.mxu0 %v7936_v16  ;;  %5269 = vmatprep.mubr.bf16.mxu1 %v8647_v33  ;;  %v7952_v33 = vld [vmem:[#allocation11 + $0x40] ss:$8 sps:$4 sm:$0xff]   ;;  %v7955_v14 = vld [vmem:[#allocation7 + $0xb88] ss:$16 sps:$4 sm:$0xff]  }
 0x327   :  { %v7963_v16 = vld [vmem:[#allocation7 + $0xbac] ss:$16 sps:$4 sm:$0xff]  }
 0x328   :  { %5240 = vmatpush1.bf16.msra.mxu1 %v7889_v17  ;;  %v8008_v17 = vld [vmem:[#allocation11 + $0xd4] ss:$8 sps:$4 sm:$0xff]  }
 0x329   :  { %5793 = vmatpush1.bf16.msra.mxu0 %v7934_v25  ;;  %5241 = vmatprep.subr.bf16.mxu1 %v7897_v29  ;;  %v7961_v25 = vld [vmem:[#allocation7 + $0xba8] ss:$16 sps:$4 sm:$0xff]   ;;  %v8006_v29 = vld [vmem:[#allocation11 + $0xd0] ss:$8 sps:$4 sm:$0xff]  }
 0x32a   :  { %5794 = vmatprep.subr.bf16.mxu0 %v7942_v37  ;;  %v7969_v37 = vld [vmem:[#allocation7 + $0xbcc] ss:$16 sps:$4 sm:$0xff]  }
 0x32c   :  { %5242 = vmatpush1.bf16.msra.mxu1 %v7895_v38  ;;  %v8014_v38 = vld [vmem:[#allocation11 + $0xe4] ss:$8 sps:$4 sm:$0xff]  }
 0x32d   :  { %5795 = vmatpush1.bf16.msra.mxu0 %v7940_v53  ;;  %5243 = vmatprep.subr.bf16.mxu1 %v7903_v59  ;;  %v7967_v53 = vld [vmem:[#allocation7 + $0xbc8] ss:$16 sps:$4 sm:$0xff]   ;;  %v8012_v59 = vld [vmem:[#allocation11 + $0xe0] ss:$8 sps:$4 sm:$0xff]  }
 0x32e   :  { %5796 = vmatprep.subr.bf16.mxu0 %v7948_v18  ;;  %v7975_v18 = vld [vmem:[#allocation7 + $0xbec] ss:$16 sps:$4 sm:$0xff]  }
 0x330   :  { %5244 = vmatpush1.bf16.msra.mxu1 %v7901_v21  ;;  %v8020_v21 = vld [vmem:[#allocation11 + $0xf4] ss:$8 sps:$4 sm:$0xff]  }
 0x331   :  { %5797 = vmatpush1.bf16.msra.mxu0 %v7946_v39  ;;  %5245 = vmatprep.subr.bf16.mxu1 %v7909_v62  ;;  %v7973_v39 = vld [vmem:[#allocation7 + $0xbe8] ss:$16 sps:$4 sm:$0xff]   ;;  %v8018_v62 = vld [vmem:[#allocation11 + $0xf0] ss:$8 sps:$4 sm:$0xff]  }
 0x332   :  { %5798 = vmatprep.subr.bf16.mxu0 %v7954_v58  ;;  %v7981_v58 = vld [vmem:[#allocation7 + $0xe0c] ss:$16 sps:$4 sm:$0xff]  }
 0x334   :  { %5246 = vmatpush1.bf16.msra.mxu1 %v7907_v56  ;;  %v7979_v56 = vld [vmem:[#allocation7 + $0xe08] ss:$16 sps:$4 sm:$0xff]  }
 0x335   :  { %5799 = vmatpush1.bf16.msra.mxu0 %v7952_v33  ;;  %5247 = vmatprep.subr.bf16.mxu1 %v7915_v10  ;;  %v7987_v33 = vld [vmem:[#allocation7 + $0xe2c] ss:$16 sps:$4 sm:$0xff]   ;;  %v7985_v10 = vld [vmem:[#allocation7 + $0xe28] ss:$16 sps:$4 sm:$0xff]  }
 0x336   :  { %5800 = vmatprep.subr.bf16.mxu0 %v7960_v11  ;;  %v4943_v41 = vpop.f32.mrb[24].mxu1  ;;  %v7993_v11 = vld [vmem:[#allocation7 + $0xe4c] ss:$16 sps:$4 sm:$0xff]  }
 0x337   :  { %v5066_v42 = vpop.f32.mrb[24].mxu0  ;;  %v4944_v34 = vadd.f32 %v4943_v41, %v8720_v7  ;;  %v4945_v26 = vpop.f32.mrb[25].mxu1  ;;  %v7972_v7 = vld [vmem:[#allocation11 + $0x74] ss:$8 sps:$4 sm:$0xff]   ;;  %v8005_v41 = vld [vmem:[#allocation7 + $0xe8c] ss:$16 sps:$4 sm:$0xff]  }
 0x338   :  { %v8730_v35 = vadd.f32 %v5066_v42, %v8682_v45  ;;  %v5068_v60 = vpop.f32.mrb[25].mxu0  ;;  %v4946_v43 = vadd.f32 %v4945_v26, %v8723_v40  ;;  %v4947_v46 = vpop.f32.mrb[26].mxu1  ;;  %5248 = vmatpush1.bf16.msra.mxu1 %v7913_v30  ;;  %v7991_v30 = vld [vmem:[#allocation7 + $0xe48] ss:$16 sps:$4 sm:$0xff]   ;;  %v8011_v26 = vld [vmem:[#allocation7 + $0xeac] ss:$16 sps:$4 sm:$0xff]  }
 0x339   :  { %v8734_v44 = vadd.f32 %v5068_v60, %v8687_v24  ;;  %5801 = vmatpush1.bf16.msra.mxu0 %v7958_v20  ;;  %v5070_v32 = vpop.f32.mrb[26].mxu0  ;;  %v4948_v2 = vpop.f32.mrb[27].mxu1  ;;  %5249 = vmatprep.subr.bf16.mxu1 %v7921_v0  ;;  %v8737_v45 = vadd.f32 %v8713_v48, %v4944_v34  ;;  %v7925_v24 = vld [vmem:[#allocation7 + $0xae8] ss:$16 sps:$4 sm:$0xff]   ;;  %v7999_v20 = vld [vmem:[#allocation7 + $0xe6c] ss:$16 sps:$4 sm:$0xff]   ;;  %v5362_v0 = vlaneseq }
 0x33a   :  { %5802 = vmatprep.subr.bf16.mxu0 %v7966_v63  ;;  %v5071_v5 = vpop.f32.mrb[27].mxu0  ;;  %v8740_v40 = vadd.f32 %v8716_v36, %v4946_v43  ;;  %v7984_v48 = vld [vmem:[#allocation11 + $0x94] ss:$8 sps:$4 sm:$0xff]   ;;  %v7982_v36 = vld [vmem:[#allocation11 + $0x90] ss:$8 sps:$4 sm:$0xff]  }
 0x33b   :  { %v7997_v63 = vld [vmem:[#allocation7 + $0xe68] ss:$16 sps:$4 sm:$0xff]   ;;  %v8744_v42 = vshrl.u32 %v5362_v0, 7 }
 0x33c   :  { %5250 = vmatpush1.bf16.msra.mxu1 %v7919_v47  ;;  %v8003_v34 = vld [vmem:[#allocation7 + $0xe88] ss:$16 sps:$4 sm:$0xff]   ;;  %v8017_v47 = vld [vmem:[#allocation7 + $0xecc] ss:$16 sps:$4 sm:$0xff]  }
 0x33d   :  { %5803 = vmatpush1.bf16.msra.mxu0 %v7964_v51  ;;  %5251 = vmatprep.subr.bf16.mxu1 %v7927_v4  ;;  %v5368_v60 = vsub.s32 1, %v8744_v42  ;;  %v8009_v43 = vld [vmem:[#allocation7 + $0xea8] ss:$16 sps:$4 sm:$0xff]  }
 0x33e   :  { %5804 = vmatprep.subr.bf16.mxu0 %v7972_v7  ;;  %v8053_v0 = vld [vmem:[#allocation11 + $0x114] ss:$8 sps:$4 sm:$0xff]  }
 0x340   :  { %5252 = vmatpush1.bf16.msra.mxu1 %v7925_v24 }
 0x341   :  { %5805 = vmatpush1.bf16.msra.mxu0 %v7970_v22  ;;  %5253 = vmatprep.subr.bf16.mxu1 %v7933_v6  ;;  %v8015_v6 = vld [vmem:[#allocation7 + $0xec8] ss:$16 sps:$4 sm:$0xff]  }
 0x342   :  { %5806 = vmatprep.subr.bf16.mxu0 %v7978_v8 }
 0x344   :  { %5254 = vmatpush1.bf16.msra.mxu1 %v7931_v9 }
 0x345   :  { %5807 = vmatpush1.bf16.msra.mxu0 %v7976_v23  ;;  %5255 = vmatprep.subr.bf16.mxu1 %v7939_v27  ;;  %v8023_v27 = vld [vmem:[#allocation7 + $0xeec] ss:$16 sps:$4 sm:$0xff]  }
 0x346   :  { %5808 = vmatprep.subr.bf16.mxu0 %v7984_v48 }
 0x348   :  { %5256 = vmatpush1.bf16.msra.mxu1 %v7937_v49 }
 0x349   :  { %5809 = vmatpush1.bf16.msra.mxu0 %v7982_v36  ;;  %5257 = vmatprep.subr.bf16.mxu1 %v7945_v50 }
 0x34a   :  { %5810 = vmatprep.subr.bf16.mxu0 %v7990_v55  ;;  %v8021_v55 = vld [vmem:[#allocation7 + $0xee8] ss:$16 sps:$4 sm:$0xff]  }
 0x34c   :  { %5258 = vmatpush1.bf16.msra.mxu1 %v7943_v57 }
 0x34d   :  { %5811 = vmatpush1.bf16.msra.mxu0 %v7988_v1  ;;  %5259 = vmatprep.subr.bf16.mxu1 %v7951_v12  ;;  %v8029_v12 = vld [vmem:[#allocation7 + $0xf2c] ss:$16 sps:$4 sm:$0xff]  }
 0x34e   :  { %5812 = vmatprep.subr.bf16.mxu0 %v7996_v61  ;;  %v8027_v61 = vld [vmem:[#allocation7 + $0xf28] ss:$16 sps:$4 sm:$0xff]  }
 0x350   :  { %5260 = vmatpush1.bf16.msra.mxu1 %v7949_v31  ;;  %v8032_v31 = vld [vmem:[#allocation7 + $0xf4c] ss:$16 sps:$4 sm:$0xff]  }
 0x351   :  { %5813 = vmatpush1.bf16.msra.mxu0 %v7994_v28  ;;  %5261 = vmatprep.subr.bf16.mxu1 %v7957_v13  ;;  %v8030_v28 = vld [vmem:[#allocation7 + $0xf48] ss:$16 sps:$4 sm:$0xff]   ;;  %v8035_v13 = vld [vmem:[#allocation7 + $0xf6c] ss:$16 sps:$4 sm:$0xff]  }
 0x352   :  { %5814 = vmatprep.subr.bf16.mxu0 %v8002_v19  ;;  %v8033_v19 = vld [vmem:[#allocation7 + $0xf68] ss:$16 sps:$4 sm:$0xff]  }
 0x354   :  { %5262 = vmatpush1.bf16.msra.mxu1 %v7955_v14  ;;  %v8038_v14 = vld [vmem:[#allocation7 + $0xf8c] ss:$16 sps:$4 sm:$0xff]  }
 0x355   :  { %5815 = vmatpush1.bf16.msra.mxu0 %v8000_v15  ;;  %5263 = vmatprep.subr.bf16.mxu1 %v7963_v16  ;;  %v8036_v15 = vld [vmem:[#allocation7 + $0xf88] ss:$16 sps:$4 sm:$0xff]   ;;  %v8041_v16 = vld [vmem:[#allocation7 + $0xfac] ss:$16 sps:$4 sm:$0xff]  }
 0x356   :  { %5816 = vmatprep.subr.bf16.mxu0 %v8008_v17  ;;  %v8039_v17 = vld [vmem:[#allocation7 + $0xfa8] ss:$16 sps:$4 sm:$0xff]  }
 0x358   :  { %5264 = vmatpush1.bf16.msra.mxu1 %v7961_v25  ;;  %v8044_v25 = vld [vmem:[#allocation7 + $0xfcc] ss:$16 sps:$4 sm:$0xff]  }
 0x359   :  { %5817 = vmatpush1.bf16.msra.mxu0 %v8006_v29  ;;  %5265 = vmatprep.subr.bf16.mxu1 %v7969_v37  ;;  %v8042_v29 = vld [vmem:[#allocation7 + $0xfc8] ss:$16 sps:$4 sm:$0xff]   ;;  %v8047_v37 = vld [vmem:[#allocation7 + $0xfec] ss:$16 sps:$4 sm:$0xff]  }
 0x35a   :  { %5818 = vmatprep.subr.bf16.mxu0 %v8014_v38  ;;  %v8045_v38 = vld [vmem:[#allocation7 + $0xfe8] ss:$16 sps:$4 sm:$0xff]  }
 0x35c   :  { %5266 = vmatpush1.bf16.msra.mxu1 %v7967_v53 }
 0x35d   :  { %5819 = vmatpush1.bf16.msra.mxu0 %v8012_v59  ;;  %5267 = vmatprep.subr.bf16.mxu1 %v7975_v18 }
 0x35e   :  { %5820 = vmatprep.subr.bf16.mxu0 %v8020_v21 }
 0x360   :  { %5268 = vmatpush1.bf16.msra.mxu1 %v7973_v39 }
 0x361   :  { %5821 = vmatpush1.bf16.msra.mxu0 %v8018_v62  ;;  %5319 = vmatprep.subr.bf16.mxu1 %v7981_v58 }
 0x363   :  { %5270 = vmatmul.mubr.bf16.vlgmr.msra.gmra.mrb[40].mxu1 %v8667_v54  ;;  %v5364_v54 = vsub.s32 0, %v8744_v42 }
 0x364   :  { %5320 = vmatpush1.bf16.msra.mxu1 %v7979_v56  ;;  %5351 = vmatprep.mubr.bf16.mxu1 %v8673_v3  ;;  %v8747_v3 = vld [vmem:[#allocation10] sm:$0xf] }
 0x365   :  { %5321 = vmatprep.subr.bf16.mxu1 %v7987_v33  ;;  %v5365_v46 = vrot.slane %v8747_v3, %v5364_v54  ;;  %v5369_v32 = vrot.slane %v8747_v3, %v5368_v60 }
 0x368   :  { %5322 = vmatpush1.bf16.msra.mxu1 %v7985_v10 }
 0x369   :  { %5323 = vmatprep.subr.bf16.mxu1 %v7993_v11 }
 0x36c   :  { %5324 = vmatpush1.bf16.msra.mxu1 %v7991_v30 }
 0x36d   :  { %5325 = vmatprep.subr.bf16.mxu1 %v7999_v20  ;;  %v8050_v20 = vld [vmem:[#allocation11 + $0x104] ss:$8 sps:$4 sm:$0xff]  }
 0x36e   :  { %5831 = vmatprep.subr.bf16.mxu0 %v8050_v20 }
 0x370   :  { %5326 = vmatpush1.bf16.msra.mxu1 %v7997_v63  ;;  %v8056_v63 = vld [vmem:[#allocation11 + $0x124] ss:$8 sps:$4 sm:$0xff]  }
 0x371   :  { %5327 = vmatprep.subr.bf16.mxu1 %v8005_v41  ;;  %v8054_v41 = vld [vmem:[#allocation11 + $0x120] ss:$8 sps:$4 sm:$0xff]  }
 0x374   :  { %5328 = vmatpush1.bf16.msra.mxu1 %v8003_v34  ;;  %v8057_v34 = vld [vmem:[#allocation11 + $0x130] ss:$8 sps:$4 sm:$0xff]  }
 0x375   :  { %5329 = vmatprep.subr.bf16.mxu1 %v8011_v26  ;;  %v8062_v26 = vld [vmem:[#allocation11 + $0x144] ss:$8 sps:$4 sm:$0xff]  }
 0x376   :  { %v5025_v51 = vpop.f32.mrb[28].mxu1 }
 0x377   :  { %v8756_v2 = vpop.f32.mrb[28].mxu0  ;;  %v5026_v4 = vadd.f32 %v5025_v51, %v8737_v45  ;;  %v5027_v7 = vpop.f32.mrb[29].mxu1  ;;  %v8026_v45 = vld [vmem:[#allocation7 + $0xf0c] ss:$16 sps:$4 sm:$0xff]   ;;  %v8068_v51 = vld [vmem:[#allocation11 + $0x164] ss:$8 sps:$4 sm:$0xff]  }
 0x378   :  { %v8759_v5 = vpop.f32.mrb[29].mxu0  ;;  %v5028_v24 = vadd.f32 %v5027_v7, %v8740_v40  ;;  %v5029_v22 = vpop.f32.mrb[30].mxu1  ;;  %5330 = vmatpush1.bf16.msra.mxu1 %v8009_v43  ;;  %v8024_v40 = vld [vmem:[#allocation7 + $0xf08] ss:$16 sps:$4 sm:$0xff]   ;;  %v8060_v43 = vld [vmem:[#allocation11 + $0x140] ss:$8 sps:$4 sm:$0xff]  }
 0x379   :  { %v5152_v8 = vpop.f32.mrb[30].mxu0  ;;  %v5382_v9 = vadd.f32 %v5365_v46, %v5026_v4  ;;  %v5030_v23 = vpop.f32.mrb[31].mxu1  ;;  %5331 = vmatprep.subr.bf16.mxu1 %v8017_v47  ;;  %v8065_v46 = vld [vmem:[#allocation11 + $0x154] ss:$8 sps:$4 sm:$0xff]   ;;  %v8063_v47 = vld [vmem:[#allocation11 + $0x150] ss:$8 sps:$4 sm:$0xff]  }
 0x37a   :  { %v5153_v48 = vpop.f32.mrb[31].mxu0  ;;  %v5383_v49 = vadd.f32 %v5369_v32, %v5028_v24  ;;  %v8066_v32 = vld [vmem:[#allocation11 + $0x160] ss:$8 sps:$4 sm:$0xff]   ;;  %v8069_v4 = vld [vmem:[#allocation11 + $0x170] ss:$8 sps:$4 sm:$0xff]  }
 0x37b   :  { %v5386_v36 = vmax.f32 %v5382_v9, 0.0  ;;  %v8074_v7 = vld [vmem:[#allocation11 + $0x184] ss:$8 sps:$4 sm:$0xff]   ;;  %v8077_v24 = vld [vmem:[#allocation11 + $0x194] ss:$8 sps:$4 sm:$0xff]  }
 0x37c   :  { %v5387_v50 = vmax.f32 %v5383_v49, 0.0  ;;  %5332 = vmatpush1.bf16.msra.mxu1 %v8015_v6  ;;  %v8075_v22 = vld [vmem:[#allocation11 + $0x190] ss:$8 sps:$4 sm:$0xff]   ;;  %v8080_v6 = vld [vmem:[#allocation11 + $0x1a4] ss:$8 sps:$4 sm:$0xff]  }
 0x37d   :  { %5333 = vmatprep.subr.bf16.mxu1 %v8023_v27  ;;  %v5390_v1 = vpack.c.bf16 %v5386_v36, %v5386_v36  ;;  %v8078_v8 = vld [vmem:[#allocation11 + $0x1a0] ss:$8 sps:$4 sm:$0xff]   ;;  %v8083_v9 = vld [vmem:[#allocation11 + $0x1b4] ss:$8 sps:$4 sm:$0xff]   ;;  %v8081_v23 = vld [vmem:[#allocation11 + $0x1b0] ss:$8 sps:$4 sm:$0xff]  }
 0x37e   :  { %v5391_v57 = vpack.c.bf16 %v5387_v50, %v5387_v50  ;;  %v8086_v27 = vld [vmem:[#allocation11 + $0x1c4] ss:$8 sps:$4 sm:$0xff]   ;;  %v8084_v48 = vld [vmem:[#allocation11 + $0x1c0] ss:$8 sps:$4 sm:$0xff]   ;;  %v8089_v49 = vld [vmem:[#allocation11 + $0x1d4] ss:$8 sps:$4 sm:$0xff]  }
 0x37f   :  { %v8087_v36 = vld [vmem:[#allocation11 + $0x1d0] ss:$8 sps:$4 sm:$0xff]  }
 0x380   :  { %5334 = vmatpush1.bf16.msra.mxu1 %v8021_v55  ;;  %5822 = vmatprep.mubr.bf16.mxu0 %v5391_v57 }
 0x381   :  { %5823 = vmatmul.mubr.bf16.vlgmr.msra.gmra.mrb[40].mxu0 %v5390_v1  ;;  %5335 = vmatprep.subr.bf16.mxu1 %v8026_v45 }
 0x384   :  { %5336 = vmatpush1.bf16.msra.mxu1 %v8024_v40  ;;  %v8092_v40 = vld [vmem:[#allocation11 + $0x1e4] ss:$8 sps:$4 sm:$0xff]  }
 0x385   :  { %5337 = vmatprep.subr.bf16.mxu1 %v8029_v12 }
 0x388   :  { %5338 = vmatpush1.bf16.msra.mxu1 %v8027_v61 }
 0x389   :  { %5339 = vmatprep.subr.bf16.mxu1 %v8032_v31 }
 0x38c   :  { %5340 = vmatpush1.bf16.msra.mxu1 %v8030_v28  ;;  %v8090_v28 = vld [vmem:[#allocation11 + $0x1e0] ss:$8 sps:$4 sm:$0xff]  }
 0x38d   :  { %5341 = vmatprep.subr.bf16.mxu1 %v8035_v13 }
 0x390   :  { %5342 = vmatpush1.bf16.msra.mxu1 %v8033_v19 }
 0x391   :  { %5343 = vmatprep.subr.bf16.mxu1 %v8038_v14 }
 0x394   :  { %5344 = vmatpush1.bf16.msra.mxu1 %v8036_v15 }
 0x395   :  { %5345 = vmatprep.subr.bf16.mxu1 %v8041_v16  ;;  %v8095_v16 = vld [vmem:[#allocation11 + $0x1f4] ss:$8 sps:$4 sm:$0xff]  }
 0x398   :  { %5346 = vmatpush1.bf16.msra.mxu1 %v8039_v17  ;;  %v8093_v17 = vld [vmem:[#allocation11 + $0x1f0] ss:$8 sps:$4 sm:$0xff]  }
 0x399   :  { %5347 = vmatprep.subr.bf16.mxu1 %v8044_v25  ;;  %v8096_v25 = vld [vmem:[#allocation14 + $0x40] sm:$0xff]  }
 0x39c   :  { %5348 = vmatpush1.bf16.msra.mxu1 %v8042_v29  ;;  %v8097_v29 = vld [vmem:[#allocation14] sm:$0xff]  }
 0x39d   :  { %5349 = vmatprep.subr.bf16.mxu1 %v8047_v37  ;;  %v8098_v37 = vld [vmem:[#allocation14 + $0x48] sm:$0xff]  }
 0x3a0   :  { %5350 = vmatpush1.bf16.msra.mxu1 %v8045_v38  ;;  %v8099_v38 = vld [vmem:[#allocation14 + $0x8] sm:$0xff]  }
 0x3a1   :  { %6878 = vmatprep.subr.bf16.mxu1 %v8096_v25 }
 0x3a3   :  { %5352 = vmatmul.mubr.bf16.vlgmr.msra.gmra.mrb[44].mxu1 %v8691_v52  ;;  %v8048_v52 = vld [vmem:[#allocation11 + $0x100] ss:$8 sps:$4 sm:$0xff]  }
 0x3a4   :  { %5832 = vmatpush1.bf16.msra.mxu0 %v8048_v52  ;;  %6879 = vmatpush3.bf16.msra.mxu1 %v8097_v29 }
 0x3a5   :  { %5833 = vmatprep.subr.bf16.mxu0 %v8053_v0  ;;  %6880 = vmatprep.subr.bf16.mxu1 %v8098_v37 }
 0x3a8   :  { %6881 = vmatpush3.bf16.msra.mxu1 %v8099_v38 }
 0x3b6   :  { %v5107_v53 = vpop.f32.mrb[32].mxu1 }
 0x3b7   :  { %v8763_v59 = vpop.f32.mrb[32].mxu0  ;;  %v5108_v18 = vadd.f32 %v5107_v53, %v8730_v35  ;;  %v5109_v21 = vpop.f32.mrb[33].mxu1  ;;  %v8051_v35 = vld [vmem:[#allocation11 + $0x110] ss:$8 sps:$4 sm:$0xff]  }
 0x3b8   :  { %v8766_v39 = vpop.f32.mrb[33].mxu0  ;;  %v5110_v62 = vadd.f32 %v5109_v21, %v8734_v44  ;;  %v5111_v58 = vpop.f32.mrb[34].mxu1  ;;  %5834 = vmatpush1.bf16.msra.mxu0 %v8051_v35  ;;  %v8059_v44 = vld [vmem:[#allocation11 + $0x134] ss:$8 sps:$4 sm:$0xff]  }
 0x3b9   :  { %v5234_v56 = vpop.f32.mrb[34].mxu0  ;;  %v5149_v33 = vadd.f32 %v8756_v2, %v5108_v18  ;;  %v5112_v10 = vpop.f32.mrb[35].mxu1  ;;  %5835 = vmatprep.subr.bf16.mxu0 %v8056_v63  ;;  %v8071_v2 = vld [vmem:[#allocation11 + $0x174] ss:$8 sps:$4 sm:$0xff]   ;;  %v8106_v58 = vld [vmem:[#allocation14 + $0x68] sm:$0xff]   ;;  %v5372_v63 = vsub.s32 2, %v8744_v42 }
 0x3ba   :  { %v5235_v11 = vpop.f32.mrb[35].mxu0  ;;  %v8771_v30 = vadd.f32 %v8759_v5, %v5110_v62  ;;  %v8072_v5 = vld [vmem:[#allocation11 + $0x180] ss:$8 sps:$4 sm:$0xff]   ;;  %v8100_v53 = vld [vmem:[#allocation14 + $0x50] sm:$0xff]  }
 0x3bb   :  { %6882 = vmatprep.subr.bf16.mxu1 %v8100_v53  ;;  %v8102_v18 = vld [vmem:[#allocation14 + $0x58] sm:$0xff]   ;;  %v8105_v62 = vld [vmem:[#allocation14 + $0x20] sm:$0xff]   ;;  %v8107_v56 = vld [vmem:[#allocation14 + $0x28] sm:$0xff]  }
 0x3bc   :  { %5836 = vmatpush1.bf16.msra.mxu0 %v8054_v41  ;;  %v8103_v21 = vld [vmem:[#allocation14 + $0x18] sm:$0xff]   ;;  %v5376_v41 = vsub.s32 3, %v8744_v42 }
 0x3bd   :  { %5837 = vmatprep.subr.bf16.mxu0 %v8059_v44  ;;  %v5373_v44 = vrot.slane %v8747_v3, %v5372_v63 }
 0x3c0   :  { %5838 = vmatpush1.bf16.msra.mxu0 %v8057_v34 }
 0x3c1   :  { %5839 = vmatprep.subr.bf16.mxu0 %v8062_v26  ;;  %v5377_v26 = vrot.slane %v8747_v3, %v5376_v41  ;;  %v5458_v3 = vld [vmem:[#allocation13] sm:$0x3] }
 0x3c4   :  { %5840 = vmatpush1.bf16.msra.mxu0 %v8060_v43 }
 0x3c5   :  { %5841 = vmatprep.subr.bf16.mxu0 %v8065_v46 }
 0x3c8   :  { %5842 = vmatpush1.bf16.msra.mxu0 %v8063_v47 }
 0x3c9   :  { %5843 = vmatprep.subr.bf16.mxu0 %v8068_v51 }
 0x3cc   :  { %5844 = vmatpush1.bf16.msra.mxu0 %v8066_v32 }
 0x3cd   :  { %5845 = vmatprep.subr.bf16.mxu0 %v8071_v2 }
 0x3d0   :  { %5846 = vmatpush1.bf16.msra.mxu0 %v8069_v4 }
 0x3d1   :  { %5847 = vmatprep.subr.bf16.mxu0 %v8074_v7 }
 0x3d4   :  { %5848 = vmatpush1.bf16.msra.mxu0 %v8072_v5 }
 0x3d5   :  { %5849 = vmatprep.subr.bf16.mxu0 %v8077_v24 }
 0x3d8   :  { %5850 = vmatpush1.bf16.msra.mxu0 %v8075_v22 }
 0x3d9   :  { %5851 = vmatprep.subr.bf16.mxu0 %v8080_v6  ;;  %v8108_v6 = vld [vmem:[#allocation14 + $0x70] sm:$0xff]  }
 0x3dc   :  { %5852 = vmatpush1.bf16.msra.mxu0 %v8078_v8  ;;  %v8109_v8 = vld [vmem:[#allocation14 + $0x30] sm:$0xff]  }
 0x3dd   :  { %5853 = vmatprep.subr.bf16.mxu0 %v8083_v9  ;;  %v8110_v9 = vld [vmem:[#allocation14 + $0x78] sm:$0xff]  }
 0x3e0   :  { %5854 = vmatpush1.bf16.msra.mxu0 %v8081_v23  ;;  %v8111_v23 = vld [vmem:[#allocation14 + $0x38] sm:$0xff]  }
 0x3e1   :  { %5855 = vmatprep.subr.bf16.mxu0 %v8086_v27  ;;  %v5463_v27 = vrot.slane %v5458_v3, %v5364_v54 }
 0x3e4   :  { %5856 = vmatpush1.bf16.msra.mxu0 %v8084_v48  ;;  %v5467_v48 = vrot.slane %v5458_v3, %v5368_v60 }
 0x3e5   :  { %5857 = vmatprep.subr.bf16.mxu0 %v8089_v49 }
 0x3e8   :  { %5858 = vmatpush1.bf16.msra.mxu0 %v8087_v36 }
 0x3e9   :  { %5859 = vmatprep.subr.bf16.mxu0 %v8092_v40 }
 0x3ec   :  { %5860 = vmatpush1.bf16.msra.mxu0 %v8090_v28  ;;  %v6861_v28 = vld [vmem:[#allocation16] ss:$0 sm:$0xff] }
 0x3ed   :  { %5861 = vmatprep.subr.bf16.mxu0 %v8095_v16 }
 0x3f0   :  { %5862 = vmatpush1.bf16.msra.mxu0 %v8093_v17 }
 0x3f6   :  { %v5189_v50 = vpop.f32.mrb[36].mxu1 }
 0x3f7   :  { %v5312_v55 = vpop.f32.mrb[36].mxu0  ;;  %v5190_v45 = vadd.f32 %v5189_v50, %v5149_v33  ;;  %v5191_v57 = vpop.f32.mrb[37].mxu1 }
 0x3f8   :  { %v5314_v1 = vpop.f32.mrb[37].mxu0  ;;  %v5192_v12 = vadd.f32 %v5191_v57, %v8771_v30  ;;  %v5193_v61 = vpop.f32.mrb[38].mxu1 }
 0x3f9   :  { %v5316_v31 = vpop.f32.mrb[38].mxu0  ;;  %v5231_v13 = vadd.f32 %v8763_v59, %v5190_v45  ;;  %v5194_v19 = vpop.f32.mrb[39].mxu1  ;;  %v8101_v59 = vld [vmem:[#allocation14 + $0x10] sm:$0xff]  }
 0x3fa   :  { %v5317_v14 = vpop.f32.mrb[39].mxu0  ;;  %v5233_v15 = vadd.f32 %v8766_v39, %v5192_v12  ;;  %6883 = vmatpush3.bf16.msra.mxu1 %v8101_v59  ;;  %v8104_v39 = vld [vmem:[#allocation14 + $0x60] sm:$0xff]  }
 0x3fb   :  { %6884 = vmatprep.subr.bf16.mxu1 %v8102_v18 }
 0x3fe   :  { %6885 = vmatpush3.bf16.msra.mxu1 %v8103_v21 }
 0x3ff   :  { %6886 = vmatprep.subr.bf16.mxu1 %v8104_v39 }
 0x402   :  { %6887 = vmatpush3.bf16.msra.mxu1 %v8105_v62 }
 0x403   :  { %6888 = vmatprep.subr.bf16.mxu1 %v8106_v58 }
 0x406   :  { %6889 = vmatpush3.bf16.msra.mxu1 %v8107_v56 }
 0x407   :  { %6890 = vmatprep.subr.bf16.mxu1 %v8108_v6 }
 0x40a   :  { %6891 = vmatpush3.bf16.msra.mxu1 %v8109_v8 }
 0x40b   :  { %6892 = vmatprep.subr.bf16.mxu1 %v8110_v9 }
 0x40e   :  { %6893 = vmatpush3.bf16.msra.mxu1 %v8111_v23 }
 0x436   :  { %v5271_v33 = vpop.f32.mrb[40].mxu1 }
 0x437   :  { %v5272_v10 = vadd.f32 %v5271_v33, %v5231_v13  ;;  %v5273_v11 = vpop.f32.mrb[41].mxu1 }
 0x438   :  { %v5274_v30 = vadd.f32 %v5273_v11, %v5233_v15  ;;  %v5275_v52 = vpop.f32.mrb[42].mxu1 }
 0x439   :  { %v5313_v20 = vadd.f32 %v5312_v55, %v5272_v10  ;;  %v5276_v0 = vpop.f32.mrb[43].mxu1 }
 0x43a   :  { %v5315_v35 = vadd.f32 %v5314_v1, %v5274_v30 }
 0x476   :  { %v5353_v34 = vpop.f32.mrb[44].mxu1 }
 0x477   :  { %v5354_v43 = vadd.f32 %v5353_v34, %v5313_v20  ;;  %v5355_v46 = vpop.f32.mrb[45].mxu1 }
 0x478   :  { %v5356_v47 = vadd.f32 %v5355_v46, %v5315_v35  ;;  %v5357_v51 = vpop.f32.mrb[46].mxu1 }
 0x479   :  { %v5384_v32 = vadd.f32 %v5373_v44, %v5354_v43  ;;  %v5358_v2 = vpop.f32.mrb[47].mxu1 }
 0x47a   :  { %v5385_v4 = vadd.f32 %v5377_v26, %v5356_v47 }
 0x47b   :  { %v5388_v7 = vmax.f32 %v5384_v32, 0.0 }
 0x47c   :  { %v5389_v5 = vmax.f32 %v5385_v4, 0.0 }
 0x47d   :  { %v5392_v22 = vpack.c.bf16 %v5388_v7, %v5388_v7 }
 0x47e   :  { %v5393_v24 = vpack.c.bf16 %v5389_v5, %v5389_v5 }
 0x480   :  { %5863 = vmatprep.mubr.bf16.mxu0 %v5393_v24 }
 0x481   :  { %5864 = vmatmul.mubr.bf16.vlgmr.msra.gmra.mrb[40].mxu0 %v5392_v22 }
 0x554   :  { %v5865_v49 = vpop.f32.mrb[40].mxu0 }
 0x555   :  { %v6900_v36 = vadd.f32 %v5865_v49, %v5463_v27  ;;  %v5867_v50 = vpop.f32.mrb[41].mxu0 }
 0x556   :  { %v6901_v55 = vadd.f32 %v5867_v50, %v5467_v48  ;;  %v5869_v45 = vpop.f32.mrb[42].mxu0 }
 0x557   :  { %v5872_v57 = vmax.f32 %v6900_v36, 0.0  ;;  %v5870_v1 = vpop.f32.mrb[43].mxu0 }
 0x558   :  { %v5873_v40 = vmax.f32 %v6901_v55, 0.0 }
 0x559   :  { %v5874_v61 = vpack.c.bf16 %v5872_v57, %v5872_v57 }
 0x55a   :  { %v5875_v12 = vpack.c.bf16 %v5873_v40, %v5873_v40 }
 0x55c   :  { %6043 = vmatprep.mubr.bf16.mxu1 %v5875_v12 }
 0x55d   :  { %6044 = vmatmul.mubr.bf16.vlgmr.msra.gmra.mrb[48].mxu1 %v5874_v61 }
 0x630   :  { %v6894_v31 = vpop.f32.mrb[48].mxu1 }
 0x631   :  { %v6895_v13 = vpop.f32.mrb[49].mxu1 }
 0x632   :  { %v6896_v54 = vadd.f32 %v6895_v13, %v6894_v31  ;;  %v6897_v42 = vpop.f32.mrb[50].mxu1 }
 0x633   :  { %v6898_v60 = vpop.f32.mrb[51].mxu1 }
 0x634   :  { %v6046_v19 = vadd.f32 %v6896_v54, %v6861_v28 }
 0x636   :  { %6051 = vst [vmem:[#allocation17] sm:$0xff] %v6046_v19 }
 0x637   :  { %8321 = shalt.err (!%p8318_p6)
}
 0x638   :  { %s8322_s10 = scalar_lea.hbm %s8805_s9, 128 }
 0x639   :  { %p8323_p7 = scmp.ne.s32.totalorder %s8805_s9, %s8322_s10  ;;  %p8326_p8 = scmp.lt.u32.totalorder %s8322_s10, %s8805_s9 }
 0x63b   :  { %p8328_p9 = pnand %p8326_p8, %p8323_p7 }
 0x63d   :  { %8331 = shalt.err (!%p8328_p9)
}
 0x63e   :  { %6061 = dma.vmem_to_hbm [thread:$0]  %s6059_s29, 128, %s8805_s9, [#allocation4]  }
 0x63f   :  { %8342 = dma.done.wait [#allocation4], 128  }
 0x640   :  { %8343 = vsyncadd [#allocation4], 4294967168 }
 0x641   :  { %6065 = vsyncpa [#allocation3], 1 }
 0x642   :  { %6066 = vsyncpa [#allocation6], 1 }
 0x643   :  { %6067 = vsyncpa [#allocation9], 1 }
 0x644   :  { %6068 = vsyncpa [#allocation12], 1 }
 0x645   :  { %6069 = vsyncpa [#allocation15], 1 }
 0x646   :  { %6070 = vsyncpa [#allocation4], 1 }

// kernel: tpu_custom_call.1
= control target key start
LH: loop header
LB: loop body
LE: loop exit
PB: predicated region body
PF: predicated region fallthrough
CT: control target
= control target key end

     0   :  { %14 = vsyncpa [#allocation3], 0  ;;  %s8796_s0 = inlined_call_operand.hbm [shape: bf16[8,2048], index: 0, kind: input, shape index: {}]   ;;  %s8797_s1 = inlined_call_operand.hbm [shape: bf16[8,768], index: 1, kind: input, shape index: {}]   ;;  %s8798_s2 = inlined_call_operand.hbm [shape: bf16[2048,512], index: 2, kind: input, shape index: {}]   ;;  %s8799_s3 = inlined_call_operand.hbm [shape: bf16[768,512], index: 3, kind: input, shape index: {}]   ;;  %s8800_s4 = inlined_call_operand.hbm [shape: f32[1,512], index: 4, kind: input, shape index: {}]   ;;  %s8801_s5 = inlined_call_operand.hbm [shape: bf16[512,256], index: 5, kind: input, shape index: {}]   ;;  %s8802_s6 = inlined_call_operand.hbm [shape: f32[1,256], index: 6, kind: input, shape index: {}]   ;;  %s8803_s7 = inlined_call_operand.hbm [shape: bf16[256,128], index: 7, kind: input, shape index: {}]   ;;  %s8804_s8 = inlined_call_operand.hbm [shape: f32[1,128], index: 8, kind: input, shape index: {}]   ;;  %s8805_s9 = inlined_call_operand.hbm [shape: f32[8,128], index: 9, kind: output, shape index: {}]  }
   0x1   :  { %15 = vsyncpa [#allocation6], 0 }
   0x2   :  { %16 = vsyncpa [#allocation9], 0 }
   0x3   :  { %17 = vsyncpa [#allocation12], 0 }
   0x4   :  { %18 = vsyncpa [#allocation15], 0 }
   0x5   :  { %19 = vsyncpa [#allocation4], 0  ;;  %s8344_s30 = smov [#allocation5]   ;;  %s8112_s13 = scalar_lea.hbm %s8797_s1, 384 }
   0x6   :  { %s36_s10 = sshll.u32 %s8344_s30, 4  ;;  %p8113_p0 = scmp.ne.s32.totalorder %s8797_s1, %s8112_s13  ;;  %s37_s10 = int_to_ptr.vmem [resolvable:$true] %s36_s10 }
   0x7   :  { %p8116_p1 = scmp.lt.u32.totalorder %s8112_s13, %s8797_s1 }
   0x9   :  { %p8118_p2 = pnand %p8116_p1, %p8113_p0 }
   0xb   :  { %8121 = shalt.err (!%p8118_p2)
}
   0xc   :  { %s8122_s18 = scalar_lea.vmem %s37_s10, 384  ;;  %p8127_p4 = scmp.lt.s32.totalorder %s37_s10, %s37_s10 }
   0xd   :  { %p8123_p3 = scmp.ne.s32.totalorder %s37_s10, %s8122_s18  ;;  %p8128_p5 = scmp.lt.s32.totalorder %s8122_s18, %s8122_s18 }
   0xf   :  { %p8129_p6 = por %p8128_p5, %p8127_p4 }
  0x11   :  { %p8130_p7 = pnand %p8129_p6, %p8123_p3 }
  0x13   :  { %8133 = shalt.err (!%p8130_p7)
}
  0x14   :  { %39 = dma.hbm_to_vmem [thread:$0]  %s8797_s1, 384, %s37_s10, [#allocation6]  }
  0x15   :  { %s8345_s21 = smov [#allocation8]   ;;  %s8346_s23 = smov [#allocation11]  }
  0x16   :  { %s57_s22 = sshll.u32 %s8345_s21, 4  ;;  %s79_s24 = sshll.u32 %s8346_s23, 4  ;;  %s58_s22 = int_to_ptr.vmem [resolvable:$true] %s57_s22  ;;  %s80_s24 = int_to_ptr.vmem [resolvable:$true] %s79_s24 }
  0x17   :  { %s8134_s27 = scalar_lea.hbm %s8799_s3, 24576 }
  0x18   :  { %p8135_p8 = scmp.ne.s32.totalorder %s8799_s3, %s8134_s27  ;;  %p8138_p9 = scmp.lt.u32.totalorder %s8134_s27, %s8799_s3 }
  0x1a   :  { %p8140_p10 = pnand %p8138_p9, %p8135_p8 }
  0x1c   :  { %8143 = shalt.err (!%p8140_p10)
}
  0x1d   :  { %s8144_s1 = scalar_lea.vmem %s58_s22, 24576  ;;  %p8149_p12 = scmp.lt.s32.totalorder %s58_s22, %s58_s22 }
  0x1e   :  { %p8145_p11 = scmp.ne.s32.totalorder %s58_s22, %s8144_s1  ;;  %p8150_p13 = scmp.lt.s32.totalorder %s8144_s1, %s8144_s1 }
  0x20   :  { %p8151_p0 = por %p8150_p13, %p8149_p12 }
  0x22   :  { %p8152_p1 = pnand %p8151_p0, %p8145_p11 }
  0x24   :  { %8155 = shalt.err (!%p8152_p1)
}
  0x25   :  { %s8347_s10 = smov 256   ;;  %s8348_s12 = smov 16  }
  0x26   :  { %63 = dma.hbm_to_vmem [thread:$0]  %s8799_s3, 24576, %s58_s22, [#allocation9], %s8347_s10, %s8347_s10, %s8348_s12  }
  0x27   :  { %s8156_s17 = scalar_lea.hbm %s8801_s5, 8192 }
  0x28   :  { %p8157_p2 = scmp.ne.s32.totalorder %s8801_s5, %s8156_s17  ;;  %p8160_p3 = scmp.lt.u32.totalorder %s8156_s17, %s8801_s5 }
  0x2a   :  { %p8162_p4 = pnand %p8160_p3, %p8157_p2 }
  0x2c   :  { %8165 = shalt.err (!%p8162_p4)
}
  0x2d   :  { %s8166_s23 = scalar_lea.vmem %s80_s24, 8192  ;;  %p8171_p6 = scmp.lt.s32.totalorder %s80_s24, %s80_s24 }
  0x2e   :  { %p8167_p5 = scmp.ne.s32.totalorder %s80_s24, %s8166_s23  ;;  %p8172_p7 = scmp.lt.s32.totalorder %s8166_s23, %s8166_s23 }
  0x30   :  { %p8173_p8 = por %p8172_p7, %p8171_p6 }
  0x32   :  { %p8174_p9 = pnand %p8173_p8, %p8167_p5 }
  0x34   :  { %8177 = shalt.err (!%p8174_p9)
}
  0x35   :  { %s8349_s3 = smov 128   ;;  %s8350_s22 = smov 8  }
  0x36   :  { %85 = dma.hbm_to_vmem [thread:$0]  %s8801_s5, 8192, %s80_s24, [#allocation12], %s8349_s3, %s8349_s3, %s8350_s22  }
  0x37   :  { %s8351_s27 = smov [#allocation14]   ;;  %s8178_s11 = scalar_lea.hbm %s8803_s7, 2048 }
  0x38   :  { %s101_s28 = sshll.u32 %s8351_s27, 4  ;;  %p8179_p10 = scmp.ne.s32.totalorder %s8803_s7, %s8178_s11  ;;  %s102_s28 = int_to_ptr.vmem [resolvable:$true] %s101_s28 }
  0x39   :  { %p8182_p11 = scmp.lt.u32.totalorder %s8178_s11, %s8803_s7 }
  0x3b   :  { %p8184_p12 = pnand %p8182_p11, %p8179_p10 }
  0x3d   :  { %8187 = shalt.err (!%p8184_p12)
}
  0x3e   :  { %s8188_s16 = scalar_lea.vmem %s102_s28, 2048  ;;  %p8193_p0 = scmp.lt.s32.totalorder %s102_s28, %s102_s28 }
  0x3f   :  { %p8189_p13 = scmp.ne.s32.totalorder %s102_s28, %s8188_s16  ;;  %p8194_p1 = scmp.lt.s32.totalorder %s8188_s16, %s8188_s16 }
  0x41   :  { %p8195_p2 = por %p8194_p1, %p8193_p0 }
  0x43   :  { %p8196_p3 = pnand %p8195_p2, %p8189_p13 }
  0x45   :  { %8199 = shalt.err (!%p8196_p3)
}
  0x46   :  { %s8352_s5 = smov 64   ;;  %s8353_s24 = smov 4  }
  0x47   :  { %107 = dma.hbm_to_vmem [thread:$0]  %s8803_s7, 2048, %s102_s28, [#allocation15], %s8352_s5, %s8352_s5, %s8353_s24  }
  0x48   :  { %s8354_s19 = smov [#allocation2]   ;;  %s8355_s21 = smov [#allocation7]  }
  0x49   :  { %s26_s20 = sshll.u32 %s8354_s19, 4  ;;  %s45_s23 = sshll.u32 %s8355_s21, 4  ;;  %s27_s20 = int_to_ptr.vmem [resolvable:$true] %s26_s20  ;;  %s8461_s23 = int_to_ptr.vmem [resolvable:$true] %s45_s23 }
  0x4a   :  { %s8200_s25 = scalar_lea.hbm %s8796_s0, 1024 }
  0x4b   :  { %p8201_p4 = scmp.ne.s32.totalorder %s8796_s0, %s8200_s25  ;;  %p8204_p5 = scmp.lt.u32.totalorder %s8200_s25, %s8796_s0 }
  0x4d   :  { %p8206_p6 = pnand %p8204_p5, %p8201_p4 }
  0x4f   :  { %8209 = shalt.err (!%p8206_p6)
}
  0x50   :  { %s8210_s7 = scalar_lea.vmem %s27_s20, 1024  ;;  %p8215_p8 = scmp.lt.s32.totalorder %s27_s20, %s27_s20 }
  0x51   :  { %p8211_p7 = scmp.ne.s32.totalorder %s27_s20, %s8210_s7  ;;  %p8216_p9 = scmp.lt.s32.totalorder %s8210_s7, %s8210_s7 }
  0x53   :  { %p8217_p10 = por %p8216_p9, %p8215_p8 }
  0x55   :  { %p8218_p11 = pnand %p8217_p10, %p8211_p7 }
  0x57   :  { %8221 = shalt.err (!%p8218_p11)
}
  0x58   :  { %29 = dma.hbm_to_vmem [thread:$0]  %s8796_s0, 1024, %s27_s20, [#allocation3]  }
  0x59   :  { %s8222_s14 = scalar_lea.hbm %s8798_s2, 65536 }
  0x5a   :  { %p8223_p12 = scmp.ne.s32.totalorder %s8798_s2, %s8222_s14  ;;  %p8226_p13 = scmp.lt.u32.totalorder %s8222_s14, %s8798_s2 }
  0x5c   :  { %p8228_p0 = pnand %p8226_p13, %p8223_p12 }
  0x5e   :  { %8231 = shalt.err (!%p8228_p0)
}
  0x5f   :  { %s8232_s17 = scalar_lea.vmem %s8461_s23, 65536  ;;  %p8237_p2 = scmp.lt.s32.totalorder %s8461_s23, %s8461_s23 }
  0x60   :  { %p8233_p1 = scmp.ne.s32.totalorder %s8461_s23, %s8232_s17  ;;  %p8238_p3 = scmp.lt.s32.totalorder %s8232_s17, %s8232_s17 }
  0x62   :  { %p8239_p4 = por %p8238_p3, %p8237_p2 }
  0x64   :  { %p8240_p5 = pnand %p8239_p4, %p8233_p1 }
  0x66   :  { %8243 = shalt.err (!%p8240_p5)
}
  0x67   :  { %51 = dma.hbm_to_vmem [thread:$0]  %s8798_s2, 65536, %s8461_s23, [#allocation6], %s8347_s10, %s8347_s10, %s8348_s12  }
  0x68   :  { %s8356_s19 = smov [#allocation10]   ;;  %s8357_s21 = smov [#allocation13]  }
  0x69   :  { %s70_s20 = sshll.u32 %s8356_s19, 4  ;;  %s92_s3 = sshll.u32 %s8357_s21, 4  ;;  %s71_s20 = int_to_ptr.vmem [resolvable:$true] %s70_s20  ;;  %s93_s3 = int_to_ptr.vmem [resolvable:$true] %s92_s3 }
  0x6a   :  { %s8244_s26 = scalar_lea.hbm %s8800_s4, 64 }
  0x6b   :  { %p8245_p6 = scmp.ne.s32.totalorder %s8800_s4, %s8244_s26  ;;  %p8248_p7 = scmp.lt.u32.totalorder %s8244_s26, %s8800_s4 }
  0x6d   :  { %p8250_p8 = pnand %p8248_p7, %p8245_p6 }
  0x6f   :  { %8253 = shalt.err (!%p8250_p8)
}
  0x70   :  { %s8254_s2 = scalar_lea.vmem %s71_s20, 64  ;;  %p8259_p10 = scmp.lt.s32.totalorder %s71_s20, %s71_s20 }
  0x71   :  { %p8255_p9 = scmp.ne.s32.totalorder %s71_s20, %s8254_s2  ;;  %p8260_p11 = scmp.lt.s32.totalorder %s8254_s2, %s8254_s2 }
  0x73   :  { %p8261_p12 = por %p8260_p11, %p8259_p10 }
  0x75   :  { %p8262_p13 = pnand %p8261_p12, %p8255_p9 }
  0x77   :  { %8265 = shalt.err (!%p8262_p13)
}
  0x78   :  { %73 = dma.hbm_to_vmem [thread:$0]  %s8800_s4, 64, %s71_s20, [#allocation9]  }
  0x79   :  { %s8266_s11 = scalar_lea.hbm %s8802_s6, 32 }
  0x7a   :  { %p8267_p0 = scmp.ne.s32.totalorder %s8802_s6, %s8266_s11  ;;  %p8270_p1 = scmp.lt.u32.totalorder %s8266_s11, %s8802_s6 }
  0x7c   :  { %p8272_p2 = pnand %p8270_p1, %p8267_p0 }
  0x7e   :  { %8275 = shalt.err (!%p8272_p2)
}
  0x7f   :  { %s8276_s16 = scalar_lea.vmem %s93_s3, 32  ;;  %p8281_p4 = scmp.lt.s32.totalorder %s93_s3, %s93_s3 }
  0x80   :  { %p8277_p3 = scmp.ne.s32.totalorder %s93_s3, %s8276_s16  ;;  %p8282_p5 = scmp.lt.s32.totalorder %s8276_s16, %s8276_s16 }
  0x82   :  { %p8283_p6 = por %p8282_p5, %p8281_p4 }
  0x84   :  { %p8284_p7 = pnand %p8283_p6, %p8277_p3 }
  0x86   :  { %8287 = shalt.err (!%p8284_p7)
}
  0x87   :  { %95 = dma.hbm_to_vmem [thread:$0]  %s8802_s6, 32, %s93_s3, [#allocation12]  }
  0x88   :  { %s8358_s24 = smov [#allocation16]   ;;  %s8288_s19 = scalar_lea.hbm %s8804_s8, 16 }
  0x89   :  { %s114_s17 = sshll.u32 %s8358_s24, 4  ;;  %p8289_p8 = scmp.ne.s32.totalorder %s8804_s8, %s8288_s19  ;;  %s115_s17 = int_to_ptr.vmem [resolvable:$true] %s114_s17 }
  0x8a   :  { %p8292_p9 = scmp.lt.u32.totalorder %s8288_s19, %s8804_s8 }
  0x8c   :  { %p8294_p10 = pnand %p8292_p9, %p8289_p8 }
  0x8e   :  { %8297 = shalt.err (!%p8294_p10)
}
  0x8f   :  { %s8298_s26 = scalar_lea.vmem %s115_s17, 16  ;;  %s8302_s6 = scalar_lea.vmem %s115_s17, 32 }
  0x90   :  { %p8299_p11 = scmp.ne.s32.totalorder %s115_s17, %s8298_s26  ;;  %p8303_p12 = scmp.lt.s32.totalorder %s115_s17, %s115_s17 }
  0x91   :  { %p8304_p13 = scmp.lt.s32.totalorder %s8302_s6, %s8298_s26 }
  0x93   :  { %p8305_p0 = por %p8304_p13, %p8303_p12 }
  0x95   :  { %p8306_p1 = pnand %p8305_p0, %p8299_p11 }
  0x97   :  { %8309 = shalt.err (!%p8306_p1)
}
  0x98   :  { %117 = dma.hbm_to_vmem [thread:$0]  %s8804_s8, 16, %s115_s17, [#allocation15]  }
  0x99   :  { %8332 = dma.done.wait [#allocation3], 1024  }
  0x9a   :  { %8333 = vsyncadd [#allocation3], 4294966272 }
  0x9b   :  { %8334 = dma.done.wait [#allocation6], 65920  }
  0x9c   :  { %8335 = vsyncadd [#allocation6], 4294901376 }
  0x9d   :  { %8336 = dma.done.wait [#allocation9], 24640  }
  0x9e   :  { %8337 = vsyncadd [#allocation9], 4294942656 }
  0x9f   :  { %8338 = dma.done.wait [#allocation12], 8224  }
  0xa0   :  { %8339 = vsyncadd [#allocation12], 4294959072 }
  0xa1   :  { %8340 = dma.done.wait [#allocation15], 2064  }
  0xa2   :  { %8341 = vsyncadd [#allocation15], 4294965232  ;;  %v6922_v0 = vld [vmem:[#allocation8 + $0x4] ss:$16 sps:$4 sm:$0xff]   ;;  %v6926_v2 = vld [vmem:[#allocation8] ss:$16 sps:$4 sm:$0xff]  }
  0xa3   :  { %v6924_v1 = vld [vmem:[#allocation8 + $0x404] ss:$16 sps:$4 sm:$0xff]   ;;  %1842 = vmatprep.subr.bf16.mxu1 %v6922_v0  ;;  %v6927_v3 = vld [vmem:[#allocation8 + $0x400] ss:$16 sps:$4 sm:$0xff]   ;;  %v154_v46 = vld [vmem:[#allocation5] sm:$0xff]  ;;  %s8359_s8 = smov [#allocation17]  }
  0xa4   :  { %1924 = vmatprep.subr.bf16.mxu0 %v6924_v1  ;;  %v6928_v4 = vld [vmem:[#allocation8 + $0x24] ss:$16 sps:$4 sm:$0xff]   ;;  %1843 = vmatpush1.bf16.msra.mxu1 %v6926_v2  ;;  %v6932_v6 = vld [vmem:[#allocation8 + $0x20] ss:$16 sps:$4 sm:$0xff]   ;;  %v8531_v48 = vcombine.high %v154_v46, %v154_v46  ;;  %v156_v50 = vld [vmem:[#allocation5 + $0x10] sm:$0xff]  ;;  %s6058_s29 = sshll.u32 %s8359_s8, 4  ;;  %s6059_s29 = int_to_ptr.vmem [resolvable:$true] %s6058_s29 }
  0xa5   :  { %1925 = vmatpush1.bf16.msra.mxu0 %v6927_v3  ;;  %v6930_v5 = vld [vmem:[#allocation8 + $0x424] ss:$16 sps:$4 sm:$0xff]   ;;  %1844 = vmatprep.subr.bf16.mxu1 %v6928_v4  ;;  %v6933_v7 = vld [vmem:[#allocation8 + $0x420] ss:$16 sps:$4 sm:$0xff]   ;;  %v8533_v53 = vcombine.high %v156_v50, %v156_v50  ;;  %s8310_s30 = scalar_lea.vmem %s6059_s29, 128  ;;  %p8315_p3 = scmp.lt.s32.totalorder %s6059_s29, %s6059_s29 }
  0xa6   :  { %1926 = vmatprep.subr.bf16.mxu0 %v6930_v5  ;;  %v6934_v8 = vld [vmem:[#allocation8 + $0x44] ss:$16 sps:$4 sm:$0xff]   ;;  %v6938_v10 = vld [vmem:[#allocation8 + $0x40] ss:$16 sps:$4 sm:$0xff]   ;;  %1874 = vmatprep.mubr.bf16.mxu1 %v8531_v48  ;;  %v7027_v5 = vld [vmem:[#allocation8 + $0x20c] ss:$16 sps:$4 sm:$0xff]   ;;  %p8311_p2 = scmp.ne.s32.totalorder %s6059_s29, %s8310_s30  ;;  %p8316_p4 = scmp.lt.s32.totalorder %s8310_s30, %s8310_s30 }
  0xa7   :  { %v6936_v9 = vld [vmem:[#allocation8 + $0x444] ss:$16 sps:$4 sm:$0xff]   ;;  %v6939_v11 = vld [vmem:[#allocation8 + $0x440] ss:$16 sps:$4 sm:$0xff]   ;;  %1956 = vmatprep.mubr.bf16.mxu0 %v8533_v53 }
  0xa8   :  { %1845 = vmatpush1.bf16.msra.mxu1 %v6932_v6  ;;  %v6940_v12 = vld [vmem:[#allocation8 + $0x64] ss:$16 sps:$4 sm:$0xff]   ;;  %v6944_v14 = vld [vmem:[#allocation8 + $0x60] ss:$16 sps:$4 sm:$0xff]   ;;  %v8537_v6 = vcombine.low %v154_v46, %v154_v46  ;;  %p8317_p5 = por %p8316_p4, %p8315_p3 }
  0xa9   :  { %1927 = vmatpush1.bf16.msra.mxu0 %v6933_v7  ;;  %1846 = vmatprep.subr.bf16.mxu1 %v6934_v8  ;;  %v6942_v13 = vld [vmem:[#allocation8 + $0x464] ss:$16 sps:$4 sm:$0xff]   ;;  %v6945_v15 = vld [vmem:[#allocation8 + $0x460] ss:$16 sps:$4 sm:$0xff]   ;;  %v8539_v7 = vcombine.low %v156_v50, %v156_v50  ;;  %v7087_v50 = vld [vmem:[#allocation8 + $0x34c] ss:$16 sps:$4 sm:$0xff]  }
  0xaa   :  { %1928 = vmatprep.subr.bf16.mxu0 %v6936_v9  ;;  %v6946_v16 = vld [vmem:[#allocation8 + $0x84] ss:$16 sps:$4 sm:$0xff]   ;;  %v6950_v18 = vld [vmem:[#allocation8 + $0x80] ss:$16 sps:$4 sm:$0xff]   ;;  %v7025_v9 = vld [vmem:[#allocation8 + $0x208] ss:$16 sps:$4 sm:$0xff]   ;;  %p8318_p6 = pnand %p8317_p5, %p8311_p2 }
  0xab   :  { %v6948_v17 = vld [vmem:[#allocation8 + $0x484] ss:$16 sps:$4 sm:$0xff]   ;;  %v6951_v19 = vld [vmem:[#allocation8 + $0x480] ss:$16 sps:$4 sm:$0xff]  }
  0xac   :  { %1847 = vmatpush1.bf16.msra.mxu1 %v6938_v10  ;;  %v6952_v20 = vld [vmem:[#allocation8 + $0xa4] ss:$16 sps:$4 sm:$0xff]   ;;  %v6956_v22 = vld [vmem:[#allocation8 + $0xa0] ss:$16 sps:$4 sm:$0xff]  }
  0xad   :  { %1929 = vmatpush1.bf16.msra.mxu0 %v6939_v11  ;;  %1848 = vmatprep.subr.bf16.mxu1 %v6940_v12  ;;  %v6954_v21 = vld [vmem:[#allocation8 + $0x4a4] ss:$16 sps:$4 sm:$0xff]   ;;  %v6957_v23 = vld [vmem:[#allocation8 + $0x4a0] ss:$16 sps:$4 sm:$0xff]   ;;  %v7033_v11 = vld [vmem:[#allocation8 + $0x22c] ss:$16 sps:$4 sm:$0xff]  }
  0xae   :  { %1930 = vmatprep.subr.bf16.mxu0 %v6942_v13  ;;  %v6958_v24 = vld [vmem:[#allocation8 + $0xc4] ss:$16 sps:$4 sm:$0xff]   ;;  %v6962_v26 = vld [vmem:[#allocation8 + $0xc0] ss:$16 sps:$4 sm:$0xff]   ;;  %v7031_v13 = vld [vmem:[#allocation8 + $0x228] ss:$16 sps:$4 sm:$0xff]  }
  0xaf   :  { %v6960_v25 = vld [vmem:[#allocation8 + $0x4c4] ss:$16 sps:$4 sm:$0xff]   ;;  %v6963_v27 = vld [vmem:[#allocation8 + $0x4c0] ss:$16 sps:$4 sm:$0xff]  }
  0xb0   :  { %1849 = vmatpush1.bf16.msra.mxu1 %v6944_v14  ;;  %v6964_v28 = vld [vmem:[#allocation8 + $0xe4] ss:$16 sps:$4 sm:$0xff]   ;;  %v6968_v30 = vld [vmem:[#allocation8 + $0xe0] ss:$16 sps:$4 sm:$0xff]  }
  0xb1   :  { %1931 = vmatpush1.bf16.msra.mxu0 %v6945_v15  ;;  %1850 = vmatprep.subr.bf16.mxu1 %v6946_v16  ;;  %v6966_v29 = vld [vmem:[#allocation8 + $0x4e4] ss:$16 sps:$4 sm:$0xff]   ;;  %v6969_v31 = vld [vmem:[#allocation8 + $0x4e0] ss:$16 sps:$4 sm:$0xff]   ;;  %v7039_v15 = vld [vmem:[#allocation8 + $0x24c] ss:$16 sps:$4 sm:$0xff]  }
  0xb2   :  { %1932 = vmatprep.subr.bf16.mxu0 %v6948_v17  ;;  %v6970_v32 = vld [vmem:[#allocation8 + $0x104] ss:$16 sps:$4 sm:$0xff]   ;;  %v6974_v34 = vld [vmem:[#allocation8 + $0x100] ss:$16 sps:$4 sm:$0xff]   ;;  %v7037_v17 = vld [vmem:[#allocation8 + $0x248] ss:$16 sps:$4 sm:$0xff]  }
  0xb3   :  { %v6972_v33 = vld [vmem:[#allocation8 + $0x504] ss:$16 sps:$4 sm:$0xff]   ;;  %v6975_v35 = vld [vmem:[#allocation8 + $0x500] ss:$16 sps:$4 sm:$0xff]  }
  0xb4   :  { %1851 = vmatpush1.bf16.msra.mxu1 %v6950_v18  ;;  %v6976_v36 = vld [vmem:[#allocation8 + $0x124] ss:$16 sps:$4 sm:$0xff]   ;;  %v6980_v38 = vld [vmem:[#allocation8 + $0x120] ss:$16 sps:$4 sm:$0xff]  }
  0xb5   :  { %1933 = vmatpush1.bf16.msra.mxu0 %v6951_v19  ;;  %1852 = vmatprep.subr.bf16.mxu1 %v6952_v20  ;;  %v6978_v37 = vld [vmem:[#allocation8 + $0x524] ss:$16 sps:$4 sm:$0xff]   ;;  %v6981_v39 = vld [vmem:[#allocation8 + $0x520] ss:$16 sps:$4 sm:$0xff]   ;;  %v7045_v19 = vld [vmem:[#allocation8 + $0x26c] ss:$16 sps:$4 sm:$0xff]  }
  0xb6   :  { %1934 = vmatprep.subr.bf16.mxu0 %v6954_v21  ;;  %v6982_v40 = vld [vmem:[#allocation8 + $0x144] ss:$16 sps:$4 sm:$0xff]   ;;  %v6986_v42 = vld [vmem:[#allocation8 + $0x140] ss:$16 sps:$4 sm:$0xff]   ;;  %v7043_v21 = vld [vmem:[#allocation8 + $0x268] ss:$16 sps:$4 sm:$0xff]  }
  0xb7   :  { %v6984_v41 = vld [vmem:[#allocation8 + $0x544] ss:$16 sps:$4 sm:$0xff]   ;;  %v6987_v43 = vld [vmem:[#allocation8 + $0x540] ss:$16 sps:$4 sm:$0xff]  }
  0xb8   :  { %1853 = vmatpush1.bf16.msra.mxu1 %v6956_v22  ;;  %v6988_v44 = vld [vmem:[#allocation8 + $0x164] ss:$16 sps:$4 sm:$0xff]   ;;  %v6992_v47 = vld [vmem:[#allocation8 + $0x160] ss:$16 sps:$4 sm:$0xff]  }
  0xb9   :  { %1935 = vmatpush1.bf16.msra.mxu0 %v6957_v23  ;;  %1854 = vmatprep.subr.bf16.mxu1 %v6958_v24  ;;  %v6990_v45 = vld [vmem:[#allocation8 + $0x564] ss:$16 sps:$4 sm:$0xff]   ;;  %v6993_v49 = vld [vmem:[#allocation8 + $0x560] ss:$16 sps:$4 sm:$0xff]   ;;  %v7051_v23 = vld [vmem:[#allocation8 + $0x28c] ss:$16 sps:$4 sm:$0xff]  }
  0xba   :  { %1936 = vmatprep.subr.bf16.mxu0 %v6960_v25  ;;  %v6994_v51 = vld [vmem:[#allocation8 + $0x184] ss:$16 sps:$4 sm:$0xff]   ;;  %v6998_v54 = vld [vmem:[#allocation8 + $0x180] ss:$16 sps:$4 sm:$0xff]   ;;  %v7049_v25 = vld [vmem:[#allocation8 + $0x288] ss:$16 sps:$4 sm:$0xff]  }
  0xbb   :  { %v6996_v52 = vld [vmem:[#allocation8 + $0x584] ss:$16 sps:$4 sm:$0xff]   ;;  %v6999_v55 = vld [vmem:[#allocation8 + $0x580] ss:$16 sps:$4 sm:$0xff]  }
  0xbc   :  { %1855 = vmatpush1.bf16.msra.mxu1 %v6962_v26  ;;  %v7000_v56 = vld [vmem:[#allocation8 + $0x1a4] ss:$16 sps:$4 sm:$0xff]   ;;  %v7004_v58 = vld [vmem:[#allocation8 + $0x1a0] ss:$16 sps:$4 sm:$0xff]  }
  0xbd   :  { %1937 = vmatpush1.bf16.msra.mxu0 %v6963_v27  ;;  %1856 = vmatprep.subr.bf16.mxu1 %v6964_v28  ;;  %v7002_v57 = vld [vmem:[#allocation8 + $0x5a4] ss:$16 sps:$4 sm:$0xff]   ;;  %v7005_v59 = vld [vmem:[#allocation8 + $0x5a0] ss:$16 sps:$4 sm:$0xff]   ;;  %v7057_v27 = vld [vmem:[#allocation8 + $0x2ac] ss:$16 sps:$4 sm:$0xff]  }
  0xbe   :  { %1938 = vmatprep.subr.bf16.mxu0 %v6966_v29  ;;  %v7006_v60 = vld [vmem:[#allocation8 + $0x1c4] ss:$16 sps:$4 sm:$0xff]   ;;  %v7010_v62 = vld [vmem:[#allocation8 + $0x1c0] ss:$16 sps:$4 sm:$0xff]   ;;  %v7055_v29 = vld [vmem:[#allocation8 + $0x2a8] ss:$16 sps:$4 sm:$0xff]  }
  0xbf   :  { %v7008_v61 = vld [vmem:[#allocation8 + $0x5c4] ss:$16 sps:$4 sm:$0xff]   ;;  %v7011_v63 = vld [vmem:[#allocation8 + $0x5c0] ss:$16 sps:$4 sm:$0xff]  }
  0xc0   :  { %1857 = vmatpush1.bf16.msra.mxu1 %v6968_v30  ;;  %v7012_v0 = vld [vmem:[#allocation8 + $0x1e4] ss:$16 sps:$4 sm:$0xff]   ;;  %v7016_v2 = vld [vmem:[#allocation8 + $0x1e0] ss:$16 sps:$4 sm:$0xff]  }
  0xc1   :  { %1939 = vmatpush1.bf16.msra.mxu0 %v6969_v31  ;;  %1858 = vmatprep.subr.bf16.mxu1 %v6970_v32  ;;  %v7014_v1 = vld [vmem:[#allocation8 + $0x5e4] ss:$16 sps:$4 sm:$0xff]   ;;  %v7017_v3 = vld [vmem:[#allocation8 + $0x5e0] ss:$16 sps:$4 sm:$0xff]   ;;  %v7063_v31 = vld [vmem:[#allocation8 + $0x2cc] ss:$16 sps:$4 sm:$0xff]  }
  0xc2   :  { %1940 = vmatprep.subr.bf16.mxu0 %v6972_v33  ;;  %v7022_v4 = vld [vmem:[#allocation8 + $0x204] ss:$16 sps:$4 sm:$0xff]   ;;  %v7020_v8 = vld [vmem:[#allocation8 + $0x200] ss:$16 sps:$4 sm:$0xff]  }
  0xc3   :  { %v7030_v10 = vld [vmem:[#allocation8 + $0x224] ss:$16 sps:$4 sm:$0xff]   ;;  %v7028_v12 = vld [vmem:[#allocation8 + $0x220] ss:$16 sps:$4 sm:$0xff]  }
  0xc4   :  { %1859 = vmatpush1.bf16.msra.mxu1 %v6974_v34  ;;  %v7036_v14 = vld [vmem:[#allocation8 + $0x244] ss:$16 sps:$4 sm:$0xff]   ;;  %v7034_v16 = vld [vmem:[#allocation8 + $0x240] ss:$16 sps:$4 sm:$0xff]  }
  0xc5   :  { %1941 = vmatpush1.bf16.msra.mxu0 %v6975_v35  ;;  %1860 = vmatprep.subr.bf16.mxu1 %v6976_v36  ;;  %v7042_v18 = vld [vmem:[#allocation8 + $0x264] ss:$16 sps:$4 sm:$0xff]   ;;  %v7040_v20 = vld [vmem:[#allocation8 + $0x260] ss:$16 sps:$4 sm:$0xff]   ;;  %v7061_v35 = vld [vmem:[#allocation8 + $0x2c8] ss:$16 sps:$4 sm:$0xff]  }
  0xc6   :  { %1942 = vmatprep.subr.bf16.mxu0 %v6978_v37  ;;  %v7048_v22 = vld [vmem:[#allocation8 + $0x284] ss:$16 sps:$4 sm:$0xff]   ;;  %v7046_v24 = vld [vmem:[#allocation8 + $0x280] ss:$16 sps:$4 sm:$0xff]   ;;  %v7069_v37 = vld [vmem:[#allocation8 + $0x2ec] ss:$16 sps:$4 sm:$0xff]  }
  0xc7   :  { %v7054_v26 = vld [vmem:[#allocation8 + $0x2a4] ss:$16 sps:$4 sm:$0xff]   ;;  %v7052_v28 = vld [vmem:[#allocation8 + $0x2a0] ss:$16 sps:$4 sm:$0xff]  }
  0xc8   :  { %1861 = vmatpush1.bf16.msra.mxu1 %v6980_v38  ;;  %v7060_v30 = vld [vmem:[#allocation8 + $0x2c4] ss:$16 sps:$4 sm:$0xff]   ;;  %v7058_v33 = vld [vmem:[#allocation8 + $0x2c0] ss:$16 sps:$4 sm:$0xff]  }
  0xc9   :  { %1943 = vmatpush1.bf16.msra.mxu0 %v6981_v39  ;;  %1862 = vmatprep.subr.bf16.mxu1 %v6982_v40  ;;  %v8543_v32 = vld [vmem:[#allocation5 + $0x8] sm:$0xff]  ;;  %v7067_v39 = vld [vmem:[#allocation8 + $0x2e8] ss:$16 sps:$4 sm:$0xff]  }
  0xca   :  { %1944 = vmatprep.subr.bf16.mxu0 %v6984_v41  ;;  %v6074_v34 = vcombine.high %v8543_v32, %v8543_v32  ;;  %v7066_v36 = vld [vmem:[#allocation8 + $0x2e4] ss:$16 sps:$4 sm:$0xff]   ;;  %v7064_v38 = vld [vmem:[#allocation8 + $0x2e0] ss:$16 sps:$4 sm:$0xff]   ;;  %v7075_v41 = vld [vmem:[#allocation8 + $0x30c] ss:$16 sps:$4 sm:$0xff]  }
  0xcb   :  { %v7072_v40 = vld [vmem:[#allocation8 + $0x304] ss:$16 sps:$4 sm:$0xff]   ;;  %v7076_v46 = vld [vmem:[#allocation8 + $0x320] ss:$16 sps:$4 sm:$0xff]  }
  0xcc   :  { %1863 = vmatpush1.bf16.msra.mxu1 %v6986_v42  ;;  %v7070_v42 = vld [vmem:[#allocation8 + $0x300] ss:$16 sps:$4 sm:$0xff]  }
  0xcd   :  { %1945 = vmatpush1.bf16.msra.mxu0 %v6987_v43  ;;  %1864 = vmatprep.subr.bf16.mxu1 %v6988_v44  ;;  %v7073_v43 = vld [vmem:[#allocation8 + $0x308] ss:$16 sps:$4 sm:$0xff]   ;;  %v7078_v44 = vld [vmem:[#allocation8 + $0x324] ss:$16 sps:$4 sm:$0xff]  }
  0xce   :  { %1946 = vmatprep.subr.bf16.mxu0 %v6990_v45  ;;  %v7081_v45 = vld [vmem:[#allocation8 + $0x32c] ss:$16 sps:$4 sm:$0xff]  }
  0xd0   :  { %1865 = vmatpush1.bf16.msra.mxu1 %v6992_v47  ;;  %v7079_v47 = vld [vmem:[#allocation8 + $0x328] ss:$16 sps:$4 sm:$0xff]  }
  0xd1   :  { %1947 = vmatpush1.bf16.msra.mxu0 %v6993_v49  ;;  %1866 = vmatprep.subr.bf16.mxu1 %v6994_v51  ;;  %v7084_v49 = vld [vmem:[#allocation8 + $0x344] ss:$16 sps:$4 sm:$0xff]   ;;  %v7082_v51 = vld [vmem:[#allocation8 + $0x340] ss:$16 sps:$4 sm:$0xff]  }
  0xd2   :  { %1948 = vmatprep.subr.bf16.mxu0 %v6996_v52  ;;  %v7085_v52 = vld [vmem:[#allocation8 + $0x348] ss:$16 sps:$4 sm:$0xff]  }
  0xd4   :  { %1867 = vmatpush1.bf16.msra.mxu1 %v6998_v54  ;;  %v7090_v54 = vld [vmem:[#allocation8 + $0x364] ss:$16 sps:$4 sm:$0xff]  }
  0xd5   :  { %1949 = vmatpush1.bf16.msra.mxu0 %v6999_v55  ;;  %1868 = vmatprep.subr.bf16.mxu1 %v7000_v56  ;;  %v7093_v55 = vld [vmem:[#allocation8 + $0x36c] ss:$16 sps:$4 sm:$0xff]   ;;  %v7088_v56 = vld [vmem:[#allocation8 + $0x360] ss:$16 sps:$4 sm:$0xff]  }
  0xd6   :  { %1950 = vmatprep.subr.bf16.mxu0 %v7002_v57  ;;  %v7091_v57 = vld [vmem:[#allocation8 + $0x368] ss:$16 sps:$4 sm:$0xff]  }
  0xd8   :  { %1869 = vmatpush1.bf16.msra.mxu1 %v7004_v58  ;;  %v7096_v58 = vld [vmem:[#allocation8 + $0x384] ss:$16 sps:$4 sm:$0xff]  }
  0xd9   :  { %1951 = vmatpush1.bf16.msra.mxu0 %v7005_v59  ;;  %1870 = vmatprep.subr.bf16.mxu1 %v7006_v60  ;;  %v7099_v59 = vld [vmem:[#allocation8 + $0x38c] ss:$16 sps:$4 sm:$0xff]   ;;  %v7094_v60 = vld [vmem:[#allocation8 + $0x380] ss:$16 sps:$4 sm:$0xff]  }
  0xda   :  { %1952 = vmatprep.subr.bf16.mxu0 %v7008_v61  ;;  %v7097_v61 = vld [vmem:[#allocation8 + $0x388] ss:$16 sps:$4 sm:$0xff]  }
  0xdc   :  { %1871 = vmatpush1.bf16.msra.mxu1 %v7010_v62  ;;  %v7102_v62 = vld [vmem:[#allocation8 + $0x3a4] ss:$16 sps:$4 sm:$0xff]  }
  0xdd   :  { %1953 = vmatpush1.bf16.msra.mxu0 %v7011_v63  ;;  %1872 = vmatprep.subr.bf16.mxu1 %v7012_v0  ;;  %v7105_v63 = vld [vmem:[#allocation8 + $0x3ac] ss:$16 sps:$4 sm:$0xff]   ;;  %v7100_v0 = vld [vmem:[#allocation8 + $0x3a0] ss:$16 sps:$4 sm:$0xff]  }
  0xde   :  { %1954 = vmatprep.subr.bf16.mxu0 %v7014_v1  ;;  %v7103_v1 = vld [vmem:[#allocation8 + $0x3a8] ss:$16 sps:$4 sm:$0xff]  }
  0xe0   :  { %1873 = vmatpush1.bf16.msra.mxu1 %v7016_v2  ;;  %v7108_v2 = vld [vmem:[#allocation8 + $0x3c4] ss:$16 sps:$4 sm:$0xff]  }
  0xe1   :  { %1955 = vmatpush1.bf16.msra.mxu0 %v7017_v3  ;;  %1883 = vmatprep.subr.bf16.mxu1 %v7022_v4  ;;  %v7111_v3 = vld [vmem:[#allocation8 + $0x3cc] ss:$16 sps:$4 sm:$0xff]   ;;  %v7106_v4 = vld [vmem:[#allocation8 + $0x3c0] ss:$16 sps:$4 sm:$0xff]  }
  0xe2   :  { %2006 = vmatprep.subr.bf16.mxu0 %v7027_v5  ;;  %v7109_v5 = vld [vmem:[#allocation8 + $0x3c8] ss:$16 sps:$4 sm:$0xff]  }
  0xe3   :  { %1875 = vmatmul.mubr.bf16.vlgmr.msra.gmra.mrb[0].mxu1 %v8537_v6 }
  0xe4   :  { %1957 = vmatmul.mubr.bf16.vlgmr.msra.gmra.mrb[0].mxu0 %v8539_v7  ;;  %1884 = vmatpush1.bf16.msra.mxu1 %v7020_v8  ;;  %v7114_v8 = vld [vmem:[#allocation8 + $0x3e4] ss:$16 sps:$4 sm:$0xff]  }
  0xe5   :  { %2007 = vmatpush1.bf16.msra.mxu0 %v7025_v9  ;;  %1885 = vmatprep.subr.bf16.mxu1 %v7030_v10  ;;  %v7117_v9 = vld [vmem:[#allocation8 + $0x3ec] ss:$16 sps:$4 sm:$0xff]   ;;  %v7112_v10 = vld [vmem:[#allocation8 + $0x3e0] ss:$16 sps:$4 sm:$0xff]  }
  0xe6   :  { %2008 = vmatprep.subr.bf16.mxu0 %v7033_v11  ;;  %1915 = vmatprep.mubr.bf16.mxu1 %v6074_v34  ;;  %v7115_v11 = vld [vmem:[#allocation8 + $0x3e8] ss:$16 sps:$4 sm:$0xff]  }
  0xe7   :  { %2038 = vmatprep.mubr.bf16.mxu0 %v6074_v34  ;;  %v7152_v34 = vld [vmem:[#allocation8 + $0xac] ss:$16 sps:$4 sm:$0xff]  }
  0xe8   :  { %1886 = vmatpush1.bf16.msra.mxu1 %v7028_v12  ;;  %v7122_v12 = vld [vmem:[#allocation8 + $0xc] ss:$16 sps:$4 sm:$0xff]  }
  0xe9   :  { %2009 = vmatpush1.bf16.msra.mxu0 %v7031_v13  ;;  %1887 = vmatprep.subr.bf16.mxu1 %v7036_v14  ;;  %v7125_v13 = vld [vmem:[#allocation7 + $0x4] ss:$16 sps:$4 sm:$0xff]   ;;  %v6073_v14 = vcombine.low %v8543_v32, %v8543_v32 }
  0xea   :  { %2010 = vmatprep.subr.bf16.mxu0 %v7039_v15  ;;  %v7120_v15 = vld [vmem:[#allocation8 + $0x8] ss:$16 sps:$4 sm:$0xff]   ;;  %v7149_v32 = vld [vmem:[#allocation7 + $0x84] ss:$16 sps:$4 sm:$0xff]  }
  0xec   :  { %1888 = vmatpush1.bf16.msra.mxu1 %v7034_v16  ;;  %v7123_v16 = vld [vmem:[#allocation7] ss:$16 sps:$4 sm:$0xff]  }
  0xed   :  { %2011 = vmatpush1.bf16.msra.mxu0 %v7037_v17  ;;  %1889 = vmatprep.subr.bf16.mxu1 %v7042_v18  ;;  %v7128_v17 = vld [vmem:[#allocation8 + $0x2c] ss:$16 sps:$4 sm:$0xff]   ;;  %v7131_v18 = vld [vmem:[#allocation7 + $0x24] ss:$16 sps:$4 sm:$0xff]  }
  0xee   :  { %2012 = vmatprep.subr.bf16.mxu0 %v7045_v19  ;;  %v8549_v19 = vld [vmem:[#allocation2] sm:$0xff] }
  0xf0   :  { %1890 = vmatpush1.bf16.msra.mxu1 %v7040_v20  ;;  %v8553_v20 = vcombine.high %v8549_v19, %v8549_v19 }
  0xf1   :  { %2013 = vmatpush1.bf16.msra.mxu0 %v7043_v21  ;;  %1891 = vmatprep.subr.bf16.mxu1 %v7048_v22  ;;  %v7126_v21 = vld [vmem:[#allocation8 + $0x28] ss:$16 sps:$4 sm:$0xff]   ;;  %v7129_v22 = vld [vmem:[#allocation7 + $0x20] ss:$16 sps:$4 sm:$0xff]  }
  0xf2   :  { %2014 = vmatprep.subr.bf16.mxu0 %v7051_v23  ;;  %v7134_v23 = vld [vmem:[#allocation8 + $0x4c] ss:$16 sps:$4 sm:$0xff]  }
  0xf4   :  { %1892 = vmatpush1.bf16.msra.mxu1 %v7046_v24  ;;  %v7137_v24 = vld [vmem:[#allocation7 + $0x44] ss:$16 sps:$4 sm:$0xff]  }
  0xf5   :  { %2015 = vmatpush1.bf16.msra.mxu0 %v7049_v25  ;;  %1893 = vmatprep.subr.bf16.mxu1 %v7054_v26  ;;  %v7132_v25 = vld [vmem:[#allocation8 + $0x48] ss:$16 sps:$4 sm:$0xff]   ;;  %v7135_v26 = vld [vmem:[#allocation7 + $0x40] ss:$16 sps:$4 sm:$0xff]  }
  0xf6   :  { %2016 = vmatprep.subr.bf16.mxu0 %v7057_v27  ;;  %v7140_v27 = vld [vmem:[#allocation8 + $0x6c] ss:$16 sps:$4 sm:$0xff]  }
  0xf8   :  { %1894 = vmatpush1.bf16.msra.mxu1 %v7052_v28  ;;  %v7143_v28 = vld [vmem:[#allocation7 + $0x64] ss:$16 sps:$4 sm:$0xff]  }
  0xf9   :  { %2017 = vmatpush1.bf16.msra.mxu0 %v7055_v29  ;;  %1895 = vmatprep.subr.bf16.mxu1 %v7060_v30  ;;  %v7138_v29 = vld [vmem:[#allocation8 + $0x68] ss:$16 sps:$4 sm:$0xff]   ;;  %v7141_v30 = vld [vmem:[#allocation7 + $0x60] ss:$16 sps:$4 sm:$0xff]  }
  0xfa   :  { %2018 = vmatprep.subr.bf16.mxu0 %v7063_v31  ;;  %v7146_v31 = vld [vmem:[#allocation8 + $0x8c] ss:$16 sps:$4 sm:$0xff]  }
  0xfc   :  { %1896 = vmatpush1.bf16.msra.mxu1 %v7058_v33  ;;  %v7144_v33 = vld [vmem:[#allocation8 + $0x88] ss:$16 sps:$4 sm:$0xff]  }
  0xfd   :  { %2019 = vmatpush1.bf16.msra.mxu0 %v7061_v35  ;;  %1897 = vmatprep.subr.bf16.mxu1 %v7066_v36  ;;  %v7155_v35 = vld [vmem:[#allocation7 + $0xa4] ss:$16 sps:$4 sm:$0xff]   ;;  %v7150_v36 = vld [vmem:[#allocation8 + $0xa8] ss:$16 sps:$4 sm:$0xff]  }
  0xfe   :  { %2020 = vmatprep.subr.bf16.mxu0 %v7069_v37  ;;  %v7153_v37 = vld [vmem:[#allocation7 + $0xa0] ss:$16 sps:$4 sm:$0xff]  }
 0x100   :  { %1898 = vmatpush1.bf16.msra.mxu1 %v7064_v38  ;;  %v7158_v38 = vld [vmem:[#allocation8 + $0xcc] ss:$16 sps:$4 sm:$0xff]  }
 0x101   :  { %2021 = vmatpush1.bf16.msra.mxu0 %v7067_v39  ;;  %1899 = vmatprep.subr.bf16.mxu1 %v7072_v40  ;;  %v7161_v39 = vld [vmem:[#allocation7 + $0xc4] ss:$16 sps:$4 sm:$0xff]   ;;  %v7156_v40 = vld [vmem:[#allocation8 + $0xc8] ss:$16 sps:$4 sm:$0xff]  }
 0x102   :  { %2022 = vmatprep.subr.bf16.mxu0 %v7075_v41  ;;  %v7159_v41 = vld [vmem:[#allocation7 + $0xc0] ss:$16 sps:$4 sm:$0xff]  }
 0x104   :  { %1900 = vmatpush1.bf16.msra.mxu1 %v7070_v42  ;;  %v7164_v42 = vld [vmem:[#allocation8 + $0xec] ss:$16 sps:$4 sm:$0xff]  }
 0x105   :  { %2023 = vmatpush1.bf16.msra.mxu0 %v7073_v43  ;;  %1901 = vmatprep.subr.bf16.mxu1 %v7078_v44  ;;  %v7167_v43 = vld [vmem:[#allocation7 + $0xe4] ss:$16 sps:$4 sm:$0xff]   ;;  %v7162_v44 = vld [vmem:[#allocation8 + $0xe8] ss:$16 sps:$4 sm:$0xff]  }
 0x106   :  { %2024 = vmatprep.subr.bf16.mxu0 %v7081_v45  ;;  %v7165_v45 = vld [vmem:[#allocation7 + $0xe0] ss:$16 sps:$4 sm:$0xff]  }
 0x108   :  { %1902 = vmatpush1.bf16.msra.mxu1 %v7076_v46  ;;  %v7170_v46 = vld [vmem:[#allocation8 + $0x10c] ss:$16 sps:$4 sm:$0xff]  }
 0x109   :  { %2025 = vmatpush1.bf16.msra.mxu0 %v7079_v47  ;;  %1903 = vmatprep.subr.bf16.mxu1 %v7084_v49  ;;  %v7173_v47 = vld [vmem:[#allocation7 + $0x104] ss:$16 sps:$4 sm:$0xff]   ;;  %v7168_v49 = vld [vmem:[#allocation8 + $0x108] ss:$16 sps:$4 sm:$0xff]  }
 0x10a   :  { %2026 = vmatprep.subr.bf16.mxu0 %v7087_v50  ;;  %v7171_v50 = vld [vmem:[#allocation7 + $0x100] ss:$16 sps:$4 sm:$0xff]  }
 0x10c   :  { %1904 = vmatpush1.bf16.msra.mxu1 %v7082_v51  ;;  %v7176_v51 = vld [vmem:[#allocation8 + $0x12c] ss:$16 sps:$4 sm:$0xff]  }
 0x10d   :  { %2027 = vmatpush1.bf16.msra.mxu0 %v7085_v52  ;;  %1905 = vmatprep.subr.bf16.mxu1 %v7090_v54  ;;  %v7179_v52 = vld [vmem:[#allocation7 + $0x124] ss:$16 sps:$4 sm:$0xff]   ;;  %v7174_v54 = vld [vmem:[#allocation8 + $0x128] ss:$16 sps:$4 sm:$0xff]  }
 0x10e   :  { %2028 = vmatprep.subr.bf16.mxu0 %v7093_v55  ;;  %v7177_v55 = vld [vmem:[#allocation7 + $0x120] ss:$16 sps:$4 sm:$0xff]  }
 0x110   :  { %1906 = vmatpush1.bf16.msra.mxu1 %v7088_v56  ;;  %v7182_v56 = vld [vmem:[#allocation8 + $0x14c] ss:$16 sps:$4 sm:$0xff]  }
 0x111   :  { %2029 = vmatpush1.bf16.msra.mxu0 %v7091_v57  ;;  %1907 = vmatprep.subr.bf16.mxu1 %v7096_v58  ;;  %v7185_v57 = vld [vmem:[#allocation7 + $0x144] ss:$16 sps:$4 sm:$0xff]   ;;  %v7180_v58 = vld [vmem:[#allocation8 + $0x148] ss:$16 sps:$4 sm:$0xff]  }
 0x112   :  { %2030 = vmatprep.subr.bf16.mxu0 %v7099_v59  ;;  %v7183_v59 = vld [vmem:[#allocation7 + $0x140] ss:$16 sps:$4 sm:$0xff]  }
 0x114   :  { %1908 = vmatpush1.bf16.msra.mxu1 %v7094_v60  ;;  %v7188_v60 = vld [vmem:[#allocation8 + $0x16c] ss:$16 sps:$4 sm:$0xff]  }
 0x115   :  { %2031 = vmatpush1.bf16.msra.mxu0 %v7097_v61  ;;  %1909 = vmatprep.subr.bf16.mxu1 %v7102_v62  ;;  %v7191_v61 = vld [vmem:[#allocation7 + $0x164] ss:$16 sps:$4 sm:$0xff]   ;;  %v7186_v62 = vld [vmem:[#allocation8 + $0x168] ss:$16 sps:$4 sm:$0xff]  }
 0x116   :  { %2032 = vmatprep.subr.bf16.mxu0 %v7105_v63  ;;  %v7189_v63 = vld [vmem:[#allocation7 + $0x160] ss:$16 sps:$4 sm:$0xff]  }
 0x118   :  { %1910 = vmatpush1.bf16.msra.mxu1 %v7100_v0  ;;  %v7194_v0 = vld [vmem:[#allocation8 + $0x18c] ss:$16 sps:$4 sm:$0xff]  }
 0x119   :  { %2033 = vmatpush1.bf16.msra.mxu0 %v7103_v1  ;;  %1911 = vmatprep.subr.bf16.mxu1 %v7108_v2  ;;  %v7197_v1 = vld [vmem:[#allocation7 + $0x184] ss:$16 sps:$4 sm:$0xff]   ;;  %v7192_v2 = vld [vmem:[#allocation8 + $0x188] ss:$16 sps:$4 sm:$0xff]  }
 0x11a   :  { %2034 = vmatprep.subr.bf16.mxu0 %v7111_v3  ;;  %v7195_v3 = vld [vmem:[#allocation7 + $0x180] ss:$16 sps:$4 sm:$0xff]  }
 0x11c   :  { %1912 = vmatpush1.bf16.msra.mxu1 %v7106_v4  ;;  %v7200_v4 = vld [vmem:[#allocation8 + $0x1ac] ss:$16 sps:$4 sm:$0xff]  }
 0x11d   :  { %2035 = vmatpush1.bf16.msra.mxu0 %v7109_v5  ;;  %1913 = vmatprep.subr.bf16.mxu1 %v7114_v8  ;;  %v7203_v5 = vld [vmem:[#allocation7 + $0x1a4] ss:$16 sps:$4 sm:$0xff]   ;;  %v7198_v8 = vld [vmem:[#allocation8 + $0x1a8] ss:$16 sps:$4 sm:$0xff]  }
 0x11e   :  { %2036 = vmatprep.subr.bf16.mxu0 %v7117_v9  ;;  %v7201_v9 = vld [vmem:[#allocation7 + $0x1a0] ss:$16 sps:$4 sm:$0xff]  }
 0x120   :  { %1914 = vmatpush1.bf16.msra.mxu1 %v7112_v10  ;;  %v7206_v10 = vld [vmem:[#allocation8 + $0x1cc] ss:$16 sps:$4 sm:$0xff]  }
 0x121   :  { %2037 = vmatpush1.bf16.msra.mxu0 %v7115_v11  ;;  %1965 = vmatprep.subr.bf16.mxu1 %v7122_v12  ;;  %v7209_v11 = vld [vmem:[#allocation7 + $0x1c4] ss:$16 sps:$4 sm:$0xff]   ;;  %v7204_v12 = vld [vmem:[#allocation8 + $0x1c8] ss:$16 sps:$4 sm:$0xff]  }
 0x122   :  { %4704 = vmatprep.subr.bf16.mxu0 %v7125_v13  ;;  %v7207_v13 = vld [vmem:[#allocation7 + $0x1c0] ss:$16 sps:$4 sm:$0xff]  }
 0x123   :  { %1916 = vmatmul.mubr.bf16.vlgmr.msra.gmra.mrb[4].mxu1 %v6073_v14 }
 0x124   :  { %2039 = vmatmul.mubr.bf16.vlgmr.msra.gmra.mrb[4].mxu0 %v6073_v14  ;;  %1966 = vmatpush1.bf16.msra.mxu1 %v7120_v15  ;;  %v7212_v14 = vld [vmem:[#allocation8 + $0x1ec] ss:$16 sps:$4 sm:$0xff]   ;;  %v7215_v15 = vld [vmem:[#allocation7 + $0x1e4] ss:$16 sps:$4 sm:$0xff]  }
 0x125   :  { %4705 = vmatpush1.bf16.msra.mxu0 %v7123_v16  ;;  %1967 = vmatprep.subr.bf16.mxu1 %v7128_v17  ;;  %v7210_v16 = vld [vmem:[#allocation8 + $0x1e8] ss:$16 sps:$4 sm:$0xff]   ;;  %v7213_v17 = vld [vmem:[#allocation7 + $0x1e0] ss:$16 sps:$4 sm:$0xff]  }
 0x126   :  { %4706 = vmatprep.subr.bf16.mxu0 %v7131_v18  ;;  %1997 = vmatprep.mubr.bf16.mxu1 %v8531_v48  ;;  %v7147_v48 = vld [vmem:[#allocation7 + $0x80] ss:$16 sps:$4 sm:$0xff]   ;;  %v7220_v18 = vld [vmem:[#allocation8 + $0x40c] ss:$16 sps:$4 sm:$0xff]  }
 0x127   :  { %4736 = vmatprep.mubr.bf16.mxu0 %v8553_v20 }
 0x128   :  { %1968 = vmatpush1.bf16.msra.mxu1 %v7126_v21  ;;  %v7223_v21 = vld [vmem:[#allocation7 + $0x404] ss:$16 sps:$4 sm:$0xff]  }
 0x129   :  { %4707 = vmatpush1.bf16.msra.mxu0 %v7129_v22  ;;  %1969 = vmatprep.subr.bf16.mxu1 %v7134_v23  ;;  %v7218_v22 = vld [vmem:[#allocation8 + $0x408] ss:$16 sps:$4 sm:$0xff]   ;;  %v8559_v23 = vcombine.low %v8549_v19, %v8549_v19  ;;  %v7227_v19 = vld [vmem:[#allocation7 + $0x420] ss:$16 sps:$4 sm:$0xff]  }
 0x12a   :  { %4708 = vmatprep.subr.bf16.mxu0 %v7137_v24  ;;  %v8561_v24 = vld [vmem:[#allocation2 + $0x10] sm:$0xff] }
 0x12c   :  { %1970 = vmatpush1.bf16.msra.mxu1 %v7132_v25  ;;  %v7221_v25 = vld [vmem:[#allocation7 + $0x400] ss:$16 sps:$4 sm:$0xff]  }
 0x12d   :  { %4709 = vmatpush1.bf16.msra.mxu0 %v7135_v26  ;;  %1971 = vmatprep.subr.bf16.mxu1 %v7140_v27  ;;  %v7226_v26 = vld [vmem:[#allocation8 + $0x42c] ss:$16 sps:$4 sm:$0xff]   ;;  %v7229_v27 = vld [vmem:[#allocation7 + $0x424] ss:$16 sps:$4 sm:$0xff]  }
 0x12e   :  { %4710 = vmatprep.subr.bf16.mxu0 %v7143_v28  ;;  %v8565_v28 = vcombine.high %v8561_v24, %v8561_v24 }
 0x130   :  { %1972 = vmatpush1.bf16.msra.mxu1 %v7138_v29  ;;  %v7224_v29 = vld [vmem:[#allocation8 + $0x428] ss:$16 sps:$4 sm:$0xff]  }
 0x131   :  { %4711 = vmatpush1.bf16.msra.mxu0 %v7141_v30  ;;  %1973 = vmatprep.subr.bf16.mxu1 %v7146_v31  ;;  %v7232_v30 = vld [vmem:[#allocation8 + $0x44c] ss:$16 sps:$4 sm:$0xff]   ;;  %v7235_v31 = vld [vmem:[#allocation7 + $0x444] ss:$16 sps:$4 sm:$0xff]  }
 0x132   :  { %4712 = vmatprep.subr.bf16.mxu0 %v7149_v32  ;;  %v7230_v32 = vld [vmem:[#allocation8 + $0x448] ss:$16 sps:$4 sm:$0xff]  }
 0x134   :  { %1974 = vmatpush1.bf16.msra.mxu1 %v7144_v33  ;;  %v7233_v33 = vld [vmem:[#allocation7 + $0x440] ss:$16 sps:$4 sm:$0xff]  }
 0x135   :  { %4713 = vmatpush1.bf16.msra.mxu0 %v7147_v48  ;;  %1975 = vmatprep.subr.bf16.mxu1 %v7152_v34  ;;  %v7241_v48 = vld [vmem:[#allocation7 + $0x464] ss:$16 sps:$4 sm:$0xff]   ;;  %v7236_v34 = vld [vmem:[#allocation8 + $0x468] ss:$16 sps:$4 sm:$0xff]  }
 0x136   :  { %4714 = vmatprep.subr.bf16.mxu0 %v7155_v35  ;;  %v7239_v35 = vld [vmem:[#allocation7 + $0x460] ss:$16 sps:$4 sm:$0xff]  }
 0x138   :  { %1976 = vmatpush1.bf16.msra.mxu1 %v7150_v36  ;;  %v7244_v36 = vld [vmem:[#allocation8 + $0x48c] ss:$16 sps:$4 sm:$0xff]  }
 0x139   :  { %4715 = vmatpush1.bf16.msra.mxu0 %v7153_v37  ;;  %1977 = vmatprep.subr.bf16.mxu1 %v7158_v38  ;;  %v7247_v37 = vld [vmem:[#allocation7 + $0x484] ss:$16 sps:$4 sm:$0xff]   ;;  %v7242_v38 = vld [vmem:[#allocation8 + $0x488] ss:$16 sps:$4 sm:$0xff]  }
 0x13a   :  { %4716 = vmatprep.subr.bf16.mxu0 %v7161_v39  ;;  %v7250_v39 = vld [vmem:[#allocation8 + $0x4ac] ss:$16 sps:$4 sm:$0xff]  }
 0x13c   :  { %1978 = vmatpush1.bf16.msra.mxu1 %v7156_v40  ;;  %v7253_v40 = vld [vmem:[#allocation7 + $0x4a4] ss:$16 sps:$4 sm:$0xff]  }
 0x13d   :  { %4717 = vmatpush1.bf16.msra.mxu0 %v7159_v41  ;;  %1979 = vmatprep.subr.bf16.mxu1 %v7164_v42  ;;  %v7248_v41 = vld [vmem:[#allocation8 + $0x4a8] ss:$16 sps:$4 sm:$0xff]   ;;  %v7251_v42 = vld [vmem:[#allocation7 + $0x4a0] ss:$16 sps:$4 sm:$0xff]  }
 0x13e   :  { %4718 = vmatprep.subr.bf16.mxu0 %v7167_v43  ;;  %v7256_v43 = vld [vmem:[#allocation8 + $0x4cc] ss:$16 sps:$4 sm:$0xff]  }
 0x140   :  { %1980 = vmatpush1.bf16.msra.mxu1 %v7162_v44  ;;  %v7259_v44 = vld [vmem:[#allocation7 + $0x4c4] ss:$16 sps:$4 sm:$0xff]  }
 0x141   :  { %4719 = vmatpush1.bf16.msra.mxu0 %v7165_v45  ;;  %1981 = vmatprep.subr.bf16.mxu1 %v7170_v46  ;;  %v7254_v45 = vld [vmem:[#allocation8 + $0x4c8] ss:$16 sps:$4 sm:$0xff]   ;;  %v7257_v46 = vld [vmem:[#allocation7 + $0x4c0] ss:$16 sps:$4 sm:$0xff]  }
 0x142   :  { %4720 = vmatprep.subr.bf16.mxu0 %v7173_v47  ;;  %v7262_v47 = vld [vmem:[#allocation8 + $0x4ec] ss:$16 sps:$4 sm:$0xff]  }
 0x144   :  { %1982 = vmatpush1.bf16.msra.mxu1 %v7168_v49  ;;  %v7265_v49 = vld [vmem:[#allocation7 + $0x4e4] ss:$16 sps:$4 sm:$0xff]  }
 0x145   :  { %4721 = vmatpush1.bf16.msra.mxu0 %v7171_v50  ;;  %1983 = vmatprep.subr.bf16.mxu1 %v7176_v51  ;;  %v7260_v50 = vld [vmem:[#allocation8 + $0x4e8] ss:$16 sps:$4 sm:$0xff]   ;;  %v7263_v51 = vld [vmem:[#allocation7 + $0x4e0] ss:$16 sps:$4 sm:$0xff]  }
 0x146   :  { %4722 = vmatprep.subr.bf16.mxu0 %v7179_v52  ;;  %v7268_v52 = vld [vmem:[#allocation8 + $0x50c] ss:$16 sps:$4 sm:$0xff]  }
 0x148   :  { %1984 = vmatpush1.bf16.msra.mxu1 %v7174_v54  ;;  %v7271_v54 = vld [vmem:[#allocation7 + $0x504] ss:$16 sps:$4 sm:$0xff]  }
 0x149   :  { %4723 = vmatpush1.bf16.msra.mxu0 %v7177_v55  ;;  %1985 = vmatprep.subr.bf16.mxu1 %v7182_v56  ;;  %v7266_v55 = vld [vmem:[#allocation8 + $0x508] ss:$16 sps:$4 sm:$0xff]   ;;  %v7269_v56 = vld [vmem:[#allocation7 + $0x500] ss:$16 sps:$4 sm:$0xff]  }
 0x14a   :  { %4724 = vmatprep.subr.bf16.mxu0 %v7185_v57  ;;  %v7274_v57 = vld [vmem:[#allocation8 + $0x52c] ss:$16 sps:$4 sm:$0xff]  }
 0x14c   :  { %1986 = vmatpush1.bf16.msra.mxu1 %v7180_v58  ;;  %v7277_v58 = vld [vmem:[#allocation7 + $0x524] ss:$16 sps:$4 sm:$0xff]  }
 0x14d   :  { %4725 = vmatpush1.bf16.msra.mxu0 %v7183_v59  ;;  %1987 = vmatprep.subr.bf16.mxu1 %v7188_v60  ;;  %v7272_v59 = vld [vmem:[#allocation8 + $0x528] ss:$16 sps:$4 sm:$0xff]   ;;  %v7275_v60 = vld [vmem:[#allocation7 + $0x520] ss:$16 sps:$4 sm:$0xff]  }
 0x14e   :  { %4726 = vmatprep.subr.bf16.mxu0 %v7191_v61  ;;  %v7280_v61 = vld [vmem:[#allocation8 + $0x54c] ss:$16 sps:$4 sm:$0xff]  }
 0x150   :  { %1988 = vmatpush1.bf16.msra.mxu1 %v7186_v62  ;;  %v7283_v62 = vld [vmem:[#allocation7 + $0x544] ss:$16 sps:$4 sm:$0xff]  }
 0x151   :  { %4727 = vmatpush1.bf16.msra.mxu0 %v7189_v63  ;;  %1989 = vmatprep.subr.bf16.mxu1 %v7194_v0  ;;  %v7278_v63 = vld [vmem:[#allocation8 + $0x548] ss:$16 sps:$4 sm:$0xff]   ;;  %v7281_v0 = vld [vmem:[#allocation7 + $0x540] ss:$16 sps:$4 sm:$0xff]  }
 0x152   :  { %4728 = vmatprep.subr.bf16.mxu0 %v7197_v1  ;;  %v7286_v1 = vld [vmem:[#allocation8 + $0x56c] ss:$16 sps:$4 sm:$0xff]  }
 0x154   :  { %1990 = vmatpush1.bf16.msra.mxu1 %v7192_v2  ;;  %v7289_v2 = vld [vmem:[#allocation7 + $0x564] ss:$16 sps:$4 sm:$0xff]  }
 0x155   :  { %4729 = vmatpush1.bf16.msra.mxu0 %v7195_v3  ;;  %1991 = vmatprep.subr.bf16.mxu1 %v7200_v4  ;;  %v7284_v3 = vld [vmem:[#allocation8 + $0x568] ss:$16 sps:$4 sm:$0xff]   ;;  %v7287_v4 = vld [vmem:[#allocation7 + $0x560] ss:$16 sps:$4 sm:$0xff]  }
 0x156   :  { %4730 = vmatprep.subr.bf16.mxu0 %v7203_v5  ;;  %v7292_v5 = vld [vmem:[#allocation8 + $0x58c] ss:$16 sps:$4 sm:$0xff]  }
 0x158   :  { %1992 = vmatpush1.bf16.msra.mxu1 %v7198_v8  ;;  %v7295_v8 = vld [vmem:[#allocation7 + $0x584] ss:$16 sps:$4 sm:$0xff]  }
 0x159   :  { %4731 = vmatpush1.bf16.msra.mxu0 %v7201_v9  ;;  %1993 = vmatprep.subr.bf16.mxu1 %v7206_v10  ;;  %v7290_v9 = vld [vmem:[#allocation8 + $0x588] ss:$16 sps:$4 sm:$0xff]   ;;  %v7293_v10 = vld [vmem:[#allocation7 + $0x580] ss:$16 sps:$4 sm:$0xff]  }
 0x15a   :  { %4732 = vmatprep.subr.bf16.mxu0 %v7209_v11  ;;  %v7298_v11 = vld [vmem:[#allocation8 + $0x5ac] ss:$16 sps:$4 sm:$0xff]  }
 0x15c   :  { %1994 = vmatpush1.bf16.msra.mxu1 %v7204_v12  ;;  %v7301_v12 = vld [vmem:[#allocation7 + $0x5a4] ss:$16 sps:$4 sm:$0xff]  }
 0x15d   :  { %4733 = vmatpush1.bf16.msra.mxu0 %v7207_v13  ;;  %1995 = vmatprep.subr.bf16.mxu1 %v7212_v14  ;;  %v7296_v13 = vld [vmem:[#allocation8 + $0x5a8] ss:$16 sps:$4 sm:$0xff]   ;;  %v7299_v14 = vld [vmem:[#allocation7 + $0x5a0] ss:$16 sps:$4 sm:$0xff]  }
 0x15e   :  { %4734 = vmatprep.subr.bf16.mxu0 %v7215_v15  ;;  %v7304_v15 = vld [vmem:[#allocation8 + $0x5cc] ss:$16 sps:$4 sm:$0xff]  }
 0x160   :  { %1996 = vmatpush1.bf16.msra.mxu1 %v7210_v16  ;;  %v7307_v16 = vld [vmem:[#allocation7 + $0x5c4] ss:$16 sps:$4 sm:$0xff]  }
 0x161   :  { %4735 = vmatpush1.bf16.msra.mxu0 %v7213_v17  ;;  %2047 = vmatprep.subr.bf16.mxu1 %v7220_v18  ;;  %v7302_v17 = vld [vmem:[#allocation8 + $0x5c8] ss:$16 sps:$4 sm:$0xff]   ;;  %v7305_v18 = vld [vmem:[#allocation7 + $0x5c0] ss:$16 sps:$4 sm:$0xff]  }
 0x162   :  { %4786 = vmatprep.subr.bf16.mxu0 %v7223_v21  ;;  %v7310_v21 = vld [vmem:[#allocation8 + $0x5ec] ss:$16 sps:$4 sm:$0xff]  }
 0x163   :  { %1998 = vmatmul.mubr.bf16.vlgmr.msra.gmra.mrb[8].mxu1 %v8537_v6  ;;  %v7238_v6 = vld [vmem:[#allocation8 + $0x46c] ss:$16 sps:$4 sm:$0xff]  }
 0x164   :  { %4737 = vmatmul.mubr.bf16.vlgmr.msra.gmra.mrb[8].mxu0 %v8559_v23  ;;  %2048 = vmatpush1.bf16.msra.mxu1 %v7218_v22  ;;  %v7313_v22 = vld [vmem:[#allocation7 + $0x5e4] ss:$16 sps:$4 sm:$0xff]  }
 0x165   :  { %4787 = vmatpush1.bf16.msra.mxu0 %v7221_v25  ;;  %2049 = vmatprep.subr.bf16.mxu1 %v7226_v26  ;;  %v7308_v25 = vld [vmem:[#allocation8 + $0x5e8] ss:$16 sps:$4 sm:$0xff]   ;;  %v7311_v26 = vld [vmem:[#allocation7 + $0x5e0] ss:$16 sps:$4 sm:$0xff]  }
 0x166   :  { %4788 = vmatprep.subr.bf16.mxu0 %v7229_v27  ;;  %2079 = vmatprep.mubr.bf16.mxu1 %v8533_v53  ;;  %v7245_v53 = vld [vmem:[#allocation7 + $0x480] ss:$16 sps:$4 sm:$0xff]   ;;  %v7316_v27 = vld [vmem:[#allocation7 + $0x204] ss:$16 sps:$4 sm:$0xff]  }
 0x167   :  { %4818 = vmatprep.mubr.bf16.mxu0 %v8565_v28 }
 0x168   :  { %2050 = vmatpush1.bf16.msra.mxu1 %v7224_v29  ;;  %v7321_v29 = vld [vmem:[#allocation7 + $0x804] ss:$16 sps:$4 sm:$0xff]  }
 0x169   :  { %4789 = vmatpush1.bf16.msra.mxu0 %v7227_v19  ;;  %2051 = vmatprep.subr.bf16.mxu1 %v7232_v30  ;;  %v7314_v19 = vld [vmem:[#allocation7 + $0x200] ss:$16 sps:$4 sm:$0xff]   ;;  %v8573_v30 = vcombine.low %v8561_v24, %v8561_v24 }
 0x16a   :  { %4790 = vmatprep.subr.bf16.mxu0 %v7235_v31  ;;  %v8575_v31 = vld [vmem:[#allocation2 + $0x8] sm:$0xff] }
 0x16b   :  { %v7322_v24 = vld [vmem:[#allocation7 + $0x220] ss:$16 sps:$4 sm:$0xff]  }
 0x16c   :  { %2052 = vmatpush1.bf16.msra.mxu1 %v7230_v32  ;;  %v8577_v32 = vld [vmem:[#allocation2 + $0x20] sm:$0xff] }
 0x16d   :  { %4791 = vmatpush1.bf16.msra.mxu0 %v7233_v33  ;;  %2053 = vmatprep.subr.bf16.mxu1 %v7238_v6  ;;  %v7319_v33 = vld [vmem:[#allocation7 + $0x800] ss:$16 sps:$4 sm:$0xff]   ;;  %v7324_v6 = vld [vmem:[#allocation7 + $0x224] ss:$16 sps:$4 sm:$0xff]  }
 0x16e   :  { %4792 = vmatprep.subr.bf16.mxu0 %v7241_v48  ;;  %v7327_v48 = vld [vmem:[#allocation7 + $0x824] ss:$16 sps:$4 sm:$0xff]  }
 0x170   :  { %2054 = vmatpush1.bf16.msra.mxu1 %v7236_v34  ;;  %v8581_v34 = vcombine.high %v8575_v31, %v8575_v31 }
 0x171   :  { %4793 = vmatpush1.bf16.msra.mxu0 %v7239_v35  ;;  %2055 = vmatprep.subr.bf16.mxu1 %v7244_v36  ;;  %v8585_v35 = vcombine.high %v8577_v32, %v8577_v32  ;;  %v7325_v36 = vld [vmem:[#allocation7 + $0x820] ss:$16 sps:$4 sm:$0xff]  }
 0x172   :  { %4794 = vmatprep.subr.bf16.mxu0 %v7247_v37  ;;  %v7330_v37 = vld [vmem:[#allocation7 + $0x244] ss:$16 sps:$4 sm:$0xff]  }
 0x174   :  { %2056 = vmatpush1.bf16.msra.mxu1 %v7242_v38  ;;  %v7333_v38 = vld [vmem:[#allocation7 + $0x844] ss:$16 sps:$4 sm:$0xff]  }
 0x175   :  { %4795 = vmatpush1.bf16.msra.mxu0 %v7245_v53  ;;  %2057 = vmatprep.subr.bf16.mxu1 %v7250_v39  ;;  %v7328_v53 = vld [vmem:[#allocation7 + $0x240] ss:$16 sps:$4 sm:$0xff]  }
 0x176   :  { %4796 = vmatprep.subr.bf16.mxu0 %v7253_v40  ;;  %v7331_v39 = vld [vmem:[#allocation7 + $0x840] ss:$16 sps:$4 sm:$0xff]   ;;  %v7339_v40 = vld [vmem:[#allocation7 + $0x864] ss:$16 sps:$4 sm:$0xff]  }
 0x178   :  { %2058 = vmatpush1.bf16.msra.mxu1 %v7248_v41  ;;  %v7334_v41 = vld [vmem:[#allocation7 + $0x260] ss:$16 sps:$4 sm:$0xff]  }
 0x179   :  { %4797 = vmatpush1.bf16.msra.mxu0 %v7251_v42  ;;  %2059 = vmatprep.subr.bf16.mxu1 %v7256_v43  ;;  %v7337_v42 = vld [vmem:[#allocation7 + $0x860] ss:$16 sps:$4 sm:$0xff]   ;;  %v7342_v43 = vld [vmem:[#allocation7 + $0x284] ss:$16 sps:$4 sm:$0xff]  }
 0x17a   :  { %4798 = vmatprep.subr.bf16.mxu0 %v7259_v44  ;;  %v7345_v44 = vld [vmem:[#allocation7 + $0x884] ss:$16 sps:$4 sm:$0xff]  }
 0x17c   :  { %2060 = vmatpush1.bf16.msra.mxu1 %v7254_v45  ;;  %v7340_v45 = vld [vmem:[#allocation7 + $0x280] ss:$16 sps:$4 sm:$0xff]  }
 0x17d   :  { %4799 = vmatpush1.bf16.msra.mxu0 %v7257_v46  ;;  %2061 = vmatprep.subr.bf16.mxu1 %v7262_v47  ;;  %v7343_v46 = vld [vmem:[#allocation7 + $0x880] ss:$16 sps:$4 sm:$0xff]   ;;  %v7348_v47 = vld [vmem:[#allocation7 + $0x2a4] ss:$16 sps:$4 sm:$0xff]  }
 0x17e   :  { %4800 = vmatprep.subr.bf16.mxu0 %v7265_v49  ;;  %v7351_v49 = vld [vmem:[#allocation7 + $0x8a4] ss:$16 sps:$4 sm:$0xff]  }
 0x180   :  { %2062 = vmatpush1.bf16.msra.mxu1 %v7260_v50  ;;  %v7346_v50 = vld [vmem:[#allocation7 + $0x2a0] ss:$16 sps:$4 sm:$0xff]  }
 0x181   :  { %4801 = vmatpush1.bf16.msra.mxu0 %v7263_v51  ;;  %2063 = vmatprep.subr.bf16.mxu1 %v7268_v52  ;;  %v7349_v51 = vld [vmem:[#allocation7 + $0x8a0] ss:$16 sps:$4 sm:$0xff]   ;;  %v7354_v52 = vld [vmem:[#allocation7 + $0x2c4] ss:$16 sps:$4 sm:$0xff]  }
 0x182   :  { %4802 = vmatprep.subr.bf16.mxu0 %v7271_v54  ;;  %v7357_v54 = vld [vmem:[#allocation7 + $0x8c4] ss:$16 sps:$4 sm:$0xff]  }
 0x184   :  { %2064 = vmatpush1.bf16.msra.mxu1 %v7266_v55 }
 0x185   :  { %4803 = vmatpush1.bf16.msra.mxu0 %v7269_v56  ;;  %2065 = vmatprep.subr.bf16.mxu1 %v7274_v57  ;;  %v7352_v56 = vld [vmem:[#allocation7 + $0x2c0] ss:$16 sps:$4 sm:$0xff]  }
 0x186   :  { %4804 = vmatprep.subr.bf16.mxu0 %v7277_v58  ;;  %v7355_v57 = vld [vmem:[#allocation7 + $0x8c0] ss:$16 sps:$4 sm:$0xff]  }
 0x188   :  { %2066 = vmatpush1.bf16.msra.mxu1 %v7272_v59 }
 0x189   :  { %4805 = vmatpush1.bf16.msra.mxu0 %v7275_v60  ;;  %2067 = vmatprep.subr.bf16.mxu1 %v7280_v61 }
 0x18a   :  { %4806 = vmatprep.subr.bf16.mxu0 %v7283_v62 }
 0x18c   :  { %2068 = vmatpush1.bf16.msra.mxu1 %v7278_v63 }
 0x18d   :  { %4807 = vmatpush1.bf16.msra.mxu0 %v7281_v0  ;;  %2069 = vmatprep.subr.bf16.mxu1 %v7286_v1  ;;  %v7360_v0 = vld [vmem:[#allocation7 + $0x2e4] ss:$16 sps:$4 sm:$0xff]  }
 0x18e   :  { %4808 = vmatprep.subr.bf16.mxu0 %v7289_v2  ;;  %v7363_v1 = vld [vmem:[#allocation7 + $0x8e4] ss:$16 sps:$4 sm:$0xff]  }
 0x190   :  { %2070 = vmatpush1.bf16.msra.mxu1 %v7284_v3  ;;  %v7358_v3 = vld [vmem:[#allocation7 + $0x2e0] ss:$16 sps:$4 sm:$0xff]  }
 0x191   :  { %4809 = vmatpush1.bf16.msra.mxu0 %v7287_v4  ;;  %2071 = vmatprep.subr.bf16.mxu1 %v7292_v5  ;;  %v7361_v4 = vld [vmem:[#allocation7 + $0x8e0] ss:$16 sps:$4 sm:$0xff]   ;;  %v7366_v5 = vld [vmem:[#allocation7 + $0x304] ss:$16 sps:$4 sm:$0xff]  }
 0x192   :  { %4810 = vmatprep.subr.bf16.mxu0 %v7295_v8  ;;  %v7369_v8 = vld [vmem:[#allocation7 + $0x904] ss:$16 sps:$4 sm:$0xff]  }
 0x194   :  { %2072 = vmatpush1.bf16.msra.mxu1 %v7290_v9  ;;  %v7364_v9 = vld [vmem:[#allocation7 + $0x300] ss:$16 sps:$4 sm:$0xff]  }
 0x195   :  { %4811 = vmatpush1.bf16.msra.mxu0 %v7293_v10  ;;  %2073 = vmatprep.subr.bf16.mxu1 %v7298_v11  ;;  %v7367_v10 = vld [vmem:[#allocation7 + $0x900] ss:$16 sps:$4 sm:$0xff]   ;;  %v7372_v11 = vld [vmem:[#allocation7 + $0x324] ss:$16 sps:$4 sm:$0xff]  }
 0x196   :  { %4812 = vmatprep.subr.bf16.mxu0 %v7301_v12  ;;  %v7375_v12 = vld [vmem:[#allocation7 + $0x924] ss:$16 sps:$4 sm:$0xff]  }
 0x198   :  { %2074 = vmatpush1.bf16.msra.mxu1 %v7296_v13  ;;  %v7370_v13 = vld [vmem:[#allocation7 + $0x320] ss:$16 sps:$4 sm:$0xff]  }
 0x199   :  { %4813 = vmatpush1.bf16.msra.mxu0 %v7299_v14  ;;  %2075 = vmatprep.subr.bf16.mxu1 %v7304_v15  ;;  %v7373_v14 = vld [vmem:[#allocation7 + $0x920] ss:$16 sps:$4 sm:$0xff]   ;;  %v7378_v15 = vld [vmem:[#allocation7 + $0x344] ss:$16 sps:$4 sm:$0xff]  }
 0x19a   :  { %4814 = vmatprep.subr.bf16.mxu0 %v7307_v16  ;;  %v7381_v16 = vld [vmem:[#allocation7 + $0x944] ss:$16 sps:$4 sm:$0xff]  }
 0x19c   :  { %2076 = vmatpush1.bf16.msra.mxu1 %v7302_v17  ;;  %v7376_v17 = vld [vmem:[#allocation7 + $0x340] ss:$16 sps:$4 sm:$0xff]  }
 0x19d   :  { %4815 = vmatpush1.bf16.msra.mxu0 %v7305_v18  ;;  %2077 = vmatprep.subr.bf16.mxu1 %v7310_v21  ;;  %v7379_v18 = vld [vmem:[#allocation7 + $0x940] ss:$16 sps:$4 sm:$0xff]   ;;  %v7384_v21 = vld [vmem:[#allocation7 + $0x364] ss:$16 sps:$4 sm:$0xff]  }
 0x19e   :  { %4816 = vmatprep.subr.bf16.mxu0 %v7313_v22  ;;  %v7387_v22 = vld [vmem:[#allocation7 + $0x964] ss:$16 sps:$4 sm:$0xff]  }
 0x1a0   :  { %2078 = vmatpush1.bf16.msra.mxu1 %v7308_v25  ;;  %v7382_v25 = vld [vmem:[#allocation7 + $0x360] ss:$16 sps:$4 sm:$0xff]  }
 0x1a1   :  { %4817 = vmatpush1.bf16.msra.mxu0 %v7311_v26  ;;  %4745 = vmatprep.subr.bf16.mxu1 %v7316_v27  ;;  %v7385_v26 = vld [vmem:[#allocation7 + $0x960] ss:$16 sps:$4 sm:$0xff]   ;;  %v7390_v27 = vld [vmem:[#allocation7 + $0x384] ss:$16 sps:$4 sm:$0xff]  }
 0x1a2   :  { %4868 = vmatprep.subr.bf16.mxu0 %v7321_v29  ;;  %v7393_v29 = vld [vmem:[#allocation7 + $0x984] ss:$16 sps:$4 sm:$0xff]  }
 0x1a3   :  { %2080 = vmatmul.mubr.bf16.vlgmr.msra.gmra.mrb[12].mxu1 %v8539_v7  ;;  %v7336_v7 = vld [vmem:[#allocation7 + $0x264] ss:$16 sps:$4 sm:$0xff]  }
 0x1a4   :  { %4819 = vmatmul.mubr.bf16.vlgmr.msra.gmra.mrb[12].mxu0 %v8573_v30  ;;  %4746 = vmatpush1.bf16.msra.mxu1 %v7314_v19  ;;  %v7388_v19 = vld [vmem:[#allocation7 + $0x380] ss:$16 sps:$4 sm:$0xff]  }
 0x1a5   :  { %4869 = vmatpush1.bf16.msra.mxu0 %v7319_v33  ;;  %4747 = vmatprep.subr.bf16.mxu1 %v7324_v6  ;;  %v7391_v33 = vld [vmem:[#allocation7 + $0x980] ss:$16 sps:$4 sm:$0xff]   ;;  %v7396_v6 = vld [vmem:[#allocation7 + $0x3a4] ss:$16 sps:$4 sm:$0xff]  }
 0x1a6   :  { %4870 = vmatprep.subr.bf16.mxu0 %v7327_v48  ;;  %4777 = vmatprep.mubr.bf16.mxu1 %v8581_v34  ;;  %v7399_v48 = vld [vmem:[#allocation7 + $0x9a4] ss:$16 sps:$4 sm:$0xff]  }
 0x1a7   :  { %4900 = vmatprep.mubr.bf16.mxu0 %v8585_v35 }
 0x1a8   :  { %4748 = vmatpush1.bf16.msra.mxu1 %v7322_v24  ;;  %v7394_v24 = vld [vmem:[#allocation7 + $0x3a0] ss:$16 sps:$4 sm:$0xff]  }
 0x1a9   :  { %4871 = vmatpush1.bf16.msra.mxu0 %v7325_v36  ;;  %4749 = vmatprep.subr.bf16.mxu1 %v7330_v37  ;;  %v7397_v36 = vld [vmem:[#allocation7 + $0x9a0] ss:$16 sps:$4 sm:$0xff]   ;;  %v7402_v37 = vld [vmem:[#allocation7 + $0x3c4] ss:$16 sps:$4 sm:$0xff]  }
 0x1aa   :  { %4872 = vmatprep.subr.bf16.mxu0 %v7333_v38  ;;  %v7405_v38 = vld [vmem:[#allocation7 + $0x9c4] ss:$16 sps:$4 sm:$0xff]  }
 0x1ac   :  { %4750 = vmatpush1.bf16.msra.mxu1 %v7328_v53  ;;  %v7400_v53 = vld [vmem:[#allocation7 + $0x3c0] ss:$16 sps:$4 sm:$0xff]  }
 0x1ad   :  { %4873 = vmatpush1.bf16.msra.mxu0 %v7331_v39  ;;  %4751 = vmatprep.subr.bf16.mxu1 %v7336_v7  ;;  %v7403_v39 = vld [vmem:[#allocation7 + $0x9c0] ss:$16 sps:$4 sm:$0xff]   ;;  %v7408_v7 = vld [vmem:[#allocation7 + $0x3e4] ss:$16 sps:$4 sm:$0xff]  }
 0x1ae   :  { %4874 = vmatprep.subr.bf16.mxu0 %v7339_v40  ;;  %v7411_v40 = vld [vmem:[#allocation7 + $0x9e4] ss:$16 sps:$4 sm:$0xff]  }
 0x1b0   :  { %4752 = vmatpush1.bf16.msra.mxu1 %v7334_v41  ;;  %v7406_v41 = vld [vmem:[#allocation7 + $0x3e0] ss:$16 sps:$4 sm:$0xff]  }
 0x1b1   :  { %4875 = vmatpush1.bf16.msra.mxu0 %v7337_v42  ;;  %4753 = vmatprep.subr.bf16.mxu1 %v7342_v43  ;;  %v7409_v42 = vld [vmem:[#allocation7 + $0x9e0] ss:$16 sps:$4 sm:$0xff]   ;;  %v7416_v43 = vld [vmem:[#allocation7 + $0x604] ss:$16 sps:$4 sm:$0xff]  }
 0x1b2   :  { %4876 = vmatprep.subr.bf16.mxu0 %v7345_v44  ;;  %v7421_v44 = vld [vmem:[#allocation7 + $0xc04] ss:$16 sps:$4 sm:$0xff]  }
 0x1b4   :  { %4754 = vmatpush1.bf16.msra.mxu1 %v7340_v45  ;;  %v8599_v45 = vld [vmem:[#allocation2 + $0x18] sm:$0xff] }
 0x1b5   :  { %4877 = vmatpush1.bf16.msra.mxu0 %v7343_v46  ;;  %4755 = vmatprep.subr.bf16.mxu1 %v7348_v47  ;;  %v7414_v46 = vld [vmem:[#allocation7 + $0x600] ss:$16 sps:$4 sm:$0xff]  }
 0x1b6   :  { %4878 = vmatprep.subr.bf16.mxu0 %v7351_v49  ;;  %v8591_v55 = vpop.f32.mrb[0].mxu1  ;;  %v7419_v47 = vld [vmem:[#allocation7 + $0xc00] ss:$16 sps:$4 sm:$0xff]   ;;  %v8603_v49 = vcombine.low %v8575_v31, %v8575_v31 }
 0x1b7   :  { %v8593_v58 = vpop.f32.mrb[0].mxu0  ;;  %v8595_v59 = vpop.f32.mrb[1].mxu1 }
 0x1b8   :  { %v8597_v60 = vpop.f32.mrb[1].mxu0  ;;  %v1880_v61 = vpop.f32.mrb[2].mxu1  ;;  %4756 = vmatpush1.bf16.msra.mxu1 %v7346_v50  ;;  %v8607_v50 = vcombine.low %v8577_v32, %v8577_v32  ;;  %v7430_v32 = vld [vmem:[#allocation7 + $0x644] ss:$16 sps:$4 sm:$0xff]  }
 0x1b9   :  { %4879 = vmatpush1.bf16.msra.mxu0 %v7349_v51  ;;  %v1962_v62 = vpop.f32.mrb[2].mxu0  ;;  %v1881_v63 = vpop.f32.mrb[3].mxu1  ;;  %4757 = vmatprep.subr.bf16.mxu1 %v7354_v52  ;;  %v7424_v51 = vld [vmem:[#allocation7 + $0x624] ss:$16 sps:$4 sm:$0xff]   ;;  %v8609_v52 = vld [vmem:[#allocation2 + $0x30] sm:$0xff]  ;;  %v8613_v61 = vcombine.high %v8599_v45, %v8599_v45 }
 0x1ba   :  { %4880 = vmatprep.subr.bf16.mxu0 %v7357_v54  ;;  %v1963_v2 = vpop.f32.mrb[3].mxu0  ;;  %v7427_v54 = vld [vmem:[#allocation7 + $0xc24] ss:$16 sps:$4 sm:$0xff]   ;;  %v8617_v31 = vcombine.high %v8609_v52, %v8609_v52  ;;  %v7428_v63 = vld [vmem:[#allocation7 + $0x640] ss:$16 sps:$4 sm:$0xff]  }
 0x1bb   :  { %v7433_v62 = vld [vmem:[#allocation7 + $0xc44] ss:$16 sps:$4 sm:$0xff]  }
 0x1bc   :  { %4758 = vmatpush1.bf16.msra.mxu1 %v7352_v56  ;;  %v7422_v56 = vld [vmem:[#allocation7 + $0x620] ss:$16 sps:$4 sm:$0xff]   ;;  %v7439_v2 = vld [vmem:[#allocation7 + $0xc64] ss:$16 sps:$4 sm:$0xff]  }
 0x1bd   :  { %4881 = vmatpush1.bf16.msra.mxu0 %v7355_v57  ;;  %4759 = vmatprep.subr.bf16.mxu1 %v7360_v0  ;;  %v7425_v57 = vld [vmem:[#allocation7 + $0xc20] ss:$16 sps:$4 sm:$0xff]  }
 0x1be   :  { %4882 = vmatprep.subr.bf16.mxu0 %v7363_v1  ;;  %v7431_v0 = vld [vmem:[#allocation7 + $0xc40] ss:$16 sps:$4 sm:$0xff]   ;;  %v7436_v1 = vld [vmem:[#allocation7 + $0x664] ss:$16 sps:$4 sm:$0xff]  }
 0x1c0   :  { %4760 = vmatpush1.bf16.msra.mxu1 %v7358_v3  ;;  %v7434_v3 = vld [vmem:[#allocation7 + $0x660] ss:$16 sps:$4 sm:$0xff]  }
 0x1c1   :  { %4883 = vmatpush1.bf16.msra.mxu0 %v7361_v4  ;;  %4761 = vmatprep.subr.bf16.mxu1 %v7366_v5  ;;  %v7437_v4 = vld [vmem:[#allocation7 + $0xc60] ss:$16 sps:$4 sm:$0xff]   ;;  %v7442_v5 = vld [vmem:[#allocation7 + $0x684] ss:$16 sps:$4 sm:$0xff]  }
 0x1c2   :  { %4884 = vmatprep.subr.bf16.mxu0 %v7369_v8  ;;  %v7445_v8 = vld [vmem:[#allocation7 + $0xc84] ss:$16 sps:$4 sm:$0xff]  }
 0x1c4   :  { %4762 = vmatpush1.bf16.msra.mxu1 %v7364_v9  ;;  %v7440_v9 = vld [vmem:[#allocation7 + $0x680] ss:$16 sps:$4 sm:$0xff]  }
 0x1c5   :  { %4885 = vmatpush1.bf16.msra.mxu0 %v7367_v10  ;;  %4763 = vmatprep.subr.bf16.mxu1 %v7372_v11  ;;  %v7443_v10 = vld [vmem:[#allocation7 + $0xc80] ss:$16 sps:$4 sm:$0xff]   ;;  %v7448_v11 = vld [vmem:[#allocation7 + $0x6a4] ss:$16 sps:$4 sm:$0xff]  }
 0x1c6   :  { %4886 = vmatprep.subr.bf16.mxu0 %v7375_v12  ;;  %v7451_v12 = vld [vmem:[#allocation7 + $0xca4] ss:$16 sps:$4 sm:$0xff]  }
 0x1c8   :  { %4764 = vmatpush1.bf16.msra.mxu1 %v7370_v13  ;;  %v7446_v13 = vld [vmem:[#allocation7 + $0x6a0] ss:$16 sps:$4 sm:$0xff]  }
 0x1c9   :  { %4887 = vmatpush1.bf16.msra.mxu0 %v7373_v14  ;;  %4765 = vmatprep.subr.bf16.mxu1 %v7378_v15  ;;  %v7449_v14 = vld [vmem:[#allocation7 + $0xca0] ss:$16 sps:$4 sm:$0xff]   ;;  %v7454_v15 = vld [vmem:[#allocation7 + $0x6c4] ss:$16 sps:$4 sm:$0xff]  }
 0x1ca   :  { %4888 = vmatprep.subr.bf16.mxu0 %v7381_v16  ;;  %v7457_v16 = vld [vmem:[#allocation7 + $0xcc4] ss:$16 sps:$4 sm:$0xff]  }
 0x1cc   :  { %4766 = vmatpush1.bf16.msra.mxu1 %v7376_v17 }
 0x1cd   :  { %4889 = vmatpush1.bf16.msra.mxu0 %v7379_v18  ;;  %4767 = vmatprep.subr.bf16.mxu1 %v7384_v21  ;;  %v7452_v18 = vld [vmem:[#allocation7 + $0x6c0] ss:$16 sps:$4 sm:$0xff]  }
 0x1ce   :  { %4890 = vmatprep.subr.bf16.mxu0 %v7387_v22  ;;  %v7455_v21 = vld [vmem:[#allocation7 + $0xcc0] ss:$16 sps:$4 sm:$0xff]  }
 0x1d0   :  { %4768 = vmatpush1.bf16.msra.mxu1 %v7382_v25 }
 0x1d1   :  { %4891 = vmatpush1.bf16.msra.mxu0 %v7385_v26  ;;  %4769 = vmatprep.subr.bf16.mxu1 %v7390_v27 }
 0x1d2   :  { %4892 = vmatprep.subr.bf16.mxu0 %v7393_v29 }
 0x1d4   :  { %4770 = vmatpush1.bf16.msra.mxu1 %v7388_v19 }
 0x1d5   :  { %4893 = vmatpush1.bf16.msra.mxu0 %v7391_v33  ;;  %4771 = vmatprep.subr.bf16.mxu1 %v7396_v6 }
 0x1d6   :  { %4894 = vmatprep.subr.bf16.mxu0 %v7399_v48 }
 0x1d8   :  { %4772 = vmatpush1.bf16.msra.mxu1 %v7394_v24  ;;  %v7460_v24 = vld [vmem:[#allocation7 + $0x6e4] ss:$16 sps:$4 sm:$0xff]  }
 0x1d9   :  { %4895 = vmatpush1.bf16.msra.mxu0 %v7397_v36  ;;  %4773 = vmatprep.subr.bf16.mxu1 %v7402_v37  ;;  %v7463_v36 = vld [vmem:[#allocation7 + $0xce4] ss:$16 sps:$4 sm:$0xff]  }
 0x1da   :  { %4896 = vmatprep.subr.bf16.mxu0 %v7405_v38  ;;  %v7458_v38 = vld [vmem:[#allocation7 + $0x6e0] ss:$16 sps:$4 sm:$0xff]  }
 0x1dc   :  { %4774 = vmatpush1.bf16.msra.mxu1 %v7400_v53  ;;  %v7461_v53 = vld [vmem:[#allocation7 + $0xce0] ss:$16 sps:$4 sm:$0xff]  }
 0x1dd   :  { %4897 = vmatpush1.bf16.msra.mxu0 %v7403_v39  ;;  %4775 = vmatprep.subr.bf16.mxu1 %v7408_v7  ;;  %v7469_v39 = vld [vmem:[#allocation7 + $0xd04] ss:$16 sps:$4 sm:$0xff]   ;;  %v7464_v7 = vld [vmem:[#allocation7 + $0x700] ss:$16 sps:$4 sm:$0xff]  }
 0x1de   :  { %4898 = vmatprep.subr.bf16.mxu0 %v7411_v40  ;;  %v7472_v40 = vld [vmem:[#allocation7 + $0x724] ss:$16 sps:$4 sm:$0xff]  }
 0x1e0   :  { %4776 = vmatpush1.bf16.msra.mxu1 %v7406_v41  ;;  %v7475_v41 = vld [vmem:[#allocation7 + $0xd24] ss:$16 sps:$4 sm:$0xff]  }
 0x1e1   :  { %4899 = vmatpush1.bf16.msra.mxu0 %v7409_v42  ;;  %4827 = vmatprep.subr.bf16.mxu1 %v7416_v43  ;;  %v7470_v42 = vld [vmem:[#allocation7 + $0x720] ss:$16 sps:$4 sm:$0xff]   ;;  %v7478_v43 = vld [vmem:[#allocation7 + $0x744] ss:$16 sps:$4 sm:$0xff]  }
 0x1e2   :  { %4950 = vmatprep.subr.bf16.mxu0 %v7421_v44  ;;  %v7481_v44 = vld [vmem:[#allocation7 + $0xd44] ss:$16 sps:$4 sm:$0xff]  }
 0x1e3   :  { %4778 = vmatmul.mubr.bf16.vlgmr.msra.gmra.mrb[16].mxu1 %v8603_v49 }
 0x1e4   :  { %4901 = vmatmul.mubr.bf16.vlgmr.msra.gmra.mrb[16].mxu0 %v8607_v50  ;;  %4828 = vmatpush1.bf16.msra.mxu1 %v7414_v46  ;;  %v7476_v46 = vld [vmem:[#allocation7 + $0x740] ss:$16 sps:$4 sm:$0xff]  }
 0x1e5   :  { %4951 = vmatpush1.bf16.msra.mxu0 %v7419_v47  ;;  %4829 = vmatprep.subr.bf16.mxu1 %v7424_v51  ;;  %v7479_v47 = vld [vmem:[#allocation7 + $0xd40] ss:$16 sps:$4 sm:$0xff]   ;;  %v7484_v51 = vld [vmem:[#allocation7 + $0x764] ss:$16 sps:$4 sm:$0xff]  }
 0x1e6   :  { %4952 = vmatprep.subr.bf16.mxu0 %v7427_v54  ;;  %4859 = vmatprep.mubr.bf16.mxu1 %v8613_v61  ;;  %v7487_v54 = vld [vmem:[#allocation7 + $0xd64] ss:$16 sps:$4 sm:$0xff]  }
 0x1e7   :  { %4982 = vmatprep.mubr.bf16.mxu0 %v8617_v31 }
 0x1e8   :  { %4830 = vmatpush1.bf16.msra.mxu1 %v7422_v56  ;;  %v7482_v56 = vld [vmem:[#allocation7 + $0x760] ss:$16 sps:$4 sm:$0xff]  }
 0x1e9   :  { %4953 = vmatpush1.bf16.msra.mxu0 %v7425_v57  ;;  %4831 = vmatprep.subr.bf16.mxu1 %v7430_v32  ;;  %v7485_v57 = vld [vmem:[#allocation7 + $0xd60] ss:$16 sps:$4 sm:$0xff]   ;;  %v7490_v32 = vld [vmem:[#allocation7 + $0x784] ss:$16 sps:$4 sm:$0xff]  }
 0x1ea   :  { %4954 = vmatprep.subr.bf16.mxu0 %v7433_v62  ;;  %v7493_v62 = vld [vmem:[#allocation7 + $0xd84] ss:$16 sps:$4 sm:$0xff]  }
 0x1ec   :  { %4832 = vmatpush1.bf16.msra.mxu1 %v7428_v63  ;;  %v7488_v63 = vld [vmem:[#allocation7 + $0x780] ss:$16 sps:$4 sm:$0xff]  }
 0x1ed   :  { %4955 = vmatpush1.bf16.msra.mxu0 %v7431_v0  ;;  %4833 = vmatprep.subr.bf16.mxu1 %v7436_v1  ;;  %v7491_v0 = vld [vmem:[#allocation7 + $0xd80] ss:$16 sps:$4 sm:$0xff]   ;;  %v7496_v1 = vld [vmem:[#allocation7 + $0x7a4] ss:$16 sps:$4 sm:$0xff]  }
 0x1ee   :  { %4956 = vmatprep.subr.bf16.mxu0 %v7439_v2  ;;  %v7499_v2 = vld [vmem:[#allocation7 + $0xda4] ss:$16 sps:$4 sm:$0xff]  }
 0x1f0   :  { %4834 = vmatpush1.bf16.msra.mxu1 %v7434_v3  ;;  %v7494_v3 = vld [vmem:[#allocation7 + $0x7a0] ss:$16 sps:$4 sm:$0xff]  }
 0x1f1   :  { %4957 = vmatpush1.bf16.msra.mxu0 %v7437_v4  ;;  %4835 = vmatprep.subr.bf16.mxu1 %v7442_v5  ;;  %v7497_v4 = vld [vmem:[#allocation7 + $0xda0] ss:$16 sps:$4 sm:$0xff]   ;;  %v7502_v5 = vld [vmem:[#allocation7 + $0x7c4] ss:$16 sps:$4 sm:$0xff]  }
 0x1f2   :  { %4958 = vmatprep.subr.bf16.mxu0 %v7445_v8  ;;  %v7505_v8 = vld [vmem:[#allocation7 + $0xdc4] ss:$16 sps:$4 sm:$0xff]  }
 0x1f4   :  { %4836 = vmatpush1.bf16.msra.mxu1 %v7440_v9  ;;  %v7500_v9 = vld [vmem:[#allocation7 + $0x7c0] ss:$16 sps:$4 sm:$0xff]  }
 0x1f5   :  { %4959 = vmatpush1.bf16.msra.mxu0 %v7443_v10  ;;  %4837 = vmatprep.subr.bf16.mxu1 %v7448_v11  ;;  %v7503_v10 = vld [vmem:[#allocation7 + $0xdc0] ss:$16 sps:$4 sm:$0xff]   ;;  %v7508_v11 = vld [vmem:[#allocation7 + $0x7e4] ss:$16 sps:$4 sm:$0xff]  }
 0x1f6   :  { %4960 = vmatprep.subr.bf16.mxu0 %v7451_v12  ;;  %v1917_v17 = vpop.f32.mrb[4].mxu1  ;;  %v7511_v12 = vld [vmem:[#allocation7 + $0xde4] ss:$16 sps:$4 sm:$0xff]  }
 0x1f7   :  { %v8623_v22 = vpop.f32.mrb[4].mxu0  ;;  %v1918_v25 = vadd.f32 %v1917_v17, %v8591_v55  ;;  %v1919_v26 = vpop.f32.mrb[5].mxu1  ;;  %v7514_v17 = vld [vmem:[#allocation7 + $0xa00] ss:$16 sps:$4 sm:$0xff]  }
 0x1f8   :  { %v8626_v27 = vpop.f32.mrb[5].mxu0  ;;  %v1920_v29 = vadd.f32 %v1919_v26, %v8595_v59  ;;  %v1921_v19 = vpop.f32.mrb[6].mxu1  ;;  %4838 = vmatpush1.bf16.msra.mxu1 %v7446_v13  ;;  %v7466_v59 = vld [vmem:[#allocation7 + $0x704] ss:$16 sps:$4 sm:$0xff]   ;;  %v7506_v13 = vld [vmem:[#allocation7 + $0x7e0] ss:$16 sps:$4 sm:$0xff]  }
 0x1f9   :  { %4961 = vmatpush1.bf16.msra.mxu0 %v7449_v14  ;;  %v2044_v33 = vpop.f32.mrb[6].mxu0  ;;  %v8630_v6 = vadd.f32 %v8593_v58, %v1918_v25  ;;  %v1922_v48 = vpop.f32.mrb[7].mxu1  ;;  %4839 = vmatprep.subr.bf16.mxu1 %v7454_v15  ;;  %v7467_v58 = vld [vmem:[#allocation7 + $0xd00] ss:$16 sps:$4 sm:$0xff]   ;;  %v7516_v15 = vld [vmem:[#allocation7 + $0xa04] ss:$16 sps:$4 sm:$0xff]  }
 0x1fa   :  { %4962 = vmatprep.subr.bf16.mxu0 %v7457_v16  ;;  %v2045_v37 = vpop.f32.mrb[7].mxu0  ;;  %v8633_v55 = vadd.f32 %v8597_v60, %v1920_v29  ;;  %v7473_v60 = vld [vmem:[#allocation7 + $0xd20] ss:$16 sps:$4 sm:$0xff]   ;;  %v7521_v16 = vld [vmem:[#allocation7 + $0xc] ss:$16 sps:$4 sm:$0xff]  }
 0x1fb   :  { %v7509_v14 = vld [vmem:[#allocation7 + $0xde0] ss:$16 sps:$4 sm:$0xff]   ;;  %v7519_v25 = vld [vmem:[#allocation7 + $0x8] ss:$16 sps:$4 sm:$0xff]   ;;  %v7524_v29 = vld [vmem:[#allocation7 + $0xa24] ss:$16 sps:$4 sm:$0xff]  }
 0x1fc   :  { %4840 = vmatpush1.bf16.msra.mxu1 %v7452_v18  ;;  %v8637_v18 = vcombine.low %v8599_v45, %v8599_v45  ;;  %v8643_v26 = vld [vmem:[#allocation2 + $0x28] sm:$0xff]  ;;  %v7527_v19 = vld [vmem:[#allocation7 + $0x2c] ss:$16 sps:$4 sm:$0xff]   ;;  %v7531_v37 = vld [vmem:[#allocation7 + $0x48] ss:$16 sps:$4 sm:$0xff]  }
 0x1fd   :  { %4963 = vmatpush1.bf16.msra.mxu0 %v7455_v21  ;;  %4841 = vmatprep.subr.bf16.mxu1 %v7460_v24  ;;  %v8641_v21 = vcombine.low %v8609_v52, %v8609_v52  ;;  %v8647_v33 = vcombine.high %v8643_v26, %v8643_v26  ;;  %v7522_v45 = vld [vmem:[#allocation7 + $0xa20] ss:$16 sps:$4 sm:$0xff]   ;;  %v7525_v52 = vld [vmem:[#allocation7 + $0x28] ss:$16 sps:$4 sm:$0xff]   ;;  %v7530_v48 = vld [vmem:[#allocation7 + $0xa44] ss:$16 sps:$4 sm:$0xff]  }
 0x1fe   :  { %4964 = vmatprep.subr.bf16.mxu0 %v7463_v36  ;;  %v7533_v24 = vld [vmem:[#allocation7 + $0x4c] ss:$16 sps:$4 sm:$0xff]   ;;  %v7528_v36 = vld [vmem:[#allocation7 + $0xa40] ss:$16 sps:$4 sm:$0xff]  }
 0x200   :  { %4842 = vmatpush1.bf16.msra.mxu1 %v7458_v38  ;;  %v7536_v38 = vld [vmem:[#allocation7 + $0xa64] ss:$16 sps:$4 sm:$0xff]  }
 0x201   :  { %4965 = vmatpush1.bf16.msra.mxu0 %v7461_v53  ;;  %4843 = vmatprep.subr.bf16.mxu1 %v7466_v59  ;;  %v7539_v53 = vld [vmem:[#allocation7 + $0x6c] ss:$16 sps:$4 sm:$0xff]   ;;  %v7534_v59 = vld [vmem:[#allocation7 + $0xa60] ss:$16 sps:$4 sm:$0xff]  }
 0x202   :  { %4966 = vmatprep.subr.bf16.mxu0 %v7469_v39  ;;  %v7537_v39 = vld [vmem:[#allocation7 + $0x68] ss:$16 sps:$4 sm:$0xff]  }
 0x204   :  { %4844 = vmatpush1.bf16.msra.mxu1 %v7464_v7  ;;  %v7542_v7 = vld [vmem:[#allocation7 + $0xa84] ss:$16 sps:$4 sm:$0xff]  }
 0x205   :  { %4967 = vmatpush1.bf16.msra.mxu0 %v7467_v58  ;;  %4845 = vmatprep.subr.bf16.mxu1 %v7472_v40  ;;  %v7545_v58 = vld [vmem:[#allocation7 + $0x8c] ss:$16 sps:$4 sm:$0xff]   ;;  %v7540_v40 = vld [vmem:[#allocation7 + $0xa80] ss:$16 sps:$4 sm:$0xff]  }
 0x206   :  { %4968 = vmatprep.subr.bf16.mxu0 %v7475_v41  ;;  %v7548_v41 = vld [vmem:[#allocation7 + $0xaa4] ss:$16 sps:$4 sm:$0xff]  }
 0x208   :  { %4846 = vmatpush1.bf16.msra.mxu1 %v7470_v42  ;;  %v7551_v42 = vld [vmem:[#allocation7 + $0xac] ss:$16 sps:$4 sm:$0xff]  }
 0x209   :  { %4969 = vmatpush1.bf16.msra.mxu0 %v7473_v60  ;;  %4847 = vmatprep.subr.bf16.mxu1 %v7478_v43  ;;  %v7546_v60 = vld [vmem:[#allocation7 + $0xaa0] ss:$16 sps:$4 sm:$0xff]   ;;  %v7549_v43 = vld [vmem:[#allocation7 + $0xa8] ss:$16 sps:$4 sm:$0xff]  }
 0x20a   :  { %4970 = vmatprep.subr.bf16.mxu0 %v7481_v44  ;;  %v7554_v44 = vld [vmem:[#allocation7 + $0xac4] ss:$16 sps:$4 sm:$0xff]  }
 0x20c   :  { %4848 = vmatpush1.bf16.msra.mxu1 %v7476_v46  ;;  %v7557_v46 = vld [vmem:[#allocation7 + $0xcc] ss:$16 sps:$4 sm:$0xff]  }
 0x20d   :  { %4971 = vmatpush1.bf16.msra.mxu0 %v7479_v47  ;;  %4849 = vmatprep.subr.bf16.mxu1 %v7484_v51 }
 0x20e   :  { %4972 = vmatprep.subr.bf16.mxu0 %v7487_v54  ;;  %v7552_v54 = vld [vmem:[#allocation7 + $0xac0] ss:$16 sps:$4 sm:$0xff]  }
 0x210   :  { %4850 = vmatpush1.bf16.msra.mxu1 %v7482_v56 }
 0x211   :  { %4973 = vmatpush1.bf16.msra.mxu0 %v7485_v57  ;;  %4851 = vmatprep.subr.bf16.mxu1 %v7490_v32 }
 0x212   :  { %4974 = vmatprep.subr.bf16.mxu0 %v7493_v62 }
 0x214   :  { %4852 = vmatpush1.bf16.msra.mxu1 %v7488_v63  ;;  %v7555_v63 = vld [vmem:[#allocation7 + $0xc8] ss:$16 sps:$4 sm:$0xff]  }
 0x215   :  { %4975 = vmatpush1.bf16.msra.mxu0 %v7491_v0  ;;  %4853 = vmatprep.subr.bf16.mxu1 %v7496_v1 }
 0x216   :  { %4976 = vmatprep.subr.bf16.mxu0 %v7499_v2 }
 0x218   :  { %4854 = vmatpush1.bf16.msra.mxu1 %v7494_v3  ;;  %v7560_v3 = vld [vmem:[#allocation7 + $0xae4] ss:$16 sps:$4 sm:$0xff]  }
 0x219   :  { %4977 = vmatpush1.bf16.msra.mxu0 %v7497_v4  ;;  %4855 = vmatprep.subr.bf16.mxu1 %v7502_v5 }
 0x21a   :  { %4978 = vmatprep.subr.bf16.mxu0 %v7505_v8  ;;  %v7558_v8 = vld [vmem:[#allocation7 + $0xae0] ss:$16 sps:$4 sm:$0xff]  }
 0x21c   :  { %4856 = vmatpush1.bf16.msra.mxu1 %v7500_v9  ;;  %v7561_v9 = vld [vmem:[#allocation7 + $0xe8] ss:$16 sps:$4 sm:$0xff]  }
 0x21d   :  { %4979 = vmatpush1.bf16.msra.mxu0 %v7503_v10  ;;  %4857 = vmatprep.subr.bf16.mxu1 %v7508_v11  ;;  %v7566_v10 = vld [vmem:[#allocation7 + $0xb04] ss:$16 sps:$4 sm:$0xff]   ;;  %v7567_v11 = vld [vmem:[#allocation7 + $0x108] ss:$16 sps:$4 sm:$0xff]  }
 0x21e   :  { %4980 = vmatprep.subr.bf16.mxu0 %v7511_v12  ;;  %v7572_v12 = vld [vmem:[#allocation7 + $0xb24] ss:$16 sps:$4 sm:$0xff]  }
 0x220   :  { %4858 = vmatpush1.bf16.msra.mxu1 %v7506_v13  ;;  %v7575_v13 = vld [vmem:[#allocation7 + $0x12c] ss:$16 sps:$4 sm:$0xff]  }
 0x221   :  { %4981 = vmatpush1.bf16.msra.mxu0 %v7509_v14  ;;  %4909 = vmatprep.subr.bf16.mxu1 %v7516_v15  ;;  %v7570_v14 = vld [vmem:[#allocation7 + $0xb20] ss:$16 sps:$4 sm:$0xff]   ;;  %v7573_v15 = vld [vmem:[#allocation7 + $0x128] ss:$16 sps:$4 sm:$0xff]  }
 0x222   :  { %5032 = vmatprep.subr.bf16.mxu0 %v7521_v16  ;;  %v7578_v16 = vld [vmem:[#allocation7 + $0xb44] ss:$16 sps:$4 sm:$0xff]  }
 0x223   :  { %4860 = vmatmul.mubr.bf16.vlgmr.msra.gmra.mrb[20].mxu1 %v8637_v18 }
 0x224   :  { %4983 = vmatmul.mubr.bf16.vlgmr.msra.gmra.mrb[20].mxu0 %v8641_v21  ;;  %4910 = vmatpush1.bf16.msra.mxu1 %v7514_v17  ;;  %v7581_v17 = vld [vmem:[#allocation7 + $0x14c] ss:$16 sps:$4 sm:$0xff]  }
 0x225   :  { %5033 = vmatpush1.bf16.msra.mxu0 %v7519_v25  ;;  %4911 = vmatprep.subr.bf16.mxu1 %v7524_v29  ;;  %v7576_v25 = vld [vmem:[#allocation7 + $0xb40] ss:$16 sps:$4 sm:$0xff]   ;;  %v7579_v29 = vld [vmem:[#allocation7 + $0x148] ss:$16 sps:$4 sm:$0xff]  }
 0x226   :  { %5034 = vmatprep.subr.bf16.mxu0 %v7527_v19  ;;  %4941 = vmatprep.mubr.bf16.mxu1 %v8647_v33  ;;  %v7584_v19 = vld [vmem:[#allocation7 + $0xb64] ss:$16 sps:$4 sm:$0xff]  }
 0x227   :  { %5064 = vmatprep.mubr.bf16.mxu0 %v8553_v20  ;;  %v7543_v20 = vld [vmem:[#allocation7 + $0x88] ss:$16 sps:$4 sm:$0xff]  }
 0x228   :  { %4912 = vmatpush1.bf16.msra.mxu1 %v7522_v45  ;;  %v7587_v45 = vld [vmem:[#allocation7 + $0x16c] ss:$16 sps:$4 sm:$0xff]  }
 0x229   :  { %5035 = vmatpush1.bf16.msra.mxu0 %v7525_v52  ;;  %4913 = vmatprep.subr.bf16.mxu1 %v7530_v48  ;;  %v7582_v52 = vld [vmem:[#allocation7 + $0xb60] ss:$16 sps:$4 sm:$0xff]   ;;  %v7585_v48 = vld [vmem:[#allocation7 + $0x168] ss:$16 sps:$4 sm:$0xff]  }
 0x22a   :  { %5036 = vmatprep.subr.bf16.mxu0 %v7533_v24  ;;  %v7590_v24 = vld [vmem:[#allocation7 + $0xb84] ss:$16 sps:$4 sm:$0xff]  }
 0x22c   :  { %4914 = vmatpush1.bf16.msra.mxu1 %v7528_v36  ;;  %v7593_v36 = vld [vmem:[#allocation7 + $0x18c] ss:$16 sps:$4 sm:$0xff]  }
 0x22d   :  { %5037 = vmatpush1.bf16.msra.mxu0 %v7531_v37  ;;  %4915 = vmatprep.subr.bf16.mxu1 %v7536_v38  ;;  %v7588_v37 = vld [vmem:[#allocation7 + $0xb80] ss:$16 sps:$4 sm:$0xff]   ;;  %v7591_v38 = vld [vmem:[#allocation7 + $0x188] ss:$16 sps:$4 sm:$0xff]  }
 0x22e   :  { %5038 = vmatprep.subr.bf16.mxu0 %v7539_v53  ;;  %v7596_v53 = vld [vmem:[#allocation7 + $0xba4] ss:$16 sps:$4 sm:$0xff]  }
 0x230   :  { %4916 = vmatpush1.bf16.msra.mxu1 %v7534_v59  ;;  %v7599_v59 = vld [vmem:[#allocation7 + $0x1ac] ss:$16 sps:$4 sm:$0xff]  }
 0x231   :  { %5039 = vmatpush1.bf16.msra.mxu0 %v7537_v39  ;;  %4917 = vmatprep.subr.bf16.mxu1 %v7542_v7  ;;  %v7594_v39 = vld [vmem:[#allocation7 + $0xba0] ss:$16 sps:$4 sm:$0xff]   ;;  %v7597_v7 = vld [vmem:[#allocation7 + $0x1a8] ss:$16 sps:$4 sm:$0xff]  }
 0x232   :  { %5040 = vmatprep.subr.bf16.mxu0 %v7545_v58  ;;  %v7602_v58 = vld [vmem:[#allocation7 + $0xbc4] ss:$16 sps:$4 sm:$0xff]  }
 0x234   :  { %4918 = vmatpush1.bf16.msra.mxu1 %v7540_v40  ;;  %v7605_v40 = vld [vmem:[#allocation7 + $0x1cc] ss:$16 sps:$4 sm:$0xff]  }
 0x235   :  { %5041 = vmatpush1.bf16.msra.mxu0 %v7543_v20  ;;  %4919 = vmatprep.subr.bf16.mxu1 %v7548_v41  ;;  %v7600_v20 = vld [vmem:[#allocation7 + $0xbc0] ss:$16 sps:$4 sm:$0xff]   ;;  %v7603_v41 = vld [vmem:[#allocation7 + $0x1c8] ss:$16 sps:$4 sm:$0xff]  }
 0x236   :  { %5042 = vmatprep.subr.bf16.mxu0 %v7551_v42  ;;  %v1999_v47 = vpop.f32.mrb[8].mxu1  ;;  %v7608_v42 = vld [vmem:[#allocation7 + $0xbe4] ss:$16 sps:$4 sm:$0xff]  }
 0x237   :  { %v4738_v51 = vpop.f32.mrb[8].mxu0  ;;  %v8654_v56 = vadd.f32 %v8623_v22, %v1999_v47  ;;  %v2001_v32 = vpop.f32.mrb[9].mxu1  ;;  %v7563_v22 = vld [vmem:[#allocation7 + $0xec] ss:$16 sps:$4 sm:$0xff]  }
 0x238   :  { %v8657_v57 = vadd.f32 %v4738_v51, %v8630_v6  ;;  %v4740_v62 = vpop.f32.mrb[9].mxu0  ;;  %v8660_v0 = vadd.f32 %v8626_v27, %v2001_v32  ;;  %v2003_v2 = vpop.f32.mrb[10].mxu1  ;;  %4920 = vmatpush1.bf16.msra.mxu1 %v7546_v60  ;;  %v7569_v27 = vld [vmem:[#allocation7 + $0x10c] ss:$16 sps:$4 sm:$0xff]   ;;  %v7614_v51 = vld [vmem:[#allocation7 + $0xe00] ss:$16 sps:$4 sm:$0xff]  }
 0x239   :  { %v8663_v1 = vadd.f32 %v4740_v62, %v8633_v55  ;;  %5043 = vmatpush1.bf16.msra.mxu0 %v7549_v43  ;;  %v4742_v4 = vpop.f32.mrb[10].mxu0  ;;  %v2004_v5 = vpop.f32.mrb[11].mxu1  ;;  %4921 = vmatprep.subr.bf16.mxu1 %v7554_v44  ;;  %v7564_v55 = vld [vmem:[#allocation7 + $0xb00] ss:$16 sps:$4 sm:$0xff]   ;;  %v7611_v60 = vld [vmem:[#allocation7 + $0x1ec] ss:$16 sps:$4 sm:$0xff]  }
 0x23a   :  { %5044 = vmatprep.subr.bf16.mxu0 %v7557_v46  ;;  %v4743_v6 = vpop.f32.mrb[11].mxu0  ;;  %v7606_v43 = vld [vmem:[#allocation7 + $0xbe0] ss:$16 sps:$4 sm:$0xff]   ;;  %v7609_v44 = vld [vmem:[#allocation7 + $0x1e8] ss:$16 sps:$4 sm:$0xff]  }
 0x23b   :  { %v7616_v46 = vld [vmem:[#allocation7 + $0xe04] ss:$16 sps:$4 sm:$0xff]   ;;  %v7640_v47 = vld [vmem:[#allocation7 + $0x40c] ss:$16 sps:$4 sm:$0xff]   ;;  %v7617_v4 = vld [vmem:[#allocation7 + $0xe20] ss:$16 sps:$4 sm:$0xff]  }
 0x23c   :  { %4922 = vmatpush1.bf16.msra.mxu1 %v7552_v54  ;;  %v8667_v54 = vcombine.low %v8643_v26, %v8643_v26  ;;  %v7619_v32 = vld [vmem:[#allocation7 + $0xe24] ss:$16 sps:$4 sm:$0xff]   ;;  %v7646_v2 = vld [vmem:[#allocation7 + $0x42c] ss:$16 sps:$4 sm:$0xff]   ;;  %v7644_v5 = vld [vmem:[#allocation7 + $0x428] ss:$16 sps:$4 sm:$0xff]  }
 0x23d   :  { %5045 = vmatpush1.bf16.msra.mxu0 %v7555_v63  ;;  %4923 = vmatprep.subr.bf16.mxu1 %v7560_v3  ;;  %v8669_v62 = vld [vmem:[#allocation2 + $0x38] sm:$0xff]  ;;  %v7638_v63 = vld [vmem:[#allocation7 + $0x408] ss:$16 sps:$4 sm:$0xff]  }
 0x23e   :  { %5046 = vmatprep.subr.bf16.mxu0 %v7563_v22  ;;  %v8673_v3 = vcombine.high %v8669_v62, %v8669_v62  ;;  %v7622_v26 = vld [vmem:[#allocation7 + $0xe44] ss:$16 sps:$4 sm:$0xff]   ;;  %v7652_v22 = vld [vmem:[#allocation7 + $0x44c] ss:$16 sps:$4 sm:$0xff]   ;;  %v7620_v6 = vld [vmem:[#allocation7 + $0xe40] ss:$16 sps:$4 sm:$0xff]  }
 0x240   :  { %4924 = vmatpush1.bf16.msra.mxu1 %v7558_v8  ;;  %v7625_v8 = vld [vmem:[#allocation7 + $0xe64] ss:$16 sps:$4 sm:$0xff]  }
 0x241   :  { %5047 = vmatpush1.bf16.msra.mxu0 %v7561_v9  ;;  %4925 = vmatprep.subr.bf16.mxu1 %v7566_v10  ;;  %v7650_v9 = vld [vmem:[#allocation7 + $0x448] ss:$16 sps:$4 sm:$0xff]   ;;  %v7658_v10 = vld [vmem:[#allocation7 + $0x46c] ss:$16 sps:$4 sm:$0xff]  }
 0x242   :  { %5048 = vmatprep.subr.bf16.mxu0 %v7569_v27  ;;  %v7628_v27 = vld [vmem:[#allocation7 + $0xe84] ss:$16 sps:$4 sm:$0xff]  }
 0x244   :  { %4926 = vmatpush1.bf16.msra.mxu1 %v7564_v55  ;;  %v7656_v55 = vld [vmem:[#allocation7 + $0x468] ss:$16 sps:$4 sm:$0xff]  }
 0x245   :  { %5049 = vmatpush1.bf16.msra.mxu0 %v7567_v11  ;;  %4927 = vmatprep.subr.bf16.mxu1 %v7572_v12  ;;  %v7664_v11 = vld [vmem:[#allocation7 + $0x48c] ss:$16 sps:$4 sm:$0xff]   ;;  %v7626_v12 = vld [vmem:[#allocation7 + $0xe80] ss:$16 sps:$4 sm:$0xff]  }
 0x246   :  { %5050 = vmatprep.subr.bf16.mxu0 %v7575_v13  ;;  %v7631_v13 = vld [vmem:[#allocation7 + $0xea4] ss:$16 sps:$4 sm:$0xff]  }
 0x248   :  { %4928 = vmatpush1.bf16.msra.mxu1 %v7570_v14  ;;  %v7670_v14 = vld [vmem:[#allocation7 + $0x4ac] ss:$16 sps:$4 sm:$0xff]  }
 0x249   :  { %5051 = vmatpush1.bf16.msra.mxu0 %v7573_v15  ;;  %4929 = vmatprep.subr.bf16.mxu1 %v7578_v16  ;;  %v7629_v15 = vld [vmem:[#allocation7 + $0xea0] ss:$16 sps:$4 sm:$0xff]   ;;  %v7668_v16 = vld [vmem:[#allocation7 + $0x4a8] ss:$16 sps:$4 sm:$0xff]  }
 0x24a   :  { %5052 = vmatprep.subr.bf16.mxu0 %v7581_v17  ;;  %v7634_v17 = vld [vmem:[#allocation7 + $0xec4] ss:$16 sps:$4 sm:$0xff]  }
 0x24c   :  { %4930 = vmatpush1.bf16.msra.mxu1 %v7576_v25  ;;  %v7676_v25 = vld [vmem:[#allocation7 + $0x4cc] ss:$16 sps:$4 sm:$0xff]  }
 0x24d   :  { %5053 = vmatpush1.bf16.msra.mxu0 %v7579_v29  ;;  %4931 = vmatprep.subr.bf16.mxu1 %v7584_v19 }
 0x24e   :  { %5054 = vmatprep.subr.bf16.mxu0 %v7587_v45 }
 0x250   :  { %4932 = vmatpush1.bf16.msra.mxu1 %v7582_v52 }
 0x251   :  { %5055 = vmatpush1.bf16.msra.mxu0 %v7585_v48  ;;  %4933 = vmatprep.subr.bf16.mxu1 %v7590_v24 }
 0x252   :  { %5056 = vmatprep.subr.bf16.mxu0 %v7593_v36 }
 0x254   :  { %4934 = vmatpush1.bf16.msra.mxu1 %v7588_v37  ;;  %v7632_v37 = vld [vmem:[#allocation7 + $0xec0] ss:$16 sps:$4 sm:$0xff]  }
 0x255   :  { %5057 = vmatpush1.bf16.msra.mxu0 %v7591_v38  ;;  %4935 = vmatprep.subr.bf16.mxu1 %v7596_v53  ;;  %v7674_v38 = vld [vmem:[#allocation7 + $0x4c8] ss:$16 sps:$4 sm:$0xff]  }
 0x256   :  { %5058 = vmatprep.subr.bf16.mxu0 %v7599_v59 }
 0x258   :  { %4936 = vmatpush1.bf16.msra.mxu1 %v7594_v39  ;;  %v7637_v39 = vld [vmem:[#allocation7 + $0xee4] ss:$16 sps:$4 sm:$0xff]  }
 0x259   :  { %5059 = vmatpush1.bf16.msra.mxu0 %v7597_v7  ;;  %4937 = vmatprep.subr.bf16.mxu1 %v7602_v58  ;;  %v7682_v7 = vld [vmem:[#allocation7 + $0x4ec] ss:$16 sps:$4 sm:$0xff]  }
 0x25a   :  { %5060 = vmatprep.subr.bf16.mxu0 %v7605_v40  ;;  %v7680_v40 = vld [vmem:[#allocation7 + $0x4e8] ss:$16 sps:$4 sm:$0xff]  }
 0x25c   :  { %4938 = vmatpush1.bf16.msra.mxu1 %v7600_v20  ;;  %v7643_v20 = vld [vmem:[#allocation7 + $0xf04] ss:$16 sps:$4 sm:$0xff]  }
 0x25d   :  { %5061 = vmatpush1.bf16.msra.mxu0 %v7603_v41  ;;  %4939 = vmatprep.subr.bf16.mxu1 %v7608_v42  ;;  %v7641_v41 = vld [vmem:[#allocation7 + $0xf00] ss:$16 sps:$4 sm:$0xff]   ;;  %v7686_v42 = vld [vmem:[#allocation7 + $0x508] ss:$16 sps:$4 sm:$0xff]  }
 0x25e   :  { %5062 = vmatprep.subr.bf16.mxu0 %v7611_v60  ;;  %v7649_v60 = vld [vmem:[#allocation7 + $0xf24] ss:$16 sps:$4 sm:$0xff]  }
 0x260   :  { %4940 = vmatpush1.bf16.msra.mxu1 %v7606_v43  ;;  %v7696_v43 = vld [vmem:[#allocation7 + $0x52c] ss:$16 sps:$4 sm:$0xff]  }
 0x261   :  { %5063 = vmatpush1.bf16.msra.mxu0 %v7609_v44  ;;  %4991 = vmatprep.subr.bf16.mxu1 %v7616_v46  ;;  %v7647_v44 = vld [vmem:[#allocation7 + $0xf20] ss:$16 sps:$4 sm:$0xff]   ;;  %v7694_v46 = vld [vmem:[#allocation7 + $0x528] ss:$16 sps:$4 sm:$0xff]  }
 0x262   :  { %5114 = vmatprep.subr.bf16.mxu0 %v7640_v47  ;;  %v7655_v47 = vld [vmem:[#allocation7 + $0xf44] ss:$16 sps:$4 sm:$0xff]  }
 0x263   :  { %4942 = vmatmul.mubr.bf16.vlgmr.msra.gmra.mrb[24].mxu1 %v8667_v54 }
 0x264   :  { %5065 = vmatmul.mubr.bf16.vlgmr.msra.gmra.mrb[24].mxu0 %v8559_v23  ;;  %4992 = vmatpush1.bf16.msra.mxu1 %v7614_v51  ;;  %v7623_v23 = vld [vmem:[#allocation7 + $0xe60] ss:$16 sps:$4 sm:$0xff]   ;;  %v7702_v51 = vld [vmem:[#allocation7 + $0x54c] ss:$16 sps:$4 sm:$0xff]  }
 0x265   :  { %5115 = vmatpush1.bf16.msra.mxu0 %v7638_v63  ;;  %4993 = vmatprep.subr.bf16.mxu1 %v7619_v32  ;;  %v7653_v32 = vld [vmem:[#allocation7 + $0xf40] ss:$16 sps:$4 sm:$0xff]   ;;  %v7700_v63 = vld [vmem:[#allocation7 + $0x548] ss:$16 sps:$4 sm:$0xff]  }
 0x266   :  { %5116 = vmatprep.subr.bf16.mxu0 %v7646_v2  ;;  %5023 = vmatprep.mubr.bf16.mxu1 %v8673_v3  ;;  %v7661_v2 = vld [vmem:[#allocation7 + $0xf64] ss:$16 sps:$4 sm:$0xff]  }
 0x267   :  { %5146 = vmatprep.mubr.bf16.mxu0 %v8565_v28  ;;  %v7662_v28 = vld [vmem:[#allocation7 + $0x488] ss:$16 sps:$4 sm:$0xff]  }
 0x268   :  { %4994 = vmatpush1.bf16.msra.mxu1 %v7617_v4  ;;  %v7708_v4 = vld [vmem:[#allocation7 + $0x56c] ss:$16 sps:$4 sm:$0xff]  }
 0x269   :  { %5117 = vmatpush1.bf16.msra.mxu0 %v7644_v5  ;;  %4995 = vmatprep.subr.bf16.mxu1 %v7622_v26  ;;  %v7659_v26 = vld [vmem:[#allocation7 + $0xf60] ss:$16 sps:$4 sm:$0xff]   ;;  %v7706_v5 = vld [vmem:[#allocation7 + $0x568] ss:$16 sps:$4 sm:$0xff]  }
 0x26a   :  { %5118 = vmatprep.subr.bf16.mxu0 %v7652_v22  ;;  %v7667_v22 = vld [vmem:[#allocation7 + $0xf84] ss:$16 sps:$4 sm:$0xff]  }
 0x26c   :  { %4996 = vmatpush1.bf16.msra.mxu1 %v7620_v6  ;;  %v7714_v6 = vld [vmem:[#allocation7 + $0x58c] ss:$16 sps:$4 sm:$0xff]  }
 0x26d   :  { %5119 = vmatpush1.bf16.msra.mxu0 %v7650_v9  ;;  %4997 = vmatprep.subr.bf16.mxu1 %v7625_v8  ;;  %v7665_v8 = vld [vmem:[#allocation7 + $0xf80] ss:$16 sps:$4 sm:$0xff]   ;;  %v7712_v9 = vld [vmem:[#allocation7 + $0x588] ss:$16 sps:$4 sm:$0xff]  }
 0x26e   :  { %5120 = vmatprep.subr.bf16.mxu0 %v7658_v10  ;;  %v7673_v10 = vld [vmem:[#allocation7 + $0xfa4] ss:$16 sps:$4 sm:$0xff]  }
 0x270   :  { %4998 = vmatpush1.bf16.msra.mxu1 %v7623_v23  ;;  %v7720_v23 = vld [vmem:[#allocation7 + $0x5ac] ss:$16 sps:$4 sm:$0xff]  }
 0x271   :  { %5121 = vmatpush1.bf16.msra.mxu0 %v7656_v55  ;;  %4999 = vmatprep.subr.bf16.mxu1 %v7628_v27  ;;  %v7671_v27 = vld [vmem:[#allocation7 + $0xfa0] ss:$16 sps:$4 sm:$0xff]   ;;  %v7718_v55 = vld [vmem:[#allocation7 + $0x5a8] ss:$16 sps:$4 sm:$0xff]  }
 0x272   :  { %5122 = vmatprep.subr.bf16.mxu0 %v7664_v11  ;;  %v7679_v11 = vld [vmem:[#allocation7 + $0xfc4] ss:$16 sps:$4 sm:$0xff]  }
 0x274   :  { %5000 = vmatpush1.bf16.msra.mxu1 %v7626_v12  ;;  %v7726_v12 = vld [vmem:[#allocation7 + $0x5cc] ss:$16 sps:$4 sm:$0xff]  }
 0x275   :  { %5123 = vmatpush1.bf16.msra.mxu0 %v7662_v28  ;;  %5001 = vmatprep.subr.bf16.mxu1 %v7631_v13  ;;  %v7677_v28 = vld [vmem:[#allocation7 + $0xfc0] ss:$16 sps:$4 sm:$0xff]   ;;  %v7724_v13 = vld [vmem:[#allocation7 + $0x5c8] ss:$16 sps:$4 sm:$0xff]  }
 0x276   :  { %5124 = vmatprep.subr.bf16.mxu0 %v7670_v14  ;;  %v2081_v29 = vpop.f32.mrb[12].mxu1  ;;  %v7685_v14 = vld [vmem:[#allocation7 + $0xfe4] ss:$16 sps:$4 sm:$0xff]  }
 0x277   :  { %v8679_v19 = vpop.f32.mrb[12].mxu0  ;;  %v8682_v45 = vadd.f32 %v2081_v29, %v8654_v56  ;;  %v2083_v52 = vpop.f32.mrb[13].mxu1  ;;  %v7635_v56 = vld [vmem:[#allocation7 + $0xee0] ss:$16 sps:$4 sm:$0xff]   ;;  %v7738_v29 = vld [vmem:[#allocation7 + $0x80c] ss:$16 sps:$4 sm:$0xff]  }
 0x278   :  { %v8684_v48 = vpop.f32.mrb[13].mxu0  ;;  %v8687_v24 = vadd.f32 %v2083_v52, %v8660_v0  ;;  %v2085_v36 = vpop.f32.mrb[14].mxu1  ;;  %5002 = vmatpush1.bf16.msra.mxu1 %v7629_v15  ;;  %v7688_v0 = vld [vmem:[#allocation7 + $0x50c] ss:$16 sps:$4 sm:$0xff]   ;;  %v8691_v52 = vcombine.low %v8669_v62, %v8669_v62 }
 0x279   :  { %5125 = vmatpush1.bf16.msra.mxu0 %v7668_v16  ;;  %v4824_v53 = vpop.f32.mrb[14].mxu0  ;;  %v2086_v59 = vpop.f32.mrb[15].mxu1  ;;  %5003 = vmatprep.subr.bf16.mxu1 %v7634_v17  ;;  %v7732_v15 = vld [vmem:[#allocation7 + $0x5ec] ss:$16 sps:$4 sm:$0xff]   ;;  %v7683_v16 = vld [vmem:[#allocation7 + $0xfe0] ss:$16 sps:$4 sm:$0xff]  }
 0x27a   :  { %5126 = vmatprep.subr.bf16.mxu0 %v7676_v25  ;;  %v4825_v58 = vpop.f32.mrb[15].mxu0  ;;  %v7730_v17 = vld [vmem:[#allocation7 + $0x5e8] ss:$16 sps:$4 sm:$0xff]   ;;  %v7693_v25 = vld [vmem:[#allocation7 + $0x20c] ss:$16 sps:$4 sm:$0xff]  }
 0x27b   :  { %v7691_v36 = vld [vmem:[#allocation7 + $0x208] ss:$16 sps:$4 sm:$0xff]   ;;  %v7744_v53 = vld [vmem:[#allocation7 + $0x82c] ss:$16 sps:$4 sm:$0xff]  }
 0x27c   :  { %5004 = vmatpush1.bf16.msra.mxu1 %v7632_v37  ;;  %v7736_v37 = vld [vmem:[#allocation7 + $0x808] ss:$16 sps:$4 sm:$0xff]   ;;  %v7750_v62 = vld [vmem:[#allocation7 + $0x84c] ss:$16 sps:$4 sm:$0xff]  }
 0x27d   :  { %5127 = vmatpush1.bf16.msra.mxu0 %v7674_v38  ;;  %5005 = vmatprep.subr.bf16.mxu1 %v7637_v39  ;;  %v7699_v38 = vld [vmem:[#allocation7 + $0x22c] ss:$16 sps:$4 sm:$0xff]   ;;  %v7697_v59 = vld [vmem:[#allocation7 + $0x228] ss:$16 sps:$4 sm:$0xff]  }
 0x27e   :  { %5128 = vmatprep.subr.bf16.mxu0 %v7682_v7  ;;  %v7742_v39 = vld [vmem:[#allocation7 + $0x828] ss:$16 sps:$4 sm:$0xff]   ;;  %v7705_v7 = vld [vmem:[#allocation7 + $0x24c] ss:$16 sps:$4 sm:$0xff]  }
 0x27f   :  { %v7703_v58 = vld [vmem:[#allocation7 + $0x248] ss:$16 sps:$4 sm:$0xff]  }
 0x280   :  { %5006 = vmatpush1.bf16.msra.mxu1 %v7635_v56  ;;  %v7748_v56 = vld [vmem:[#allocation7 + $0x848] ss:$16 sps:$4 sm:$0xff]  }
 0x281   :  { %5129 = vmatpush1.bf16.msra.mxu0 %v7680_v40  ;;  %5007 = vmatprep.subr.bf16.mxu1 %v7643_v20  ;;  %v7711_v40 = vld [vmem:[#allocation7 + $0x26c] ss:$16 sps:$4 sm:$0xff]   ;;  %v7709_v20 = vld [vmem:[#allocation7 + $0x268] ss:$16 sps:$4 sm:$0xff]  }
 0x282   :  { %5130 = vmatprep.subr.bf16.mxu0 %v7688_v0  ;;  %v7754_v0 = vld [vmem:[#allocation7 + $0x868] ss:$16 sps:$4 sm:$0xff]  }
 0x284   :  { %5008 = vmatpush1.bf16.msra.mxu1 %v7641_v41  ;;  %v7717_v41 = vld [vmem:[#allocation7 + $0x28c] ss:$16 sps:$4 sm:$0xff]  }
 0x285   :  { %5131 = vmatpush1.bf16.msra.mxu0 %v7686_v42  ;;  %5009 = vmatprep.subr.bf16.mxu1 %v7649_v60  ;;  %v7762_v42 = vld [vmem:[#allocation7 + $0x88c] ss:$16 sps:$4 sm:$0xff]  }
 0x286   :  { %5132 = vmatprep.subr.bf16.mxu0 %v7696_v43  ;;  %v7723_v60 = vld [vmem:[#allocation7 + $0x2ac] ss:$16 sps:$4 sm:$0xff]  }
 0x287   :  { %v7768_v43 = vld [vmem:[#allocation7 + $0x8ac] ss:$16 sps:$4 sm:$0xff]  }
 0x288   :  { %5010 = vmatpush1.bf16.msra.mxu1 %v7647_v44  ;;  %v7721_v44 = vld [vmem:[#allocation7 + $0x2a8] ss:$16 sps:$4 sm:$0xff]  }
 0x289   :  { %5133 = vmatpush1.bf16.msra.mxu0 %v7694_v46  ;;  %5011 = vmatprep.subr.bf16.mxu1 %v7655_v47  ;;  %v7766_v46 = vld [vmem:[#allocation7 + $0x8a8] ss:$16 sps:$4 sm:$0xff]   ;;  %v7729_v47 = vld [vmem:[#allocation7 + $0x2cc] ss:$16 sps:$4 sm:$0xff]  }
 0x28a   :  { %5134 = vmatprep.subr.bf16.mxu0 %v7702_v51  ;;  %v7774_v51 = vld [vmem:[#allocation7 + $0x8cc] ss:$16 sps:$4 sm:$0xff]  }
 0x28c   :  { %5012 = vmatpush1.bf16.msra.mxu1 %v7653_v32 }
 0x28d   :  { %5135 = vmatpush1.bf16.msra.mxu0 %v7700_v63  ;;  %5013 = vmatprep.subr.bf16.mxu1 %v7661_v2 }
 0x28e   :  { %5136 = vmatprep.subr.bf16.mxu0 %v7708_v4 }
 0x290   :  { %5014 = vmatpush1.bf16.msra.mxu1 %v7659_v26 }
 0x291   :  { %5137 = vmatpush1.bf16.msra.mxu0 %v7706_v5  ;;  %5015 = vmatprep.subr.bf16.mxu1 %v7667_v22 }
 0x292   :  { %5138 = vmatprep.subr.bf16.mxu0 %v7714_v6  ;;  %v7727_v6 = vld [vmem:[#allocation7 + $0x2c8] ss:$16 sps:$4 sm:$0xff]  }
 0x294   :  { %5016 = vmatpush1.bf16.msra.mxu1 %v7665_v8  ;;  %v7772_v8 = vld [vmem:[#allocation7 + $0x8c8] ss:$16 sps:$4 sm:$0xff]  }
 0x295   :  { %5139 = vmatpush1.bf16.msra.mxu0 %v7712_v9  ;;  %5017 = vmatprep.subr.bf16.mxu1 %v7673_v10 }
 0x296   :  { %5140 = vmatprep.subr.bf16.mxu0 %v7720_v23 }
 0x298   :  { %5018 = vmatpush1.bf16.msra.mxu1 %v7671_v27  ;;  %v7735_v27 = vld [vmem:[#allocation7 + $0x2ec] ss:$16 sps:$4 sm:$0xff]  }
 0x299   :  { %5141 = vmatpush1.bf16.msra.mxu0 %v7718_v55  ;;  %5019 = vmatprep.subr.bf16.mxu1 %v7679_v11  ;;  %v7780_v55 = vld [vmem:[#allocation7 + $0x8ec] ss:$16 sps:$4 sm:$0xff]  }
 0x29a   :  { %5142 = vmatprep.subr.bf16.mxu0 %v7726_v12  ;;  %v7778_v12 = vld [vmem:[#allocation7 + $0x8e8] ss:$16 sps:$4 sm:$0xff]  }
 0x29c   :  { %5020 = vmatpush1.bf16.msra.mxu1 %v7677_v28  ;;  %v7741_v28 = vld [vmem:[#allocation7 + $0x30c] ss:$16 sps:$4 sm:$0xff]  }
 0x29d   :  { %5143 = vmatpush1.bf16.msra.mxu0 %v7724_v13  ;;  %5021 = vmatprep.subr.bf16.mxu1 %v7685_v14  ;;  %v7786_v13 = vld [vmem:[#allocation7 + $0x90c] ss:$16 sps:$4 sm:$0xff]   ;;  %v7784_v14 = vld [vmem:[#allocation7 + $0x908] ss:$16 sps:$4 sm:$0xff]  }
 0x29e   :  { %5144 = vmatprep.subr.bf16.mxu0 %v7732_v15  ;;  %v7747_v15 = vld [vmem:[#allocation7 + $0x32c] ss:$16 sps:$4 sm:$0xff]  }
 0x2a0   :  { %5022 = vmatpush1.bf16.msra.mxu1 %v7683_v16  ;;  %v7792_v16 = vld [vmem:[#allocation7 + $0x92c] ss:$16 sps:$4 sm:$0xff]  }
 0x2a1   :  { %5145 = vmatpush1.bf16.msra.mxu0 %v7730_v17  ;;  %5073 = vmatprep.subr.bf16.mxu1 %v7693_v25  ;;  %v7745_v17 = vld [vmem:[#allocation7 + $0x328] ss:$16 sps:$4 sm:$0xff]   ;;  %v7753_v25 = vld [vmem:[#allocation7 + $0x34c] ss:$16 sps:$4 sm:$0xff]  }
 0x2a2   :  { %5196 = vmatprep.subr.bf16.mxu0 %v7738_v29  ;;  %v7798_v29 = vld [vmem:[#allocation7 + $0x94c] ss:$16 sps:$4 sm:$0xff]  }
 0x2a3   :  { %5024 = vmatmul.mubr.bf16.vlgmr.msra.gmra.mrb[28].mxu1 %v8691_v52 }
 0x2a4   :  { %5147 = vmatmul.mubr.bf16.vlgmr.msra.gmra.mrb[28].mxu0 %v8573_v30  ;;  %5074 = vmatpush1.bf16.msra.mxu1 %v7691_v36  ;;  %v7756_v30 = vld [vmem:[#allocation7 + $0x86c] ss:$16 sps:$4 sm:$0xff]   ;;  %v7751_v36 = vld [vmem:[#allocation7 + $0x348] ss:$16 sps:$4 sm:$0xff]  }
 0x2a5   :  { %5197 = vmatpush1.bf16.msra.mxu0 %v7736_v37  ;;  %5075 = vmatprep.subr.bf16.mxu1 %v7699_v38  ;;  %v7796_v37 = vld [vmem:[#allocation7 + $0x948] ss:$16 sps:$4 sm:$0xff]   ;;  %v7759_v38 = vld [vmem:[#allocation7 + $0x36c] ss:$16 sps:$4 sm:$0xff]  }
 0x2a6   :  { %5198 = vmatprep.subr.bf16.mxu0 %v7744_v53  ;;  %5105 = vmatprep.mubr.bf16.mxu1 %v8581_v34  ;;  %v7715_v34 = vld [vmem:[#allocation7 + $0x288] ss:$16 sps:$4 sm:$0xff]   ;;  %v7804_v53 = vld [vmem:[#allocation7 + $0x96c] ss:$16 sps:$4 sm:$0xff]  }
 0x2a7   :  { %5228 = vmatprep.mubr.bf16.mxu0 %v8585_v35  ;;  %v7760_v35 = vld [vmem:[#allocation7 + $0x888] ss:$16 sps:$4 sm:$0xff]  }
 0x2a8   :  { %5076 = vmatpush1.bf16.msra.mxu1 %v7697_v59  ;;  %v7757_v59 = vld [vmem:[#allocation7 + $0x368] ss:$16 sps:$4 sm:$0xff]  }
 0x2a9   :  { %5199 = vmatpush1.bf16.msra.mxu0 %v7742_v39  ;;  %5077 = vmatprep.subr.bf16.mxu1 %v7705_v7  ;;  %v7802_v39 = vld [vmem:[#allocation7 + $0x968] ss:$16 sps:$4 sm:$0xff]   ;;  %v7765_v7 = vld [vmem:[#allocation7 + $0x38c] ss:$16 sps:$4 sm:$0xff]  }
 0x2aa   :  { %5200 = vmatprep.subr.bf16.mxu0 %v7750_v62  ;;  %v7810_v62 = vld [vmem:[#allocation7 + $0x98c] ss:$16 sps:$4 sm:$0xff]  }
 0x2ac   :  { %5078 = vmatpush1.bf16.msra.mxu1 %v7703_v58  ;;  %v7763_v58 = vld [vmem:[#allocation7 + $0x388] ss:$16 sps:$4 sm:$0xff]  }
 0x2ad   :  { %5201 = vmatpush1.bf16.msra.mxu0 %v7748_v56  ;;  %5079 = vmatprep.subr.bf16.mxu1 %v7711_v40  ;;  %v7808_v56 = vld [vmem:[#allocation7 + $0x988] ss:$16 sps:$4 sm:$0xff]   ;;  %v7771_v40 = vld [vmem:[#allocation7 + $0x3ac] ss:$16 sps:$4 sm:$0xff]  }
 0x2ae   :  { %5202 = vmatprep.subr.bf16.mxu0 %v7756_v30  ;;  %v7816_v30 = vld [vmem:[#allocation7 + $0x9ac] ss:$16 sps:$4 sm:$0xff]  }
 0x2b0   :  { %5080 = vmatpush1.bf16.msra.mxu1 %v7709_v20  ;;  %v7769_v20 = vld [vmem:[#allocation7 + $0x3a8] ss:$16 sps:$4 sm:$0xff]  }
 0x2b1   :  { %5203 = vmatpush1.bf16.msra.mxu0 %v7754_v0  ;;  %5081 = vmatprep.subr.bf16.mxu1 %v7717_v41  ;;  %v7814_v0 = vld [vmem:[#allocation7 + $0x9a8] ss:$16 sps:$4 sm:$0xff]   ;;  %v7777_v41 = vld [vmem:[#allocation7 + $0x3cc] ss:$16 sps:$4 sm:$0xff]  }
 0x2b2   :  { %5204 = vmatprep.subr.bf16.mxu0 %v7762_v42  ;;  %v7822_v42 = vld [vmem:[#allocation7 + $0x9cc] ss:$16 sps:$4 sm:$0xff]  }
 0x2b4   :  { %5082 = vmatpush1.bf16.msra.mxu1 %v7715_v34  ;;  %v7775_v34 = vld [vmem:[#allocation7 + $0x3c8] ss:$16 sps:$4 sm:$0xff]  }
 0x2b5   :  { %5205 = vmatpush1.bf16.msra.mxu0 %v7760_v35  ;;  %5083 = vmatprep.subr.bf16.mxu1 %v7723_v60  ;;  %v7820_v35 = vld [vmem:[#allocation7 + $0x9c8] ss:$16 sps:$4 sm:$0xff]   ;;  %v7783_v60 = vld [vmem:[#allocation7 + $0x3ec] ss:$16 sps:$4 sm:$0xff]  }
 0x2b6   :  { %5206 = vmatprep.subr.bf16.mxu0 %v7768_v43  ;;  %v4779_v32 = vpop.f32.mrb[16].mxu1  ;;  %v7828_v43 = vld [vmem:[#allocation7 + $0x9ec] ss:$16 sps:$4 sm:$0xff]  }
 0x2b7   :  { %v8697_v63 = vpop.f32.mrb[16].mxu0  ;;  %v4780_v2 = vadd.f32 %v4779_v32, %v8657_v57  ;;  %v4781_v4 = vpop.f32.mrb[17].mxu1  ;;  %v7787_v32 = vld [vmem:[#allocation7 + $0x608] ss:$16 sps:$4 sm:$0xff]  }
 0x2b8   :  { %v8700_v26 = vpop.f32.mrb[17].mxu0  ;;  %v4782_v5 = vadd.f32 %v4781_v4, %v8663_v1  ;;  %v4783_v22 = vpop.f32.mrb[18].mxu1  ;;  %5084 = vmatpush1.bf16.msra.mxu1 %v7721_v44  ;;  %v7733_v1 = vld [vmem:[#allocation7 + $0x2e8] ss:$16 sps:$4 sm:$0xff]   ;;  %v7795_v4 = vld [vmem:[#allocation7 + $0x62c] ss:$16 sps:$4 sm:$0xff]  }
 0x2b9   :  { %5207 = vmatpush1.bf16.msra.mxu0 %v7766_v46  ;;  %v4906_v9 = vpop.f32.mrb[18].mxu0  ;;  %v8704_v10 = vadd.f32 %v8679_v19, %v4780_v2  ;;  %v4784_v23 = vpop.f32.mrb[19].mxu1  ;;  %5085 = vmatprep.subr.bf16.mxu1 %v7729_v47  ;;  %v7739_v19 = vld [vmem:[#allocation7 + $0x308] ss:$16 sps:$4 sm:$0xff]   ;;  %v7789_v47 = vld [vmem:[#allocation7 + $0x60c] ss:$16 sps:$4 sm:$0xff]  }
 0x2ba   :  { %5208 = vmatprep.subr.bf16.mxu0 %v7774_v51  ;;  %v4907_v57 = vpop.f32.mrb[19].mxu0  ;;  %v8707_v11 = vadd.f32 %v8684_v48, %v4782_v5  ;;  %v7790_v48 = vld [vmem:[#allocation7 + $0x928] ss:$16 sps:$4 sm:$0xff]   ;;  %v7834_v51 = vld [vmem:[#allocation7 + $0xc0c] ss:$16 sps:$4 sm:$0xff]  }
 0x2bb   :  { %v7781_v44 = vld [vmem:[#allocation7 + $0x3e8] ss:$16 sps:$4 sm:$0xff]   ;;  %v7840_v5 = vld [vmem:[#allocation7 + $0xc2c] ss:$16 sps:$4 sm:$0xff]  }
 0x2bc   :  { %5086 = vmatpush1.bf16.msra.mxu1 %v7727_v6  ;;  %v7826_v46 = vld [vmem:[#allocation7 + $0x9e8] ss:$16 sps:$4 sm:$0xff]   ;;  %v7846_v9 = vld [vmem:[#allocation7 + $0xc4c] ss:$16 sps:$4 sm:$0xff]  }
 0x2bd   :  { %5209 = vmatpush1.bf16.msra.mxu0 %v7772_v8  ;;  %5087 = vmatprep.subr.bf16.mxu1 %v7735_v27  ;;  %v7832_v2 = vld [vmem:[#allocation7 + $0xc08] ss:$16 sps:$4 sm:$0xff]   ;;  %v7801_v8 = vld [vmem:[#allocation7 + $0x64c] ss:$16 sps:$4 sm:$0xff]  }
 0x2be   :  { %5210 = vmatprep.subr.bf16.mxu0 %v7780_v55  ;;  %v7793_v22 = vld [vmem:[#allocation7 + $0x628] ss:$16 sps:$4 sm:$0xff]  }
 0x2bf   :  { %v7838_v6 = vld [vmem:[#allocation7 + $0xc28] ss:$16 sps:$4 sm:$0xff]  }
 0x2c0   :  { %5088 = vmatpush1.bf16.msra.mxu1 %v7733_v1  ;;  %v7799_v23 = vld [vmem:[#allocation7 + $0x648] ss:$16 sps:$4 sm:$0xff]   ;;  %v7813_v1 = vld [vmem:[#allocation7 + $0x68c] ss:$16 sps:$4 sm:$0xff]  }
 0x2c1   :  { %5211 = vmatpush1.bf16.msra.mxu0 %v7778_v12  ;;  %5089 = vmatprep.subr.bf16.mxu1 %v7741_v28  ;;  %v7844_v27 = vld [vmem:[#allocation7 + $0xc48] ss:$16 sps:$4 sm:$0xff]   ;;  %v7858_v12 = vld [vmem:[#allocation7 + $0xc8c] ss:$16 sps:$4 sm:$0xff]  }
 0x2c2   :  { %5212 = vmatprep.subr.bf16.mxu0 %v7786_v13  ;;  %v7805_v55 = vld [vmem:[#allocation7 + $0x668] ss:$16 sps:$4 sm:$0xff]   ;;  %v7819_v28 = vld [vmem:[#allocation7 + $0x6ac] ss:$16 sps:$4 sm:$0xff]  }
 0x2c3   :  { %v7850_v57 = vld [vmem:[#allocation7 + $0xc68] ss:$16 sps:$4 sm:$0xff]   ;;  %v7864_v13 = vld [vmem:[#allocation7 + $0xcac] ss:$16 sps:$4 sm:$0xff]  }
 0x2c4   :  { %5090 = vmatpush1.bf16.msra.mxu1 %v7739_v19  ;;  %v7817_v19 = vld [vmem:[#allocation7 + $0x6a8] ss:$16 sps:$4 sm:$0xff]  }
 0x2c5   :  { %5213 = vmatpush1.bf16.msra.mxu0 %v7784_v14  ;;  %5091 = vmatprep.subr.bf16.mxu1 %v7747_v15  ;;  %v7862_v14 = vld [vmem:[#allocation7 + $0xca8] ss:$16 sps:$4 sm:$0xff]   ;;  %v7825_v15 = vld [vmem:[#allocation7 + $0x6cc] ss:$16 sps:$4 sm:$0xff]  }
 0x2c6   :  { %5214 = vmatprep.subr.bf16.mxu0 %v7792_v16  ;;  %v7870_v16 = vld [vmem:[#allocation7 + $0xccc] ss:$16 sps:$4 sm:$0xff]  }
 0x2c8   :  { %5092 = vmatpush1.bf16.msra.mxu1 %v7745_v17 }
 0x2c9   :  { %5215 = vmatpush1.bf16.msra.mxu0 %v7790_v48  ;;  %5093 = vmatprep.subr.bf16.mxu1 %v7753_v25 }
 0x2ca   :  { %5216 = vmatprep.subr.bf16.mxu0 %v7798_v29 }
 0x2cc   :  { %5094 = vmatpush1.bf16.msra.mxu1 %v7751_v36 }
 0x2cd   :  { %5217 = vmatpush1.bf16.msra.mxu0 %v7796_v37  ;;  %5095 = vmatprep.subr.bf16.mxu1 %v7759_v38 }
 0x2ce   :  { %5218 = vmatprep.subr.bf16.mxu0 %v7804_v53  ;;  %v7823_v53 = vld [vmem:[#allocation7 + $0x6c8] ss:$16 sps:$4 sm:$0xff]  }
 0x2d0   :  { %5096 = vmatpush1.bf16.msra.mxu1 %v7757_v59  ;;  %v7868_v59 = vld [vmem:[#allocation7 + $0xcc8] ss:$16 sps:$4 sm:$0xff]  }
 0x2d1   :  { %5219 = vmatpush1.bf16.msra.mxu0 %v7802_v39  ;;  %5097 = vmatprep.subr.bf16.mxu1 %v7765_v7 }
 0x2d2   :  { %5220 = vmatprep.subr.bf16.mxu0 %v7810_v62 }
 0x2d4   :  { %5098 = vmatpush1.bf16.msra.mxu1 %v7763_v58  ;;  %v7831_v58 = vld [vmem:[#allocation7 + $0x6ec] ss:$16 sps:$4 sm:$0xff]  }
 0x2d5   :  { %5221 = vmatpush1.bf16.msra.mxu0 %v7808_v56  ;;  %5099 = vmatprep.subr.bf16.mxu1 %v7771_v40  ;;  %v7876_v56 = vld [vmem:[#allocation7 + $0xcec] ss:$16 sps:$4 sm:$0xff]  }
 0x2d6   :  { %5222 = vmatprep.subr.bf16.mxu0 %v7816_v30  ;;  %v7874_v30 = vld [vmem:[#allocation7 + $0xce8] ss:$16 sps:$4 sm:$0xff]  }
 0x2d8   :  { %5100 = vmatpush1.bf16.msra.mxu1 %v7769_v20  ;;  %v7837_v20 = vld [vmem:[#allocation7 + $0x70c] ss:$16 sps:$4 sm:$0xff]  }
 0x2d9   :  { %5223 = vmatpush1.bf16.msra.mxu0 %v7814_v0  ;;  %5101 = vmatprep.subr.bf16.mxu1 %v7777_v41  ;;  %v7882_v0 = vld [vmem:[#allocation7 + $0xd0c] ss:$16 sps:$4 sm:$0xff]   ;;  %v7880_v41 = vld [vmem:[#allocation7 + $0xd08] ss:$16 sps:$4 sm:$0xff]  }
 0x2da   :  { %5224 = vmatprep.subr.bf16.mxu0 %v7822_v42  ;;  %v7843_v42 = vld [vmem:[#allocation7 + $0x72c] ss:$16 sps:$4 sm:$0xff]  }
 0x2dc   :  { %5102 = vmatpush1.bf16.msra.mxu1 %v7775_v34  ;;  %v7888_v34 = vld [vmem:[#allocation7 + $0xd2c] ss:$16 sps:$4 sm:$0xff]  }
 0x2dd   :  { %5225 = vmatpush1.bf16.msra.mxu0 %v7820_v35  ;;  %5103 = vmatprep.subr.bf16.mxu1 %v7783_v60  ;;  %v7841_v35 = vld [vmem:[#allocation7 + $0x728] ss:$16 sps:$4 sm:$0xff]   ;;  %v7849_v60 = vld [vmem:[#allocation7 + $0x74c] ss:$16 sps:$4 sm:$0xff]  }
 0x2de   :  { %5226 = vmatprep.subr.bf16.mxu0 %v7828_v43  ;;  %v7894_v43 = vld [vmem:[#allocation7 + $0xd4c] ss:$16 sps:$4 sm:$0xff]  }
 0x2e0   :  { %5104 = vmatpush1.bf16.msra.mxu1 %v7781_v44  ;;  %v7847_v44 = vld [vmem:[#allocation7 + $0x748] ss:$16 sps:$4 sm:$0xff]  }
 0x2e1   :  { %5227 = vmatpush1.bf16.msra.mxu0 %v7826_v46  ;;  %5155 = vmatprep.subr.bf16.mxu1 %v7789_v47  ;;  %v7892_v46 = vld [vmem:[#allocation7 + $0xd48] ss:$16 sps:$4 sm:$0xff]   ;;  %v7855_v47 = vld [vmem:[#allocation7 + $0x76c] ss:$16 sps:$4 sm:$0xff]  }
 0x2e2   :  { %5278 = vmatprep.subr.bf16.mxu0 %v7834_v51  ;;  %v7900_v51 = vld [vmem:[#allocation7 + $0xd6c] ss:$16 sps:$4 sm:$0xff]  }
 0x2e3   :  { %5106 = vmatmul.mubr.bf16.vlgmr.msra.gmra.mrb[32].mxu1 %v8603_v49  ;;  %v7807_v49 = vld [vmem:[#allocation7 + $0x66c] ss:$16 sps:$4 sm:$0xff]  }
 0x2e4   :  { %5229 = vmatmul.mubr.bf16.vlgmr.msra.gmra.mrb[32].mxu0 %v8607_v50  ;;  %5156 = vmatpush1.bf16.msra.mxu1 %v7787_v32  ;;  %v7852_v50 = vld [vmem:[#allocation7 + $0xc6c] ss:$16 sps:$4 sm:$0xff]   ;;  %v7853_v32 = vld [vmem:[#allocation7 + $0x768] ss:$16 sps:$4 sm:$0xff]  }
 0x2e5   :  { %5279 = vmatpush1.bf16.msra.mxu0 %v7832_v2  ;;  %5157 = vmatprep.subr.bf16.mxu1 %v7795_v4  ;;  %v7898_v2 = vld [vmem:[#allocation7 + $0xd68] ss:$16 sps:$4 sm:$0xff]   ;;  %v7861_v4 = vld [vmem:[#allocation7 + $0x78c] ss:$16 sps:$4 sm:$0xff]  }
 0x2e6   :  { %5280 = vmatprep.subr.bf16.mxu0 %v7840_v5  ;;  %5187 = vmatprep.mubr.bf16.mxu1 %v8613_v61  ;;  %v7811_v61 = vld [vmem:[#allocation7 + $0x688] ss:$16 sps:$4 sm:$0xff]   ;;  %v7906_v5 = vld [vmem:[#allocation7 + $0xd8c] ss:$16 sps:$4 sm:$0xff]  }
 0x2e7   :  { %5310 = vmatprep.mubr.bf16.mxu0 %v8617_v31  ;;  %v7856_v31 = vld [vmem:[#allocation7 + $0xc88] ss:$16 sps:$4 sm:$0xff]  }
 0x2e8   :  { %5158 = vmatpush1.bf16.msra.mxu1 %v7793_v22  ;;  %v7859_v22 = vld [vmem:[#allocation7 + $0x788] ss:$16 sps:$4 sm:$0xff]  }
 0x2e9   :  { %5281 = vmatpush1.bf16.msra.mxu0 %v7838_v6  ;;  %5159 = vmatprep.subr.bf16.mxu1 %v7801_v8  ;;  %v7904_v6 = vld [vmem:[#allocation7 + $0xd88] ss:$16 sps:$4 sm:$0xff]   ;;  %v7867_v8 = vld [vmem:[#allocation7 + $0x7ac] ss:$16 sps:$4 sm:$0xff]  }
 0x2ea   :  { %5282 = vmatprep.subr.bf16.mxu0 %v7846_v9  ;;  %v7912_v9 = vld [vmem:[#allocation7 + $0xdac] ss:$16 sps:$4 sm:$0xff]  }
 0x2ec   :  { %5160 = vmatpush1.bf16.msra.mxu1 %v7799_v23  ;;  %v7865_v23 = vld [vmem:[#allocation7 + $0x7a8] ss:$16 sps:$4 sm:$0xff]  }
 0x2ed   :  { %5283 = vmatpush1.bf16.msra.mxu0 %v7844_v27  ;;  %5161 = vmatprep.subr.bf16.mxu1 %v7807_v49  ;;  %v7910_v27 = vld [vmem:[#allocation7 + $0xda8] ss:$16 sps:$4 sm:$0xff]   ;;  %v7873_v49 = vld [vmem:[#allocation7 + $0x7cc] ss:$16 sps:$4 sm:$0xff]  }
 0x2ee   :  { %5284 = vmatprep.subr.bf16.mxu0 %v7852_v50  ;;  %v7918_v50 = vld [vmem:[#allocation7 + $0xdcc] ss:$16 sps:$4 sm:$0xff]  }
 0x2f0   :  { %5162 = vmatpush1.bf16.msra.mxu1 %v7805_v55  ;;  %v7871_v55 = vld [vmem:[#allocation7 + $0x7c8] ss:$16 sps:$4 sm:$0xff]  }
 0x2f1   :  { %5285 = vmatpush1.bf16.msra.mxu0 %v7850_v57  ;;  %5163 = vmatprep.subr.bf16.mxu1 %v7813_v1  ;;  %v7916_v57 = vld [vmem:[#allocation7 + $0xdc8] ss:$16 sps:$4 sm:$0xff]   ;;  %v7879_v1 = vld [vmem:[#allocation7 + $0x7ec] ss:$16 sps:$4 sm:$0xff]  }
 0x2f2   :  { %5286 = vmatprep.subr.bf16.mxu0 %v7858_v12  ;;  %v7924_v12 = vld [vmem:[#allocation7 + $0xdec] ss:$16 sps:$4 sm:$0xff]  }
 0x2f4   :  { %5164 = vmatpush1.bf16.msra.mxu1 %v7811_v61  ;;  %v7877_v61 = vld [vmem:[#allocation7 + $0x7e8] ss:$16 sps:$4 sm:$0xff]  }
 0x2f5   :  { %5287 = vmatpush1.bf16.msra.mxu0 %v7856_v31  ;;  %5165 = vmatprep.subr.bf16.mxu1 %v7819_v28  ;;  %v7922_v31 = vld [vmem:[#allocation7 + $0xde8] ss:$16 sps:$4 sm:$0xff]   ;;  %v7885_v28 = vld [vmem:[#allocation7 + $0xa0c] ss:$16 sps:$4 sm:$0xff]  }
 0x2f6   :  { %5288 = vmatprep.subr.bf16.mxu0 %v7864_v13  ;;  %v4861_v17 = vpop.f32.mrb[20].mxu1  ;;  %v7930_v13 = vld [vmem:[#allocation11 + $0x4] ss:$8 sps:$4 sm:$0xff]  }
 0x2f7   :  { %v8713_v48 = vpop.f32.mrb[20].mxu0  ;;  %v4862_v25 = vadd.f32 %v4861_v17, %v8704_v10  ;;  %v4863_v29 = vpop.f32.mrb[21].mxu1  ;;  %v7889_v17 = vld [vmem:[#allocation7 + $0xa28] ss:$16 sps:$4 sm:$0xff]  }
 0x2f8   :  { %v8716_v36 = vpop.f32.mrb[21].mxu0  ;;  %v4864_v37 = vadd.f32 %v4863_v29, %v8707_v11  ;;  %v4865_v38 = vpop.f32.mrb[22].mxu1  ;;  %5166 = vmatpush1.bf16.msra.mxu1 %v7817_v19  ;;  %v7829_v11 = vld [vmem:[#allocation7 + $0x6e8] ss:$16 sps:$4 sm:$0xff]   ;;  %v7897_v29 = vld [vmem:[#allocation7 + $0xa4c] ss:$16 sps:$4 sm:$0xff]  }
 0x2f9   :  { %5289 = vmatpush1.bf16.msra.mxu0 %v7862_v14  ;;  %v4988_v39 = vpop.f32.mrb[22].mxu0  ;;  %v8720_v7 = vadd.f32 %v8697_v63, %v4862_v25  ;;  %v4866_v62 = vpop.f32.mrb[23].mxu1  ;;  %5167 = vmatprep.subr.bf16.mxu1 %v7825_v15  ;;  %v7835_v63 = vld [vmem:[#allocation7 + $0x708] ss:$16 sps:$4 sm:$0xff]   ;;  %v7928_v14 = vld [vmem:[#allocation11] ss:$8 sps:$4 sm:$0xff]  }
 0x2fa   :  { %5290 = vmatprep.subr.bf16.mxu0 %v7870_v16  ;;  %v4989_v10 = vpop.f32.mrb[23].mxu0  ;;  %v8723_v40 = vadd.f32 %v8700_v26, %v4864_v37  ;;  %v7886_v26 = vld [vmem:[#allocation7 + $0xd28] ss:$16 sps:$4 sm:$0xff]   ;;  %v7891_v15 = vld [vmem:[#allocation7 + $0xa2c] ss:$16 sps:$4 sm:$0xff]  }
 0x2fb   :  { %v7883_v19 = vld [vmem:[#allocation7 + $0xa08] ss:$16 sps:$4 sm:$0xff]   ;;  %v7934_v25 = vld [vmem:[#allocation11 + $0x10] ss:$8 sps:$4 sm:$0xff]  }
 0x2fc   :  { %5168 = vmatpush1.bf16.msra.mxu1 %v7823_v53  ;;  %v7936_v16 = vld [vmem:[#allocation11 + $0x14] ss:$8 sps:$4 sm:$0xff]   ;;  %v7942_v37 = vld [vmem:[#allocation11 + $0x24] ss:$8 sps:$4 sm:$0xff]   ;;  %v7940_v53 = vld [vmem:[#allocation11 + $0x20] ss:$8 sps:$4 sm:$0xff]  }
 0x2fd   :  { %5291 = vmatpush1.bf16.msra.mxu0 %v7868_v59  ;;  %5169 = vmatprep.subr.bf16.mxu1 %v7831_v58  ;;  %v7895_v38 = vld [vmem:[#allocation7 + $0xa48] ss:$16 sps:$4 sm:$0xff]   ;;  %v7903_v59 = vld [vmem:[#allocation7 + $0xa6c] ss:$16 sps:$4 sm:$0xff]  }
 0x2fe   :  { %5292 = vmatprep.subr.bf16.mxu0 %v7876_v56  ;;  %v7946_v39 = vld [vmem:[#allocation11 + $0x30] ss:$8 sps:$4 sm:$0xff]   ;;  %v7954_v58 = vld [vmem:[#allocation11 + $0x44] ss:$8 sps:$4 sm:$0xff]  }
 0x2ff   :  { %v7909_v62 = vld [vmem:[#allocation7 + $0xa8c] ss:$16 sps:$4 sm:$0xff]   ;;  %v7907_v56 = vld [vmem:[#allocation7 + $0xa88] ss:$16 sps:$4 sm:$0xff]  }
 0x300   :  { %5170 = vmatpush1.bf16.msra.mxu1 %v7829_v11  ;;  %v7915_v10 = vld [vmem:[#allocation7 + $0xaac] ss:$16 sps:$4 sm:$0xff]   ;;  %v7960_v11 = vld [vmem:[#allocation11 + $0x54] ss:$8 sps:$4 sm:$0xff]  }
 0x301   :  { %5293 = vmatpush1.bf16.msra.mxu0 %v7874_v30  ;;  %5171 = vmatprep.subr.bf16.mxu1 %v7837_v20  ;;  %v7913_v30 = vld [vmem:[#allocation7 + $0xaa8] ss:$16 sps:$4 sm:$0xff]   ;;  %v7958_v20 = vld [vmem:[#allocation11 + $0x50] ss:$8 sps:$4 sm:$0xff]  }
 0x302   :  { %5294 = vmatprep.subr.bf16.mxu0 %v7882_v0  ;;  %v7921_v0 = vld [vmem:[#allocation7 + $0xacc] ss:$16 sps:$4 sm:$0xff]  }
 0x304   :  { %5172 = vmatpush1.bf16.msra.mxu1 %v7835_v63  ;;  %v7966_v63 = vld [vmem:[#allocation11 + $0x64] ss:$8 sps:$4 sm:$0xff]  }
 0x305   :  { %5295 = vmatpush1.bf16.msra.mxu0 %v7880_v41  ;;  %5173 = vmatprep.subr.bf16.mxu1 %v7843_v42 }
 0x306   :  { %5296 = vmatprep.subr.bf16.mxu0 %v7888_v34 }
 0x308   :  { %5174 = vmatpush1.bf16.msra.mxu1 %v7841_v35 }
 0x309   :  { %5297 = vmatpush1.bf16.msra.mxu0 %v7886_v26  ;;  %5175 = vmatprep.subr.bf16.mxu1 %v7849_v60 }
 0x30a   :  { %5298 = vmatprep.subr.bf16.mxu0 %v7894_v43 }
 0x30c   :  { %5176 = vmatpush1.bf16.msra.mxu1 %v7847_v44 }
 0x30d   :  { %5299 = vmatpush1.bf16.msra.mxu0 %v7892_v46  ;;  %5177 = vmatprep.subr.bf16.mxu1 %v7855_v47  ;;  %v7919_v47 = vld [vmem:[#allocation7 + $0xac8] ss:$16 sps:$4 sm:$0xff]  }
 0x30e   :  { %5300 = vmatprep.subr.bf16.mxu0 %v7900_v51  ;;  %v7964_v51 = vld [vmem:[#allocation11 + $0x60] ss:$8 sps:$4 sm:$0xff]  }
 0x310   :  { %5178 = vmatpush1.bf16.msra.mxu1 %v7853_v32 }
 0x311   :  { %5301 = vmatpush1.bf16.msra.mxu0 %v7898_v2  ;;  %5179 = vmatprep.subr.bf16.mxu1 %v7861_v4  ;;  %v7927_v4 = vld [vmem:[#allocation7 + $0xaec] ss:$16 sps:$4 sm:$0xff]  }
 0x312   :  { %5302 = vmatprep.subr.bf16.mxu0 %v7906_v5 }
 0x314   :  { %5180 = vmatpush1.bf16.msra.mxu1 %v7859_v22  ;;  %v7970_v22 = vld [vmem:[#allocation11 + $0x70] ss:$8 sps:$4 sm:$0xff]  }
 0x315   :  { %5303 = vmatpush1.bf16.msra.mxu0 %v7904_v6  ;;  %5181 = vmatprep.subr.bf16.mxu1 %v7867_v8  ;;  %v7933_v6 = vld [vmem:[#allocation7 + $0xb0c] ss:$16 sps:$4 sm:$0xff]   ;;  %v7978_v8 = vld [vmem:[#allocation11 + $0x84] ss:$8 sps:$4 sm:$0xff]  }
 0x316   :  { %5304 = vmatprep.subr.bf16.mxu0 %v7912_v9  ;;  %v7931_v9 = vld [vmem:[#allocation7 + $0xb08] ss:$16 sps:$4 sm:$0xff]  }
 0x318   :  { %5182 = vmatpush1.bf16.msra.mxu1 %v7865_v23  ;;  %v7976_v23 = vld [vmem:[#allocation11 + $0x80] ss:$8 sps:$4 sm:$0xff]  }
 0x319   :  { %5305 = vmatpush1.bf16.msra.mxu0 %v7910_v27  ;;  %5183 = vmatprep.subr.bf16.mxu1 %v7873_v49  ;;  %v7939_v27 = vld [vmem:[#allocation7 + $0xb2c] ss:$16 sps:$4 sm:$0xff]   ;;  %v7937_v49 = vld [vmem:[#allocation7 + $0xb28] ss:$16 sps:$4 sm:$0xff]  }
 0x31a   :  { %5306 = vmatprep.subr.bf16.mxu0 %v7918_v50  ;;  %v7945_v50 = vld [vmem:[#allocation7 + $0xb4c] ss:$16 sps:$4 sm:$0xff]  }
 0x31c   :  { %5184 = vmatpush1.bf16.msra.mxu1 %v7871_v55  ;;  %v7990_v55 = vld [vmem:[#allocation11 + $0xa4] ss:$8 sps:$4 sm:$0xff]  }
 0x31d   :  { %5307 = vmatpush1.bf16.msra.mxu0 %v7916_v57  ;;  %5185 = vmatprep.subr.bf16.mxu1 %v7879_v1  ;;  %v7943_v57 = vld [vmem:[#allocation7 + $0xb48] ss:$16 sps:$4 sm:$0xff]   ;;  %v7988_v1 = vld [vmem:[#allocation11 + $0xa0] ss:$8 sps:$4 sm:$0xff]  }
 0x31e   :  { %5308 = vmatprep.subr.bf16.mxu0 %v7924_v12  ;;  %v7951_v12 = vld [vmem:[#allocation7 + $0xb6c] ss:$16 sps:$4 sm:$0xff]  }
 0x320   :  { %5186 = vmatpush1.bf16.msra.mxu1 %v7877_v61  ;;  %v7996_v61 = vld [vmem:[#allocation11 + $0xb4] ss:$8 sps:$4 sm:$0xff]  }
 0x321   :  { %5309 = vmatpush1.bf16.msra.mxu0 %v7922_v31  ;;  %5237 = vmatprep.subr.bf16.mxu1 %v7885_v28  ;;  %v7949_v31 = vld [vmem:[#allocation7 + $0xb68] ss:$16 sps:$4 sm:$0xff]   ;;  %v7994_v28 = vld [vmem:[#allocation11 + $0xb0] ss:$8 sps:$4 sm:$0xff]  }
 0x322   :  { %5790 = vmatprep.subr.bf16.mxu0 %v7930_v13  ;;  %v7957_v13 = vld [vmem:[#allocation7 + $0xb8c] ss:$16 sps:$4 sm:$0xff]  }
 0x323   :  { %5188 = vmatmul.mubr.bf16.vlgmr.msra.gmra.mrb[36].mxu1 %v8637_v18  ;;  %v7948_v18 = vld [vmem:[#allocation11 + $0x34] ss:$8 sps:$4 sm:$0xff]  }
 0x324   :  { %5311 = vmatmul.mubr.bf16.vlgmr.msra.gmra.mrb[36].mxu0 %v8641_v21  ;;  %5238 = vmatpush1.bf16.msra.mxu1 %v7883_v19  ;;  %v7901_v21 = vld [vmem:[#allocation7 + $0xa68] ss:$16 sps:$4 sm:$0xff]  }
 0x325   :  { %5791 = vmatpush1.bf16.msra.mxu0 %v7928_v14  ;;  %5239 = vmatprep.subr.bf16.mxu1 %v7891_v15  ;;  %v8002_v19 = vld [vmem:[#allocation11 + $0xc4] ss:$8 sps:$4 sm:$0xff]   ;;  %v8000_v15 = vld [vmem:[#allocation11 + $0xc0] ss:$8 sps:$4 sm:$0xff]  }
 0x326   :  { %5792 = vmatprep.subr.bf16.mxu0 %v7936_v16  ;;  %5269 = vmatprep.mubr.bf16.mxu1 %v8647_v33  ;;  %v7952_v33 = vld [vmem:[#allocation11 + $0x40] ss:$8 sps:$4 sm:$0xff]   ;;  %v7955_v14 = vld [vmem:[#allocation7 + $0xb88] ss:$16 sps:$4 sm:$0xff]  }
 0x327   :  { %v7963_v16 = vld [vmem:[#allocation7 + $0xbac] ss:$16 sps:$4 sm:$0xff]  }
 0x328   :  { %5240 = vmatpush1.bf16.msra.mxu1 %v7889_v17  ;;  %v8008_v17 = vld [vmem:[#allocation11 + $0xd4] ss:$8 sps:$4 sm:$0xff]  }
 0x329   :  { %5793 = vmatpush1.bf16.msra.mxu0 %v7934_v25  ;;  %5241 = vmatprep.subr.bf16.mxu1 %v7897_v29  ;;  %v7961_v25 = vld [vmem:[#allocation7 + $0xba8] ss:$16 sps:$4 sm:$0xff]   ;;  %v8006_v29 = vld [vmem:[#allocation11 + $0xd0] ss:$8 sps:$4 sm:$0xff]  }
 0x32a   :  { %5794 = vmatprep.subr.bf16.mxu0 %v7942_v37  ;;  %v7969_v37 = vld [vmem:[#allocation7 + $0xbcc] ss:$16 sps:$4 sm:$0xff]  }
 0x32c   :  { %5242 = vmatpush1.bf16.msra.mxu1 %v7895_v38  ;;  %v8014_v38 = vld [vmem:[#allocation11 + $0xe4] ss:$8 sps:$4 sm:$0xff]  }
 0x32d   :  { %5795 = vmatpush1.bf16.msra.mxu0 %v7940_v53  ;;  %5243 = vmatprep.subr.bf16.mxu1 %v7903_v59  ;;  %v7967_v53 = vld [vmem:[#allocation7 + $0xbc8] ss:$16 sps:$4 sm:$0xff]   ;;  %v8012_v59 = vld [vmem:[#allocation11 + $0xe0] ss:$8 sps:$4 sm:$0xff]  }
 0x32e   :  { %5796 = vmatprep.subr.bf16.mxu0 %v7948_v18  ;;  %v7975_v18 = vld [vmem:[#allocation7 + $0xbec] ss:$16 sps:$4 sm:$0xff]  }
 0x330   :  { %5244 = vmatpush1.bf16.msra.mxu1 %v7901_v21  ;;  %v8020_v21 = vld [vmem:[#allocation11 + $0xf4] ss:$8 sps:$4 sm:$0xff]  }
 0x331   :  { %5797 = vmatpush1.bf16.msra.mxu0 %v7946_v39  ;;  %5245 = vmatprep.subr.bf16.mxu1 %v7909_v62  ;;  %v7973_v39 = vld [vmem:[#allocation7 + $0xbe8] ss:$16 sps:$4 sm:$0xff]   ;;  %v8018_v62 = vld [vmem:[#allocation11 + $0xf0] ss:$8 sps:$4 sm:$0xff]  }
 0x332   :  { %5798 = vmatprep.subr.bf16.mxu0 %v7954_v58  ;;  %v7981_v58 = vld [vmem:[#allocation7 + $0xe0c] ss:$16 sps:$4 sm:$0xff]  }
 0x334   :  { %5246 = vmatpush1.bf16.msra.mxu1 %v7907_v56  ;;  %v7979_v56 = vld [vmem:[#allocation7 + $0xe08] ss:$16 sps:$4 sm:$0xff]  }
 0x335   :  { %5799 = vmatpush1.bf16.msra.mxu0 %v7952_v33  ;;  %5247 = vmatprep.subr.bf16.mxu1 %v7915_v10  ;;  %v7987_v33 = vld [vmem:[#allocation7 + $0xe2c] ss:$16 sps:$4 sm:$0xff]   ;;  %v7985_v10 = vld [vmem:[#allocation7 + $0xe28] ss:$16 sps:$4 sm:$0xff]  }
 0x336   :  { %5800 = vmatprep.subr.bf16.mxu0 %v7960_v11  ;;  %v4943_v41 = vpop.f32.mrb[24].mxu1  ;;  %v7993_v11 = vld [vmem:[#allocation7 + $0xe4c] ss:$16 sps:$4 sm:$0xff]  }
 0x337   :  { %v5066_v42 = vpop.f32.mrb[24].mxu0  ;;  %v4944_v34 = vadd.f32 %v4943_v41, %v8720_v7  ;;  %v4945_v26 = vpop.f32.mrb[25].mxu1  ;;  %v7972_v7 = vld [vmem:[#allocation11 + $0x74] ss:$8 sps:$4 sm:$0xff]   ;;  %v8005_v41 = vld [vmem:[#allocation7 + $0xe8c] ss:$16 sps:$4 sm:$0xff]  }
 0x338   :  { %v8730_v35 = vadd.f32 %v5066_v42, %v8682_v45  ;;  %v5068_v60 = vpop.f32.mrb[25].mxu0  ;;  %v4946_v43 = vadd.f32 %v4945_v26, %v8723_v40  ;;  %v4947_v46 = vpop.f32.mrb[26].mxu1  ;;  %5248 = vmatpush1.bf16.msra.mxu1 %v7913_v30  ;;  %v7991_v30 = vld [vmem:[#allocation7 + $0xe48] ss:$16 sps:$4 sm:$0xff]   ;;  %v8011_v26 = vld [vmem:[#allocation7 + $0xeac] ss:$16 sps:$4 sm:$0xff]  }
 0x339   :  { %v8734_v44 = vadd.f32 %v5068_v60, %v8687_v24  ;;  %5801 = vmatpush1.bf16.msra.mxu0 %v7958_v20  ;;  %v5070_v32 = vpop.f32.mrb[26].mxu0  ;;  %v4948_v2 = vpop.f32.mrb[27].mxu1  ;;  %5249 = vmatprep.subr.bf16.mxu1 %v7921_v0  ;;  %v8737_v45 = vadd.f32 %v8713_v48, %v4944_v34  ;;  %v7925_v24 = vld [vmem:[#allocation7 + $0xae8] ss:$16 sps:$4 sm:$0xff]   ;;  %v7999_v20 = vld [vmem:[#allocation7 + $0xe6c] ss:$16 sps:$4 sm:$0xff]   ;;  %v5362_v0 = vlaneseq }
 0x33a   :  { %5802 = vmatprep.subr.bf16.mxu0 %v7966_v63  ;;  %v5071_v5 = vpop.f32.mrb[27].mxu0  ;;  %v8740_v40 = vadd.f32 %v8716_v36, %v4946_v43  ;;  %v7984_v48 = vld [vmem:[#allocation11 + $0x94] ss:$8 sps:$4 sm:$0xff]   ;;  %v7982_v36 = vld [vmem:[#allocation11 + $0x90] ss:$8 sps:$4 sm:$0xff]  }
 0x33b   :  { %v7997_v63 = vld [vmem:[#allocation7 + $0xe68] ss:$16 sps:$4 sm:$0xff]   ;;  %v8744_v42 = vshrl.u32 %v5362_v0, 7 }
 0x33c   :  { %5250 = vmatpush1.bf16.msra.mxu1 %v7919_v47  ;;  %v8003_v34 = vld [vmem:[#allocation7 + $0xe88] ss:$16 sps:$4 sm:$0xff]   ;;  %v8017_v47 = vld [vmem:[#allocation7 + $0xecc] ss:$16 sps:$4 sm:$0xff]  }
 0x33d   :  { %5803 = vmatpush1.bf16.msra.mxu0 %v7964_v51  ;;  %5251 = vmatprep.subr.bf16.mxu1 %v7927_v4  ;;  %v5368_v60 = vsub.s32 1, %v8744_v42  ;;  %v8009_v43 = vld [vmem:[#allocation7 + $0xea8] ss:$16 sps:$4 sm:$0xff]  }
 0x33e   :  { %5804 = vmatprep.subr.bf16.mxu0 %v7972_v7  ;;  %v8053_v0 = vld [vmem:[#allocation11 + $0x114] ss:$8 sps:$4 sm:$0xff]  }
 0x340   :  { %5252 = vmatpush1.bf16.msra.mxu1 %v7925_v24 }
 0x341   :  { %5805 = vmatpush1.bf16.msra.mxu0 %v7970_v22  ;;  %5253 = vmatprep.subr.bf16.mxu1 %v7933_v6  ;;  %v8015_v6 = vld [vmem:[#allocation7 + $0xec8] ss:$16 sps:$4 sm:$0xff]  }
 0x342   :  { %5806 = vmatprep.subr.bf16.mxu0 %v7978_v8 }
 0x344   :  { %5254 = vmatpush1.bf16.msra.mxu1 %v7931_v9 }
 0x345   :  { %5807 = vmatpush1.bf16.msra.mxu0 %v7976_v23  ;;  %5255 = vmatprep.subr.bf16.mxu1 %v7939_v27  ;;  %v8023_v27 = vld [vmem:[#allocation7 + $0xeec] ss:$16 sps:$4 sm:$0xff]  }
 0x346   :  { %5808 = vmatprep.subr.bf16.mxu0 %v7984_v48 }
 0x348   :  { %5256 = vmatpush1.bf16.msra.mxu1 %v7937_v49 }
 0x349   :  { %5809 = vmatpush1.bf16.msra.mxu0 %v7982_v36  ;;  %5257 = vmatprep.subr.bf16.mxu1 %v7945_v50 }
 0x34a   :  { %5810 = vmatprep.subr.bf16.mxu0 %v7990_v55  ;;  %v8021_v55 = vld [vmem:[#allocation7 + $0xee8] ss:$16 sps:$4 sm:$0xff]  }
 0x34c   :  { %5258 = vmatpush1.bf16.msra.mxu1 %v7943_v57 }
 0x34d   :  { %5811 = vmatpush1.bf16.msra.mxu0 %v7988_v1  ;;  %5259 = vmatprep.subr.bf16.mxu1 %v7951_v12  ;;  %v8029_v12 = vld [vmem:[#allocation7 + $0xf2c] ss:$16 sps:$4 sm:$0xff]  }
 0x34e   :  { %5812 = vmatprep.subr.bf16.mxu0 %v7996_v61  ;;  %v8027_v61 = vld [vmem:[#allocation7 + $0xf28] ss:$16 sps:$4 sm:$0xff]  }
 0x350   :  { %5260 = vmatpush1.bf16.msra.mxu1 %v7949_v31  ;;  %v8032_v31 = vld [vmem:[#allocation7 + $0xf4c] ss:$16 sps:$4 sm:$0xff]  }
 0x351   :  { %5813 = vmatpush1.bf16.msra.mxu0 %v7994_v28  ;;  %5261 = vmatprep.subr.bf16.mxu1 %v7957_v13  ;;  %v8030_v28 = vld [vmem:[#allocation7 + $0xf48] ss:$16 sps:$4 sm:$0xff]   ;;  %v8035_v13 = vld [vmem:[#allocation7 + $0xf6c] ss:$16 sps:$4 sm:$0xff]  }
 0x352   :  { %5814 = vmatprep.subr.bf16.mxu0 %v8002_v19  ;;  %v8033_v19 = vld [vmem:[#allocation7 + $0xf68] ss:$16 sps:$4 sm:$0xff]  }
 0x354   :  { %5262 = vmatpush1.bf16.msra.mxu1 %v7955_v14  ;;  %v8038_v14 = vld [vmem:[#allocation7 + $0xf8c] ss:$16 sps:$4 sm:$0xff]  }
 0x355   :  { %5815 = vmatpush1.bf16.msra.mxu0 %v8000_v15  ;;  %5263 = vmatprep.subr.bf16.mxu1 %v7963_v16  ;;  %v8036_v15 = vld [vmem:[#allocation7 + $0xf88] ss:$16 sps:$4 sm:$0xff]   ;;  %v8041_v16 = vld [vmem:[#allocation7 + $0xfac] ss:$16 sps:$4 sm:$0xff]  }
 0x356   :  { %5816 = vmatprep.subr.bf16.mxu0 %v8008_v17  ;;  %v8039_v17 = vld [vmem:[#allocation7 + $0xfa8] ss:$16 sps:$4 sm:$0xff]  }
 0x358   :  { %5264 = vmatpush1.bf16.msra.mxu1 %v7961_v25  ;;  %v8044_v25 = vld [vmem:[#allocation7 + $0xfcc] ss:$16 sps:$4 sm:$0xff]  }
 0x359   :  { %5817 = vmatpush1.bf16.msra.mxu0 %v8006_v29  ;;  %5265 = vmatprep.subr.bf16.mxu1 %v7969_v37  ;;  %v8042_v29 = vld [vmem:[#allocation7 + $0xfc8] ss:$16 sps:$4 sm:$0xff]   ;;  %v8047_v37 = vld [vmem:[#allocation7 + $0xfec] ss:$16 sps:$4 sm:$0xff]  }
 0x35a   :  { %5818 = vmatprep.subr.bf16.mxu0 %v8014_v38  ;;  %v8045_v38 = vld [vmem:[#allocation7 + $0xfe8] ss:$16 sps:$4 sm:$0xff]  }
 0x35c   :  { %5266 = vmatpush1.bf16.msra.mxu1 %v7967_v53 }
 0x35d   :  { %5819 = vmatpush1.bf16.msra.mxu0 %v8012_v59  ;;  %5267 = vmatprep.subr.bf16.mxu1 %v7975_v18 }
 0x35e   :  { %5820 = vmatprep.subr.bf16.mxu0 %v8020_v21 }
 0x360   :  { %5268 = vmatpush1.bf16.msra.mxu1 %v7973_v39 }
 0x361   :  { %5821 = vmatpush1.bf16.msra.mxu0 %v8018_v62  ;;  %5319 = vmatprep.subr.bf16.mxu1 %v7981_v58 }
 0x363   :  { %5270 = vmatmul.mubr.bf16.vlgmr.msra.gmra.mrb[40].mxu1 %v8667_v54  ;;  %v5364_v54 = vsub.s32 0, %v8744_v42 }
 0x364   :  { %5320 = vmatpush1.bf16.msra.mxu1 %v7979_v56  ;;  %5351 = vmatprep.mubr.bf16.mxu1 %v8673_v3  ;;  %v8747_v3 = vld [vmem:[#allocation10] sm:$0xf] }
 0x365   :  { %5321 = vmatprep.subr.bf16.mxu1 %v7987_v33  ;;  %v5365_v46 = vrot.slane %v8747_v3, %v5364_v54  ;;  %v5369_v32 = vrot.slane %v8747_v3, %v5368_v60 }
 0x368   :  { %5322 = vmatpush1.bf16.msra.mxu1 %v7985_v10 }
 0x369   :  { %5323 = vmatprep.subr.bf16.mxu1 %v7993_v11 }
 0x36c   :  { %5324 = vmatpush1.bf16.msra.mxu1 %v7991_v30 }
 0x36d   :  { %5325 = vmatprep.subr.bf16.mxu1 %v7999_v20  ;;  %v8050_v20 = vld [vmem:[#allocation11 + $0x104] ss:$8 sps:$4 sm:$0xff]  }
 0x36e   :  { %5831 = vmatprep.subr.bf16.mxu0 %v8050_v20 }
 0x370   :  { %5326 = vmatpush1.bf16.msra.mxu1 %v7997_v63  ;;  %v8056_v63 = vld [vmem:[#allocation11 + $0x124] ss:$8 sps:$4 sm:$0xff]  }
 0x371   :  { %5327 = vmatprep.subr.bf16.mxu1 %v8005_v41  ;;  %v8054_v41 = vld [vmem:[#allocation11 + $0x120] ss:$8 sps:$4 sm:$0xff]  }
 0x374   :  { %5328 = vmatpush1.bf16.msra.mxu1 %v8003_v34  ;;  %v8057_v34 = vld [vmem:[#allocation11 + $0x130] ss:$8 sps:$4 sm:$0xff]  }
 0x375   :  { %5329 = vmatprep.subr.bf16.mxu1 %v8011_v26  ;;  %v8062_v26 = vld [vmem:[#allocation11 + $0x144] ss:$8 sps:$4 sm:$0xff]  }
 0x376   :  { %v5025_v51 = vpop.f32.mrb[28].mxu1 }
 0x377   :  { %v8756_v2 = vpop.f32.mrb[28].mxu0  ;;  %v5026_v4 = vadd.f32 %v5025_v51, %v8737_v45  ;;  %v5027_v7 = vpop.f32.mrb[29].mxu1  ;;  %v8026_v45 = vld [vmem:[#allocation7 + $0xf0c] ss:$16 sps:$4 sm:$0xff]   ;;  %v8068_v51 = vld [vmem:[#allocation11 + $0x164] ss:$8 sps:$4 sm:$0xff]  }
 0x378   :  { %v8759_v5 = vpop.f32.mrb[29].mxu0  ;;  %v5028_v24 = vadd.f32 %v5027_v7, %v8740_v40  ;;  %v5029_v22 = vpop.f32.mrb[30].mxu1  ;;  %5330 = vmatpush1.bf16.msra.mxu1 %v8009_v43  ;;  %v8024_v40 = vld [vmem:[#allocation7 + $0xf08] ss:$16 sps:$4 sm:$0xff]   ;;  %v8060_v43 = vld [vmem:[#allocation11 + $0x140] ss:$8 sps:$4 sm:$0xff]  }
 0x379   :  { %v5152_v8 = vpop.f32.mrb[30].mxu0  ;;  %v5382_v9 = vadd.f32 %v5365_v46, %v5026_v4  ;;  %v5030_v23 = vpop.f32.mrb[31].mxu1  ;;  %5331 = vmatprep.subr.bf16.mxu1 %v8017_v47  ;;  %v8065_v46 = vld [vmem:[#allocation11 + $0x154] ss:$8 sps:$4 sm:$0xff]   ;;  %v8063_v47 = vld [vmem:[#allocation11 + $0x150] ss:$8 sps:$4 sm:$0xff]  }
 0x37a   :  { %v5153_v48 = vpop.f32.mrb[31].mxu0  ;;  %v5383_v49 = vadd.f32 %v5369_v32, %v5028_v24  ;;  %v8066_v32 = vld [vmem:[#allocation11 + $0x160] ss:$8 sps:$4 sm:$0xff]   ;;  %v8069_v4 = vld [vmem:[#allocation11 + $0x170] ss:$8 sps:$4 sm:$0xff]  }
 0x37b   :  { %v5386_v36 = vmax.f32 %v5382_v9, 0.0  ;;  %v8074_v7 = vld [vmem:[#allocation11 + $0x184] ss:$8 sps:$4 sm:$0xff]   ;;  %v8077_v24 = vld [vmem:[#allocation11 + $0x194] ss:$8 sps:$4 sm:$0xff]  }
 0x37c   :  { %v5387_v50 = vmax.f32 %v5383_v49, 0.0  ;;  %5332 = vmatpush1.bf16.msra.mxu1 %v8015_v6  ;;  %v8075_v22 = vld [vmem:[#allocation11 + $0x190] ss:$8 sps:$4 sm:$0xff]   ;;  %v8080_v6 = vld [vmem:[#allocation11 + $0x1a4] ss:$8 sps:$4 sm:$0xff]  }
 0x37d   :  { %5333 = vmatprep.subr.bf16.mxu1 %v8023_v27  ;;  %v5390_v1 = vpack.c.bf16 %v5386_v36, %v5386_v36  ;;  %v8078_v8 = vld [vmem:[#allocation11 + $0x1a0] ss:$8 sps:$4 sm:$0xff]   ;;  %v8083_v9 = vld [vmem:[#allocation11 + $0x1b4] ss:$8 sps:$4 sm:$0xff]   ;;  %v8081_v23 = vld [vmem:[#allocation11 + $0x1b0] ss:$8 sps:$4 sm:$0xff]  }
 0x37e   :  { %v5391_v57 = vpack.c.bf16 %v5387_v50, %v5387_v50  ;;  %v8086_v27 = vld [vmem:[#allocation11 + $0x1c4] ss:$8 sps:$4 sm:$0xff]   ;;  %v8084_v48 = vld [vmem:[#allocation11 + $0x1c0] ss:$8 sps:$4 sm:$0xff]   ;;  %v8089_v49 = vld [vmem:[#allocation11 + $0x1d4] ss:$8 sps:$4 sm:$0xff]  }
 0x37f   :  { %v8087_v36 = vld [vmem:[#allocation11 + $0x1d0] ss:$8 sps:$4 sm:$0xff]  }
 0x380   :  { %5334 = vmatpush1.bf16.msra.mxu1 %v8021_v55  ;;  %5822 = vmatprep.mubr.bf16.mxu0 %v5391_v57 }
 0x381   :  { %5823 = vmatmul.mubr.bf16.vlgmr.msra.gmra.mrb[40].mxu0 %v5390_v1  ;;  %5335 = vmatprep.subr.bf16.mxu1 %v8026_v45 }
 0x384   :  { %5336 = vmatpush1.bf16.msra.mxu1 %v8024_v40  ;;  %v8092_v40 = vld [vmem:[#allocation11 + $0x1e4] ss:$8 sps:$4 sm:$0xff]  }
 0x385   :  { %5337 = vmatprep.subr.bf16.mxu1 %v8029_v12 }
 0x388   :  { %5338 = vmatpush1.bf16.msra.mxu1 %v8027_v61 }
 0x389   :  { %5339 = vmatprep.subr.bf16.mxu1 %v8032_v31 }
 0x38c   :  { %5340 = vmatpush1.bf16.msra.mxu1 %v8030_v28  ;;  %v8090_v28 = vld [vmem:[#allocation11 + $0x1e0] ss:$8 sps:$4 sm:$0xff]  }
 0x38d   :  { %5341 = vmatprep.subr.bf16.mxu1 %v8035_v13 }
 0x390   :  { %5342 = vmatpush1.bf16.msra.mxu1 %v8033_v19 }
 0x391   :  { %5343 = vmatprep.subr.bf16.mxu1 %v8038_v14 }
 0x394   :  { %5344 = vmatpush1.bf16.msra.mxu1 %v8036_v15 }
 0x395   :  { %5345 = vmatprep.subr.bf16.mxu1 %v8041_v16  ;;  %v8095_v16 = vld [vmem:[#allocation11 + $0x1f4] ss:$8 sps:$4 sm:$0xff]  }
 0x398   :  { %5346 = vmatpush1.bf16.msra.mxu1 %v8039_v17  ;;  %v8093_v17 = vld [vmem:[#allocation11 + $0x1f0] ss:$8 sps:$4 sm:$0xff]  }
 0x399   :  { %5347 = vmatprep.subr.bf16.mxu1 %v8044_v25  ;;  %v8096_v25 = vld [vmem:[#allocation14 + $0x40] sm:$0xff]  }
 0x39c   :  { %5348 = vmatpush1.bf16.msra.mxu1 %v8042_v29  ;;  %v8097_v29 = vld [vmem:[#allocation14] sm:$0xff]  }
 0x39d   :  { %5349 = vmatprep.subr.bf16.mxu1 %v8047_v37  ;;  %v8098_v37 = vld [vmem:[#allocation14 + $0x48] sm:$0xff]  }
 0x3a0   :  { %5350 = vmatpush1.bf16.msra.mxu1 %v8045_v38  ;;  %v8099_v38 = vld [vmem:[#allocation14 + $0x8] sm:$0xff]  }
 0x3a1   :  { %6878 = vmatprep.subr.bf16.mxu1 %v8096_v25 }
 0x3a3   :  { %5352 = vmatmul.mubr.bf16.vlgmr.msra.gmra.mrb[44].mxu1 %v8691_v52  ;;  %v8048_v52 = vld [vmem:[#allocation11 + $0x100] ss:$8 sps:$4 sm:$0xff]  }
 0x3a4   :  { %5832 = vmatpush1.bf16.msra.mxu0 %v8048_v52  ;;  %6879 = vmatpush3.bf16.msra.mxu1 %v8097_v29 }
 0x3a5   :  { %5833 = vmatprep.subr.bf16.mxu0 %v8053_v0  ;;  %6880 = vmatprep.subr.bf16.mxu1 %v8098_v37 }
 0x3a8   :  { %6881 = vmatpush3.bf16.msra.mxu1 %v8099_v38 }
 0x3b6   :  { %v5107_v53 = vpop.f32.mrb[32].mxu1 }
 0x3b7   :  { %v8763_v59 = vpop.f32.mrb[32].mxu0  ;;  %v5108_v18 = vadd.f32 %v5107_v53, %v8730_v35  ;;  %v5109_v21 = vpop.f32.mrb[33].mxu1  ;;  %v8051_v35 = vld [vmem:[#allocation11 + $0x110] ss:$8 sps:$4 sm:$0xff]  }
 0x3b8   :  { %v8766_v39 = vpop.f32.mrb[33].mxu0  ;;  %v5110_v62 = vadd.f32 %v5109_v21, %v8734_v44  ;;  %v5111_v58 = vpop.f32.mrb[34].mxu1  ;;  %5834 = vmatpush1.bf16.msra.mxu0 %v8051_v35  ;;  %v8059_v44 = vld [vmem:[#allocation11 + $0x134] ss:$8 sps:$4 sm:$0xff]  }
 0x3b9   :  { %v5234_v56 = vpop.f32.mrb[34].mxu0  ;;  %v5149_v33 = vadd.f32 %v8756_v2, %v5108_v18  ;;  %v5112_v10 = vpop.f32.mrb[35].mxu1  ;;  %5835 = vmatprep.subr.bf16.mxu0 %v8056_v63  ;;  %v8071_v2 = vld [vmem:[#allocation11 + $0x174] ss:$8 sps:$4 sm:$0xff]   ;;  %v8106_v58 = vld [vmem:[#allocation14 + $0x68] sm:$0xff]   ;;  %v5372_v63 = vsub.s32 2, %v8744_v42 }
 0x3ba   :  { %v5235_v11 = vpop.f32.mrb[35].mxu0  ;;  %v8771_v30 = vadd.f32 %v8759_v5, %v5110_v62  ;;  %v8072_v5 = vld [vmem:[#allocation11 + $0x180] ss:$8 sps:$4 sm:$0xff]   ;;  %v8100_v53 = vld [vmem:[#allocation14 + $0x50] sm:$0xff]  }
 0x3bb   :  { %6882 = vmatprep.subr.bf16.mxu1 %v8100_v53  ;;  %v8102_v18 = vld [vmem:[#allocation14 + $0x58] sm:$0xff]   ;;  %v8105_v62 = vld [vmem:[#allocation14 + $0x20] sm:$0xff]   ;;  %v8107_v56 = vld [vmem:[#allocation14 + $0x28] sm:$0xff]  }
 0x3bc   :  { %5836 = vmatpush1.bf16.msra.mxu0 %v8054_v41  ;;  %v8103_v21 = vld [vmem:[#allocation14 + $0x18] sm:$0xff]   ;;  %v5376_v41 = vsub.s32 3, %v8744_v42 }
 0x3bd   :  { %5837 = vmatprep.subr.bf16.mxu0 %v8059_v44  ;;  %v5373_v44 = vrot.slane %v8747_v3, %v5372_v63 }
 0x3c0   :  { %5838 = vmatpush1.bf16.msra.mxu0 %v8057_v34 }
 0x3c1   :  { %5839 = vmatprep.subr.bf16.mxu0 %v8062_v26  ;;  %v5377_v26 = vrot.slane %v8747_v3, %v5376_v41  ;;  %v5458_v3 = vld [vmem:[#allocation13] sm:$0x3] }
 0x3c4   :  { %5840 = vmatpush1.bf16.msra.mxu0 %v8060_v43 }
 0x3c5   :  { %5841 = vmatprep.subr.bf16.mxu0 %v8065_v46 }
 0x3c8   :  { %5842 = vmatpush1.bf16.msra.mxu0 %v8063_v47 }
 0x3c9   :  { %5843 = vmatprep.subr.bf16.mxu0 %v8068_v51 }
 0x3cc   :  { %5844 = vmatpush1.bf16.msra.mxu0 %v8066_v32 }
 0x3cd   :  { %5845 = vmatprep.subr.bf16.mxu0 %v8071_v2 }
 0x3d0   :  { %5846 = vmatpush1.bf16.msra.mxu0 %v8069_v4 }
 0x3d1   :  { %5847 = vmatprep.subr.bf16.mxu0 %v8074_v7 }
 0x3d4   :  { %5848 = vmatpush1.bf16.msra.mxu0 %v8072_v5 }
 0x3d5   :  { %5849 = vmatprep.subr.bf16.mxu0 %v8077_v24 }
 0x3d8   :  { %5850 = vmatpush1.bf16.msra.mxu0 %v8075_v22 }
 0x3d9   :  { %5851 = vmatprep.subr.bf16.mxu0 %v8080_v6  ;;  %v8108_v6 = vld [vmem:[#allocation14 + $0x70] sm:$0xff]  }
 0x3dc   :  { %5852 = vmatpush1.bf16.msra.mxu0 %v8078_v8  ;;  %v8109_v8 = vld [vmem:[#allocation14 + $0x30] sm:$0xff]  }
 0x3dd   :  { %5853 = vmatprep.subr.bf16.mxu0 %v8083_v9  ;;  %v8110_v9 = vld [vmem:[#allocation14 + $0x78] sm:$0xff]  }
 0x3e0   :  { %5854 = vmatpush1.bf16.msra.mxu0 %v8081_v23  ;;  %v8111_v23 = vld [vmem:[#allocation14 + $0x38] sm:$0xff]  }
 0x3e1   :  { %5855 = vmatprep.subr.bf16.mxu0 %v8086_v27  ;;  %v5463_v27 = vrot.slane %v5458_v3, %v5364_v54 }
 0x3e4   :  { %5856 = vmatpush1.bf16.msra.mxu0 %v8084_v48  ;;  %v5467_v48 = vrot.slane %v5458_v3, %v5368_v60 }
 0x3e5   :  { %5857 = vmatprep.subr.bf16.mxu0 %v8089_v49 }
 0x3e8   :  { %5858 = vmatpush1.bf16.msra.mxu0 %v8087_v36 }
 0x3e9   :  { %5859 = vmatprep.subr.bf16.mxu0 %v8092_v40 }
 0x3ec   :  { %5860 = vmatpush1.bf16.msra.mxu0 %v8090_v28  ;;  %v6861_v28 = vld [vmem:[#allocation16] ss:$0 sm:$0xff] }
 0x3ed   :  { %5861 = vmatprep.subr.bf16.mxu0 %v8095_v16 }
 0x3f0   :  { %5862 = vmatpush1.bf16.msra.mxu0 %v8093_v17 }
 0x3f6   :  { %v5189_v50 = vpop.f32.mrb[36].mxu1 }
 0x3f7   :  { %v5312_v55 = vpop.f32.mrb[36].mxu0  ;;  %v5190_v45 = vadd.f32 %v5189_v50, %v5149_v33  ;;  %v5191_v57 = vpop.f32.mrb[37].mxu1 }
 0x3f8   :  { %v5314_v1 = vpop.f32.mrb[37].mxu0  ;;  %v5192_v12 = vadd.f32 %v5191_v57, %v8771_v30  ;;  %v5193_v61 = vpop.f32.mrb[38].mxu1 }
 0x3f9   :  { %v5316_v31 = vpop.f32.mrb[38].mxu0  ;;  %v5231_v13 = vadd.f32 %v8763_v59, %v5190_v45  ;;  %v5194_v19 = vpop.f32.mrb[39].mxu1  ;;  %v8101_v59 = vld [vmem:[#allocation14 + $0x10] sm:$0xff]  }
 0x3fa   :  { %v5317_v14 = vpop.f32.mrb[39].mxu0  ;;  %v5233_v15 = vadd.f32 %v8766_v39, %v5192_v12  ;;  %6883 = vmatpush3.bf16.msra.mxu1 %v8101_v59  ;;  %v8104_v39 = vld [vmem:[#allocation14 + $0x60] sm:$0xff]  }
 0x3fb   :  { %6884 = vmatprep.subr.bf16.mxu1 %v8102_v18 }
 0x3fe   :  { %6885 = vmatpush3.bf16.msra.mxu1 %v8103_v21 }
 0x3ff   :  { %6886 = vmatprep.subr.bf16.mxu1 %v8104_v39 }
 0x402   :  { %6887 = vmatpush3.bf16.msra.mxu1 %v8105_v62 }
 0x403   :  { %6888 = vmatprep.subr.bf16.mxu1 %v8106_v58 }
 0x406   :  { %6889 = vmatpush3.bf16.msra.mxu1 %v8107_v56 }
 0x407   :  { %6890 = vmatprep.subr.bf16.mxu1 %v8108_v6 }
 0x40a   :  { %6891 = vmatpush3.bf16.msra.mxu1 %v8109_v8 }
 0x40b   :  { %6892 = vmatprep.subr.bf16.mxu1 %v8110_v9 }
 0x40e   :  { %6893 = vmatpush3.bf16.msra.mxu1 %v8111_v23 }
 0x436   :  { %v5271_v33 = vpop.f32.mrb[40].mxu1 }
 0x437   :  { %v5272_v10 = vadd.f32 %v5271_v33, %v5231_v13  ;;  %v5273_v11 = vpop.f32.mrb[41].mxu1 }
 0x438   :  { %v5274_v30 = vadd.f32 %v5273_v11, %v5233_v15  ;;  %v5275_v52 = vpop.f32.mrb[42].mxu1 }
 0x439   :  { %v5313_v20 = vadd.f32 %v5312_v55, %v5272_v10  ;;  %v5276_v0 = vpop.f32.mrb[43].mxu1 }
 0x43a   :  { %v5315_v35 = vadd.f32 %v5314_v1, %v5274_v30 }
 0x476   :  { %v5353_v34 = vpop.f32.mrb[44].mxu1 }
 0x477   :  { %v5354_v43 = vadd.f32 %v5353_v34, %v5313_v20  ;;  %v5355_v46 = vpop.f32.mrb[45].mxu1 }
 0x478   :  { %v5356_v47 = vadd.f32 %v5355_v46, %v5315_v35  ;;  %v5357_v51 = vpop.f32.mrb[46].mxu1 }
 0x479   :  { %v5384_v32 = vadd.f32 %v5373_v44, %v5354_v43  ;;  %v5358_v2 = vpop.f32.mrb[47].mxu1 }
 0x47a   :  { %v5385_v4 = vadd.f32 %v5377_v26, %v5356_v47 }
 0x47b   :  { %v5388_v7 = vmax.f32 %v5384_v32, 0.0 }
 0x47c   :  { %v5389_v5 = vmax.f32 %v5385_v4, 0.0 }
 0x47d   :  { %v5392_v22 = vpack.c.bf16 %v5388_v7, %v5388_v7 }
 0x47e   :  { %v5393_v24 = vpack.c.bf16 %v5389_v5, %v5389_v5 }
 0x480   :  { %5863 = vmatprep.mubr.bf16.mxu0 %v5393_v24 }
 0x481   :  { %5864 = vmatmul.mubr.bf16.vlgmr.msra.gmra.mrb[40].mxu0 %v5392_v22 }
 0x554   :  { %v5865_v49 = vpop.f32.mrb[40].mxu0 }
 0x555   :  { %v6900_v36 = vadd.f32 %v5865_v49, %v5463_v27  ;;  %v5867_v50 = vpop.f32.mrb[41].mxu0 }
 0x556   :  { %v6901_v55 = vadd.f32 %v5867_v50, %v5467_v48  ;;  %v5869_v45 = vpop.f32.mrb[42].mxu0 }
 0x557   :  { %v5872_v57 = vmax.f32 %v6900_v36, 0.0  ;;  %v5870_v1 = vpop.f32.mrb[43].mxu0 }
 0x558   :  { %v5873_v40 = vmax.f32 %v6901_v55, 0.0 }
 0x559   :  { %v5874_v61 = vpack.c.bf16 %v5872_v57, %v5872_v57 }
 0x55a   :  { %v5875_v12 = vpack.c.bf16 %v5873_v40, %v5873_v40 }
 0x55c   :  { %6043 = vmatprep.mubr.bf16.mxu1 %v5875_v12 }
 0x55d   :  { %6044 = vmatmul.mubr.bf16.vlgmr.msra.gmra.mrb[48].mxu1 %v5874_v61 }
 0x630   :  { %v6894_v31 = vpop.f32.mrb[48].mxu1 }
 0x631   :  { %v6895_v13 = vpop.f32.mrb[49].mxu1 }
 0x632   :  { %v6896_v54 = vadd.f32 %v6895_v13, %v6894_v31  ;;  %v6897_v42 = vpop.f32.mrb[50].mxu1 }
 0x633   :  { %v6898_v60 = vpop.f32.mrb[51].mxu1 }
 0x634   :  { %v6046_v19 = vadd.f32 %v6896_v54, %v6861_v28 }
 0x636   :  { %6051 = vst [vmem:[#allocation17] sm:$0xff] %v6046_v19 }
 0x637   :  { %8321 = shalt.err (!%p8318_p6)
}
 0x638   :  { %s8322_s10 = scalar_lea.hbm %s8805_s9, 128 }
 0x639   :  { %p8323_p7 = scmp.ne.s32.totalorder %s8805_s9, %s8322_s10  ;;  %p8326_p8 = scmp.lt.u32.totalorder %s8322_s10, %s8805_s9 }
 0x63b   :  { %p8328_p9 = pnand %p8326_p8, %p8323_p7 }
 0x63d   :  { %8331 = shalt.err (!%p8328_p9)
}
 0x63e   :  { %6061 = dma.vmem_to_hbm [thread:$0]  %s6059_s29, 128, %s8805_s9, [#allocation4]  }
 0x63f   :  { %8342 = dma.done.wait [#allocation4], 128  }
 0x640   :  { %8343 = vsyncadd [#allocation4], 4294967168 }
 0x641   :  { %6065 = vsyncpa [#allocation3], 1 }
 0x642   :  { %6066 = vsyncpa [#allocation6], 1 }
 0x643   :  { %6067 = vsyncpa [#allocation9], 1 }
 0x644   :  { %6068 = vsyncpa [#allocation12], 1 }
 0x645   :  { %6069 = vsyncpa [#allocation15], 1 }
 0x646   :  { %6070 = vsyncpa [#allocation4], 1 }

</bundles_post_ra>
